<compile_context>
chip_gen: v6e
topology: v6e:2x2x1
jax: 0.10.0
libtpu: 0.0.40
codegen_flags: <defaults>
</compile_context>

<pallas_src>
import functools

import jax
import jax.numpy as jnp
from jax.experimental import pallas as pl
from jax.experimental.pallas import tpu as pltpu


LANE = 128   # stage-1 folded K: 3 kh taps * 28 image cols = 84, zero-padded to 128
HALF = 512   # per-parity conv output width after permutation: 448 real + 64 zero lanes


# ---------------------------------------------------------------------------
# Fused whole-network kernel (one batch block per grid step).
# ---------------------------------------------------------------------------
def _fused_cnn_kernel(xe_ref, xo_ref, band1_ref, bias1_ref, band2_ref, bias2_ref,
                      w1_ref, b1_ref, w2_ref, b2_ref, o_ref, *, bb):
    # xe/xo_ref : (14*bb, 128) bf16  stage-1 row operands (even / odd conv rows);
    #                                row order (pool-row parity, pool-row//2, image),
    #                                lanes = 3 kh taps x 28 input cols (+ zero pad).
    # band1_ref : (128, 1024)  bf16  stage-1 banded weights, taps stacked along K,
    #                                output cols permuted [even-w | odd-w] (512 each).
    # band2_ref : (3,512,1024) bf16  stage-2 banded weights, one matrix per kh tap.
    # bias1/2   : (1, 512)     f32   conv biases in pooled-column order (+ zero pad).
    # w1_ref    : (7,512,128)  bf16  fc1 weights, one block per stage-2 pooled row.
    # b1_ref    : (1, 128)     f32   fc1 bias.
    # w2_ref    : (128, 128)   bf16  fc2 weights, output zero-padded 10 -> 128.
    # b2_ref    : (1, 128)     f32   fc2 bias (zero padded).
    # o_ref     : (bb, 128)    f32   logits (cols 10..127 are zero).
    dot = functools.partial(jnp.dot, preferred_element_type=jnp.float32)
    bf16 = jnp.bfloat16

    # ---- stage 1: conv1(3x3, pad=1) + bias + ReLU + 2x2 maxpool ------------------
    band1 = band1_ref[...]
    acc_e = dot(xe_ref[...], band1)                    # conv rows 2*h    (14*bb, 1024)
    acc_o = dot(xo_ref[...], band1)                    # conv rows 2*h+1
    r = jnp.maximum(acc_e, acc_o)                      # row half of the 2x2 pool
    r = jnp.maximum(r[:, :HALF], r[:, HALF:])          # column half (vreg-aligned split)
    # bias + ReLU commute with the max pool (same bias inside every window).
    y1 = jnp.maximum(r + bias1_ref[...], 0.0).astype(bf16)       # (14*bb, 512)

    # ---- stage-2 operands: contiguous row slices of y1 ---------------------------
    # y1 rows [0:7bb] are the even pooled rows (0,2,..,12), [7bb:14bb] the odd ones
    # (1,3,..,13), each ordered (row//2, image).  Stage-2 conv rows 2m / 2m+1 need
    # the zero-row-padded stage-1 rows 2m .. 2m+3, i.e. the four operands below.
    n7 = 7 * bb
    y1_even = y1[:n7]
    y1_odd = y1[n7:]
    zrow = jnp.zeros((bb, HALF), bf16)
    a0 = jnp.concatenate([zrow, y1_odd[:n7 - bb]], axis=0)       # padded row 2m
    a1 = y1_even                                                 # padded row 2m+1
    a2 = y1_odd                                                  # padded row 2m+2
    a3 = jnp.concatenate([y1_even[bb:], zrow], axis=0)           # padded row 2m+3

    # ---- stage 2: conv2(3x3, pad=1) + bias + ReLU + 2x2 maxpool ------------------
    c0, c1, c2 = band2_ref[0], band2_ref[1], band2_ref[2]
    acc_e = dot(a0, c0)
    acc_e += dot(a1, c1)
    acc_e += dot(a2, c2)                                         # conv rows 2m   (7*bb, 1024)
    acc_o = dot(a1, c0)
    acc_o += dot(a2, c1)
    acc_o += dot(a3, c2)                                         # conv rows 2m+1
    r2 = jnp.maximum(acc_e, acc_o)
    r2 = jnp.maximum(r2[:, :HALF], r2[:, HALF:])
    y2 = jnp.maximum(r2 + bias2_ref[...], 0.0).astype(bf16)      # (7*bb, 512), rows (m, image)

    # ---- fc head: fc1 + ReLU + (identity dropout) + fc2 --------------------------
    h = dot(y2[:bb], w1_ref[0])
    for m in range(1, 7):                                        # static unroll: 7 row blocks
        h += dot(y2[m * bb:(m + 1) * bb], w1_ref[m])
    h = jnp.maximum(h + b1_ref[...], 0.0)                        # (bb, 128) f32
    # TODO(synk): nn.Dropout(0.5) is identity at inference; a training-mode forward
    # would need pltpu.prng_seed / prng_random_bits masking and 1/(1-p) scaling here.
    o = dot(h.astype(bf16), w2_ref[...]) + b2_ref[...]
    o_ref[...] = o.astype(o_ref.dtype)


# ---------------------------------------------------------------------------
# One-time weight repacking (pure XLA on tiny tensors, outside the kernel).
# ---------------------------------------------------------------------------
def _banded_conv_weights(w_oihw, width, k_pad, half):
    """torch-layout (O, I, 3, 3) conv weight -> (3, k_pad, 2*half) banded matrices.

    Row u*I+ci of tap kh holds w[co, ci, kh, u-w+1] at output column
        (w//2)*O + co          if w is even,
        half + (w//2)*O + co   if w is odd,
    (zero outside the kw band), so  conv_row = sum_kh x_row[kh] @ band[kh]  and the
    2x2 column pool is max(cols[:half], cols[half:]) with both halves vreg aligned.
    """
    o, i = w_oihw.shape[0], w_oihw.shape[1]
    wt = jnp.transpose(w_oihw.astype(jnp.float32), (2, 3, 1, 0))     # (kh, kw, ci, co)
    u = jnp.arange(width)[:, None]
    w = jnp.arange(width)[None, :]
    kw = u - w + 1
    valid = (kw >= 0) & (kw <= 2)
    band = wt[:, jnp.clip(kw, 0, 2)]                                 # (3, u, w, ci, co)
    band = jnp.where(valid[None, :, :, None, None], band, 0.0)
    band = jnp.transpose(band, (0, 1, 3, 2, 4)).reshape(3, width * i, width, o)
    even = band[:, :, 0::2, :].reshape(3, width * i, (width // 2) * o)
    odd = band[:, :, 1::2, :].reshape(3, width * i, (width // 2) * o)
    pad = lambda t: jnp.pad(t, ((0, 0), (0, k_pad - width * i), (0, half - t.shape[-1])))
    return jnp.concatenate([pad(even), pad(odd)], axis=-1)


def prepare_params(p):
    """Repack PyTorch-layout params into kernel-friendly bf16/f32 operands (done once)."""
    f32, bf16 = jnp.float32, jnp.bfloat16
    # Stage 1: fold the 3 kh taps into a single K (operand rows carry the 3 shifted
    # image rows on lanes); pad K 84 -> 128.
    band1 = _banded_conv_weights(p["conv1_w"], width=28, k_pad=28, half=HALF)
    band1 = jnp.pad(band1.reshape(3 * 28, 2 * HALF), ((0, LANE - 3 * 28), (0, 0)))
    band2 = _banded_conv_weights(p["conv2_w"], width=14, k_pad=HALF, half=HALF)
    bias1 = jnp.pad(jnp.tile(p["conv1_b"].astype(f32), 14), (0, HALF - 14 * 32))[None, :]
    bias2 = jnp.pad(jnp.tile(p["conv2_b"].astype(f32), 7), (0, HALF - 7 * 64))[None, :]
    # fc1 columns are in PyTorch (c, h, w) flatten order; our slab rows are h with
    # (w, c) on lanes (+64 zero pad), so repack to (h, w*64 + c [+pad], out).
    w1 = p["fc1_w"].reshape(128, 64, 7, 7).transpose(2, 3, 1, 0).reshape(7, 7 * 64, 128)
    w1 = jnp.pad(w1, ((0, 0), (0, HALF - 7 * 64), (0, 0)))
    w2 = jnp.pad(p["fc2_w"].T, ((0, 0), (0, 128 - 10)))               # 10 -> 128 lanes
    b2 = jnp.pad(p["fc2_b"], (0, 128 - 10))[None, :]
    return {
        "band1": band1.astype(bf16), "bias1": bias1,
        "band2": band2.astype(bf16), "bias2": bias2,
        "w1": w1.astype(bf16), "b1": p["fc1_b"].astype(f32)[None, :],
        "w2": w2.astype(bf16), "b2": b2.astype(f32),
    }


# ---------------------------------------------------------------------------
# Wrapper: build the stage-1 row operands (pure XLA on the tiny raw input) and
# run the single fused pallas_call over batch blocks.
# ---------------------------------------------------------------------------
def _stage1_row_operands(x_hw, nb, bb):
    """(nb*bb, 28, 28) bf16 images -> two (nb*14*bb, 128) bf16 stage-1 row operands."""
    _, _, w = x_hw.shape
    xp = jnp.pad(x_hw, ((0, 0), (1, 3), (0, 0)))           # padded rows: [0, x0..x27, 0, 0, 0]
    q = jnp.arange(7)
    par = jnp.arange(2)
    taps = jnp.arange(3)
    base = 4 * q[None, :] + 2 * par[:, None]                # = 2*h1 for pooled row h1 = 2q + p
    idx = base[:, :, None] + taps                           # (2, 7, 3) padded-row indices

    def pack(g):                                            # g: (nb*bb, 2, 7, 3, 28)
        g = g.reshape(nb, bb, 2, 7, 3 * w)                  # fold the 3 taps onto lanes (84)
        g = jnp.transpose(g, (0, 2, 3, 1, 4))               # rows -> (parity, q, image)
        g = g.reshape(nb * 14 * bb, 3 * w)
        return jnp.pad(g, ((0, 0), (0, LANE - 3 * w)))      # lane pad 84 -> 128

    return pack(jnp.take(xp, idx, axis=1)), pack(jnp.take(xp, idx + 1, axis=1))


def flexible_cnn_forward(x_nchw, prep, block_batch=16):
    # block_batch=16 keeps per-step VMEM well inside the default scoped budget on
    # every generation (weights ~4.3 MB resident, double-buffered); 32 fills the MXU
    # a bit better on v6e/v7x if VMEM headroom allows.
    n, _, h, w = x_nchw.shape                               # (N, 1, 28, 28)
    bb = n if n < block_batch else block_batch
    nb = (n + bb - 1) // bb
    n_pad = nb * bb
    x = x_nchw.reshape(n, h, w).astype(jnp.bfloat16)
    if n_pad != n:
        x = jnp.pad(x, ((0, n_pad - n), (0, 0), (0, 0)))
    xe, xo = _stage1_row_operands(x, nb, bb)

    m1, m2 = 14 * n_pad, 7 * n_pad
    flops = int(2 * 2 * m1 * LANE * 2 * HALF                # stage 1: 2 dots
                + 6 * 2 * m2 * HALF * 2 * HALF              # stage 2: 6 dots
                + 7 * 2 * n_pad * HALF * 128                # fc1
                + 2 * n_pad * 128 * 128)                    # fc2
    weight_bytes = sum(int(v.size) * v.dtype.itemsize for v in prep.values())
    bytes_accessed = int(xe.size * 2 + xo.size * 2 + weight_bytes + n_pad * 128 * 4)

    out = pl.pallas_call(
        functools.partial(_fused_cnn_kernel, bb=bb),
        out_shape=jax.ShapeDtypeStruct((n_pad, 128), jnp.float32),
        grid=(nb,),
        in_specs=[
            pl.BlockSpec((14 * bb, LANE), lambda i: (i, 0)),            # xe
            pl.BlockSpec((14 * bb, LANE), lambda i: (i, 0)),            # xo
            # Weights are grid-invariant; they fit the default scoped VMEM even with
            # the default double buffering, so no pipeline_mode override is needed.
            pl.BlockSpec((LANE, 2 * HALF), lambda i: (0, 0)),           # band1
            pl.BlockSpec((1, HALF), lambda i: (0, 0)),                  # bias1
            pl.BlockSpec((3, HALF, 2 * HALF), lambda i: (0, 0, 0)),     # band2
            pl.BlockSpec((1, HALF), lambda i: (0, 0)),                  # bias2
            pl.BlockSpec((7, HALF, 128), lambda i: (0, 0, 0)),          # fc1 w
            pl.BlockSpec((1, 128), lambda i: (0, 0)),                   # fc1 b
            pl.BlockSpec((128, 128), lambda i: (0, 0)),                 # fc2 w
            pl.BlockSpec((1, 128), lambda i: (0, 0)),                   # fc2 b
        ],
        out_specs=pl.BlockSpec((bb, 128), lambda i: (i, 0)),
        compiler_params=pltpu.CompilerParams(dimension_semantics=("parallel",)),
        cost_estimate=pl.CostEstimate(flops=flops, transcendentals=0,
                                      bytes_accessed=bytes_accessed),
    )(xe, xo, prep["band1"], prep["bias1"], prep["band2"], prep["bias2"],
      prep["w1"], prep["b1"], prep["w2"], prep["b2"])
    return out[:n, :10]


# ---------------------------------------------------------------------------
# PyTorch-style parameter init (same distributions as nn.Conv2d / nn.Linear).
# ---------------------------------------------------------------------------
def init_params(key):
    ks = jax.random.split(key, 8)

    def u(k, shape, fan_in):
        bound = 1.0 / jnp.sqrt(jnp.float32(fan_in))
        return jax.random.uniform(k, shape, jnp.float32, -bound, bound)

    return {
        "conv1_w": u(ks[0], (32, 1, 3, 3), 1 * 9),
        "conv1_b": u(ks[1], (32,), 1 * 9),
        "conv2_w": u(ks[2], (64, 32, 3, 3), 32 * 9),
        "conv2_b": u(ks[3], (64,), 32 * 9),
        "fc1_w":   u(ks[4], (128, 64 * 7 * 7), 64 * 7 * 7),
        "fc1_b":   u(ks[5], (128,), 64 * 7 * 7),
        "fc2_w":   u(ks[6], (10, 128), 128),
        "fc2_b":   u(ks[7], (10,), 128),
    }


if __name__ == "__main__":
    key = jax.random.PRNGKey(0)
    pkey, xkey = jax.random.split(key)
    params = init_params(pkey)
    prep = prepare_params(params)
    # Module geometry implies 28x28 single-channel input (64*7*7 flatten after two 2x pools).
    x = jax.random.normal(xkey, (2, 1, 28, 28), jnp.float32)
    out = jax.jit(flexible_cnn_forward)(x, prep)
    jax.block_until_ready(out)
    assert out.shape == (2, 10) and out.dtype == jnp.float32
    print("KERNEL_OK")
</pallas_src>

<mosaic_0001>
module attributes {stable_mosaic.version = 11 : i64} {
  func.func @_fused_cnn_kernel(%arg0: i32, %arg1: memref<28x128xbf16, #tpu.memory_space<vmem>>, %arg2: memref<28x128xbf16, #tpu.memory_space<vmem>>, %arg3: memref<128x1024xbf16, #tpu.memory_space<vmem>>, %arg4: memref<1x512xf32, #tpu.memory_space<vmem>>, %arg5: memref<3x512x1024xbf16, #tpu.memory_space<vmem>>, %arg6: memref<1x512xf32, #tpu.memory_space<vmem>>, %arg7: memref<7x512x128xbf16, #tpu.memory_space<vmem>>, %arg8: memref<1x128xf32, #tpu.memory_space<vmem>>, %arg9: memref<128x128xbf16, #tpu.memory_space<vmem>>, %arg10: memref<1x128xf32, #tpu.memory_space<vmem>>, %arg11: memref<2x128xf32, #tpu.memory_space<vmem>>) attributes {dimension_semantics = [#tpu.dimension_semantics<parallel>], iteration_bounds = array<i64: 1>, scalar_prefetch = 0 : i64, scratch_operands = 0 : i64, tpu.core_type = #tpu.core_type<tc>, window_params = [{transform_indices = @transform_0, window_bounds = array<i64: 28, 128>}, {transform_indices = @transform_1, window_bounds = array<i64: 28, 128>}, {pipeline_mode = #tpu.pipeline_mode<synchronous>, transform_indices = @transform_2, window_bounds = array<i64: 128, 1024>}, {pipeline_mode = #tpu.pipeline_mode<synchronous>, transform_indices = @transform_3, window_bounds = array<i64: 1, 512>}, {pipeline_mode = #tpu.pipeline_mode<synchronous>, transform_indices = @transform_4, window_bounds = array<i64: 3, 512, 1024>}, {pipeline_mode = #tpu.pipeline_mode<synchronous>, transform_indices = @transform_5, window_bounds = array<i64: 1, 512>}, {pipeline_mode = #tpu.pipeline_mode<synchronous>, transform_indices = @transform_6, window_bounds = array<i64: 7, 512, 128>}, {pipeline_mode = #tpu.pipeline_mode<synchronous>, transform_indices = @transform_7, window_bounds = array<i64: 1, 128>}, {pipeline_mode = #tpu.pipeline_mode<synchronous>, transform_indices = @transform_8, window_bounds = array<i64: 128, 128>}, {pipeline_mode = #tpu.pipeline_mode<synchronous>, transform_indices = @transform_9, window_bounds = array<i64: 1, 128>}, {transform_indices = @transform_10, window_bounds = array<i64: 2, 128>}]} {
    %c0 = arith.constant 0 : index
    %c0_0 = arith.constant 0 : index
    %0 = vector.load %arg3[%c0, %c0_0] : memref<128x1024xbf16, #tpu.memory_space<vmem>>, vector<128x1024xbf16>
    %c0_1 = arith.constant 0 : index
    %c0_2 = arith.constant 0 : index
    %1 = vector.load %arg1[%c0_1, %c0_2] : memref<28x128xbf16, #tpu.memory_space<vmem>>, vector<28x128xbf16>
    %cst = arith.constant dense<0.000000e+00> : vector<28x1024xf32>
    %2 = tpu.matmul %1, %0, %cst {dimension_numbers = #tpu.dot_dimension_numbers<[1], [0], [0], [1], [0, 0, 1, 1], [], []>} : vector<28x128xbf16>, vector<128x1024xbf16>, vector<28x1024xf32> -> vector<28x1024xf32>
    %c0_3 = arith.constant 0 : index
    %c0_4 = arith.constant 0 : index
    %3 = vector.load %arg2[%c0_3, %c0_4] : memref<28x128xbf16, #tpu.memory_space<vmem>>, vector<28x128xbf16>
    %cst_5 = arith.constant dense<0.000000e+00> : vector<28x1024xf32>
    %4 = tpu.matmul %3, %0, %cst_5 {dimension_numbers = #tpu.dot_dimension_numbers<[1], [0], [0], [1], [0, 0, 1, 1], [], []>} : vector<28x128xbf16>, vector<128x1024xbf16>, vector<28x1024xf32> -> vector<28x1024xf32>
    %5 = arith.maximumf %2, %4 : vector<28x1024xf32>
    %6 = vector.extract_strided_slice %5 {offsets = [0, 0], sizes = [28, 512], strides = [1, 1]} : vector<28x1024xf32> to vector<28x512xf32>
    %7 = vector.extract_strided_slice %5 {offsets = [0, 512], sizes = [28, 512], strides = [1, 1]} : vector<28x1024xf32> to vector<28x512xf32>
    %8 = arith.maximumf %6, %7 : vector<28x512xf32>
    %c0_6 = arith.constant 0 : index
    %c0_7 = arith.constant 0 : index
    %9 = vector.load %arg4[%c0_6, %c0_7] : memref<1x512xf32, #tpu.memory_space<vmem>>, vector<1x512xf32>
    %10 = vector.broadcast %9 : vector<1x512xf32> to vector<28x512xf32>
    %11 = arith.addf %8, %10 : vector<28x512xf32>
    %cst_8 = arith.constant 0.000000e+00 : f32
    %12 = vector.broadcast %cst_8 : f32 to vector<28x512xf32>
    %13 = arith.maximumf %11, %12 : vector<28x512xf32>
    %14 = arith.truncf %13 : vector<28x512xf32> to vector<28x512xbf16>
    %15 = vector.extract_strided_slice %14 {offsets = [0, 0], sizes = [14, 512], strides = [1, 1]} : vector<28x512xbf16> to vector<14x512xbf16>
    %16 = vector.extract_strided_slice %14 {offsets = [14, 0], sizes = [14, 512], strides = [1, 1]} : vector<28x512xbf16> to vector<14x512xbf16>
    %cst_9 = arith.constant 0.000000e+00 : bf16
    %17 = vector.broadcast %cst_9 : bf16 to vector<2x512xbf16>
    %18 = vector.extract_strided_slice %16 {offsets = [0, 0], sizes = [12, 512], strides = [1, 1]} : vector<14x512xbf16> to vector<12x512xbf16>
    %19 = tpu.concatenate %17, %18 in 0 : vector<2x512xbf16>, vector<12x512xbf16> -> vector<14x512xbf16>
    %20 = vector.extract_strided_slice %15 {offsets = [2, 0], sizes = [12, 512], strides = [1, 1]} : vector<14x512xbf16> to vector<12x512xbf16>
    %21 = tpu.concatenate %20, %17 in 0 : vector<12x512xbf16>, vector<2x512xbf16> -> vector<14x512xbf16>
    %c0_10 = arith.constant 0 : index
    %c0_11 = arith.constant 0 : index
    %c0_12 = arith.constant 0 : index
    %22 = vector.load %arg5[%c0_10, %c0_11, %c0_12] : memref<3x512x1024xbf16, #tpu.memory_space<vmem>>, vector<1x512x1024xbf16>
    %23 = vector.shape_cast %22 : vector<1x512x1024xbf16> to vector<512x1024xbf16>
    %c1 = arith.constant 1 : index
    %c0_13 = arith.constant 0 : index
    %c0_14 = arith.constant 0 : index
    %24 = vector.load %arg5[%c1, %c0_13, %c0_14] : memref<3x512x1024xbf16, #tpu.memory_space<vmem>>, vector<1x512x1024xbf16>
    %25 = vector.shape_cast %24 : vector<1x512x1024xbf16> to vector<512x1024xbf16>
    %c2 = arith.constant 2 : index
    %c0_15 = arith.constant 0 : index
    %c0_16 = arith.constant 0 : index
    %26 = vector.load %arg5[%c2, %c0_15, %c0_16] : memref<3x512x1024xbf16, #tpu.memory_space<vmem>>, vector<1x512x1024xbf16>
    %27 = vector.shape_cast %26 : vector<1x512x1024xbf16> to vector<512x1024xbf16>
    %cst_17 = arith.constant dense<0.000000e+00> : vector<14x1024xf32>
    %28 = tpu.matmul %19, %23, %cst_17 {dimension_numbers = #tpu.dot_dimension_numbers<[1], [0], [0], [1], [0, 0, 1, 1], [], []>} : vector<14x512xbf16>, vector<512x1024xbf16>, vector<14x1024xf32> -> vector<14x1024xf32>
    %cst_18 = arith.constant dense<0.000000e+00> : vector<14x1024xf32>
    %29 = tpu.matmul %15, %25, %cst_18 {dimension_numbers = #tpu.dot_dimension_numbers<[1], [0], [0], [1], [0, 0, 1, 1], [], []>} : vector<14x512xbf16>, vector<512x1024xbf16>, vector<14x1024xf32> -> vector<14x1024xf32>
    %30 = arith.addf %28, %29 : vector<14x1024xf32>
    %cst_19 = arith.constant dense<0.000000e+00> : vector<14x1024xf32>
    %31 = tpu.matmul %16, %27, %cst_19 {dimension_numbers = #tpu.dot_dimension_numbers<[1], [0], [0], [1], [0, 0, 1, 1], [], []>} : vector<14x512xbf16>, vector<512x1024xbf16>, vector<14x1024xf32> -> vector<14x1024xf32>
    %32 = arith.addf %30, %31 : vector<14x1024xf32>
    %cst_20 = arith.constant dense<0.000000e+00> : vector<14x1024xf32>
    %33 = tpu.matmul %15, %23, %cst_20 {dimension_numbers = #tpu.dot_dimension_numbers<[1], [0], [0], [1], [0, 0, 1, 1], [], []>} : vector<14x512xbf16>, vector<512x1024xbf16>, vector<14x1024xf32> -> vector<14x1024xf32>
    %cst_21 = arith.constant dense<0.000000e+00> : vector<14x1024xf32>
    %34 = tpu.matmul %16, %25, %cst_21 {dimension_numbers = #tpu.dot_dimension_numbers<[1], [0], [0], [1], [0, 0, 1, 1], [], []>} : vector<14x512xbf16>, vector<512x1024xbf16>, vector<14x1024xf32> -> vector<14x1024xf32>
    %35 = arith.addf %33, %34 : vector<14x1024xf32>
    %cst_22 = arith.constant dense<0.000000e+00> : vector<14x1024xf32>
    %36 = tpu.matmul %21, %27, %cst_22 {dimension_numbers = #tpu.dot_dimension_numbers<[1], [0], [0], [1], [0, 0, 1, 1], [], []>} : vector<14x512xbf16>, vector<512x1024xbf16>, vector<14x1024xf32> -> vector<14x1024xf32>
    %37 = arith.addf %35, %36 : vector<14x1024xf32>
    %38 = arith.maximumf %32, %37 : vector<14x1024xf32>
    %39 = vector.extract_strided_slice %38 {offsets = [0, 0], sizes = [14, 512], strides = [1, 1]} : vector<14x1024xf32> to vector<14x512xf32>
    %40 = vector.extract_strided_slice %38 {offsets = [0, 512], sizes = [14, 512], strides = [1, 1]} : vector<14x1024xf32> to vector<14x512xf32>
    %41 = arith.maximumf %39, %40 : vector<14x512xf32>
    %c0_23 = arith.constant 0 : index
    %c0_24 = arith.constant 0 : index
    %42 = vector.load %arg6[%c0_23, %c0_24] : memref<1x512xf32, #tpu.memory_space<vmem>>, vector<1x512xf32>
    %43 = vector.broadcast %42 : vector<1x512xf32> to vector<14x512xf32>
    %44 = arith.addf %41, %43 : vector<14x512xf32>
    %cst_25 = arith.constant 0.000000e+00 : f32
    %45 = vector.broadcast %cst_25 : f32 to vector<14x512xf32>
    %46 = arith.maximumf %44, %45 : vector<14x512xf32>
    %47 = arith.truncf %46 : vector<14x512xf32> to vector<14x512xbf16>
    %48 = vector.extract_strided_slice %47 {offsets = [0, 0], sizes = [2, 512], strides = [1, 1]} : vector<14x512xbf16> to vector<2x512xbf16>
    %c0_26 = arith.constant 0 : index
    %c0_27 = arith.constant 0 : index
    %c0_28 = arith.constant 0 : index
    %49 = vector.load %arg7[%c0_26, %c0_27, %c0_28] : memref<7x512x128xbf16, #tpu.memory_space<vmem>>, vector<1x512x128xbf16>
    %50 = vector.shape_cast %49 : vector<1x512x128xbf16> to vector<512x128xbf16>
    %cst_29 = arith.constant dense<0.000000e+00> : vector<2x128xf32>
    %51 = tpu.matmul %48, %50, %cst_29 {dimension_numbers = #tpu.dot_dimension_numbers<[1], [0], [0], [1], [0, 0, 1, 1], [], []>} : vector<2x512xbf16>, vector<512x128xbf16>, vector<2x128xf32> -> vector<2x128xf32>
    %52 = vector.extract_strided_slice %47 {offsets = [2, 0], sizes = [2, 512], strides = [1, 1]} : vector<14x512xbf16> to vector<2x512xbf16>
    %c1_30 = arith.constant 1 : index
    %c0_31 = arith.constant 0 : index
    %c0_32 = arith.constant 0 : index
    %53 = vector.load %arg7[%c1_30, %c0_31, %c0_32] : memref<7x512x128xbf16, #tpu.memory_space<vmem>>, vector<1x512x128xbf16>
    %54 = vector.shape_cast %53 : vector<1x512x128xbf16> to vector<512x128xbf16>
    %cst_33 = arith.constant dense<0.000000e+00> : vector<2x128xf32>
    %55 = tpu.matmul %52, %54, %cst_33 {dimension_numbers = #tpu.dot_dimension_numbers<[1], [0], [0], [1], [0, 0, 1, 1], [], []>} : vector<2x512xbf16>, vector<512x128xbf16>, vector<2x128xf32> -> vector<2x128xf32>
    %56 = arith.addf %51, %55 : vector<2x128xf32>
    %57 = vector.extract_strided_slice %47 {offsets = [4, 0], sizes = [2, 512], strides = [1, 1]} : vector<14x512xbf16> to vector<2x512xbf16>
    %c2_34 = arith.constant 2 : index
    %c0_35 = arith.constant 0 : index
    %c0_36 = arith.constant 0 : index
    %58 = vector.load %arg7[%c2_34, %c0_35, %c0_36] : memref<7x512x128xbf16, #tpu.memory_space<vmem>>, vector<1x512x128xbf16>
    %59 = vector.shape_cast %58 : vector<1x512x128xbf16> to vector<512x128xbf16>
    %cst_37 = arith.constant dense<0.000000e+00> : vector<2x128xf32>
    %60 = tpu.matmul %57, %59, %cst_37 {dimension_numbers = #tpu.dot_dimension_numbers<[1], [0], [0], [1], [0, 0, 1, 1], [], []>} : vector<2x512xbf16>, vector<512x128xbf16>, vector<2x128xf32> -> vector<2x128xf32>
    %61 = arith.addf %56, %60 : vector<2x128xf32>
    %62 = vector.extract_strided_slice %47 {offsets = [6, 0], sizes = [2, 512], strides = [1, 1]} : vector<14x512xbf16> to vector<2x512xbf16>
    %c3 = arith.constant 3 : index
    %c0_38 = arith.constant 0 : index
    %c0_39 = arith.constant 0 : index
    %63 = vector.load %arg7[%c3, %c0_38, %c0_39] : memref<7x512x128xbf16, #tpu.memory_space<vmem>>, vector<1x512x128xbf16>
    %64 = vector.shape_cast %63 : vector<1x512x128xbf16> to vector<512x128xbf16>
    %cst_40 = arith.constant dense<0.000000e+00> : vector<2x128xf32>
    %65 = tpu.matmul %62, %64, %cst_40 {dimension_numbers = #tpu.dot_dimension_numbers<[1], [0], [0], [1], [0, 0, 1, 1], [], []>} : vector<2x512xbf16>, vector<512x128xbf16>, vector<2x128xf32> -> vector<2x128xf32>
    %66 = arith.addf %61, %65 : vector<2x128xf32>
    %67 = vector.extract_strided_slice %47 {offsets = [8, 0], sizes = [2, 512], strides = [1, 1]} : vector<14x512xbf16> to vector<2x512xbf16>
    %c4 = arith.constant 4 : index
    %c0_41 = arith.constant 0 : index
    %c0_42 = arith.constant 0 : index
    %68 = vector.load %arg7[%c4, %c0_41, %c0_42] : memref<7x512x128xbf16, #tpu.memory_space<vmem>>, vector<1x512x128xbf16>
    %69 = vector.shape_cast %68 : vector<1x512x128xbf16> to vector<512x128xbf16>
    %cst_43 = arith.constant dense<0.000000e+00> : vector<2x128xf32>
    %70 = tpu.matmul %67, %69, %cst_43 {dimension_numbers = #tpu.dot_dimension_numbers<[1], [0], [0], [1], [0, 0, 1, 1], [], []>} : vector<2x512xbf16>, vector<512x128xbf16>, vector<2x128xf32> -> vector<2x128xf32>
    %71 = arith.addf %66, %70 : vector<2x128xf32>
    %72 = vector.extract_strided_slice %47 {offsets = [10, 0], sizes = [2, 512], strides = [1, 1]} : vector<14x512xbf16> to vector<2x512xbf16>
    %c5 = arith.constant 5 : index
    %c0_44 = arith.constant 0 : index
    %c0_45 = arith.constant 0 : index
    %73 = vector.load %arg7[%c5, %c0_44, %c0_45] : memref<7x512x128xbf16, #tpu.memory_space<vmem>>, vector<1x512x128xbf16>
    %74 = vector.shape_cast %73 : vector<1x512x128xbf16> to vector<512x128xbf16>
    %cst_46 = arith.constant dense<0.000000e+00> : vector<2x128xf32>
    %75 = tpu.matmul %72, %74, %cst_46 {dimension_numbers = #tpu.dot_dimension_numbers<[1], [0], [0], [1], [0, 0, 1, 1], [], []>} : vector<2x512xbf16>, vector<512x128xbf16>, vector<2x128xf32> -> vector<2x128xf32>
    %76 = arith.addf %71, %75 : vector<2x128xf32>
    %77 = vector.extract_strided_slice %47 {offsets = [12, 0], sizes = [2, 512], strides = [1, 1]} : vector<14x512xbf16> to vector<2x512xbf16>
    %c6 = arith.constant 6 : index
    %c0_47 = arith.constant 0 : index
    %c0_48 = arith.constant 0 : index
    %78 = vector.load %arg7[%c6, %c0_47, %c0_48] : memref<7x512x128xbf16, #tpu.memory_space<vmem>>, vector<1x512x128xbf16>
    %79 = vector.shape_cast %78 : vector<1x512x128xbf16> to vector<512x128xbf16>
    %cst_49 = arith.constant dense<0.000000e+00> : vector<2x128xf32>
    %80 = tpu.matmul %77, %79, %cst_49 {dimension_numbers = #tpu.dot_dimension_numbers<[1], [0], [0], [1], [0, 0, 1, 1], [], []>} : vector<2x512xbf16>, vector<512x128xbf16>, vector<2x128xf32> -> vector<2x128xf32>
    %81 = arith.addf %76, %80 : vector<2x128xf32>
    %c0_50 = arith.constant 0 : index
    %c0_51 = arith.constant 0 : index
    %82 = vector.load %arg8[%c0_50, %c0_51] : memref<1x128xf32, #tpu.memory_space<vmem>>, vector<1x128xf32>
    %83 = vector.broadcast %82 : vector<1x128xf32> to vector<2x128xf32>
    %84 = arith.addf %81, %83 : vector<2x128xf32>
    %cst_52 = arith.constant 0.000000e+00 : f32
    %85 = vector.broadcast %cst_52 : f32 to vector<2x128xf32>
    %86 = arith.maximumf %84, %85 : vector<2x128xf32>
    %87 = arith.truncf %86 : vector<2x128xf32> to vector<2x128xbf16>
    %c0_53 = arith.constant 0 : index
    %c0_54 = arith.constant 0 : index
    %88 = vector.load %arg9[%c0_53, %c0_54] : memref<128x128xbf16, #tpu.memory_space<vmem>>, vector<128x128xbf16>
    %cst_55 = arith.constant dense<0.000000e+00> : vector<2x128xf32>
    %89 = tpu.matmul %87, %88, %cst_55 {dimension_numbers = #tpu.dot_dimension_numbers<[1], [0], [0], [1], [0, 0, 1, 1], [], []>} : vector<2x128xbf16>, vector<128x128xbf16>, vector<2x128xf32> -> vector<2x128xf32>
    %c0_56 = arith.constant 0 : index
    %c0_57 = arith.constant 0 : index
    %90 = vector.load %arg10[%c0_56, %c0_57] : memref<1x128xf32, #tpu.memory_space<vmem>>, vector<1x128xf32>
    %91 = vector.broadcast %90 : vector<1x128xf32> to vector<2x128xf32>
    %92 = arith.addf %89, %91 : vector<2x128xf32>
    %c0_58 = arith.constant 0 : index
    %c0_59 = arith.constant 0 : index
    %93 = vector.load %arg11[%c0_58, %c0_59] : memref<2x128xf32, #tpu.memory_space<vmem>>, vector<2x128xf32>
    tpu.vector_store %arg11[%c0_58, %c0_59], %92 {strides = array<i32>} : memref<2x128xf32, #tpu.memory_space<vmem>>, vector<2x128xf32>,
    return
  }
  func.func @transform_0(%arg0: i32) -> (i32, i32) {
    %c0_i32 = arith.constant 0 : i32
    %c0_i32_0 = arith.constant 0 : i32
    return %arg0, %c0_i32 : i32, i32
  }
  func.func @transform_1(%arg0: i32) -> (i32, i32) {
    %c0_i32 = arith.constant 0 : i32
    %c0_i32_0 = arith.constant 0 : i32
    return %arg0, %c0_i32 : i32, i32
  }
  func.func @transform_2(%arg0: i32) -> (i32, i32) {
    %c0_i32 = arith.constant 0 : i32
    %c0_i32_0 = arith.constant 0 : i32
    %c0_i32_1 = arith.constant 0 : i32
    return %c0_i32, %c0_i32_0 : i32, i32
  }
  func.func @transform_3(%arg0: i32) -> (i32, i32) {
    %c0_i32 = arith.constant 0 : i32
    %c0_i32_0 = arith.constant 0 : i32
    %c0_i32_1 = arith.constant 0 : i32
    return %c0_i32, %c0_i32_0 : i32, i32
  }
  func.func @transform_4(%arg0: i32) -> (i32, i32, i32) {
    %c0_i32 = arith.constant 0 : i32
    %c0_i32_0 = arith.constant 0 : i32
    %c0_i32_1 = arith.constant 0 : i32
    %c0_i32_2 = arith.constant 0 : i32
    return %c0_i32, %c0_i32_0, %c0_i32_1 : i32, i32, i32
  }
  func.func @transform_5(%arg0: i32) -> (i32, i32) {
    %c0_i32 = arith.constant 0 : i32
    %c0_i32_0 = arith.constant 0 : i32
    %c0_i32_1 = arith.constant 0 : i32
    return %c0_i32, %c0_i32_0 : i32, i32
  }
  func.func @transform_6(%arg0: i32) -> (i32, i32, i32) {
    %c0_i32 = arith.constant 0 : i32
    %c0_i32_0 = arith.constant 0 : i32
    %c0_i32_1 = arith.constant 0 : i32
    %c0_i32_2 = arith.constant 0 : i32
    return %c0_i32, %c0_i32_0, %c0_i32_1 : i32, i32, i32
  }
  func.func @transform_7(%arg0: i32) -> (i32, i32) {
    %c0_i32 = arith.constant 0 : i32
    %c0_i32_0 = arith.constant 0 : i32
    %c0_i32_1 = arith.constant 0 : i32
    return %c0_i32, %c0_i32_0 : i32, i32
  }
  func.func @transform_8(%arg0: i32) -> (i32, i32) {
    %c0_i32 = arith.constant 0 : i32
    %c0_i32_0 = arith.constant 0 : i32
    %c0_i32_1 = arith.constant 0 : i32
    return %c0_i32, %c0_i32_0 : i32, i32
  }
  func.func @transform_9(%arg0: i32) -> (i32, i32) {
    %c0_i32 = arith.constant 0 : i32
    %c0_i32_0 = arith.constant 0 : i32
    %c0_i32_1 = arith.constant 0 : i32
    return %c0_i32, %c0_i32_0 : i32, i32
  }
  func.func @transform_10(%arg0: i32) -> (i32, i32) {
    %c0_i32 = arith.constant 0 : i32
    %c0_i32_0 = arith.constant 0 : i32
    return %arg0, %c0_i32 : i32, i32
  }
}

</mosaic_0001>

<bundles_post_ra>
// kernel: flexible_cnn_forward.1
= control target key start
LH: loop header
LB: loop body
LE: loop exit
PB: predicated region body
PF: predicated region fallthrough
CT: control target
= control target key end

     0   :  { %15 = vsyncpa [#allocation3], 0  ;;  %s16638_s0 = inlined_call_operand.vmem [shape: bf16[28,128], index: 0, kind: input, shape index: {}]   ;;  %s16639_s1 = inlined_call_operand.vmem [shape: bf16[28,128], index: 1, kind: input, shape index: {}]   ;;  %s16640_s2 = inlined_call_operand.hbm [shape: bf16[128,1024], index: 2, kind: input, shape index: {}]   ;;  %s16641_s3 = inlined_call_operand.hbm [shape: f32[1,512], index: 3, kind: input, shape index: {}]   ;;  %s16642_s4 = inlined_call_operand.hbm [shape: bf16[3,512,1024], index: 4, kind: input, shape index: {}]   ;;  %s16643_s5 = inlined_call_operand.hbm [shape: f32[1,512], index: 5, kind: input, shape index: {}]   ;;  %s16644_s6 = inlined_call_operand.hbm [shape: bf16[7,512,128], index: 6, kind: input, shape index: {}]   ;;  %s16645_s7 = inlined_call_operand.hbm [shape: f32[1,128], index: 7, kind: input, shape index: {}]   ;;  %s16646_s8 = inlined_call_operand.hbm [shape: bf16[128,128], index: 8, kind: input, shape index: {}]   ;;  %s16647_s9 = inlined_call_operand.hbm [shape: f32[1,128], index: 9, kind: input, shape index: {}]   ;;  %s16648_s10 = inlined_call_operand.hbm [shape: f32[2,128], index: 10, kind: output, shape index: {}]  }
   0x1   :  { %16 = vsyncpa [#allocation6], 0 }
   0x2   :  { %17 = vsyncpa [#allocation9], 0 }
   0x3   :  { %18 = vsyncpa [#allocation12], 0 }
   0x4   :  { %19 = vsyncpa [#allocation15], 0 }
   0x5   :  { %20 = vsyncpa [#allocation4], 0  ;;  %s12384_s13 = smov [#allocation5]   ;;  %s12385_s15 = smov [#allocation8]  }
   0x6   :  { %s43_s14 = sshll.u32 %s12384_s13, 4  ;;  %s65_s16 = sshll.u32 %s12385_s15, 4  ;;  %s44_s14 = int_to_ptr.vmem [resolvable:$true] %s43_s14  ;;  %s66_s16 = int_to_ptr.vmem [resolvable:$true] %s65_s16 }
   0x7   :  { %s12200_s17 = scalar_lea.vmem %s44_s14, 64  ;;  %p12205_p1 = scmp.lt.s32.totalorder %s44_s14, %s44_s14 }
   0x8   :  { %p12201_p0 = scmp.ne.s32.totalorder %s44_s14, %s12200_s17  ;;  %p12206_p2 = scmp.lt.s32.totalorder %s12200_s17, %s12200_s17 }
   0xa   :  { %p12207_p3 = por %p12206_p2, %p12205_p1 }
   0xc   :  { %p12208_p4 = pnand %p12207_p3, %p12201_p0 }
   0xe   :  { %12211 = shalt.err (!%p12208_p4)
}
   0xf   :  { %46 = dma.hbm_to_vmem [thread:$0]  %s16641_s3, 64, %s44_s14, [#allocation6]  }
  0x10   :  { %s12220_s20 = scalar_lea.vmem %s66_s16, 64  ;;  %p12225_p6 = scmp.lt.s32.totalorder %s66_s16, %s66_s16 }
  0x11   :  { %p12221_p5 = scmp.ne.s32.totalorder %s66_s16, %s12220_s20  ;;  %p12226_p7 = scmp.lt.s32.totalorder %s12220_s20, %s12220_s20 }
  0x13   :  { %p12227_p8 = por %p12226_p7, %p12225_p6 }
  0x15   :  { %p12228_p9 = pnand %p12227_p8, %p12221_p5 }
  0x17   :  { %12231 = shalt.err (!%p12228_p9)
}
  0x18   :  { %68 = dma.hbm_to_vmem [thread:$0]  %s16643_s5, 64, %s66_s16, [#allocation9]  }
  0x19   :  { %s12386_s23 = smov [#allocation11]   ;;  %s12387_s25 = smov [#allocation2]  }
  0x1a   :  { %s87_s24 = sshll.u32 %s12386_s23, 4  ;;  %s30_s26 = sshll.u32 %s12387_s25, 4  ;;  %s88_s24 = int_to_ptr.vmem [resolvable:$true] %s87_s24  ;;  %s31_s26 = int_to_ptr.vmem [resolvable:$true] %s30_s26 }
  0x1b   :  { %s12240_s27 = scalar_lea.vmem %s88_s24, 16  ;;  %s12244_s3 = scalar_lea.vmem %s88_s24, 32 }
  0x1c   :  { %p12241_p10 = scmp.ne.s32.totalorder %s88_s24, %s12240_s27  ;;  %p12245_p11 = scmp.lt.s32.totalorder %s88_s24, %s88_s24 }
  0x1d   :  { %p12246_p12 = scmp.lt.s32.totalorder %s12244_s3, %s12240_s27 }
  0x1f   :  { %p12247_p13 = por %p12246_p12, %p12245_p11 }
  0x21   :  { %p12248_p0 = pnand %p12247_p13, %p12241_p10 }
  0x23   :  { %12251 = shalt.err (!%p12248_p0)
}
  0x24   :  { %90 = dma.hbm_to_vmem [thread:$0]  %s16645_s7, 16, %s88_s24, [#allocation12]  }
  0x25   :  { %s12260_s30 = scalar_lea.vmem %s31_s26, 8192  ;;  %p12265_p2 = scmp.lt.s32.totalorder %s31_s26, %s31_s26 }
  0x26   :  { %p12261_p1 = scmp.ne.s32.totalorder %s31_s26, %s12260_s30  ;;  %p12266_p3 = scmp.lt.s32.totalorder %s12260_s30, %s12260_s30 }
  0x28   :  { %p12267_p4 = por %p12266_p3, %p12265_p2 }
  0x2a   :  { %p12268_p5 = pnand %p12267_p4, %p12261_p1 }
  0x2c   :  { %12271 = shalt.err (!%p12268_p5)
}
  0x2d   :  { %s12388_s5 = smov 512   ;;  %s12389_s11 = smov 32  }
  0x2e   :  { %36 = dma.hbm_to_vmem [thread:$0]  %s16640_s2, 8192, %s31_s26, [#allocation3], %s12388_s5, %s12388_s5, %s12389_s11  }
  0x2f   :  { %s12390_s14 = smov [#allocation7]   ;;  %s12391_s16 = smov [#allocation10]  }
  0x30   :  { %s52_s15 = sshll.u32 %s12390_s14, 4  ;;  %s74_s17 = sshll.u32 %s12391_s16, 4  ;;  %s53_s15 = int_to_ptr.vmem [resolvable:$true] %s52_s15  ;;  %s75_s17 = int_to_ptr.vmem [resolvable:$true] %s74_s17 }
  0x31   :  { %s12280_s7 = scalar_lea.vmem %s53_s15, 98304  ;;  %p12285_p7 = scmp.lt.s32.totalorder %s53_s15, %s53_s15 }
  0x32   :  { %p12281_p6 = scmp.ne.s32.totalorder %s53_s15, %s12280_s7  ;;  %p12286_p8 = scmp.lt.s32.totalorder %s12280_s7, %s12280_s7 }
  0x34   :  { %p12287_p9 = por %p12286_p8, %p12285_p7 }
  0x36   :  { %p12288_p10 = pnand %p12287_p9, %p12281_p6 }
  0x38   :  { %12291 = shalt.err (!%p12288_p10)
}
  0x39   :  { %58 = dma.hbm_to_vmem [thread:$0]  %s16642_s4, 98304, %s53_s15, [#allocation6], %s12388_s5, %s12388_s5, %s12389_s11  }
  0x3a   :  { %s12300_s20 = scalar_lea.vmem %s75_s17, 28672  ;;  %p12305_p12 = scmp.lt.s32.totalorder %s75_s17, %s75_s17 }
  0x3b   :  { %p12301_p11 = scmp.ne.s32.totalorder %s75_s17, %s12300_s20  ;;  %p12306_p13 = scmp.lt.s32.totalorder %s12300_s20, %s12300_s20 }
  0x3d   :  { %p12307_p0 = por %p12306_p13, %p12305_p12 }
  0x3f   :  { %p12308_p1 = pnand %p12307_p0, %p12301_p11 }
  0x41   :  { %12311 = shalt.err (!%p12308_p1)
}
  0x42   :  { %s12392_s2 = smov 64   ;;  %s12393_s21 = smov 4  }
  0x43   :  { %80 = dma.hbm_to_vmem [thread:$0]  %s16644_s6, 28672, %s75_s17, [#allocation9], %s12392_s2, %s12392_s2, %s12393_s21  }
  0x44   :  { %s12394_s24 = smov [#allocation13]   ;;  %s12395_s26 = smov [#allocation14]  }
  0x45   :  { %s96_s25 = sshll.u32 %s12394_s24, 4  ;;  %s109_s27 = sshll.u32 %s12395_s26, 4  ;;  %s97_s25 = int_to_ptr.vmem [resolvable:$true] %s96_s25  ;;  %s110_s27 = int_to_ptr.vmem [resolvable:$true] %s109_s27 }
  0x46   :  { %s12320_s4 = scalar_lea.vmem %s97_s25, 1024  ;;  %p12325_p3 = scmp.lt.s32.totalorder %s97_s25, %s97_s25 }
  0x47   :  { %p12321_p2 = scmp.ne.s32.totalorder %s97_s25, %s12320_s4  ;;  %p12326_p4 = scmp.lt.s32.totalorder %s12320_s4, %s12320_s4 }
  0x49   :  { %p12327_p5 = por %p12326_p4, %p12325_p3 }
  0x4b   :  { %p12328_p6 = pnand %p12327_p5, %p12321_p2 }
  0x4d   :  { %12331 = shalt.err (!%p12328_p6)
}
  0x4e   :  { %102 = dma.hbm_to_vmem [thread:$0]  %s16646_s8, 1024, %s97_s25, [#allocation12], %s12392_s2, %s12392_s2, %s12393_s21  }
  0x4f   :  { %s12340_s29 = scalar_lea.vmem %s110_s27, 16  ;;  %s12344_s6 = scalar_lea.vmem %s110_s27, 32 }
  0x50   :  { %p12341_p7 = scmp.ne.s32.totalorder %s110_s27, %s12340_s29  ;;  %p12345_p8 = scmp.lt.s32.totalorder %s110_s27, %s110_s27 }
  0x51   :  { %p12346_p9 = scmp.lt.s32.totalorder %s12344_s6, %s12340_s29 }
  0x53   :  { %p12347_p10 = por %p12346_p9, %p12345_p8 }
  0x55   :  { %p12348_p11 = pnand %p12347_p10, %p12341_p7 }
  0x57   :  { %12351 = shalt.err (!%p12348_p11)
}
  0x58   :  { %112 = dma.hbm_to_vmem [thread:$0]  %s16647_s9, 16, %s110_s27, [#allocation15]  }
  0x59   :  { %12372 = dma.done.wait [#allocation3], 8192  }
  0x5a   :  { %12373 = vsyncadd [#allocation3], 4294959104 }
  0x5b   :  { %12374 = dma.done.wait [#allocation6], 98368  }
  0x5c   :  { %12375 = vsyncadd [#allocation6], 4294868928 }
  0x5d   :  { %12376 = dma.done.wait [#allocation9], 28736  }
  0x5e   :  { %12377 = vsyncadd [#allocation9], 4294938560 }
  0x5f   :  { %12378 = dma.done.wait [#allocation12], 1040  }
  0x60   :  { %12379 = vsyncadd [#allocation12], 4294966256 }
  0x61   :  { %12380 = dma.done.wait [#allocation15], 16  }
  0x62   :  { %12381 = vsyncadd [#allocation15], 4294967280  ;;  %v16649_v0 = vmov 0   ;;  %v194_v1 = vld [vmem:[#allocation2 + $0x1c0] sm:$0xff]  ;;  %v195_v3 = vld [vmem:[#allocation2 + $0x1c8] sm:$0xff]  ;;  %vm1109_vm0 = vcmask 1040384  }
  0x63   :  { %570 = vmatprep.mubr.bf16.mxu0 %v16649_v0  ;;  %623 = vmatprep.mubr.bf16.mxu1 %v16649_v0  ;;  %v198_v2 = vld [vmem:[#allocation2 + $0x1e0] sm:$0xff]  ;;  %v199_v5 = vld [vmem:[#allocation2 + $0x1e8] sm:$0xff]  ;;  %v196_v60 = vld [vmem:[#allocation2 + $0x1d0] sm:$0xff]  ;;  %vm1096_vm2 = vcmask 1041408   ;;  %vm1127_vm3 = vcmask 1045504   ;;  %vm12398_vm4 = vmmov 0  }
  0x64   :  { %v12481_v4 = vcombine.high %v194_v1, %v198_v2  ;;  %v12483_v6 = vcombine.low %v194_v1, %v198_v2  ;;  %v186_v7 = vld [vmem:[#allocation2 + $0x180] sm:$0xff]  ;;  %v12485_v9 = vcombine.high %v195_v3, %v199_v5  ;;  %v12487_v10 = vcombine.low %v195_v3, %v199_v5  ;;  %v187_v12 = vld [vmem:[#allocation2 + $0x188] sm:$0xff]  ;;  %v200_v61 = vld [vmem:[#allocation2 + $0x1f0] sm:$0xff] }
  0x65   :  { %v190_v8 = vld [vmem:[#allocation2 + $0x1a0] sm:$0xff]  ;;  %v191_v13 = vld [vmem:[#allocation2 + $0x1a8] sm:$0xff]  ;;  %v197_v1 = vld [vmem:[#allocation2 + $0x1d8] sm:$0xff] }
  0x66   :  { %v12489_v11 = vcombine.high %v186_v7, %v190_v8  ;;  %v178_v14 = vld [vmem:[#allocation2 + $0x140] sm:$0xff]  ;;  %538 = vmatprep.subr.bf16.mxu0 %v12481_v4  ;;  %v12492_v15 = vcombine.high %v187_v12, %v191_v13  ;;  %v179_v17 = vld [vmem:[#allocation2 + $0x148] sm:$0xff]  ;;  %591 = vmatprep.subr.bf16.mxu1 %v12485_v9  ;;  %v12496_v19 = vcombine.low %v186_v7, %v190_v8  ;;  %v201_v2 = vld [vmem:[#allocation2 + $0x1f8] sm:$0xff] }
  0x67   :  { %v182_v16 = vld [vmem:[#allocation2 + $0x160] sm:$0xff]  ;;  %v183_v18 = vld [vmem:[#allocation2 + $0x168] sm:$0xff]  ;;  %539 = vmatpush1.bf16.msra.mxu0 %v12483_v6  ;;  %592 = vmatpush1.bf16.msra.mxu1 %v12487_v10  ;;  %v12500_v20 = vcombine.low %v187_v12, %v191_v13  ;;  %v188_v7 = vld [vmem:[#allocation2 + $0x190] sm:$0xff] }
  0x68   :  { %540 = vmatprep.subr.bf16.mxu0 %v12489_v11  ;;  %v12502_v21 = vcombine.high %v178_v14, %v182_v16  ;;  %593 = vmatprep.subr.bf16.mxu1 %v12492_v15  ;;  %v12505_v22 = vcombine.high %v179_v17, %v183_v18  ;;  %v170_v23 = vld [vmem:[#allocation2 + $0x100] sm:$0xff]  ;;  %v171_v25 = vld [vmem:[#allocation2 + $0x108] sm:$0xff]  ;;  %v12508_v27 = vcombine.low %v178_v14, %v182_v16  ;;  %v192_v8 = vld [vmem:[#allocation2 + $0x1b0] sm:$0xff] }
  0x69   :  { %v174_v24 = vld [vmem:[#allocation2 + $0x120] sm:$0xff]  ;;  %v175_v26 = vld [vmem:[#allocation2 + $0x128] sm:$0xff]  ;;  %v12512_v28 = vcombine.low %v179_v17, %v183_v18  ;;  %v12579_v14 = vcombine.high %v196_v60, %v200_v61  ;;  %v189_v16 = vld [vmem:[#allocation2 + $0x198] sm:$0xff]  ;;  %v12582_v18 = vcombine.high %v197_v1, %v201_v2 }
  0x6a   :  { %v12514_v29 = vcombine.high %v170_v23, %v174_v24  ;;  %v12517_v30 = vcombine.high %v171_v25, %v175_v26  ;;  %v162_v31 = vld [vmem:[#allocation2 + $0xc0] sm:$0xff]  ;;  %v163_v33 = vld [vmem:[#allocation2 + $0xc8] sm:$0xff]  ;;  %v12520_v35 = vcombine.low %v170_v23, %v174_v24  ;;  %v12524_v36 = vcombine.low %v171_v25, %v175_v26  ;;  %v193_v17 = vld [vmem:[#allocation2 + $0x1b8] sm:$0xff] }
  0x6b   :  { %541 = vmatpush1.bf16.msra.mxu0 %v12496_v19  ;;  %594 = vmatpush1.bf16.msra.mxu1 %v12500_v20  ;;  %v166_v32 = vld [vmem:[#allocation2 + $0xe0] sm:$0xff]  ;;  %v167_v34 = vld [vmem:[#allocation2 + $0xe8] sm:$0xff]  ;;  %v12585_v23 = vcombine.low %v196_v60, %v200_v61  ;;  %v180_v24 = vld [vmem:[#allocation2 + $0x150] sm:$0xff]  ;;  %v12589_v26 = vcombine.low %v197_v1, %v201_v2 }
  0x6c   :  { %542 = vmatprep.subr.bf16.mxu0 %v12502_v21  ;;  %595 = vmatprep.subr.bf16.mxu1 %v12505_v22  ;;  %v12526_v37 = vcombine.high %v162_v31, %v166_v32  ;;  %v12529_v38 = vcombine.high %v163_v33, %v167_v34  ;;  %v154_v39 = vld [vmem:[#allocation2 + $0x80] sm:$0xff]  ;;  %v155_v41 = vld [vmem:[#allocation2 + $0x88] sm:$0xff]  ;;  %v12532_v43 = vcombine.low %v162_v31, %v166_v32  ;;  %v184_v25 = vld [vmem:[#allocation2 + $0x170] sm:$0xff] }
  0x6d   :  { %v158_v40 = vld [vmem:[#allocation2 + $0xa0] sm:$0xff]  ;;  %v159_v42 = vld [vmem:[#allocation2 + $0xa8] sm:$0xff]  ;;  %v12536_v44 = vcombine.low %v163_v33, %v167_v34  ;;  %v12591_v31 = vcombine.high %v188_v7, %v192_v8  ;;  %v181_v32 = vld [vmem:[#allocation2 + $0x158] sm:$0xff]  ;;  %v12594_v34 = vcombine.high %v189_v16, %v193_v17 }
  0x6e   :  { %v12538_v45 = vcombine.high %v154_v39, %v158_v40  ;;  %v146_v46 = vld [vmem:[#allocation2 + $0x40] sm:$0xff]  ;;  %v12541_v47 = vcombine.high %v155_v41, %v159_v42  ;;  %v147_v49 = vld [vmem:[#allocation2 + $0x48] sm:$0xff]  ;;  %v12544_v51 = vcombine.low %v154_v39, %v158_v40  ;;  %v12548_v52 = vcombine.low %v155_v41, %v159_v42  ;;  %v185_v33 = vld [vmem:[#allocation2 + $0x178] sm:$0xff] }
  0x6f   :  { %543 = vmatpush1.bf16.msra.mxu0 %v12508_v27  ;;  %596 = vmatpush1.bf16.msra.mxu1 %v12512_v28  ;;  %v150_v48 = vld [vmem:[#allocation2 + $0x60] sm:$0xff]  ;;  %v151_v50 = vld [vmem:[#allocation2 + $0x68] sm:$0xff]  ;;  %v12599_v39 = vcombine.low %v188_v7, %v192_v8  ;;  %v172_v40 = vld [vmem:[#allocation2 + $0x110] sm:$0xff]  ;;  %v12603_v42 = vcombine.low %v189_v16, %v193_v17  ;;  %v12622_v60 = vcombine.low %v181_v32, %v185_v33 }
  0x70   :  { %544 = vmatprep.subr.bf16.mxu0 %v12514_v29  ;;  %597 = vmatprep.subr.bf16.mxu1 %v12517_v30  ;;  %v12550_v53 = vcombine.high %v146_v46, %v150_v48  ;;  %v12553_v54 = vcombine.high %v147_v49, %v151_v50  ;;  %v138_v55 = vld [vmem:[#allocation2] sm:$0xff]  ;;  %v139_v57 = vld [vmem:[#allocation2 + $0x8] sm:$0xff]  ;;  %v12556_v59 = vcombine.low %v146_v46, %v150_v48  ;;  %v176_v41 = vld [vmem:[#allocation2 + $0x130] sm:$0xff] }
  0x71   :  { %v142_v56 = vld [vmem:[#allocation2 + $0x20] sm:$0xff]  ;;  %v143_v58 = vld [vmem:[#allocation2 + $0x28] sm:$0xff]  ;;  %v12560_v62 = vcombine.low %v147_v49, %v151_v50  ;;  %v12605_v46 = vcombine.high %v180_v24, %v184_v25  ;;  %v173_v48 = vld [vmem:[#allocation2 + $0x118] sm:$0xff]  ;;  %17415 = vst [vmem:[#allocation25_spill] sm:$0xff] %v12622_v60  ;;  %v12624_v61 = vcombine.high %v172_v40, %v176_v41  ;;  %v12631_v8 = vcombine.low %v172_v40, %v176_v41 }
  0x72   :  { %v12562_v63 = vcombine.high %v138_v55, %v142_v56  ;;  %v12565_v3 = vcombine.high %v139_v57, %v143_v58  ;;  %v12568_v5 = vcombine.low %v138_v55, %v142_v56  ;;  %v12572_v12 = vcombine.low %v139_v57, %v143_v58  ;;  %v12577_v13 = vld [vmem:[%s16638_s0] sm:$0xff]   ;;  %v177_v49 = vld [vmem:[#allocation2 + $0x138] sm:$0xff]  ;;  %v12610_v50 = vld [vmem:[%s16638_s0 + $0x8] sm:$0x3f]  }
  0x73   :  { %545 = vmatpush1.bf16.msra.mxu0 %v12520_v35  ;;  %598 = vmatpush1.bf16.msra.mxu1 %v12524_v36  ;;  %v12613_v55 = vcombine.high %v181_v32, %v185_v33  ;;  %v12618_v56 = vcombine.low %v180_v24, %v184_v25  ;;  %v164_v57 = vld [vmem:[#allocation2 + $0xd0] sm:$0xff]  ;;  %17416 = vst [vmem:[#allocation26_spill] sm:$0xff] %v12624_v61  ;;  %v165_v1 = vld [vmem:[#allocation2 + $0xd8] sm:$0xff]  ;;  %17418 = vst [vmem:[#allocation28_spill] sm:$0xff] %v12631_v8  ;;  %v17422_v40 = vmov 0  }
  0x74   :  { %546 = vmatprep.subr.bf16.mxu0 %v12526_v37  ;;  %599 = vmatprep.subr.bf16.mxu1 %v12529_v38  ;;  %v168_v58 = vld [vmem:[#allocation2 + $0xf0] sm:$0xff]  ;;  %v169_v2 = vld [vmem:[#allocation2 + $0xf8] sm:$0xff]  ;;  %v12627_v7 = vcombine.high %v173_v48, %v177_v49  ;;  %v12636_v24 = vcombine.low %v173_v48, %v177_v49  ;;  %vm13773_vm1 = vmneg %vm1109_vm0 }
  0x75   :  { %17413 = vst [vmem:[#allocation23_spill] sm:$0xff] %v12613_v55  ;;  %17414 = vst [vmem:[#allocation24_spill] sm:$0xff] %v12618_v56  ;;  %v156_v16 = vld [vmem:[#allocation2 + $0x90] sm:$0xff]  ;;  %v12638_v25 = vcombine.high %v164_v57, %v168_v58  ;;  %v157_v32 = vld [vmem:[#allocation2 + $0x98] sm:$0xff]  ;;  %v12646_v41 = vcombine.low %v164_v57, %v168_v58  ;;  %v12650_v48 = vcombine.low %v165_v1, %v169_v2 }
  0x76   :  { %17417 = vst [vmem:[#allocation27_spill] sm:$0xff] %v12627_v7  ;;  %v160_v17 = vld [vmem:[#allocation2 + $0xb0] sm:$0xff]  ;;  %17419 = vst [vmem:[#allocation29_spill] sm:$0xff] %v12636_v24  ;;  %v161_v33 = vld [vmem:[#allocation2 + $0xb8] sm:$0xff] }
  0x77   :  { %547 = vmatpush1.bf16.msra.mxu0 %v12532_v43  ;;  %600 = vmatpush1.bf16.msra.mxu1 %v12536_v44  ;;  %17420 = vst [vmem:[#allocation30_spill] sm:$0xff] %v12638_v25  ;;  %v12652_v49 = vcombine.high %v156_v16, %v160_v17  ;;  %v12658_v57 = vcombine.low %v156_v16, %v160_v17  ;;  %v140_v58 = vld [vmem:[#allocation2 + $0x10] sm:$0xff] }
  0x78   :  { %548 = vmatprep.subr.bf16.mxu0 %v12538_v45  ;;  %601 = vmatprep.subr.bf16.mxu1 %v12541_v47 }
  0x7b   :  { %549 = vmatpush1.bf16.msra.mxu0 %v12544_v51  ;;  %602 = vmatpush1.bf16.msra.mxu1 %v12548_v52 }
  0x7c   :  { %550 = vmatprep.subr.bf16.mxu0 %v12550_v53  ;;  %603 = vmatprep.subr.bf16.mxu1 %v12553_v54 }
  0x7f   :  { %551 = vmatpush1.bf16.msra.mxu0 %v12556_v59  ;;  %604 = vmatpush1.bf16.msra.mxu1 %v12560_v62 }
  0x80   :  { %552 = vmatprep.subr.bf16.mxu0 %v12562_v63  ;;  %605 = vmatprep.subr.bf16.mxu1 %v12565_v3 }
  0x83   :  { %553 = vmatpush1.bf16.msra.mxu0 %v12568_v5  ;;  %606 = vmatpush1.bf16.msra.mxu1 %v12572_v12 }
  0x84   :  { %644 = vmatprep.subr.bf16.mxu0 %v12579_v14  ;;  %697 = vmatprep.subr.bf16.mxu1 %v12582_v18 }
  0x86   :  { %571 = vmatmul.mubr.bf16.vlgmr.msra.gmra.mxu0 %v12577_v13  ;;  %624 = vmatmul.mubr.bf16.vlgmr.msra.gmra.mxu1 %v12577_v13 }
  0x87   :  { %645 = vmatpush1.bf16.msra.mxu0 %v12585_v23  ;;  %698 = vmatpush1.bf16.msra.mxu1 %v12589_v26 }
  0x88   :  { %646 = vmatprep.subr.bf16.mxu0 %v12591_v31  ;;  %699 = vmatprep.subr.bf16.mxu1 %v12594_v34 }
  0x89   :  { %580 = vmatprep.mubr.bf16.mxu0 %v16649_v0  ;;  %633 = vmatprep.mubr.bf16.mxu1 %v16649_v0  ;;  %v12641_v0 = vcombine.high %v165_v1, %v169_v2  ;;  %v12662_v1 = vcombine.low %v157_v32, %v161_v33 }
  0x8b   :  { %647 = vmatpush1.bf16.msra.mxu0 %v12599_v39  ;;  %700 = vmatpush1.bf16.msra.mxu1 %v12603_v42  ;;  %17421 = vst [vmem:[#allocation31_spill] sm:$0xff] %v12641_v0 }
  0x8c   :  { %648 = vmatprep.subr.bf16.mxu0 %v12605_v46  ;;  %701 = vmatprep.subr.bf16.mxu1 %v12613_v55  ;;  %v12655_v55 = vcombine.high %v157_v32, %v161_v33 }
  0x8e   :  { %581 = vmatmul.mubr.bf16.gmra.mxu0 %v12610_v50  ;;  %634 = vmatmul.mubr.bf16.gmra.mxu1 %v12610_v50  ;;  %17423 = vst [vmem:[#allocation32_spill] sm:$0xff] %v12655_v55 }
  0x8f   :  { %649 = vmatpush1.bf16.msra.mxu0 %v12618_v56  ;;  %702 = vmatpush1.bf16.msra.mxu1 %v12622_v60  ;;  %v148_v60 = vld [vmem:[#allocation2 + $0x50] sm:$0xff]  ;;  %v153_v56 = vld [vmem:[#allocation2 + $0x78] sm:$0xff] }
  0x90   :  { %650 = vmatprep.subr.bf16.mxu0 %v12624_v61  ;;  %703 = vmatprep.subr.bf16.mxu1 %v12627_v7  ;;  %v152_v61 = vld [vmem:[#allocation2 + $0x70] sm:$0xff]  ;;  %v149_v7 = vld [vmem:[#allocation2 + $0x58] sm:$0xff] }
  0x91   :  { %676 = vmatprep.mubr.bf16.mxu0 %v17422_v40  ;;  %729 = vmatprep.mubr.bf16.mxu1 %v17422_v40  ;;  %v12664_v2 = vcombine.high %v148_v60, %v152_v61  ;;  %v12670_v16 = vcombine.low %v148_v60, %v152_v61  ;;  %v12674_v17 = vcombine.low %v149_v7, %v153_v56  ;;  %v1549_v61 = vld [vmem:[#allocation7 + $0xcc0] sm:$0xff] }
  0x93   :  { %651 = vmatpush1.bf16.msra.mxu0 %v12631_v8  ;;  %704 = vmatpush1.bf16.msra.mxu1 %v12636_v24  ;;  %v144_v8 = vld [vmem:[#allocation2 + $0x30] sm:$0xff]  ;;  %v145_v24 = vld [vmem:[#allocation2 + $0x38] sm:$0xff] }
  0x94   :  { %652 = vmatprep.subr.bf16.mxu0 %v12638_v25  ;;  %705 = vmatprep.subr.bf16.mxu1 %v12641_v0  ;;  %v141_v25 = vld [vmem:[#allocation2 + $0x18] sm:$0xff]  ;;  %v12667_v0 = vcombine.high %v149_v7, %v153_v56  ;;  %v12676_v32 = vcombine.high %v140_v58, %v144_v8  ;;  %v1425_v56 = vld [vmem:[#allocation7 + $0x8e0] sm:$0xff] }
  0x95   :  { %v12679_v33 = vcombine.high %v141_v25, %v145_v24  ;;  %v12686_v60 = vcombine.low %v141_v25, %v145_v24 }
  0x97   :  { %653 = vmatpush1.bf16.msra.mxu0 %v12646_v41  ;;  %706 = vmatpush1.bf16.msra.mxu1 %v12650_v48 }
  0x98   :  { %654 = vmatprep.subr.bf16.mxu0 %v12652_v49  ;;  %707 = vmatprep.subr.bf16.mxu1 %v12655_v55  ;;  %v12682_v55 = vcombine.low %v140_v58, %v144_v8  ;;  %v1553_v8 = vld [vmem:[#allocation7 + $0xce0] sm:$0xff] }
  0x99   :  { %v12827_v25 = vcombine.low %v1549_v61, %v1553_v8  ;;  %v1545_v58 = vld [vmem:[#allocation7 + $0xca0] sm:$0xff] }
  0x9b   :  { %655 = vmatpush1.bf16.msra.mxu0 %v12658_v57  ;;  %708 = vmatpush1.bf16.msra.mxu1 %v12662_v1  ;;  %17452 = vst [vmem:[#allocation41_spill] sm:$0xff] %v12827_v25 }
  0x9c   :  { %656 = vmatprep.subr.bf16.mxu0 %v12664_v2  ;;  %709 = vmatprep.subr.bf16.mxu1 %v12667_v0 }
  0x9f   :  { %657 = vmatpush1.bf16.msra.mxu0 %v12670_v16  ;;  %710 = vmatpush1.bf16.msra.mxu1 %v12674_v17 }
  0xa0   :  { %658 = vmatprep.subr.bf16.mxu0 %v12676_v32  ;;  %711 = vmatprep.subr.bf16.mxu1 %v12679_v33 }
  0xa3   :  { %659 = vmatpush1.bf16.msra.mxu0 %v12682_v55  ;;  %712 = vmatpush1.bf16.msra.mxu1 %v12686_v60 }
  0xa4   :  { %766 = vmatprep.subr.bf16.mxu0 %v12481_v4  ;;  %819 = vmatprep.subr.bf16.mxu1 %v12485_v9  ;;  %v11958_v4 = vld [vmem:[%s16639_s1] sm:$0xff]   ;;  %v17424_v9 = vld [vmem:[#allocation23_spill] sm:$0xff] }
  0xa6   :  { %677 = vmatmul.mubr.bf16.vlgmr.msra.gmra.mxu0 %v12577_v13  ;;  %730 = vmatmul.mubr.bf16.vlgmr.msra.gmra.mxu1 %v12577_v13  ;;  %v1569_v13 = vld [vmem:[#allocation7 + $0xd60] sm:$0xff] }
  0xa7   :  { %767 = vmatpush1.bf16.msra.mxu0 %v12483_v6  ;;  %820 = vmatpush1.bf16.msra.mxu1 %v12487_v10  ;;  %v11959_v6 = vld [vmem:[%s16639_s1 + $0x8] sm:$0x3f]   ;;  %v17425_v10 = vld [vmem:[#allocation24_spill] sm:$0xff]  ;;  %s12399_s1 = smov [#allocation16]  }
  0xa8   :  { %768 = vmatprep.subr.bf16.mxu0 %v12489_v11  ;;  %821 = vmatprep.subr.bf16.mxu1 %v12492_v15  ;;  %v17426_v11 = vld [vmem:[#allocation25_spill] sm:$0xff]  ;;  %v17427_v15 = vld [vmem:[#allocation26_spill] sm:$0xff]  ;;  %s10472_s16 = sshll.u32 %s12399_s1, 4  ;;  %s10473_s16 = int_to_ptr.vmem [resolvable:$true] %s10472_s16 }
  0xa9   :  { %686 = vmatprep.mubr.bf16.mxu0 %v17422_v40  ;;  %739 = vmatprep.mubr.bf16.mxu1 %v17422_v40  ;;  %s12352_s17 = scalar_lea.vmem %s10473_s16, 32  ;;  %p12357_p13 = scmp.lt.s32.totalorder %s10473_s16, %s10473_s16 }
  0xaa   :  { %p12353_p12 = scmp.ne.s32.totalorder %s10473_s16, %s12352_s17  ;;  %p12358_p0 = scmp.lt.s32.totalorder %s12352_s17, %s12352_s17 }
  0xab   :  { %769 = vmatpush1.bf16.msra.mxu0 %v12496_v19  ;;  %822 = vmatpush1.bf16.msra.mxu1 %v12500_v20  ;;  %v17428_v19 = vld [vmem:[#allocation27_spill] sm:$0xff]  ;;  %v17429_v20 = vld [vmem:[#allocation28_spill] sm:$0xff] }
  0xac   :  { %770 = vmatprep.subr.bf16.mxu0 %v12502_v21  ;;  %823 = vmatprep.subr.bf16.mxu1 %v12505_v22  ;;  %v17430_v21 = vld [vmem:[#allocation29_spill] sm:$0xff]  ;;  %v17431_v22 = vld [vmem:[#allocation30_spill] sm:$0xff]  ;;  %p12359_p1 = por %p12358_p0, %p12357_p13 }
  0xae   :  { %687 = vmatmul.mubr.bf16.gmra.mxu0 %v12610_v50  ;;  %740 = vmatmul.mubr.bf16.gmra.mxu1 %v12610_v50  ;;  %p12360_p2 = pnand %p12359_p1, %p12353_p12 }
  0xaf   :  { %771 = vmatpush1.bf16.msra.mxu0 %v12508_v27  ;;  %824 = vmatpush1.bf16.msra.mxu1 %v12512_v28  ;;  %v17432_v27 = vld [vmem:[#allocation31_spill] sm:$0xff]  ;;  %v17433_v28 = vld [vmem:[#allocation32_spill] sm:$0xff] }
  0xb0   :  { %772 = vmatprep.subr.bf16.mxu0 %v12514_v29  ;;  %825 = vmatprep.subr.bf16.mxu1 %v12517_v30  ;;  %v1453_v29 = vld [vmem:[#allocation7 + $0x9c0] sm:$0xff] }
  0xb1   :  { %798 = vmatprep.mubr.bf16.mxu0 %v17422_v40  ;;  %851 = vmatprep.mubr.bf16.mxu1 %v17422_v40  ;;  %v1581_v30 = vld [vmem:[#allocation7 + $0xdc0] sm:$0xff] }
  0xb3   :  { %773 = vmatpush1.bf16.msra.mxu0 %v12520_v35  ;;  %826 = vmatpush1.bf16.msra.mxu1 %v12524_v36 }
  0xb4   :  { %774 = vmatprep.subr.bf16.mxu0 %v12526_v37  ;;  %827 = vmatprep.subr.bf16.mxu1 %v12529_v38  ;;  %v1585_v37 = vld [vmem:[#allocation7 + $0xde0] sm:$0xff] }
  0xb5   :  { %v12779_v38 = vcombine.low %v1581_v30, %v1585_v37 }
  0xb7   :  { %775 = vmatpush1.bf16.msra.mxu0 %v12532_v43  ;;  %828 = vmatpush1.bf16.msra.mxu1 %v12536_v44  ;;  %17436 = vst [vmem:[#allocation25_spill] sm:$0xff] %v12779_v38  ;;  %v12781_v43 = vcombine.high %v1581_v30, %v1585_v37  ;;  %v1445_v44 = vld [vmem:[#allocation7 + $0x980] sm:$0xff] }
  0xb8   :  { %776 = vmatprep.subr.bf16.mxu0 %v12538_v45  ;;  %829 = vmatprep.subr.bf16.mxu1 %v12541_v47  ;;  %v1449_v45 = vld [vmem:[#allocation7 + $0x9a0] sm:$0xff] }
  0xb9   :  { %17437 = vst [vmem:[#allocation26_spill] sm:$0xff] %v12781_v43  ;;  %v1573_v47 = vld [vmem:[#allocation7 + $0xd80] sm:$0xff] }
  0xba   :  { %v1645_v30 = vld [vmem:[#allocation7 + $0xfc0] sm:$0xff] }
  0xbb   :  { %777 = vmatpush1.bf16.msra.mxu0 %v12544_v51  ;;  %830 = vmatpush1.bf16.msra.mxu1 %v12548_v52  ;;  %v12787_v51 = vcombine.low %v1445_v44, %v1449_v45  ;;  %v12789_v52 = vcombine.high %v1445_v44, %v1449_v45  ;;  %v1649_v45 = vld [vmem:[#allocation7 + $0xfe0] sm:$0xff] }
  0xbc   :  { %778 = vmatprep.subr.bf16.mxu0 %v12550_v53  ;;  %831 = vmatprep.subr.bf16.mxu1 %v12553_v54  ;;  %v1577_v53 = vld [vmem:[#allocation7 + $0xda0] sm:$0xff] }
  0xbd   :  { %17438 = vst [vmem:[#allocation27_spill] sm:$0xff] %v12787_v51  ;;  %17439 = vst [vmem:[#allocation28_spill] sm:$0xff] %v12789_v52  ;;  %v12791_v54 = vcombine.low %v1573_v47, %v1577_v53 }
  0xbf   :  { %779 = vmatpush1.bf16.msra.mxu0 %v12556_v59  ;;  %832 = vmatpush1.bf16.msra.mxu1 %v12560_v62  ;;  %17440 = vst [vmem:[#allocation29_spill] sm:$0xff] %v12791_v54  ;;  %v12793_v59 = vcombine.high %v1573_v47, %v1577_v53  ;;  %v1437_v62 = vld [vmem:[#allocation7 + $0x940] sm:$0xff] }
  0xc0   :  { %780 = vmatprep.subr.bf16.mxu0 %v12562_v63  ;;  %833 = vmatprep.subr.bf16.mxu1 %v12565_v3  ;;  %v1441_v63 = vld [vmem:[#allocation7 + $0x960] sm:$0xff] }
  0xc1   :  { %17441 = vst [vmem:[#allocation30_spill] sm:$0xff] %v12793_v59  ;;  %v1565_v3 = vld [vmem:[#allocation7 + $0xd40] sm:$0xff] }
  0xc2   :  { %v1509_v47 = vld [vmem:[#allocation7 + $0xb80] sm:$0xff] }
  0xc3   :  { %781 = vmatpush1.bf16.msra.mxu0 %v12568_v5  ;;  %834 = vmatpush1.bf16.msra.mxu1 %v12572_v12  ;;  %v12799_v5 = vcombine.low %v1437_v62, %v1441_v63  ;;  %v12801_v12 = vcombine.high %v1437_v62, %v1441_v63  ;;  %v1513_v53 = vld [vmem:[#allocation7 + $0xba0] sm:$0xff]  ;;  %v12875_v62 = vcombine.low %v1645_v30, %v1649_v45 }
  0xc4   :  { %872 = vmatprep.subr.bf16.mxu0 %v12579_v14  ;;  %925 = vmatprep.subr.bf16.mxu1 %v12582_v18  ;;  %v1429_v14 = vld [vmem:[#allocation7 + $0x900] sm:$0xff]  ;;  %v12877_v63 = vcombine.high %v1645_v30, %v1649_v45 }
  0xc5   :  { %17442 = vst [vmem:[#allocation31_spill] sm:$0xff] %v12799_v5  ;;  %17443 = vst [vmem:[#allocation32_spill] sm:$0xff] %v12801_v12  ;;  %v1433_v18 = vld [vmem:[#allocation7 + $0x920] sm:$0xff] }
  0xc6   :  { %799 = vmatmul.mubr.bf16.vlgmr.msra.gmra.mxu0 %v11958_v4  ;;  %852 = vmatmul.mubr.bf16.vlgmr.msra.gmra.mxu1 %v11958_v4  ;;  %17468 = vst [vmem:[#allocation57_spill] sm:$0xff] %v12875_v62  ;;  %17469 = vst [vmem:[#allocation58_spill] sm:$0xff] %v12877_v63  ;;  %v1613_v30 = vld [vmem:[#allocation7 + $0xec0] sm:$0xff] }
  0xc7   :  { %873 = vmatpush1.bf16.msra.mxu0 %v12585_v23  ;;  %926 = vmatpush1.bf16.msra.mxu1 %v12589_v26  ;;  %v12803_v23 = vcombine.low %v1565_v3, %v1569_v13  ;;  %v12805_v26 = vcombine.high %v1565_v3, %v1569_v13  ;;  %v12879_v3 = vcombine.high %v1509_v47, %v1513_v53  ;;  %v1637_v13 = vld [vmem:[#allocation7 + $0xf80] sm:$0xff] }
  0xc8   :  { %874 = vmatprep.subr.bf16.mxu0 %v12591_v31  ;;  %927 = vmatprep.subr.bf16.mxu1 %v12594_v34  ;;  %v12807_v31 = vcombine.high %v1429_v14, %v1433_v18  ;;  %v1557_v34 = vld [vmem:[#allocation7 + $0xd00] sm:$0xff] }
  0xc9   :  { %808 = vmatprep.mubr.bf16.mxu0 %v17422_v40  ;;  %861 = vmatprep.mubr.bf16.mxu1 %v17422_v40  ;;  %17444 = vst [vmem:[#allocation33_spill] sm:$0xff] %v12803_v23  ;;  %17445 = vst [vmem:[#allocation34_spill] sm:$0xff] %v12805_v26 }
  0xca   :  { %17446 = vst [vmem:[#allocation35_spill] sm:$0xff] %v12807_v31  ;;  %17470 = vst [vmem:[#allocation59_spill] sm:$0xff] %v12879_v3 }
  0xcb   :  { %875 = vmatpush1.bf16.msra.mxu0 %v12599_v39  ;;  %928 = vmatpush1.bf16.msra.mxu1 %v12603_v42  ;;  %v1561_v39 = vld [vmem:[#allocation7 + $0xd20] sm:$0xff] }
  0xcc   :  { %876 = vmatprep.subr.bf16.mxu0 %v12605_v46  ;;  %929 = vmatprep.subr.bf16.mxu1 %v17424_v9  ;;  %v12810_v42 = vcombine.high %v1557_v34, %v1561_v39  ;;  %v12814_v46 = vcombine.low %v1429_v14, %v1433_v18  ;;  %v12818_v50 = vcombine.low %v1557_v34, %v1561_v39  ;;  %v1641_v14 = vld [vmem:[#allocation7 + $0xfa0] sm:$0xff] }
  0xcd   :  { %v1501_v18 = vld [vmem:[#allocation7 + $0xb40] sm:$0xff]  ;;  %v12882_v34 = vcombine.high %v1637_v13, %v1641_v14 }
  0xce   :  { %809 = vmatmul.mubr.bf16.gmra.mxu0 %v11959_v6  ;;  %862 = vmatmul.mubr.bf16.gmra.mxu1 %v11959_v6  ;;  %17447 = vst [vmem:[#allocation36_spill] sm:$0xff] %v12810_v42  ;;  %17448 = vst [vmem:[#allocation37_spill] sm:$0xff] %v12814_v46  ;;  %v1505_v39 = vld [vmem:[#allocation7 + $0xb60] sm:$0xff] }
  0xcf   :  { %877 = vmatpush1.bf16.msra.mxu0 %v17425_v10  ;;  %930 = vmatpush1.bf16.msra.mxu1 %v17426_v11  ;;  %17449 = vst [vmem:[#allocation38_spill] sm:$0xff] %v12818_v50  ;;  %v1397_v11 = vld [vmem:[#allocation7 + $0x800] sm:$0xff]  ;;  %17471 = vst [vmem:[#allocation60_spill] sm:$0xff] %v12882_v34 }
  0xd0   :  { %878 = vmatprep.subr.bf16.mxu0 %v17427_v15  ;;  %931 = vmatprep.subr.bf16.mxu1 %v17428_v19  ;;  %v1401_v15 = vld [vmem:[#allocation7 + $0x820] sm:$0xff] }
  0xd1   :  { %904 = vmatprep.mubr.bf16.mxu0 %v17422_v40  ;;  %957 = vmatprep.mubr.bf16.mxu1 %v17422_v40  ;;  %v1525_v19 = vld [vmem:[#allocation7 + $0xc00] sm:$0xff] }
  0xd3   :  { %879 = vmatpush1.bf16.msra.mxu0 %v17429_v20  ;;  %932 = vmatpush1.bf16.msra.mxu1 %v17430_v21  ;;  %v12859_v20 = vcombine.high %v1397_v11, %v1401_v15  ;;  %v1529_v21 = vld [vmem:[#allocation7 + $0xc20] sm:$0xff] }
  0xd4   :  { %880 = vmatprep.subr.bf16.mxu0 %v17431_v22  ;;  %933 = vmatprep.subr.bf16.mxu1 %v17432_v27  ;;  %v12861_v22 = vcombine.low %v1397_v11, %v1401_v15  ;;  %v12863_v27 = vcombine.low %v1525_v19, %v1529_v21 }
  0xd5   :  { %17462 = vst [vmem:[#allocation51_spill] sm:$0xff] %v12859_v20 }
  0xd6   :  { %17463 = vst [vmem:[#allocation52_spill] sm:$0xff] %v12861_v22  ;;  %17464 = vst [vmem:[#allocation53_spill] sm:$0xff] %v12863_v27 }
  0xd7   :  { %881 = vmatpush1.bf16.msra.mxu0 %v12646_v41  ;;  %934 = vmatpush1.bf16.msra.mxu1 %v12650_v48  ;;  %v1413_v41 = vld [vmem:[#allocation7 + $0x880] sm:$0xff] }
  0xd8   :  { %882 = vmatprep.subr.bf16.mxu0 %v12652_v49  ;;  %935 = vmatprep.subr.bf16.mxu1 %v17433_v28  ;;  %v1417_v48 = vld [vmem:[#allocation7 + $0x8a0] sm:$0xff]  ;;  %v12865_v28 = vcombine.high %v1525_v19, %v1529_v21 }
  0xd9   :  { %v1541_v49 = vld [vmem:[#allocation7 + $0xc80] sm:$0xff] }
  0xda   :  { %17465 = vst [vmem:[#allocation54_spill] sm:$0xff] %v12865_v28 }
  0xdb   :  { %883 = vmatpush1.bf16.msra.mxu0 %v12658_v57  ;;  %936 = vmatpush1.bf16.msra.mxu1 %v12662_v1  ;;  %v12835_v57 = vcombine.high %v1413_v41, %v1417_v48  ;;  %v12837_v1 = vcombine.low %v1413_v41, %v1417_v48  ;;  %v1497_v41 = vld [vmem:[#allocation7 + $0xb20] sm:$0xff]  ;;  %v12890_v48 = vcombine.low %v1637_v13, %v1641_v14 }
  0xdc   :  { %884 = vmatprep.subr.bf16.mxu0 %v12664_v2  ;;  %937 = vmatprep.subr.bf16.mxu1 %v12667_v0  ;;  %v1457_v0 = vld [vmem:[#allocation7 + $0x9e0] sm:$0xff]  ;;  %v12839_v2 = vcombine.low %v1541_v49, %v1545_v58 }
  0xdd   :  { %v12775_v35 = vcombine.low %v1453_v29, %v1457_v0  ;;  %v12777_v36 = vcombine.high %v1453_v29, %v1457_v0  ;;  %17454 = vst [vmem:[#allocation43_spill] sm:$0xff] %v12835_v57  ;;  %17455 = vst [vmem:[#allocation44_spill] sm:$0xff] %v12837_v1  ;;  %v1517_v29 = vld [vmem:[#allocation7 + $0xbc0] sm:$0xff] }
  0xde   :  { %17456 = vst [vmem:[#allocation45_spill] sm:$0xff] %v12839_v2  ;;  %v1521_v0 = vld [vmem:[#allocation7 + $0xbe0] sm:$0xff]  ;;  %17473 = vst [vmem:[#allocation62_spill] sm:$0xff] %v12890_v48 }
  0xdf   :  { %885 = vmatpush1.bf16.msra.mxu0 %v12670_v16  ;;  %938 = vmatpush1.bf16.msra.mxu1 %v12674_v17  ;;  %17434 = vst [vmem:[#allocation23_spill] sm:$0xff] %v12775_v35  ;;  %17435 = vst [vmem:[#allocation24_spill] sm:$0xff] %v12777_v36  ;;  %v12841_v16 = vcombine.high %v1541_v49, %v1545_v58  ;;  %v1405_v17 = vld [vmem:[#allocation7 + $0x840] sm:$0xff]  ;;  %v12871_v37 = vcombine.low %v1517_v29, %v1521_v0 }
  0xe0   :  { %886 = vmatprep.subr.bf16.mxu0 %v12676_v32  ;;  %939 = vmatprep.subr.bf16.mxu1 %v12679_v33  ;;  %v1409_v32 = vld [vmem:[#allocation7 + $0x860] sm:$0xff]  ;;  %v12873_v44 = vcombine.high %v1517_v29, %v1521_v0  ;;  %v12892_v49 = vcombine.high %v1501_v18, %v1505_v39 }
  0xe1   :  { %17457 = vst [vmem:[#allocation46_spill] sm:$0xff] %v12841_v16  ;;  %v1533_v33 = vld [vmem:[#allocation7 + $0xc40] sm:$0xff]  ;;  %17466 = vst [vmem:[#allocation55_spill] sm:$0xff] %v12871_v37 }
  0xe2   :  { %17467 = vst [vmem:[#allocation56_spill] sm:$0xff] %v12873_v44  ;;  %17474 = vst [vmem:[#allocation63_spill] sm:$0xff] %v12892_v49  ;;  %v1621_v58 = vld [vmem:[#allocation7 + $0xf00] sm:$0xff] }
  0xe3   :  { %887 = vmatpush1.bf16.msra.mxu0 %v12682_v55  ;;  %940 = vmatpush1.bf16.msra.mxu1 %v12686_v60  ;;  %v1421_v55 = vld [vmem:[#allocation7 + $0x8c0] sm:$0xff]  ;;  %v12847_v60 = vcombine.high %v1405_v17, %v1409_v32 }
  0xe4   :  { %3190 = vmatprep.subr.bf16.mxu0 %v12777_v36  ;;  %3233 = vmatprep.subr.bf16.mxu1 %v12781_v43  ;;  %v12823_v7 = vcombine.high %v1421_v55, %v1425_v56  ;;  %v12825_v24 = vcombine.low %v1421_v55, %v1425_v56  ;;  %v1629_v55 = vld [vmem:[#allocation7 + $0xf40] sm:$0xff]  ;;  %v1450_v43 = vld [vmem:[#allocation7 + $0x9a8] sm:$0xff] }
  0xe5   :  { %17458 = vst [vmem:[#allocation47_spill] sm:$0xff] %v12847_v60  ;;  %v1633_v56 = vld [vmem:[#allocation7 + $0xf60] sm:$0xff] }
  0xe6   :  { %905 = vmatmul.mubr.bf16.vlgmr.msra.gmra.mxu0 %v11958_v4  ;;  %958 = vmatmul.mubr.bf16.vlgmr.msra.gmra.mxu1 %v11958_v4  ;;  %17450 = vst [vmem:[#allocation39_spill] sm:$0xff] %v12823_v7  ;;  %17451 = vst [vmem:[#allocation40_spill] sm:$0xff] %v12825_v24  ;;  %v1537_v4 = vld [vmem:[#allocation7 + $0xc60] sm:$0xff] }
  0xe7   :  { %914 = vmatprep.mubr.bf16.mxu0 %v17422_v40  ;;  %967 = vmatprep.mubr.bf16.mxu1 %v17422_v40  ;;  %v12829_v40 = vcombine.high %v1549_v61, %v1553_v8  ;;  %v12851_v9 = vcombine.low %v1533_v33, %v1537_v4  ;;  %v12853_v10 = vcombine.high %v1533_v33, %v1537_v4  ;;  %v1493_v8 = vld [vmem:[#allocation7 + $0xb00] sm:$0xff] }
  0xe8   :  { %3191 = vmatpush1.bf16.msra.mxu0 %v12775_v35  ;;  %3234 = vmatpush1.bf16.msra.mxu1 %v12779_v38  ;;  %v12886_v61 = vcombine.low %v1509_v47, %v1513_v53  ;;  %v12898_v33 = vcombine.low %v1501_v18, %v1505_v39  ;;  %v12902_v4 = vcombine.low %v1629_v55, %v1633_v56  ;;  %v1485_v29 = vld [vmem:[#allocation7 + $0xac0] sm:$0xff]  ;;  %v1446_v35 = vld [vmem:[#allocation7 + $0x988] sm:$0xff] }
  0xe9   :  { %3192 = vmatprep.subr.bf16.mxu0 %v12789_v52  ;;  %3235 = vmatprep.subr.bf16.mxu1 %v12793_v59  ;;  %17453 = vst [vmem:[#allocation42_spill] sm:$0xff] %v12829_v40  ;;  %17460 = vst [vmem:[#allocation49_spill] sm:$0xff] %v12851_v9  ;;  %v12904_v11 = vcombine.high %v1493_v8, %v1497_v41  ;;  %v12910_v19 = vcombine.low %v1493_v8, %v1497_v41  ;;  %v1489_v0 = vld [vmem:[#allocation7 + $0xae0] sm:$0xff] }
  0xea   :  { %17461 = vst [vmem:[#allocation50_spill] sm:$0xff] %v12853_v10  ;;  %17472 = vst [vmem:[#allocation61_spill] sm:$0xff] %v12886_v61  ;;  %v12919_v45 = vcombine.high %v1485_v29, %v1489_v0  ;;  %v1617_v47 = vld [vmem:[#allocation7 + $0xee0] sm:$0xff]  ;;  %v12921_v53 = vcombine.low %v1485_v29, %v1489_v0 }
  0xeb   :  { %17476 = vst [vmem:[#allocation65_spill] sm:$0xff] %v12898_v33  ;;  %17477 = vst [vmem:[#allocation66_spill] sm:$0xff] %v12902_v4  ;;  %v12923_v13 = vcombine.low %v1613_v30, %v1617_v47  ;;  %v12925_v14 = vcombine.high %v1613_v30, %v1617_v47  ;;  %v1477_v18 = vld [vmem:[#allocation7 + $0xa80] sm:$0xff] }
  0xec   :  { %3193 = vmatpush1.bf16.msra.mxu0 %v12787_v51  ;;  %3236 = vmatpush1.bf16.msra.mxu1 %v12791_v54  ;;  %17478 = vst [vmem:[#allocation67_spill] sm:$0xff] %v12904_v11  ;;  %17480 = vst [vmem:[#allocation69_spill] sm:$0xff] %v12910_v19  ;;  %v1481_v39 = vld [vmem:[#allocation7 + $0xaa0] sm:$0xff] }
  0xed   :  { %3194 = vmatprep.subr.bf16.mxu0 %v12801_v12  ;;  %3237 = vmatprep.subr.bf16.mxu1 %v12805_v26  ;;  %17482 = vst [vmem:[#allocation71_spill] sm:$0xff] %v12919_v45  ;;  %17483 = vst [vmem:[#allocation72_spill] sm:$0xff] %v12921_v53  ;;  %v12931_v8 = vcombine.low %v1477_v18, %v1481_v39  ;;  %v12933_v41 = vcombine.high %v1477_v18, %v1481_v39  ;;  %v1469_v29 = vld [vmem:[#allocation7 + $0xa40] sm:$0xff]  ;;  %v1026_v12 = vld [vmem:[#allocation5] sm:$0xf] }
  0xee   :  { %915 = vmatmul.mubr.bf16.gmra.mxu0 %v11959_v6  ;;  %968 = vmatmul.mubr.bf16.gmra.mxu1 %v11959_v6  ;;  %v12849_v6 = vcombine.low %v1405_v17, %v1409_v32  ;;  %v1625_v17 = vld [vmem:[#allocation7 + $0xf20] sm:$0xff]  ;;  %v12895_v32 = vcombine.high %v1629_v55, %v1633_v56  ;;  %17484 = vst [vmem:[#allocation73_spill] sm:$0xff] %v12923_v13  ;;  %17485 = vst [vmem:[#allocation74_spill] sm:$0xff] %v12925_v14 }
  0xef   :  { %v12907_v15 = vcombine.high %v1621_v58, %v1625_v17  ;;  %v12914_v21 = vcombine.low %v1621_v58, %v1625_v17  ;;  %v1605_v55 = vld [vmem:[#allocation7 + $0xe80] sm:$0xff]  ;;  %17486 = vst [vmem:[#allocation75_spill] sm:$0xff] %v12931_v8  ;;  %17487 = vst [vmem:[#allocation76_spill] sm:$0xff] %v12933_v41 }
  0xf0   :  { %3195 = vmatpush1.bf16.msra.mxu0 %v12799_v5  ;;  %3238 = vmatpush1.bf16.msra.mxu1 %v12803_v23  ;;  %17459 = vst [vmem:[#allocation48_spill] sm:$0xff] %v12849_v6  ;;  %17475 = vst [vmem:[#allocation64_spill] sm:$0xff] %v12895_v32  ;;  %v1609_v56 = vld [vmem:[#allocation7 + $0xea0] sm:$0xff]  ;;  %v1028_v23 = vlaneseq }
  0xf1   :  { %3196 = vmatprep.subr.bf16.mxu0 %v12807_v31  ;;  %3239 = vmatprep.subr.bf16.mxu1 %v12810_v42  ;;  %17479 = vst [vmem:[#allocation68_spill] sm:$0xff] %v12907_v15  ;;  %17481 = vst [vmem:[#allocation70_spill] sm:$0xff] %v12914_v21  ;;  %v12935_v58 = vcombine.low %v1605_v55, %v1609_v56  ;;  %v12937_v17 = vcombine.high %v1605_v55, %v1609_v56  ;;  %v1473_v0 = vld [vmem:[#allocation7 + $0xa60] sm:$0xff] }
  0xf2   :  { %v1597_v30 = vld [vmem:[#allocation7 + $0xe40] sm:$0xff]  ;;  %v12943_v47 = vcombine.high %v1469_v29, %v1473_v0  ;;  %v12945_v18 = vcombine.low %v1469_v29, %v1473_v0  ;;  %v13069_v5 = vshrl.u32 %v1028_v23, 7 }
  0xf3   :  { %17488 = vst [vmem:[#allocation77_spill] sm:$0xff] %v12935_v58  ;;  %17489 = vst [vmem:[#allocation78_spill] sm:$0xff] %v12937_v17  ;;  %v1461_v56 = vld [vmem:[#allocation7 + $0xa00] sm:$0xff] }
  0xf4   :  { %3197 = vmatpush1.bf16.msra.mxu0 %v12814_v46  ;;  %3240 = vmatpush1.bf16.msra.mxu1 %v12818_v50  ;;  %17490 = vst [vmem:[#allocation79_spill] sm:$0xff] %v12943_v47  ;;  %17491 = vst [vmem:[#allocation80_spill] sm:$0xff] %v12945_v18  ;;  %v17505_v54 = vsub.s32 2, %v13069_v5 }
  0xf5   :  { %3198 = vmatprep.subr.bf16.mxu0 %v12823_v7  ;;  %3241 = vmatprep.subr.bf16.mxu1 %v12829_v40  ;;  %17504 = vst [vmem:[#allocation93_spill] sm:$0xff] %v13069_v5  ;;  %v16729_v7 = vsub.s32 0, %v13069_v5 }
  0xf7   :  { %v13082_v23 = vrot.slane %v1026_v12, %v16729_v7 }
  0xf8   :  { %3199 = vmatpush1.bf16.msra.mxu0 %v12825_v24  ;;  %3242 = vmatpush1.bf16.msra.mxu1 %v12827_v25 }
  0xf9   :  { %3200 = vmatprep.subr.bf16.mxu0 %v12835_v57  ;;  %3243 = vmatprep.subr.bf16.mxu1 %v12841_v16 }
  0xfc   :  { %3201 = vmatpush1.bf16.msra.mxu0 %v12837_v1  ;;  %3244 = vmatpush1.bf16.msra.mxu1 %v12839_v2 }
  0xfd   :  { %3202 = vmatprep.subr.bf16.mxu0 %v12847_v60  ;;  %3245 = vmatprep.subr.bf16.mxu1 %v12853_v10 }
 0x100   :  { %3203 = vmatpush1.bf16.msra.mxu0 %v12849_v6  ;;  %3246 = vmatpush1.bf16.msra.mxu1 %v12851_v9 }
 0x101   :  { %3204 = vmatprep.subr.bf16.mxu0 %v12859_v20  ;;  %3247 = vmatprep.subr.bf16.mxu1 %v12865_v28 }
 0x104   :  { %3205 = vmatpush1.bf16.msra.mxu0 %v12861_v22  ;;  %3248 = vmatpush1.bf16.msra.mxu1 %v12863_v27 }
 0x105   :  { %3206 = vmatprep.subr.bf16.mxu0 %v12873_v44  ;;  %3249 = vmatprep.subr.bf16.mxu1 %v12877_v63 }
 0x108   :  { %3207 = vmatpush2.bf16.msra.mxu0 %v12871_v37  ;;  %3250 = vmatpush2.bf16.msra.mxu1 %v12875_v62 }
 0x109   :  { %3208 = vmatprep.subr.bf16.mxu0 %v12879_v3  ;;  %3251 = vmatprep.subr.bf16.mxu1 %v12882_v34 }
 0x10c   :  { %3209 = vmatpush2.bf16.msra.mxu0 %v12886_v61  ;;  %3252 = vmatpush2.bf16.msra.mxu1 %v12890_v48 }
 0x10d   :  { %3210 = vmatprep.subr.bf16.mxu0 %v12892_v49  ;;  %3253 = vmatprep.subr.bf16.mxu1 %v12895_v32 }
 0x110   :  { %3211 = vmatpush2.bf16.msra.mxu0 %v12898_v33  ;;  %3254 = vmatpush2.bf16.msra.mxu1 %v12902_v4 }
 0x111   :  { %3212 = vmatprep.subr.bf16.mxu0 %v12904_v11  ;;  %3255 = vmatprep.subr.bf16.mxu1 %v12907_v15 }
 0x114   :  { %3213 = vmatpush2.bf16.msra.mxu0 %v12910_v19  ;;  %3256 = vmatpush2.bf16.msra.mxu1 %v12914_v21 }
 0x115   :  { %3214 = vmatprep.subr.bf16.mxu0 %v12919_v45  ;;  %3257 = vmatprep.subr.bf16.mxu1 %v12925_v14 }
 0x118   :  { %3215 = vmatpush2.bf16.msra.mxu0 %v12921_v53  ;;  %3258 = vmatpush2.bf16.msra.mxu1 %v12923_v13  ;;  %v1601_v13 = vld [vmem:[#allocation7 + $0xe60] sm:$0xff] }
 0x119   :  { %3216 = vmatprep.subr.bf16.mxu0 %v12933_v41  ;;  %3259 = vmatprep.subr.bf16.mxu1 %v12937_v17  ;;  %v12947_v39 = vcombine.low %v1597_v30, %v1601_v13  ;;  %v12949_v55 = vcombine.high %v1597_v30, %v1601_v13  ;;  %v1593_v41 = vld [vmem:[#allocation7 + $0xe20] sm:$0xff]  ;;  %v1454_v30 = vld [vmem:[#allocation7 + $0x9c8] sm:$0xff] }
 0x11b   :  { %17492 = vst [vmem:[#allocation81_spill] sm:$0xff] %v12947_v39  ;;  %17493 = vst [vmem:[#allocation82_spill] sm:$0xff] %v12949_v55 }
 0x11c   :  { %3217 = vmatpush2.bf16.msra.mxu0 %v12931_v8  ;;  %3260 = vmatpush2.bf16.msra.mxu1 %v12935_v58  ;;  %v1465_v8 = vld [vmem:[#allocation7 + $0xa20] sm:$0xff] }
 0x11d   :  { %3218 = vmatprep.subr.bf16.mxu0 %v12943_v47  ;;  %3261 = vmatprep.subr.bf16.mxu1 %v12949_v55  ;;  %v1589_v58 = vld [vmem:[#allocation7 + $0xe00] sm:$0xff]  ;;  %v12955_v17 = vcombine.high %v1461_v56, %v1465_v8  ;;  %v12957_v29 = vcombine.low %v1461_v56, %v1465_v8  ;;  %v1586_v47 = vld [vmem:[#allocation7 + $0xde8] sm:$0xff] }
 0x11e   :  { %v12959_v0 = vcombine.low %v1589_v58, %v1593_v41  ;;  %v12961_v13 = vcombine.high %v1589_v58, %v1593_v41 }
 0x11f   :  { %17494 = vst [vmem:[#allocation83_spill] sm:$0xff] %v12955_v17  ;;  %17495 = vst [vmem:[#allocation84_spill] sm:$0xff] %v12957_v29 }
 0x120   :  { %3219 = vmatpush2.bf16.msra.mxu0 %v12945_v18  ;;  %3262 = vmatpush2.bf16.msra.mxu1 %v12947_v39  ;;  %17496 = vst [vmem:[#allocation85_spill] sm:$0xff] %v12959_v0  ;;  %17497 = vst [vmem:[#allocation86_spill] sm:$0xff] %v12961_v13  ;;  %v1458_v39 = vld [vmem:[#allocation7 + $0x9e8] sm:$0xff] }
 0x121   :  { %3220 = vmatprep.subr.bf16.mxu0 %v12955_v17  ;;  %3263 = vmatprep.subr.bf16.mxu1 %v12961_v13  ;;  %v1582_v18 = vld [vmem:[#allocation7 + $0xdc8] sm:$0xff]  ;;  %v12967_v55 = vcombine.high %v1454_v30, %v1458_v39  ;;  %v12969_v8 = vcombine.low %v1454_v30, %v1458_v39 }
 0x122   :  { %v12971_v56 = vcombine.low %v1582_v18, %v1586_v47  ;;  %v12973_v41 = vcombine.high %v1582_v18, %v1586_v47 }
 0x123   :  { %17498 = vst [vmem:[#allocation87_spill] sm:$0xff] %v12967_v55  ;;  %17499 = vst [vmem:[#allocation88_spill] sm:$0xff] %v12969_v8  ;;  %v17506_v8 = vsub.s32 1, %v13069_v5 }
 0x124   :  { %3221 = vmatpush2.bf16.msra.mxu0 %v12957_v29  ;;  %3264 = vmatpush2.bf16.msra.mxu1 %v12959_v0  ;;  %17500 = vst [vmem:[#allocation89_spill] sm:$0xff] %v12971_v56  ;;  %17501 = vst [vmem:[#allocation90_spill] sm:$0xff] %v12973_v41  ;;  %v13088_v56 = vrot.slane %v1026_v12, %v17505_v54 }
 0x125   :  { %3276 = vmatprep.subr.bf16.mxu0 %v12967_v55  ;;  %3319 = vmatprep.subr.bf16.mxu1 %v12973_v41 }
 0x146   :  { %v12977_v58 = vpop.f32.mrf.mxu0  ;;  %v12979_v29 = vpop.f32.mrf.mxu1 }
 0x148   :  { %v12981_v13 = vpop.f32.mrf.mxu0  ;;  %v12983_v0 = vpop.f32.mrf.mxu1 }
 0x14a   :  { %v12985_v17 = vpop.f32.mrf.mxu0  ;;  %v12987_v39 = vpop.f32.mrf.mxu1 }
 0x14c   :  { %v12989_v30 = vpop.f32.mrf.mxu0  ;;  %v12991_v47 = vpop.f32.mrf.mxu1 }
 0x14e   :  { %v12993_v18 = vpop.f32.mrf.mxu0  ;;  %v12995_v55 = vpop.f32.mrf.mxu1 }
 0x150   :  { %v12997_v41 = vpop.f32.mrf.mxu0  ;;  %v12999_v53 = vpop.f32.mrf.mxu1 }
 0x152   :  { %v13001_v14 = vpop.f32.mrf.mxu0  ;;  %v13003_v45 = vpop.f32.mrf.mxu1 }
 0x153   :  { %17502 = vst [vmem:[#allocation91_spill] sm:$0xff] %v13003_v45  ;;  %v13102_v45 = vcombine.high %v1446_v35, %v1450_v43 }
 0x154   :  { %v13005_v21 = vpop.f32.mrf.mxu0  ;;  %v13007_v19 = vpop.f32.mrf.mxu1 }
 0x166   :  { %v678_v15 = vpop.f32.mrf.mxu0  ;;  %v13009_v11 = vpop.f32.mrf.mxu1 }
 0x168   :  { %v13011_v4 = vpop.f32.mrf.mxu0  ;;  %v13013_v33 = vpop.f32.mrf.mxu1 }
 0x16a   :  { %v13015_v32 = vpop.f32.mrf.mxu0  ;;  %v13017_v49 = vpop.f32.mrf.mxu1 }
 0x16c   :  { %v13019_v48 = vpop.f32.mrf.mxu0  ;;  %v13021_v61 = vpop.f32.mrf.mxu1 }
 0x16e   :  { %v13023_v34 = vpop.f32.mrf.mxu0  ;;  %v13025_v3 = vpop.f32.mrf.mxu1 }
 0x170   :  { %v13027_v62 = vpop.f32.mrf.mxu0  ;;  %v13029_v37 = vpop.f32.mrf.mxu1 }
 0x172   :  { %v13031_v63 = vpop.f32.mrf.mxu0  ;;  %v13033_v44 = vpop.f32.mrf.mxu1 }
 0x174   :  { %v13035_v27 = vpop.f32.mrf.mxu0  ;;  %v13037_v22 = vpop.f32.mrf.mxu1 }
 0x186   :  { %v800_v28 = vpop.f32.mrf.mxu0  ;;  %v853_v20 = vpop.f32.mrf.mxu1 }
 0x187   :  { %v978_v52 = vmax.f32 %v12977_v58, %v800_v28  ;;  %v980_v36 = vmax.f32 %v12979_v29, %v853_v20  ;;  %v13092_v28 = vrot.slane %v1026_v12, %v17506_v8 }
 0x188   :  { %v802_v9 = vpop.f32.mrf.mxu0  ;;  %v855_v6 = vpop.f32.mrf.mxu1 }
 0x18a   :  { %v804_v10 = vpop.f32.mrf.mxu0  ;;  %v13039_v60 = vpop.f32.mrf.mxu1 }
 0x18b   :  { %v986_v8 = vmax.f32 %v12985_v17, %v804_v10 }
 0x18c   :  { %v13041_v2 = vpop.f32.mrf.mxu0  ;;  %v13043_v1 = vpop.f32.mrf.mxu1 }
 0x18e   :  { %v13045_v16 = vpop.f32.mrf.mxu0  ;;  %v13049_v25 = vpop.f32.mrf.mxu1 }
 0x190   :  { %v13053_v40 = vpop.f32.mrf.mxu0  ;;  %v13057_v50 = vpop.f32.mrf.mxu1 }
 0x192   :  { %v13061_v42 = vpop.f32.mrf.mxu0  ;;  %v13065_v31 = vpop.f32.mrf.mxu1 }
 0x193   :  { %17503 = vst [vmem:[#allocation92_spill] sm:$0xff] %v13065_v31  ;;  %v17507_v31 = vsub.s32 3, %v13069_v5  ;;  %v1618_v5 = vld [vmem:[#allocation7 + $0xee8] sm:$0xff] }
 0x194   :  { %v13072_v26 = vpop.f32.mrf.mxu0  ;;  %v13076_v51 = vpop.f32.mrf.mxu1 }
 0x195   :  { %v13098_v20 = vrot.slane %v1026_v12, %v17507_v31  ;;  %v988_v12 = vmax.f32 %v12987_v39, %v13039_v60 }
 0x1a6   :  { %v906_v59 = vpop.f32.mrf.mxu0  ;;  %v959_v38 = vpop.f32.mrf.mxu1 }
 0x1a7   :  { %v982_v24 = vmax.f32 %v678_v15, %v906_v59  ;;  %v984_v46 = vmax.f32 %v13009_v11, %v959_v38  ;;  %v979_v59 = vmax.f32 %v12981_v13, %v802_v9  ;;  %v981_v38 = vmax.f32 %v12983_v0, %v855_v6 }
 0x1a8   :  { %v908_v57 = vpop.f32.mrf.mxu0  ;;  %v961_v7 = vpop.f32.mrf.mxu1 }
 0x1a9   :  { %v1010_v15 = vmax.f32 %v978_v52, %v982_v24  ;;  %v983_v58 = vmax.f32 %v13011_v4, %v908_v57  ;;  %v1012_v11 = vmax.f32 %v980_v36, %v984_v46  ;;  %v985_v54 = vmax.f32 %v13013_v33, %v961_v7 }
 0x1aa   :  { %v910_v29 = vpop.f32.mrf.mxu0  ;;  %v963_v57 = vpop.f32.mrf.mxu1  ;;  %v13110_v46 = vcombine.low %v1446_v35, %v1450_v43  ;;  %v987_v7 = vmax.f32 %v12989_v30, %v13041_v2 }
 0x1ab   :  { %v1048_v9 = vadd.f32 %v13082_v23, %v1010_v15  ;;  %v1011_v52 = vmax.f32 %v979_v59, %v983_v58  ;;  %v990_v24 = vmax.f32 %v13015_v32, %v910_v29  ;;  %v1013_v31 = vmax.f32 %v981_v38, %v985_v54 }
 0x1ac   :  { %v992_v6 = vmax.f32 %v13017_v49, %v963_v57  ;;  %v912_v36 = vpop.f32.mrf.mxu0  ;;  %v965_v17 = vpop.f32.mrf.mxu1  ;;  %v989_v32 = vmax.f32 %v12991_v47, %v13043_v1  ;;  %v1050_v60 = vadd.f32 %v13088_v56, %v1012_v11 }
 0x1ad   :  { %v1049_v10 = vadd.f32 %v13092_v28, %v1011_v52  ;;  %v1014_v33 = vmax.f32 %v986_v8, %v990_v24  ;;  %v991_v4 = vmax.f32 %v13019_v48, %v912_v36  ;;  %v993_v49 = vmax.f32 %v13021_v61, %v965_v17  ;;  %v1578_v36 = vld [vmem:[#allocation7 + $0xda8] sm:$0xff] }
 0x1ae   :  { %v1016_v0 = vmax.f32 %v988_v12, %v992_v6  ;;  %v916_v13 = vpop.f32.mrf.mxu0  ;;  %v1064_v35 = vmax.f32 %v1048_v9, 0.0  ;;  %v969_v30 = vpop.f32.mrf.mxu1  ;;  %v1051_v59 = vadd.f32 %v13098_v20, %v1013_v31  ;;  %v17508_v61 = vmax.f32 %v12993_v18, %v13045_v16  ;;  %v1574_v6 = vld [vmem:[#allocation7 + $0xd88] sm:$0xff] }
 0x1af   :  { %v1052_v43 = vadd.f32 %v13082_v23, %v1014_v33  ;;  %v1015_v39 = vmax.f32 %v987_v7, %v991_v4  ;;  %v998_v2 = vmax.f32 %v13023_v34, %v916_v13  ;;  %v1017_v15 = vmax.f32 %v989_v32, %v993_v49 }
 0x1b0   :  { %v1054_v48 = vadd.f32 %v13088_v56, %v1016_v0  ;;  %v1000_v1 = vmax.f32 %v13025_v3, %v969_v30  ;;  %v918_v47 = vpop.f32.mrf.mxu0  ;;  %v1065_v58 = vmax.f32 %v1049_v10, 0.0  ;;  %v971_v29 = vpop.f32.mrf.mxu1  ;;  %v17509_v9 = vmax.f32 %v12995_v55, %v13049_v25 }
 0x1b1   :  { %v1053_v38 = vadd.f32 %v13092_v28, %v1015_v39  ;;  %v1018_v11 = vmax.f32 %v17508_v61, %v998_v2  ;;  %v999_v54 = vmax.f32 %v13027_v62, %v918_v47  ;;  %v1068_v34 = vmax.f32 %v1052_v43, 0.0  ;;  %v1442_v2 = vld [vmem:[#allocation7 + $0x968] sm:$0xff]  ;;  %v17517_v47 = vld [vmem:[#allocation88_spill] sm:$0xff] }
 0x1b2   :  { %v1055_v8 = vadd.f32 %v13098_v20, %v1017_v15  ;;  %v1020_v52 = vmax.f32 %v17509_v9, %v1000_v1  ;;  %v1001_v3 = vmax.f32 %v13029_v37, %v971_v29  ;;  %v920_v24 = vpop.f32.mrf.mxu0  ;;  %v1070_v57 = vmax.f32 %v1054_v48, 0.0  ;;  %v973_v62 = vpop.f32.mrf.mxu1 }
 0x1b3   :  { %v1069_v12 = vmax.f32 %v1053_v38, 0.0  ;;  %v1056_v31 = vadd.f32 %v13082_v23, %v1018_v11  ;;  %v17510_v16 = vmax.f32 %v12997_v41, %v13053_v40  ;;  %v1067_v7 = vmax.f32 %v1051_v59, 0.0  ;;  %v1430_v38 = vld [vmem:[#allocation7 + $0x908] sm:$0xff] }
 0x1b4   :  { %v1071_v10 = vmax.f32 %v1055_v8, 0.0  ;;  %v13140_v33 = vadd.f32 %v13088_v56, %v1020_v52  ;;  %v17511_v25 = vmax.f32 %v12999_v53, %v13057_v50  ;;  %v1066_v55 = vmax.f32 %v1050_v60, 0.0  ;;  %v922_v41 = vpop.f32.mrf.mxu0  ;;  %v975_v32 = vpop.f32.mrf.mxu1 }
 0x1b5   :  { %v1019_v18 = vmax.f32 %v17510_v16, %v999_v54  ;;  %v13145_v4 = vpack.c.bf16 %v1069_v12, %v1065_v58  ;;  %v1006_v40 = vmax.f32 %v13031_v63, %v920_v24  ;;  %v13151_v0 = vpack.c.bf16 %v1068_v34, %v1064_v35  ;;  %v1438_v35 = vld [vmem:[#allocation7 + $0x948] sm:$0xff] }
 0x1b6   :  { %v1021_v37 = vmax.f32 %v17511_v25, %v1001_v3  ;;  %v13153_v49 = vpack.c.bf16 %v1071_v10, %v1067_v7  ;;  %v13156_v43 = vcombine.high %v1574_v6, %v1578_v36  ;;  %v1003_v50 = vmax.f32 %v13005_v21, %v13072_v26  ;;  %v1566_v26 = vld [vmem:[#allocation7 + $0xd48] sm:$0xff] }
 0x1b7   :  { %v13148_v17 = vadd.f32 %v13092_v28, %v1019_v18  ;;  %v13160_v53 = vpack.c.bf16 %v1070_v57, %v1066_v55  ;;  %v17513_v60 = vmax.f32 %v13001_v14, %v13061_v42  ;;  %v1008_v63 = vmax.f32 %v13033_v44, %v973_v62  ;;  %3222 = vmatprep.mubr.bf16.mxu0 %v13145_v4  ;;  %v1570_v42 = vld [vmem:[#allocation7 + $0xd68] sm:$0xff]  ;;  %v17515_v14 = vld [vmem:[#allocation92_spill] sm:$0xff] }
 0x1b8   :  { %17512 = vst [vmem:[#allocation94_spill] sm:$0xff] %v13153_v49  ;;  %v1059_v13 = vadd.f32 %v13098_v20, %v1021_v37  ;;  %v1005_v30 = vmax.f32 %v13007_v19, %v13076_v51  ;;  %v1007_v59 = vmax.f32 %v13035_v27, %v922_v41  ;;  %v1009_v48 = vmax.f32 %v13037_v22, %v975_v32  ;;  %v17514_v44 = vld [vmem:[#allocation91_spill] sm:$0xff]  ;;  %v17518_v19 = vld [vmem:[#allocation89_spill] sm:$0xff] }
 0x1b9   :  { %v1022_v39 = vmax.f32 %v17513_v60, %v1006_v40  ;;  %3265 = vmatprep.mubr.bf16.mxu1 %v13153_v49  ;;  %3223 = vmatmul.mubr.bf16.vlgmr.msra.gmra.mxu0 %v13151_v0  ;;  %v17516_v15 = vmax.f32 %v17514_v44, %v17515_v14  ;;  %v13179_v51 = vcombine.low %v1574_v6, %v1578_v36  ;;  %v1072_v61 = vmax.f32 %v1056_v31, 0.0  ;;  %v1558_v3 = vld [vmem:[#allocation7 + $0xd08] sm:$0xff] }
 0x1ba   :  { %3266 = vmatmul.mubr.bf16.vlgmr.msra.gmra.mxu1 %v13160_v53  ;;  %3277 = vmatpush1.bf16.msra.mxu0 %v17517_v47  ;;  %v1023_v27 = vmax.f32 %v1003_v50, %v1007_v59  ;;  %v1025_v22 = vmax.f32 %v1005_v30, %v1009_v48  ;;  %v13183_v58 = vcombine.high %v1438_v35, %v1442_v2  ;;  %v1562_v24 = vld [vmem:[#allocation7 + $0xd28] sm:$0xff] }
 0x1bb   :  { %v1060_v21 = vadd.f32 %v13082_v23, %v1022_v39  ;;  %v1024_v1 = vmax.f32 %v17516_v15, %v1008_v63  ;;  %3320 = vmatpush1.bf16.msra.mxu1 %v17518_v19  ;;  %3308 = vmatprep.mubr.bf16.mxu0 %v13145_v4  ;;  %v1434_v23 = vld [vmem:[#allocation7 + $0x928] sm:$0xff]  ;;  %v13188_v29 = vcombine.high %v1566_v26, %v1570_v42 }
 0x1bc   :  { %3351 = vmatprep.mubr.bf16.mxu1 %v13153_v49  ;;  %3278 = vmatprep.subr.bf16.mxu0 %v13102_v45  ;;  %v1061_v34 = vadd.f32 %v13092_v28, %v1023_v27  ;;  %v1063_v8 = vadd.f32 %v13098_v20, %v1025_v22  ;;  %v13193_v9 = vcombine.low %v1438_v35, %v1442_v2  ;;  %v1073_v28 = vmax.f32 %v13148_v17, 0.0  ;;  %v1422_v36 = vld [vmem:[#allocation7 + $0x8c8] sm:$0xff] }
 0x1bd   :  { %v1076_v11 = vmax.f32 %v1060_v21, 0.0  ;;  %v1062_v54 = vadd.f32 %v13088_v56, %v1024_v1  ;;  %3321 = vmatprep.subr.bf16.mxu1 %v13156_v43  ;;  %v13195_v52 = vcombine.low %v1566_v26, %v1570_v42  ;;  %v1074_v56 = vmax.f32 %v13140_v33, 0.0  ;;  %v1426_v7 = vld [vmem:[#allocation7 + $0x8e8] sm:$0xff] }
 0x1be   :  { %3279 = vmatpush1.bf16.msra.mxu0 %v13110_v46  ;;  %v13201_v31 = vcombine.high %v1430_v38, %v1434_v23  ;;  %v1075_v20 = vmax.f32 %v1059_v13, 0.0  ;;  %v1077_v16 = vmax.f32 %v1061_v34, 0.0  ;;  %v1079_v18 = vmax.f32 %v1063_v8, 0.0  ;;  %v1550_v25 = vld [vmem:[#allocation7 + $0xcc8] sm:$0xff] }
 0x1bf   :  { %v13198_v57 = vpack.c.bf16 %v1076_v11, %v1072_v61  ;;  %v1078_v12 = vmax.f32 %v1062_v54, 0.0  ;;  %3322 = vmatpush1.bf16.msra.mxu1 %v13179_v51  ;;  %3280 = vmatprep.subr.bf16.mxu0 %v13183_v58  ;;  %v13209_v6 = vcombine.high %v1558_v3, %v1562_v24  ;;  %v1554_v37 = vld [vmem:[#allocation7 + $0xce8] sm:$0xff]  ;;  %v13216_v55 = vcombine.low %v1430_v38, %v1434_v23 }
 0x1c0   :  { %3323 = vmatprep.subr.bf16.mxu1 %v13188_v29  ;;  %v13211_v10 = vpack.c.bf16 %v1077_v16, %v1073_v28  ;;  %v13213_v33 = vpack.c.bf16 %v1079_v18, %v1075_v20  ;;  %v13220_v17 = vcombine.low %v1558_v3, %v1562_v24  ;;  %v13222_v40 = vcombine.high %v1422_v36, %v1426_v7  ;;  %v1414_v32 = vld [vmem:[#allocation7 + $0x888] sm:$0xff] }
 0x1c1   :  { %v13206_v62 = vpack.c.bf16 %v1078_v12, %v1074_v56  ;;  %v13225_v41 = vcombine.high %v1550_v25, %v1554_v37  ;;  %v1418_v13 = vld [vmem:[#allocation7 + $0x8a8] sm:$0xff]  ;;  %v13228_v39 = vcombine.low %v1422_v36, %v1426_v7  ;;  %v13232_v63 = vcombine.low %v1550_v25, %v1554_v37 }
 0x1c2   :  { %3281 = vmatpush1.bf16.msra.mxu0 %v13193_v9  ;;  %17519 = vst [vmem:[#allocation91_spill] sm:$0xff] %v13222_v40  ;;  %v1542_v50 = vld [vmem:[#allocation7 + $0xc88] sm:$0xff]  ;;  %v13234_v35 = vcombine.high %v1414_v32, %v1418_v13  ;;  %v13240_v42 = vcombine.low %v1414_v32, %v1418_v13 }
 0x1c3   :  { %3324 = vmatpush1.bf16.msra.mxu1 %v13195_v52  ;;  %3282 = vmatprep.subr.bf16.mxu0 %v13201_v31  ;;  %17520 = vst [vmem:[#allocation92_spill] sm:$0xff] %v13225_v41  ;;  %v1546_v60 = vld [vmem:[#allocation7 + $0xca8] sm:$0xff]  ;;  %17521 = vst [vmem:[#allocation88_spill] sm:$0xff] %v13228_v39 }
 0x1c4   :  { %3325 = vmatprep.subr.bf16.mxu1 %v13209_v6  ;;  %17522 = vst [vmem:[#allocation89_spill] sm:$0xff] %v13232_v63  ;;  %17523 = vst [vmem:[#allocation95_spill] sm:$0xff] %v13234_v35  ;;  %v13237_v2 = vcombine.high %v1542_v50, %v1546_v60  ;;  %v1406_v30 = vld [vmem:[#allocation7 + $0x848] sm:$0xff]  ;;  %v13244_v21 = vcombine.low %v1542_v50, %v1546_v60 }
 0x1c5   :  { %v1410_v59 = vld [vmem:[#allocation7 + $0x868] sm:$0xff]  ;;  %17525 = vst [vmem:[#allocation97_spill] sm:$0xff] %v13240_v42 }
 0x1c6   :  { %3283 = vmatpush1.bf16.msra.mxu0 %v13216_v55  ;;  %17524 = vst [vmem:[#allocation96_spill] sm:$0xff] %v13237_v2  ;;  %v1534_v48 = vld [vmem:[#allocation7 + $0xc48] sm:$0xff]  ;;  %17526 = vst [vmem:[#allocation98_spill] sm:$0xff] %v13244_v21  ;;  %v13246_v44 = vcombine.high %v1406_v30, %v1410_v59  ;;  %v13252_v38 = vcombine.low %v1406_v30, %v1410_v59 }
 0x1c7   :  { %3326 = vmatpush1.bf16.msra.mxu1 %v13220_v17  ;;  %3284 = vmatprep.subr.bf16.mxu0 %v13222_v40  ;;  %v1538_v26 = vld [vmem:[#allocation7 + $0xc68] sm:$0xff]  ;;  %v1295_v40 = vld [vmem:[#allocation7 + $0x4d8] sm:$0xff] }
 0x1c8   :  { %3327 = vmatprep.subr.bf16.mxu1 %v13225_v41  ;;  %17527 = vst [vmem:[#allocation99_spill] sm:$0xff] %v13246_v44  ;;  %v13249_v14 = vcombine.high %v1534_v48, %v1538_v26  ;;  %v1398_v15 = vld [vmem:[#allocation7 + $0x808] sm:$0xff]  ;;  %17529 = vst [vmem:[#allocation101_spill] sm:$0xff] %v13252_v38  ;;  %v13256_v23 = vcombine.low %v1534_v48, %v1538_v26  ;;  %v1171_v41 = vld [vmem:[#allocation7 + $0xf8] sm:$0xff] }
 0x1c9   :  { %v1402_v1 = vld [vmem:[#allocation7 + $0x828] sm:$0xff] }
 0x1ca   :  { %3285 = vmatpush1.bf16.msra.mxu0 %v13228_v39  ;;  %17528 = vst [vmem:[#allocation100_spill] sm:$0xff] %v13249_v14  ;;  %v1526_v27 = vld [vmem:[#allocation7 + $0xc08] sm:$0xff]  ;;  %17530 = vst [vmem:[#allocation102_spill] sm:$0xff] %v13256_v23  ;;  %v13258_v61 = vcombine.high %v1398_v15, %v1402_v1  ;;  %v13264_v24 = vcombine.low %v1398_v15, %v1402_v1 }
 0x1cb   :  { %3328 = vmatpush1.bf16.msra.mxu1 %v13232_v63  ;;  %3286 = vmatprep.subr.bf16.mxu0 %v13234_v35  ;;  %v1530_v22 = vld [vmem:[#allocation7 + $0xc28] sm:$0xff]  ;;  %v1170_v35 = vld [vmem:[#allocation7 + $0xf0] sm:$0xff] }
 0x1cc   :  { %3329 = vmatprep.subr.bf16.mxu1 %v13237_v2  ;;  %17531 = vst [vmem:[#allocation103_spill] sm:$0xff] %v13258_v61  ;;  %v13261_v11 = vcombine.high %v1526_v27, %v1530_v22  ;;  %v1518_v54 = vld [vmem:[#allocation7 + $0xbc8] sm:$0xff]  ;;  %17533 = vst [vmem:[#allocation105_spill] sm:$0xff] %v13264_v24  ;;  %v13268_v56 = vcombine.low %v1526_v27, %v1530_v22  ;;  %v1294_v63 = vld [vmem:[#allocation7 + $0x4d0] sm:$0xff] }
 0x1cd   :  { %v1522_v34 = vld [vmem:[#allocation7 + $0xbe8] sm:$0xff] }
 0x1ce   :  { %3287 = vmatpush1.bf16.msra.mxu0 %v13240_v42  ;;  %17532 = vst [vmem:[#allocation104_spill] sm:$0xff] %v13261_v11  ;;  %v1646_v8 = vld [vmem:[#allocation7 + $0xfc8] sm:$0xff]  ;;  %17534 = vst [vmem:[#allocation106_spill] sm:$0xff] %v13268_v56  ;;  %v13270_v12 = vcombine.high %v1518_v54, %v1522_v34  ;;  %v13276_v7 = vcombine.low %v1518_v54, %v1522_v34 }
 0x1cf   :  { %3330 = vmatpush1.bf16.msra.mxu1 %v13244_v21  ;;  %3288 = vmatprep.subr.bf16.mxu0 %v13246_v44  ;;  %v1650_v3 = vld [vmem:[#allocation7 + $0xfe8] sm:$0xff] }
 0x1d0   :  { %3331 = vmatprep.subr.bf16.mxu1 %v13249_v14  ;;  %17535 = vst [vmem:[#allocation107_spill] sm:$0xff] %v13270_v12  ;;  %v13273_v28 = vcombine.high %v1646_v8, %v1650_v3  ;;  %v1510_v20 = vld [vmem:[#allocation7 + $0xb88] sm:$0xff]  ;;  %17537 = vst [vmem:[#allocation109_spill] sm:$0xff] %v13276_v7  ;;  %v13280_v25 = vcombine.low %v1646_v8, %v1650_v3 }
 0x1d1   :  { %v1514_v16 = vld [vmem:[#allocation7 + $0xba8] sm:$0xff] }
 0x1d2   :  { %3289 = vmatpush1.bf16.msra.mxu0 %v13252_v38  ;;  %17536 = vst [vmem:[#allocation108_spill] sm:$0xff] %v13273_v28  ;;  %v1638_v18 = vld [vmem:[#allocation7 + $0xf88] sm:$0xff]  ;;  %17538 = vst [vmem:[#allocation110_spill] sm:$0xff] %v13280_v25  ;;  %v13282_v37 = vcombine.high %v1510_v20, %v1514_v16  ;;  %v13288_v59 = vcombine.low %v1510_v20, %v1514_v16 }
 0x1d3   :  { %3332 = vmatpush1.bf16.msra.mxu1 %v13256_v23  ;;  %3290 = vmatprep.subr.bf16.mxu0 %v13258_v61  ;;  %v1642_v36 = vld [vmem:[#allocation7 + $0xfa8] sm:$0xff] }
 0x1d4   :  { %3333 = vmatprep.subr.bf16.mxu1 %v13261_v11  ;;  %17539 = vst [vmem:[#allocation111_spill] sm:$0xff] %v13282_v37  ;;  %v13285_v32 = vcombine.high %v1638_v18, %v1642_v36  ;;  %v1502_v13 = vld [vmem:[#allocation7 + $0xb48] sm:$0xff]  ;;  %17541 = vst [vmem:[#allocation113_spill] sm:$0xff] %v13288_v59  ;;  %v13292_v48 = vcombine.low %v1638_v18, %v1642_v36 }
 0x1d5   :  { %v1506_v50 = vld [vmem:[#allocation7 + $0xb68] sm:$0xff] }
 0x1d6   :  { %3291 = vmatpush1.bf16.msra.mxu0 %v13264_v24  ;;  %17540 = vst [vmem:[#allocation112_spill] sm:$0xff] %v13285_v32  ;;  %v1630_v60 = vld [vmem:[#allocation7 + $0xf48] sm:$0xff]  ;;  %17542 = vst [vmem:[#allocation114_spill] sm:$0xff] %v13292_v48  ;;  %v13294_v26 = vcombine.high %v1502_v13, %v1506_v50  ;;  %v13300_v34 = vcombine.low %v1502_v13, %v1506_v50 }
 0x1d7   :  { %3334 = vmatpush1.bf16.msra.mxu1 %v13268_v56  ;;  %3292 = vmatprep.subr.bf16.mxu0 %v13270_v12  ;;  %v1634_v30 = vld [vmem:[#allocation7 + $0xf68] sm:$0xff]  ;;  %v1168_v12 = vld [vmem:[#allocation7 + $0xe0] sm:$0xff] }
 0x1d8   :  { %3335 = vmatprep.subr.bf16.mxu1 %v13273_v28  ;;  %17543 = vst [vmem:[#allocation115_spill] sm:$0xff] %v13294_v26  ;;  %v13297_v15 = vcombine.high %v1630_v60, %v1634_v30  ;;  %v1494_v1 = vld [vmem:[#allocation7 + $0xb08] sm:$0xff]  ;;  %17545 = vst [vmem:[#allocation117_spill] sm:$0xff] %v13300_v34  ;;  %v13304_v8 = vcombine.low %v1630_v60, %v1634_v30  ;;  %v1292_v56 = vld [vmem:[#allocation7 + $0x4c0] sm:$0xff] }
 0x1d9   :  { %v1498_v27 = vld [vmem:[#allocation7 + $0xb28] sm:$0xff] }
 0x1da   :  { %3293 = vmatpush2.bf16.msra.mxu0 %v13276_v7  ;;  %17544 = vst [vmem:[#allocation116_spill] sm:$0xff] %v13297_v15  ;;  %v1622_v22 = vld [vmem:[#allocation7 + $0xf08] sm:$0xff]  ;;  %17546 = vst [vmem:[#allocation118_spill] sm:$0xff] %v13304_v8  ;;  %v13306_v3 = vcombine.high %v1494_v1, %v1498_v27  ;;  %v13312_v13 = vcombine.low %v1494_v1, %v1498_v27 }
 0x1db   :  { %3336 = vmatpush2.bf16.msra.mxu1 %v13280_v25  ;;  %3294 = vmatprep.subr.bf16.mxu0 %v13282_v37  ;;  %v1626_v54 = vld [vmem:[#allocation7 + $0xf28] sm:$0xff] }
 0x1dc   :  { %3337 = vmatprep.subr.bf16.mxu1 %v13285_v32  ;;  %17547 = vst [vmem:[#allocation119_spill] sm:$0xff] %v13306_v3  ;;  %v13309_v20 = vcombine.high %v1622_v22, %v1626_v54  ;;  %v1486_v16 = vld [vmem:[#allocation7 + $0xac8] sm:$0xff]  ;;  %17549 = vst [vmem:[#allocation121_spill] sm:$0xff] %v13312_v13  ;;  %v13316_v50 = vcombine.low %v1622_v22, %v1626_v54 }
 0x1dd   :  { %v1490_v18 = vld [vmem:[#allocation7 + $0xae8] sm:$0xff] }
 0x1de   :  { %3295 = vmatpush2.bf16.msra.mxu0 %v13288_v59  ;;  %17548 = vst [vmem:[#allocation120_spill] sm:$0xff] %v13309_v20  ;;  %v1614_v36 = vld [vmem:[#allocation7 + $0xec8] sm:$0xff]  ;;  %17550 = vst [vmem:[#allocation122_spill] sm:$0xff] %v13316_v50  ;;  %v13318_v60 = vcombine.high %v1486_v16, %v1490_v18  ;;  %v13324_v1 = vcombine.low %v1486_v16, %v1490_v18 }
 0x1df   :  { %3338 = vmatpush2.bf16.msra.mxu1 %v13292_v48  ;;  %3296 = vmatprep.subr.bf16.mxu0 %v13294_v26  ;;  %v13321_v30 = vcombine.high %v1614_v36, %v1618_v5  ;;  %v1482_v26 = vld [vmem:[#allocation7 + $0xaa8] sm:$0xff]  ;;  %v13328_v27 = vcombine.low %v1614_v36, %v1618_v5 }
 0x1e0   :  { %3339 = vmatprep.subr.bf16.mxu1 %v13297_v15  ;;  %17551 = vst [vmem:[#allocation123_spill] sm:$0xff] %v13318_v60  ;;  %v1478_v15 = vld [vmem:[#allocation7 + $0xa88] sm:$0xff]  ;;  %17553 = vst [vmem:[#allocation125_spill] sm:$0xff] %v13324_v1 }
 0x1e1   :  { %17552 = vst [vmem:[#allocation124_spill] sm:$0xff] %v13321_v30  ;;  %v1606_v48 = vld [vmem:[#allocation7 + $0xe88] sm:$0xff]  ;;  %17554 = vst [vmem:[#allocation126_spill] sm:$0xff] %v13328_v27  ;;  %v13330_v22 = vcombine.high %v1478_v15, %v1482_v26  ;;  %v13336_v16 = vcombine.low %v1478_v15, %v1482_v26 }
 0x1e2   :  { %3297 = vmatpush2.bf16.msra.mxu0 %v13300_v34  ;;  %v1610_v59 = vld [vmem:[#allocation7 + $0xea8] sm:$0xff] }
 0x1e3   :  { %3340 = vmatpush2.bf16.msra.mxu1 %v13304_v8  ;;  %3298 = vmatprep.subr.bf16.mxu0 %v13306_v3  ;;  %17555 = vst [vmem:[#allocation127_spill] sm:$0xff] %v13330_v22  ;;  %v13333_v54 = vcombine.high %v1606_v48, %v1610_v59  ;;  %v1474_v3 = vld [vmem:[#allocation7 + $0xa68] sm:$0xff]  ;;  %17557 = vst [vmem:[#allocation129_spill] sm:$0xff] %v13336_v16  ;;  %v13340_v5 = vcombine.low %v1606_v48, %v1610_v59 }
 0x1e4   :  { %3341 = vmatprep.subr.bf16.mxu1 %v13309_v20  ;;  %v1470_v20 = vld [vmem:[#allocation7 + $0xa48] sm:$0xff] }
 0x1e5   :  { %17556 = vst [vmem:[#allocation128_spill] sm:$0xff] %v13333_v54  ;;  %v1598_v8 = vld [vmem:[#allocation7 + $0xe48] sm:$0xff]  ;;  %17558 = vst [vmem:[#allocation130_spill] sm:$0xff] %v13340_v5  ;;  %v13342_v18 = vcombine.high %v1470_v20, %v1474_v3  ;;  %v13348_v26 = vcombine.low %v1470_v20, %v1474_v3 }
 0x1e6   :  { %3299 = vmatpush2.bf16.msra.mxu0 %v13312_v13  ;;  %v1602_v34 = vld [vmem:[#allocation7 + $0xe68] sm:$0xff] }
 0x1e7   :  { %3342 = vmatpush2.bf16.msra.mxu1 %v13316_v50  ;;  %3300 = vmatprep.subr.bf16.mxu0 %v13318_v60  ;;  %17559 = vst [vmem:[#allocation131_spill] sm:$0xff] %v13342_v18  ;;  %v13345_v36 = vcombine.high %v1598_v8, %v1602_v34  ;;  %v1466_v60 = vld [vmem:[#allocation7 + $0xa28] sm:$0xff]  ;;  %17561 = vst [vmem:[#allocation133_spill] sm:$0xff] %v13348_v26  ;;  %v13352_v59 = vcombine.low %v1598_v8, %v1602_v34 }
 0x1e8   :  { %3343 = vmatprep.subr.bf16.mxu1 %v13321_v30  ;;  %v1462_v30 = vld [vmem:[#allocation7 + $0xa08] sm:$0xff] }
 0x1e9   :  { %17560 = vst [vmem:[#allocation132_spill] sm:$0xff] %v13345_v36  ;;  %v1590_v50 = vld [vmem:[#allocation7 + $0xe08] sm:$0xff]  ;;  %17562 = vst [vmem:[#allocation134_spill] sm:$0xff] %v13352_v59  ;;  %v13354_v48 = vcombine.high %v1462_v30, %v1466_v60  ;;  %v13360_v3 = vcombine.low %v1462_v30, %v1466_v60  ;;  %v1575_v60 = vld [vmem:[#allocation7 + $0xd90] sm:$0xff] }
 0x1ea   :  { %3301 = vmatpush2.bf16.msra.mxu0 %v13324_v1  ;;  %v1594_v13 = vld [vmem:[#allocation7 + $0xe28] sm:$0xff]  ;;  %v1587_v1 = vld [vmem:[#allocation7 + $0xdf0] sm:$0xff] }
 0x1eb   :  { %3344 = vmatpush2.bf16.msra.mxu1 %v13328_v27  ;;  %3302 = vmatprep.subr.bf16.mxu0 %v13330_v22  ;;  %17563 = vst [vmem:[#allocation135_spill] sm:$0xff] %v13354_v48  ;;  %v13357_v15 = vcombine.high %v1590_v50, %v1594_v13  ;;  %v1459_v22 = vld [vmem:[#allocation7 + $0x9f0] sm:$0xff]  ;;  %17565 = vst [vmem:[#allocation137_spill] sm:$0xff] %v13360_v3  ;;  %v13364_v34 = vcombine.low %v1590_v50, %v1594_v13  ;;  %v1169_v14 = vld [vmem:[#allocation7 + $0xe8] sm:$0xff] }
 0x1ec   :  { %3345 = vmatprep.subr.bf16.mxu1 %v13333_v54  ;;  %v1455_v54 = vld [vmem:[#allocation7 + $0x9d0] sm:$0xff]  ;;  %v1293_v44 = vld [vmem:[#allocation7 + $0x4c8] sm:$0xff] }
 0x1ed   :  { %17564 = vst [vmem:[#allocation136_spill] sm:$0xff] %v13357_v15  ;;  %v1583_v27 = vld [vmem:[#allocation7 + $0xdd0] sm:$0xff]  ;;  %17566 = vst [vmem:[#allocation138_spill] sm:$0xff] %v13364_v34  ;;  %v13366_v8 = vcombine.high %v1455_v54, %v1459_v22 }
 0x1ee   :  { %3303 = vmatpush2.bf16.msra.mxu0 %v13336_v16  ;;  %v13369_v20 = vcombine.high %v1583_v27, %v1587_v1  ;;  %v1579_v30 = vld [vmem:[#allocation7 + $0xdb0] sm:$0xff]  ;;  %v13376_v13 = vcombine.low %v1583_v27, %v1587_v1 }
 0x1ef   :  { %3346 = vmatpush2.bf16.msra.mxu1 %v13340_v5  ;;  %3304 = vmatprep.subr.bf16.mxu0 %v13342_v18  ;;  %17567 = vst [vmem:[#allocation139_spill] sm:$0xff] %v13366_v8  ;;  %v1451_v18 = vld [vmem:[#allocation7 + $0x9b0] sm:$0xff]  ;;  %v13372_v5 = vcombine.low %v1455_v54, %v1459_v22  ;;  %v13390_v1 = vcombine.low %v1575_v60, %v1579_v30 }
 0x1f0   :  { %3347 = vmatprep.subr.bf16.mxu1 %v13345_v36  ;;  %17568 = vst [vmem:[#allocation140_spill] sm:$0xff] %v13369_v20  ;;  %v1447_v36 = vld [vmem:[#allocation7 + $0x990] sm:$0xff]  ;;  %17570 = vst [vmem:[#allocation142_spill] sm:$0xff] %v13376_v13 }
 0x1f1   :  { %17569 = vst [vmem:[#allocation141_spill] sm:$0xff] %v13372_v5  ;;  %v13379_v50 = vcombine.high %v1447_v36, %v1451_v18  ;;  %v1567_v22 = vld [vmem:[#allocation7 + $0xd50] sm:$0xff]  ;;  %17574 = vst [vmem:[#allocation146_spill] sm:$0xff] %v13390_v1 }
 0x1f2   :  { %3305 = vmatpush2.bf16.msra.mxu0 %v13348_v26  ;;  %v1571_v54 = vld [vmem:[#allocation7 + $0xd70] sm:$0xff] }
 0x1f3   :  { %3348 = vmatpush2.bf16.msra.mxu1 %v13352_v59  ;;  %3306 = vmatprep.subr.bf16.mxu0 %v13354_v48  ;;  %17571 = vst [vmem:[#allocation143_spill] sm:$0xff] %v13379_v50  ;;  %v1443_v48 = vld [vmem:[#allocation7 + $0x970] sm:$0xff]  ;;  %v13382_v59 = vcombine.high %v1575_v60, %v1579_v30  ;;  %v13404_v60 = vcombine.low %v1567_v22, %v1571_v54 }
 0x1f4   :  { %3349 = vmatprep.subr.bf16.mxu1 %v13357_v15  ;;  %v1439_v15 = vld [vmem:[#allocation7 + $0x950] sm:$0xff] }
 0x1f5   :  { %17572 = vst [vmem:[#allocation144_spill] sm:$0xff] %v13382_v59  ;;  %v13392_v27 = vcombine.high %v1439_v15, %v1443_v48  ;;  %17578 = vst [vmem:[#allocation150_spill] sm:$0xff] %v13404_v60  ;;  %v1551_v26 = vld [vmem:[#allocation7 + $0xcd0] sm:$0xff] }
 0x1f6   :  { %3307 = vmatpush2.bf16.msra.mxu0 %v13360_v3  ;;  %v1435_v3 = vld [vmem:[#allocation7 + $0x930] sm:$0xff] }
 0x1f7   :  { %3350 = vmatpush2.bf16.msra.mxu1 %v13364_v34  ;;  %3362 = vmatprep.subr.bf16.mxu0 %v13366_v8  ;;  %v13386_v34 = vcombine.low %v1447_v36, %v1451_v18  ;;  %17575 = vst [vmem:[#allocation147_spill] sm:$0xff] %v13392_v27  ;;  %v1431_v8 = vld [vmem:[#allocation7 + $0x910] sm:$0xff] }
 0x1f8   :  { %3405 = vmatprep.subr.bf16.mxu1 %v13369_v20  ;;  %v13396_v20 = vcombine.high %v1567_v22, %v1571_v54  ;;  %v1559_v18 = vld [vmem:[#allocation7 + $0xd10] sm:$0xff]  ;;  %v13406_v30 = vcombine.high %v1431_v8, %v1435_v3 }
 0x1f9   :  { %3309 = vmatmul.mubr.bf16.vlgmr.msra.gmra.mxu0 %v13151_v0  ;;  %17573 = vst [vmem:[#allocation145_spill] sm:$0xff] %v13386_v34  ;;  %v1563_v36 = vld [vmem:[#allocation7 + $0xd30] sm:$0xff] }
 0x1fa   :  { %3352 = vmatmul.mubr.bf16.vlgmr.msra.gmra.mxu1 %v13160_v53  ;;  %3363 = vmatpush1.bf16.msra.mxu0 %v13372_v5  ;;  %17576 = vst [vmem:[#allocation148_spill] sm:$0xff] %v13396_v20  ;;  %v13400_v5 = vcombine.low %v1439_v15, %v1443_v48  ;;  %17579 = vst [vmem:[#allocation151_spill] sm:$0xff] %v13406_v30  ;;  %v1555_v16 = vld [vmem:[#allocation7 + $0xcf0] sm:$0xff]  ;;  %v13412_v48 = vcombine.low %v1431_v8, %v1435_v3 }
 0x1fb   :  { %3394 = vmatprep.mubr.bf16.mxu0 %v13145_v4  ;;  %3406 = vmatpush1.bf16.msra.mxu1 %v13376_v13  ;;  %v1423_v13 = vld [vmem:[#allocation7 + $0x8d0] sm:$0xff]  ;;  %v13416_v15 = vcombine.low %v1559_v18, %v1563_v36  ;;  %v13421_v54 = vcombine.high %v1551_v26, %v1555_v16  ;;  %v13428_v8 = vcombine.low %v1551_v26, %v1555_v16 }
 0x1fc   :  { %3437 = vmatprep.mubr.bf16.mxu1 %v13153_v49  ;;  %3364 = vmatprep.subr.bf16.mxu0 %v13379_v50  ;;  %17577 = vst [vmem:[#allocation149_spill] sm:$0xff] %v13400_v5  ;;  %v13409_v50 = vcombine.high %v1559_v18, %v1563_v36  ;;  %17581 = vst [vmem:[#allocation153_spill] sm:$0xff] %v13412_v48 }
 0x1fd   :  { %3407 = vmatprep.subr.bf16.mxu1 %v13382_v59  ;;  %v1427_v59 = vld [vmem:[#allocation7 + $0x8f0] sm:$0xff]  ;;  %17582 = vst [vmem:[#allocation154_spill] sm:$0xff] %v13416_v15  ;;  %17584 = vst [vmem:[#allocation156_spill] sm:$0xff] %v13421_v54 }
 0x1fe   :  { %3365 = vmatpush1.bf16.msra.mxu0 %v13386_v34  ;;  %17580 = vst [vmem:[#allocation152_spill] sm:$0xff] %v13409_v50  ;;  %v13418_v22 = vcombine.high %v1423_v13, %v1427_v59  ;;  %v1547_v34 = vld [vmem:[#allocation7 + $0xcb0] sm:$0xff]  ;;  %v13424_v3 = vcombine.low %v1423_v13, %v1427_v59  ;;  %17586 = vst [vmem:[#allocation158_spill] sm:$0xff] %v13428_v8 }
 0x1ff   :  { %3408 = vmatpush1.bf16.msra.mxu1 %v13390_v1  ;;  %3366 = vmatprep.subr.bf16.mxu0 %v13392_v27  ;;  %v1419_v27 = vld [vmem:[#allocation7 + $0x8b0] sm:$0xff] }
 0x200   :  { %3409 = vmatprep.subr.bf16.mxu1 %v13396_v20  ;;  %17583 = vst [vmem:[#allocation155_spill] sm:$0xff] %v13418_v22  ;;  %v1415_v20 = vld [vmem:[#allocation7 + $0x890] sm:$0xff]  ;;  %17585 = vst [vmem:[#allocation157_spill] sm:$0xff] %v13424_v3 }
 0x201   :  { %v1543_v1 = vld [vmem:[#allocation7 + $0xc90] sm:$0xff]  ;;  %v13430_v18 = vcombine.high %v1415_v20, %v1419_v27  ;;  %v13436_v59 = vcombine.low %v1415_v20, %v1419_v27 }
 0x202   :  { %3367 = vmatpush1.bf16.msra.mxu0 %v13400_v5  ;;  %v13433_v36 = vcombine.high %v1543_v1, %v1547_v34  ;;  %v1539_v5 = vld [vmem:[#allocation7 + $0xc70] sm:$0xff]  ;;  %v13440_v16 = vcombine.low %v1543_v1, %v1547_v34 }
 0x203   :  { %3410 = vmatpush1.bf16.msra.mxu1 %v13404_v60  ;;  %3368 = vmatprep.subr.bf16.mxu0 %v13406_v30  ;;  %17587 = vst [vmem:[#allocation159_spill] sm:$0xff] %v13430_v18  ;;  %v1411_v30 = vld [vmem:[#allocation7 + $0x870] sm:$0xff]  ;;  %17589 = vst [vmem:[#allocation161_spill] sm:$0xff] %v13436_v59 }
 0x204   :  { %3411 = vmatprep.subr.bf16.mxu1 %v13409_v50  ;;  %17588 = vst [vmem:[#allocation160_spill] sm:$0xff] %v13433_v36  ;;  %v1407_v50 = vld [vmem:[#allocation7 + $0x850] sm:$0xff]  ;;  %17590 = vst [vmem:[#allocation162_spill] sm:$0xff] %v13440_v16 }
 0x205   :  { %v1535_v60 = vld [vmem:[#allocation7 + $0xc50] sm:$0xff]  ;;  %v13442_v26 = vcombine.high %v1407_v50, %v1411_v30  ;;  %v13448_v20 = vcombine.low %v1407_v50, %v1411_v30 }
 0x206   :  { %3369 = vmatpush1.bf16.msra.mxu0 %v13412_v48  ;;  %v13445_v13 = vcombine.high %v1535_v60, %v1539_v5  ;;  %v1531_v48 = vld [vmem:[#allocation7 + $0xc30] sm:$0xff]  ;;  %v13452_v34 = vcombine.low %v1535_v60, %v1539_v5 }
 0x207   :  { %3412 = vmatpush1.bf16.msra.mxu1 %v13416_v15  ;;  %3370 = vmatprep.subr.bf16.mxu0 %v13418_v22  ;;  %17591 = vst [vmem:[#allocation163_spill] sm:$0xff] %v13442_v26  ;;  %v1403_v22 = vld [vmem:[#allocation7 + $0x830] sm:$0xff]  ;;  %17593 = vst [vmem:[#allocation165_spill] sm:$0xff] %v13448_v20 }
 0x208   :  { %3413 = vmatprep.subr.bf16.mxu1 %v13421_v54  ;;  %17592 = vst [vmem:[#allocation164_spill] sm:$0xff] %v13445_v13  ;;  %v1399_v54 = vld [vmem:[#allocation7 + $0x810] sm:$0xff]  ;;  %17594 = vst [vmem:[#allocation166_spill] sm:$0xff] %v13452_v34 }
 0x209   :  { %v1527_v15 = vld [vmem:[#allocation7 + $0xc10] sm:$0xff]  ;;  %v13454_v1 = vcombine.high %v1399_v54, %v1403_v22  ;;  %v13460_v50 = vcombine.low %v1399_v54, %v1403_v22 }
 0x20a   :  { %3371 = vmatpush1.bf16.msra.mxu0 %v13424_v3  ;;  %v13457_v27 = vcombine.high %v1527_v15, %v1531_v48  ;;  %v1651_v3 = vld [vmem:[#allocation7 + $0xff0] sm:$0xff]  ;;  %v13464_v5 = vcombine.low %v1527_v15, %v1531_v48 }
 0x20b   :  { %3414 = vmatpush1.bf16.msra.mxu1 %v13428_v8  ;;  %3372 = vmatprep.subr.bf16.mxu0 %v13430_v18  ;;  %17595 = vst [vmem:[#allocation167_spill] sm:$0xff] %v13454_v1  ;;  %v1523_v18 = vld [vmem:[#allocation7 + $0xbf0] sm:$0xff]  ;;  %17597 = vst [vmem:[#allocation169_spill] sm:$0xff] %v13460_v50 }
 0x20c   :  { %3415 = vmatprep.subr.bf16.mxu1 %v13433_v36  ;;  %17596 = vst [vmem:[#allocation168_spill] sm:$0xff] %v13457_v27  ;;  %v1519_v36 = vld [vmem:[#allocation7 + $0xbd0] sm:$0xff]  ;;  %17598 = vst [vmem:[#allocation170_spill] sm:$0xff] %v13464_v5 }
 0x20d   :  { %v1647_v8 = vld [vmem:[#allocation7 + $0xfd0] sm:$0xff]  ;;  %v13466_v60 = vcombine.high %v1519_v36, %v1523_v18  ;;  %v13472_v22 = vcombine.low %v1519_v36, %v1523_v18 }
 0x20e   :  { %3373 = vmatpush1.bf16.msra.mxu0 %v13436_v59  ;;  %v13469_v30 = vcombine.high %v1647_v8, %v1651_v3  ;;  %v1643_v59 = vld [vmem:[#allocation7 + $0xfb0] sm:$0xff]  ;;  %v13476_v48 = vcombine.low %v1647_v8, %v1651_v3 }
 0x20f   :  { %3416 = vmatpush1.bf16.msra.mxu1 %v13440_v16  ;;  %3374 = vmatprep.subr.bf16.mxu0 %v13442_v26  ;;  %17599 = vst [vmem:[#allocation171_spill] sm:$0xff] %v13466_v60  ;;  %v1515_v26 = vld [vmem:[#allocation7 + $0xbb0] sm:$0xff]  ;;  %17601 = vst [vmem:[#allocation173_spill] sm:$0xff] %v13472_v22 }
 0x210   :  { %3417 = vmatprep.subr.bf16.mxu1 %v13445_v13  ;;  %17600 = vst [vmem:[#allocation172_spill] sm:$0xff] %v13469_v30  ;;  %v1511_v13 = vld [vmem:[#allocation7 + $0xb90] sm:$0xff]  ;;  %17602 = vst [vmem:[#allocation174_spill] sm:$0xff] %v13476_v48 }
 0x211   :  { %v1639_v16 = vld [vmem:[#allocation7 + $0xf90] sm:$0xff]  ;;  %v13478_v15 = vcombine.high %v1511_v13, %v1515_v26  ;;  %v13484_v18 = vcombine.low %v1511_v13, %v1515_v26 }
 0x212   :  { %3375 = vmatpush1.bf16.msra.mxu0 %v13448_v20  ;;  %v13481_v54 = vcombine.high %v1639_v16, %v1643_v59  ;;  %v1635_v20 = vld [vmem:[#allocation7 + $0xf70] sm:$0xff]  ;;  %v13488_v3 = vcombine.low %v1639_v16, %v1643_v59 }
 0x213   :  { %3418 = vmatpush1.bf16.msra.mxu1 %v13452_v34  ;;  %3376 = vmatprep.subr.bf16.mxu0 %v13454_v1  ;;  %17603 = vst [vmem:[#allocation175_spill] sm:$0xff] %v13478_v15  ;;  %v1507_v1 = vld [vmem:[#allocation7 + $0xb70] sm:$0xff]  ;;  %17605 = vst [vmem:[#allocation177_spill] sm:$0xff] %v13484_v18 }
 0x214   :  { %3419 = vmatprep.subr.bf16.mxu1 %v13457_v27  ;;  %17604 = vst [vmem:[#allocation176_spill] sm:$0xff] %v13481_v54  ;;  %v1503_v27 = vld [vmem:[#allocation7 + $0xb50] sm:$0xff]  ;;  %17606 = vst [vmem:[#allocation178_spill] sm:$0xff] %v13488_v3 }
 0x215   :  { %v1631_v34 = vld [vmem:[#allocation7 + $0xf50] sm:$0xff]  ;;  %v13490_v8 = vcombine.high %v1503_v27, %v1507_v1  ;;  %v13496_v26 = vcombine.low %v1503_v27, %v1507_v1 }
 0x216   :  { %3377 = vmatpush1.bf16.msra.mxu0 %v13460_v50  ;;  %v13493_v36 = vcombine.high %v1631_v34, %v1635_v20  ;;  %v1627_v50 = vld [vmem:[#allocation7 + $0xf30] sm:$0xff]  ;;  %v13500_v59 = vcombine.low %v1631_v34, %v1635_v20 }
 0x217   :  { %3420 = vmatpush1.bf16.msra.mxu1 %v13464_v5  ;;  %3378 = vmatprep.subr.bf16.mxu0 %v13466_v60  ;;  %17607 = vst [vmem:[#allocation179_spill] sm:$0xff] %v13490_v8  ;;  %v1499_v60 = vld [vmem:[#allocation7 + $0xb30] sm:$0xff]  ;;  %17609 = vst [vmem:[#allocation181_spill] sm:$0xff] %v13496_v26 }
 0x218   :  { %3421 = vmatprep.subr.bf16.mxu1 %v13469_v30  ;;  %17608 = vst [vmem:[#allocation180_spill] sm:$0xff] %v13493_v36  ;;  %v1495_v30 = vld [vmem:[#allocation7 + $0xb10] sm:$0xff]  ;;  %17610 = vst [vmem:[#allocation182_spill] sm:$0xff] %v13500_v59 }
 0x219   :  { %v1623_v5 = vld [vmem:[#allocation7 + $0xf10] sm:$0xff]  ;;  %v13502_v16 = vcombine.high %v1495_v30, %v1499_v60  ;;  %v13508_v1 = vcombine.low %v1495_v30, %v1499_v60 }
 0x21a   :  { %3379 = vmatpush2.bf16.msra.mxu0 %v13472_v22  ;;  %v13505_v13 = vcombine.high %v1623_v5, %v1627_v50  ;;  %v1619_v22 = vld [vmem:[#allocation7 + $0xef0] sm:$0xff]  ;;  %v13512_v20 = vcombine.low %v1623_v5, %v1627_v50 }
 0x21b   :  { %3422 = vmatpush2.bf16.msra.mxu1 %v13476_v48  ;;  %3380 = vmatprep.subr.bf16.mxu0 %v13478_v15  ;;  %17611 = vst [vmem:[#allocation183_spill] sm:$0xff] %v13502_v16  ;;  %v1491_v15 = vld [vmem:[#allocation7 + $0xaf0] sm:$0xff]  ;;  %17613 = vst [vmem:[#allocation185_spill] sm:$0xff] %v13508_v1 }
 0x21c   :  { %3423 = vmatprep.subr.bf16.mxu1 %v13481_v54  ;;  %17612 = vst [vmem:[#allocation184_spill] sm:$0xff] %v13505_v13  ;;  %v1487_v54 = vld [vmem:[#allocation7 + $0xad0] sm:$0xff]  ;;  %17614 = vst [vmem:[#allocation186_spill] sm:$0xff] %v13512_v20 }
 0x21d   :  { %v1615_v48 = vld [vmem:[#allocation7 + $0xed0] sm:$0xff]  ;;  %v13514_v34 = vcombine.high %v1487_v54, %v1491_v15  ;;  %v13520_v60 = vcombine.low %v1487_v54, %v1491_v15 }
 0x21e   :  { %3381 = vmatpush2.bf16.msra.mxu0 %v13484_v18  ;;  %v13517_v27 = vcombine.high %v1615_v48, %v1619_v22  ;;  %v1611_v18 = vld [vmem:[#allocation7 + $0xeb0] sm:$0xff]  ;;  %v13524_v50 = vcombine.low %v1615_v48, %v1619_v22 }
 0x21f   :  { %3424 = vmatpush2.bf16.msra.mxu1 %v13488_v3  ;;  %3382 = vmatprep.subr.bf16.mxu0 %v13490_v8  ;;  %17615 = vst [vmem:[#allocation187_spill] sm:$0xff] %v13514_v34  ;;  %v1483_v8 = vld [vmem:[#allocation7 + $0xab0] sm:$0xff]  ;;  %17617 = vst [vmem:[#allocation189_spill] sm:$0xff] %v13520_v60 }
 0x220   :  { %3425 = vmatprep.subr.bf16.mxu1 %v13493_v36  ;;  %17616 = vst [vmem:[#allocation188_spill] sm:$0xff] %v13517_v27  ;;  %v1479_v36 = vld [vmem:[#allocation7 + $0xa90] sm:$0xff]  ;;  %17618 = vst [vmem:[#allocation190_spill] sm:$0xff] %v13524_v50 }
 0x221   :  { %v1607_v3 = vld [vmem:[#allocation7 + $0xe90] sm:$0xff]  ;;  %v13526_v5 = vcombine.high %v1479_v36, %v1483_v8  ;;  %v13532_v15 = vcombine.low %v1479_v36, %v1483_v8 }
 0x222   :  { %3383 = vmatpush2.bf16.msra.mxu0 %v13496_v26  ;;  %v13529_v30 = vcombine.high %v1607_v3, %v1611_v18  ;;  %v1603_v26 = vld [vmem:[#allocation7 + $0xe70] sm:$0xff]  ;;  %v13536_v22 = vcombine.low %v1607_v3, %v1611_v18 }
 0x223   :  { %3426 = vmatpush2.bf16.msra.mxu1 %v13500_v59  ;;  %3384 = vmatprep.subr.bf16.mxu0 %v13502_v16  ;;  %17619 = vst [vmem:[#allocation191_spill] sm:$0xff] %v13526_v5  ;;  %v1475_v16 = vld [vmem:[#allocation7 + $0xa70] sm:$0xff]  ;;  %17621 = vst [vmem:[#allocation193_spill] sm:$0xff] %v13532_v15 }
 0x224   :  { %3427 = vmatprep.subr.bf16.mxu1 %v13505_v13  ;;  %17620 = vst [vmem:[#allocation192_spill] sm:$0xff] %v13529_v30  ;;  %v1471_v13 = vld [vmem:[#allocation7 + $0xa50] sm:$0xff]  ;;  %17622 = vst [vmem:[#allocation194_spill] sm:$0xff] %v13536_v22 }
 0x225   :  { %v1599_v59 = vld [vmem:[#allocation7 + $0xe50] sm:$0xff]  ;;  %v13538_v48 = vcombine.high %v1471_v13, %v1475_v16  ;;  %v13544_v8 = vcombine.low %v1471_v13, %v1475_v16 }
 0x226   :  { %3385 = vmatpush2.bf16.msra.mxu0 %v13508_v1  ;;  %v13541_v54 = vcombine.high %v1599_v59, %v1603_v26  ;;  %v1595_v1 = vld [vmem:[#allocation7 + $0xe30] sm:$0xff]  ;;  %v13548_v18 = vcombine.low %v1599_v59, %v1603_v26 }
 0x227   :  { %3428 = vmatpush2.bf16.msra.mxu1 %v13512_v20  ;;  %3386 = vmatprep.subr.bf16.mxu0 %v13514_v34  ;;  %17623 = vst [vmem:[#allocation195_spill] sm:$0xff] %v13538_v48  ;;  %v1467_v34 = vld [vmem:[#allocation7 + $0xa30] sm:$0xff]  ;;  %17625 = vst [vmem:[#allocation197_spill] sm:$0xff] %v13544_v8 }
 0x228   :  { %3429 = vmatprep.subr.bf16.mxu1 %v13517_v27  ;;  %17624 = vst [vmem:[#allocation196_spill] sm:$0xff] %v13541_v54  ;;  %v1463_v27 = vld [vmem:[#allocation7 + $0xa10] sm:$0xff]  ;;  %17626 = vst [vmem:[#allocation198_spill] sm:$0xff] %v13548_v18 }
 0x229   :  { %v1591_v20 = vld [vmem:[#allocation7 + $0xe10] sm:$0xff]  ;;  %v13550_v3 = vcombine.high %v1463_v27, %v1467_v34  ;;  %v13556_v16 = vcombine.low %v1463_v27, %v1467_v34  ;;  %v1576_v34 = vld [vmem:[#allocation7 + $0xd98] sm:$0xff] }
 0x22a   :  { %3387 = vmatpush2.bf16.msra.mxu0 %v13520_v60  ;;  %v13553_v36 = vcombine.high %v1591_v20, %v1595_v1  ;;  %v1588_v60 = vld [vmem:[#allocation7 + $0xdf8] sm:$0xff]  ;;  %v13560_v26 = vcombine.low %v1591_v20, %v1595_v1 }
 0x22b   :  { %3430 = vmatpush2.bf16.msra.mxu1 %v13524_v50  ;;  %3388 = vmatprep.subr.bf16.mxu0 %v13526_v5  ;;  %17627 = vst [vmem:[#allocation199_spill] sm:$0xff] %v13550_v3  ;;  %v1460_v5 = vld [vmem:[#allocation7 + $0x9f8] sm:$0xff]  ;;  %17629 = vst [vmem:[#allocation201_spill] sm:$0xff] %v13556_v16 }
 0x22c   :  { %3431 = vmatprep.subr.bf16.mxu1 %v13529_v30  ;;  %17628 = vst [vmem:[#allocation200_spill] sm:$0xff] %v13553_v36  ;;  %v1456_v30 = vld [vmem:[#allocation7 + $0x9d8] sm:$0xff]  ;;  %17630 = vst [vmem:[#allocation202_spill] sm:$0xff] %v13560_v26 }
 0x22d   :  { %v1584_v50 = vld [vmem:[#allocation7 + $0xdd8] sm:$0xff]  ;;  %v13562_v59 = vcombine.high %v1456_v30, %v1460_v5 }
 0x22e   :  { %3389 = vmatpush2.bf16.msra.mxu0 %v13532_v15  ;;  %v13565_v13 = vcombine.high %v1584_v50, %v1588_v60  ;;  %v1580_v27 = vld [vmem:[#allocation7 + $0xdb8] sm:$0xff]  ;;  %v13572_v1 = vcombine.low %v1584_v50, %v1588_v60 }
 0x22f   :  { %3432 = vmatpush2.bf16.msra.mxu1 %v13536_v22  ;;  %3390 = vmatprep.subr.bf16.mxu0 %v13538_v48  ;;  %17631 = vst [vmem:[#allocation203_spill] sm:$0xff] %v13562_v59  ;;  %v1452_v48 = vld [vmem:[#allocation7 + $0x9b8] sm:$0xff]  ;;  %v13568_v22 = vcombine.low %v1456_v30, %v1460_v5  ;;  %v13586_v60 = vcombine.low %v1576_v34, %v1580_v27 }
 0x230   :  { %3433 = vmatprep.subr.bf16.mxu1 %v13541_v54  ;;  %17632 = vst [vmem:[#allocation204_spill] sm:$0xff] %v13565_v13  ;;  %v1448_v54 = vld [vmem:[#allocation7 + $0x998] sm:$0xff]  ;;  %17634 = vst [vmem:[#allocation206_spill] sm:$0xff] %v13572_v1 }
 0x231   :  { %17633 = vst [vmem:[#allocation205_spill] sm:$0xff] %v13568_v22  ;;  %v13575_v20 = vcombine.high %v1448_v54, %v1452_v48  ;;  %v1568_v5 = vld [vmem:[#allocation7 + $0xd58] sm:$0xff]  ;;  %17638 = vst [vmem:[#allocation210_spill] sm:$0xff] %v13586_v60 }
 0x232   :  { %3391 = vmatpush2.bf16.msra.mxu0 %v13544_v8  ;;  %v1572_v30 = vld [vmem:[#allocation7 + $0xd78] sm:$0xff] }
 0x233   :  { %3434 = vmatpush2.bf16.msra.mxu1 %v13548_v18  ;;  %3392 = vmatprep.subr.bf16.mxu0 %v13550_v3  ;;  %17635 = vst [vmem:[#allocation207_spill] sm:$0xff] %v13575_v20  ;;  %v1444_v3 = vld [vmem:[#allocation7 + $0x978] sm:$0xff]  ;;  %v13578_v18 = vcombine.high %v1576_v34, %v1580_v27  ;;  %v13600_v34 = vcombine.low %v1568_v5, %v1572_v30 }
 0x234   :  { %3435 = vmatprep.subr.bf16.mxu1 %v13553_v36  ;;  %v1440_v36 = vld [vmem:[#allocation7 + $0x958] sm:$0xff] }
 0x235   :  { %17636 = vst [vmem:[#allocation208_spill] sm:$0xff] %v13578_v18  ;;  %v13588_v50 = vcombine.high %v1440_v36, %v1444_v3  ;;  %17642 = vst [vmem:[#allocation214_spill] sm:$0xff] %v13600_v34  ;;  %v1552_v8 = vld [vmem:[#allocation7 + $0xcd8] sm:$0xff] }
 0x236   :  { %3393 = vmatpush2.bf16.msra.mxu0 %v13556_v16  ;;  %v1436_v16 = vld [vmem:[#allocation7 + $0x938] sm:$0xff] }
 0x237   :  { %3436 = vmatpush2.bf16.msra.mxu1 %v13560_v26  ;;  %3448 = vmatprep.subr.bf16.mxu0 %v13562_v59  ;;  %v13582_v26 = vcombine.low %v1448_v54, %v1452_v48  ;;  %17639 = vst [vmem:[#allocation211_spill] sm:$0xff] %v13588_v50  ;;  %v1432_v59 = vld [vmem:[#allocation7 + $0x918] sm:$0xff] }
 0x238   :  { %3491 = vmatprep.subr.bf16.mxu1 %v13565_v13  ;;  %v13592_v13 = vcombine.high %v1568_v5, %v1572_v30  ;;  %v1560_v48 = vld [vmem:[#allocation7 + $0xd18] sm:$0xff]  ;;  %v13602_v27 = vcombine.high %v1432_v59, %v1436_v16 }
 0x239   :  { %3395 = vmatmul.mubr.bf16.vlgmr.msra.gmra.mxu0 %v13151_v0  ;;  %17637 = vst [vmem:[#allocation209_spill] sm:$0xff] %v13582_v26  ;;  %v1564_v54 = vld [vmem:[#allocation7 + $0xd38] sm:$0xff] }
 0x23a   :  { %3438 = vmatmul.mubr.bf16.vlgmr.msra.gmra.mxu1 %v13160_v53  ;;  %3449 = vmatpush1.bf16.msra.mxu0 %v13568_v22  ;;  %17640 = vst [vmem:[#allocation212_spill] sm:$0xff] %v13592_v13  ;;  %v13596_v22 = vcombine.low %v1440_v36, %v1444_v3  ;;  %17643 = vst [vmem:[#allocation215_spill] sm:$0xff] %v13602_v27  ;;  %v1556_v15 = vld [vmem:[#allocation7 + $0xcf8] sm:$0xff]  ;;  %v13608_v3 = vcombine.low %v1432_v59, %v1436_v16 }
 0x23b   :  { %3480 = vmatprep.mubr.bf16.mxu0 %v13145_v4  ;;  %3492 = vmatpush1.bf16.msra.mxu1 %v13572_v1  ;;  %v1424_v1 = vld [vmem:[#allocation7 + $0x8d8] sm:$0xff]  ;;  %v13612_v36 = vcombine.low %v1560_v48, %v1564_v54  ;;  %v13617_v30 = vcombine.high %v1552_v8, %v1556_v15  ;;  %v13624_v59 = vcombine.low %v1552_v8, %v1556_v15 }
 0x23c   :  { %3523 = vmatprep.mubr.bf16.mxu1 %v13153_v49  ;;  %3450 = vmatprep.subr.bf16.mxu0 %v13575_v20  ;;  %17641 = vst [vmem:[#allocation213_spill] sm:$0xff] %v13596_v22  ;;  %v13605_v20 = vcombine.high %v1560_v48, %v1564_v54  ;;  %17645 = vst [vmem:[#allocation217_spill] sm:$0xff] %v13608_v3 }
 0x23d   :  { %3493 = vmatprep.subr.bf16.mxu1 %v13578_v18  ;;  %v1428_v18 = vld [vmem:[#allocation7 + $0x8f8] sm:$0xff]  ;;  %17646 = vst [vmem:[#allocation218_spill] sm:$0xff] %v13612_v36  ;;  %17648 = vst [vmem:[#allocation220_spill] sm:$0xff] %v13617_v30 }
 0x23e   :  { %3451 = vmatpush1.bf16.msra.mxu0 %v13582_v26  ;;  %17644 = vst [vmem:[#allocation216_spill] sm:$0xff] %v13605_v20  ;;  %v13614_v5 = vcombine.high %v1424_v1, %v1428_v18  ;;  %v1548_v26 = vld [vmem:[#allocation7 + $0xcb8] sm:$0xff]  ;;  %v13620_v16 = vcombine.low %v1424_v1, %v1428_v18  ;;  %17650 = vst [vmem:[#allocation222_spill] sm:$0xff] %v13624_v59 }
 0x23f   :  { %3494 = vmatpush1.bf16.msra.mxu1 %v13586_v60  ;;  %3452 = vmatprep.subr.bf16.mxu0 %v13588_v50  ;;  %v1420_v50 = vld [vmem:[#allocation7 + $0x8b8] sm:$0xff] }
 0x240   :  { %3495 = vmatprep.subr.bf16.mxu1 %v13592_v13  ;;  %17647 = vst [vmem:[#allocation219_spill] sm:$0xff] %v13614_v5  ;;  %v1416_v13 = vld [vmem:[#allocation7 + $0x898] sm:$0xff]  ;;  %17649 = vst [vmem:[#allocation221_spill] sm:$0xff] %v13620_v16 }
 0x241   :  { %v1544_v60 = vld [vmem:[#allocation7 + $0xc98] sm:$0xff]  ;;  %v13626_v48 = vcombine.high %v1416_v13, %v1420_v50  ;;  %v13632_v18 = vcombine.low %v1416_v13, %v1420_v50 }
 0x242   :  { %3453 = vmatpush1.bf16.msra.mxu0 %v13596_v22  ;;  %v13629_v54 = vcombine.high %v1544_v60, %v1548_v26  ;;  %v1540_v22 = vld [vmem:[#allocation7 + $0xc78] sm:$0xff]  ;;  %v13636_v15 = vcombine.low %v1544_v60, %v1548_v26 }
 0x243   :  { %3496 = vmatpush1.bf16.msra.mxu1 %v13600_v34  ;;  %3454 = vmatprep.subr.bf16.mxu0 %v13602_v27  ;;  %17651 = vst [vmem:[#allocation223_spill] sm:$0xff] %v13626_v48  ;;  %v1412_v27 = vld [vmem:[#allocation7 + $0x878] sm:$0xff]  ;;  %17653 = vst [vmem:[#allocation225_spill] sm:$0xff] %v13632_v18 }
 0x244   :  { %3497 = vmatprep.subr.bf16.mxu1 %v13605_v20  ;;  %17652 = vst [vmem:[#allocation224_spill] sm:$0xff] %v13629_v54  ;;  %v1408_v20 = vld [vmem:[#allocation7 + $0x858] sm:$0xff]  ;;  %17654 = vst [vmem:[#allocation226_spill] sm:$0xff] %v13636_v15 }
 0x245   :  { %v1536_v34 = vld [vmem:[#allocation7 + $0xc58] sm:$0xff]  ;;  %v13638_v8 = vcombine.high %v1408_v20, %v1412_v27  ;;  %v13644_v13 = vcombine.low %v1408_v20, %v1412_v27 }
 0x246   :  { %3455 = vmatpush1.bf16.msra.mxu0 %v13608_v3  ;;  %v13641_v1 = vcombine.high %v1536_v34, %v1540_v22  ;;  %v1532_v3 = vld [vmem:[#allocation7 + $0xc38] sm:$0xff]  ;;  %v13648_v26 = vcombine.low %v1536_v34, %v1540_v22 }
 0x247   :  { %3498 = vmatpush1.bf16.msra.mxu1 %v13612_v36  ;;  %3456 = vmatprep.subr.bf16.mxu0 %v13614_v5  ;;  %17655 = vst [vmem:[#allocation227_spill] sm:$0xff] %v13638_v8  ;;  %v1404_v5 = vld [vmem:[#allocation7 + $0x838] sm:$0xff]  ;;  %17657 = vst [vmem:[#allocation229_spill] sm:$0xff] %v13644_v13 }
 0x248   :  { %3499 = vmatprep.subr.bf16.mxu1 %v13617_v30  ;;  %17656 = vst [vmem:[#allocation228_spill] sm:$0xff] %v13641_v1  ;;  %v1400_v30 = vld [vmem:[#allocation7 + $0x818] sm:$0xff]  ;;  %17658 = vst [vmem:[#allocation230_spill] sm:$0xff] %v13648_v26 }
 0x249   :  { %v1528_v36 = vld [vmem:[#allocation7 + $0xc18] sm:$0xff]  ;;  %v13650_v60 = vcombine.high %v1400_v30, %v1404_v5  ;;  %v13656_v20 = vcombine.low %v1400_v30, %v1404_v5 }
 0x24a   :  { %3457 = vmatpush1.bf16.msra.mxu0 %v13620_v16  ;;  %v13653_v50 = vcombine.high %v1528_v36, %v1532_v3  ;;  %v1652_v16 = vld [vmem:[#allocation7 + $0xff8] sm:$0xff]  ;;  %v13660_v22 = vcombine.low %v1528_v36, %v1532_v3 }
 0x24b   :  { %3500 = vmatpush1.bf16.msra.mxu1 %v13624_v59  ;;  %3458 = vmatprep.subr.bf16.mxu0 %v13626_v48  ;;  %17659 = vst [vmem:[#allocation231_spill] sm:$0xff] %v13650_v60  ;;  %v1524_v48 = vld [vmem:[#allocation7 + $0xbf8] sm:$0xff]  ;;  %17661 = vst [vmem:[#allocation233_spill] sm:$0xff] %v13656_v20 }
 0x24c   :  { %3501 = vmatprep.subr.bf16.mxu1 %v13629_v54  ;;  %17660 = vst [vmem:[#allocation232_spill] sm:$0xff] %v13653_v50  ;;  %v1520_v54 = vld [vmem:[#allocation7 + $0xbd8] sm:$0xff]  ;;  %17662 = vst [vmem:[#allocation234_spill] sm:$0xff] %v13660_v22 }
 0x24d   :  { %v1648_v59 = vld [vmem:[#allocation7 + $0xfd8] sm:$0xff]  ;;  %v13662_v34 = vcombine.high %v1520_v54, %v1524_v48  ;;  %v13668_v5 = vcombine.low %v1520_v54, %v1524_v48 }
 0x24e   :  { %3459 = vmatpush1.bf16.msra.mxu0 %v13632_v18  ;;  %v13665_v27 = vcombine.high %v1648_v59, %v1652_v16  ;;  %v1644_v18 = vld [vmem:[#allocation7 + $0xfb8] sm:$0xff]  ;;  %v13672_v3 = vcombine.low %v1648_v59, %v1652_v16 }
 0x24f   :  { %3502 = vmatpush1.bf16.msra.mxu1 %v13636_v15  ;;  %3460 = vmatprep.subr.bf16.mxu0 %v13638_v8  ;;  %17663 = vst [vmem:[#allocation235_spill] sm:$0xff] %v13662_v34  ;;  %v1516_v8 = vld [vmem:[#allocation7 + $0xbb8] sm:$0xff]  ;;  %17665 = vst [vmem:[#allocation237_spill] sm:$0xff] %v13668_v5 }
 0x250   :  { %3503 = vmatprep.subr.bf16.mxu1 %v13641_v1  ;;  %17664 = vst [vmem:[#allocation236_spill] sm:$0xff] %v13665_v27  ;;  %v1512_v1 = vld [vmem:[#allocation7 + $0xb98] sm:$0xff]  ;;  %17666 = vst [vmem:[#allocation238_spill] sm:$0xff] %v13672_v3 }
 0x251   :  { %v1640_v15 = vld [vmem:[#allocation7 + $0xf98] sm:$0xff]  ;;  %v13674_v36 = vcombine.high %v1512_v1, %v1516_v8  ;;  %v13680_v48 = vcombine.low %v1512_v1, %v1516_v8 }
 0x252   :  { %3461 = vmatpush1.bf16.msra.mxu0 %v13644_v13  ;;  %v13677_v30 = vcombine.high %v1640_v15, %v1644_v18  ;;  %v1636_v13 = vld [vmem:[#allocation7 + $0xf78] sm:$0xff]  ;;  %v13684_v16 = vcombine.low %v1640_v15, %v1644_v18 }
 0x253   :  { %3504 = vmatpush1.bf16.msra.mxu1 %v13648_v26  ;;  %3462 = vmatprep.subr.bf16.mxu0 %v13650_v60  ;;  %17667 = vst [vmem:[#allocation239_spill] sm:$0xff] %v13674_v36  ;;  %v1508_v60 = vld [vmem:[#allocation7 + $0xb78] sm:$0xff]  ;;  %17669 = vst [vmem:[#allocation241_spill] sm:$0xff] %v13680_v48 }
 0x254   :  { %3505 = vmatprep.subr.bf16.mxu1 %v13653_v50  ;;  %17668 = vst [vmem:[#allocation240_spill] sm:$0xff] %v13677_v30  ;;  %v1504_v50 = vld [vmem:[#allocation7 + $0xb58] sm:$0xff]  ;;  %17670 = vst [vmem:[#allocation242_spill] sm:$0xff] %v13684_v16 }
 0x255   :  { %v1632_v26 = vld [vmem:[#allocation7 + $0xf58] sm:$0xff]  ;;  %v13686_v59 = vcombine.high %v1504_v50, %v1508_v60  ;;  %v13692_v8 = vcombine.low %v1504_v50, %v1508_v60 }
 0x256   :  { %3463 = vmatpush1.bf16.msra.mxu0 %v13656_v20  ;;  %v13689_v54 = vcombine.high %v1632_v26, %v1636_v13  ;;  %v1628_v20 = vld [vmem:[#allocation7 + $0xf38] sm:$0xff]  ;;  %v13696_v18 = vcombine.low %v1632_v26, %v1636_v13 }
 0x257   :  { %3506 = vmatpush1.bf16.msra.mxu1 %v13660_v22  ;;  %3464 = vmatprep.subr.bf16.mxu0 %v13662_v34  ;;  %17671 = vst [vmem:[#allocation243_spill] sm:$0xff] %v13686_v59  ;;  %v1500_v34 = vld [vmem:[#allocation7 + $0xb38] sm:$0xff]  ;;  %17673 = vst [vmem:[#allocation245_spill] sm:$0xff] %v13692_v8 }
 0x258   :  { %3507 = vmatprep.subr.bf16.mxu1 %v13665_v27  ;;  %17672 = vst [vmem:[#allocation244_spill] sm:$0xff] %v13689_v54  ;;  %v1496_v27 = vld [vmem:[#allocation7 + $0xb18] sm:$0xff]  ;;  %17674 = vst [vmem:[#allocation246_spill] sm:$0xff] %v13696_v18 }
 0x259   :  { %v1624_v22 = vld [vmem:[#allocation7 + $0xf18] sm:$0xff]  ;;  %v13698_v15 = vcombine.high %v1496_v27, %v1500_v34  ;;  %v13704_v60 = vcombine.low %v1496_v27, %v1500_v34 }
 0x25a   :  { %3465 = vmatpush2.bf16.msra.mxu0 %v13668_v5  ;;  %v13701_v1 = vcombine.high %v1624_v22, %v1628_v20  ;;  %v1620_v5 = vld [vmem:[#allocation7 + $0xef8] sm:$0xff]  ;;  %v13708_v13 = vcombine.low %v1624_v22, %v1628_v20 }
 0x25b   :  { %3508 = vmatpush2.bf16.msra.mxu1 %v13672_v3  ;;  %3466 = vmatprep.subr.bf16.mxu0 %v13674_v36  ;;  %17675 = vst [vmem:[#allocation247_spill] sm:$0xff] %v13698_v15  ;;  %v1492_v36 = vld [vmem:[#allocation7 + $0xaf8] sm:$0xff]  ;;  %17677 = vst [vmem:[#allocation249_spill] sm:$0xff] %v13704_v60 }
 0x25c   :  { %3509 = vmatprep.subr.bf16.mxu1 %v13677_v30  ;;  %17676 = vst [vmem:[#allocation248_spill] sm:$0xff] %v13701_v1  ;;  %v1488_v30 = vld [vmem:[#allocation7 + $0xad8] sm:$0xff]  ;;  %17678 = vst [vmem:[#allocation250_spill] sm:$0xff] %v13708_v13 }
 0x25d   :  { %v1616_v3 = vld [vmem:[#allocation7 + $0xed8] sm:$0xff]  ;;  %v13710_v26 = vcombine.high %v1488_v30, %v1492_v36  ;;  %v13716_v34 = vcombine.low %v1488_v30, %v1492_v36 }
 0x25e   :  { %3467 = vmatpush2.bf16.msra.mxu0 %v13680_v48  ;;  %v13713_v50 = vcombine.high %v1616_v3, %v1620_v5  ;;  %v1612_v48 = vld [vmem:[#allocation7 + $0xeb8] sm:$0xff]  ;;  %v13720_v20 = vcombine.low %v1616_v3, %v1620_v5 }
 0x25f   :  { %3510 = vmatpush2.bf16.msra.mxu1 %v13684_v16  ;;  %3468 = vmatprep.subr.bf16.mxu0 %v13686_v59  ;;  %17679 = vst [vmem:[#allocation251_spill] sm:$0xff] %v13710_v26  ;;  %v1484_v59 = vld [vmem:[#allocation7 + $0xab8] sm:$0xff]  ;;  %17681 = vst [vmem:[#allocation253_spill] sm:$0xff] %v13716_v34 }
 0x260   :  { %3511 = vmatprep.subr.bf16.mxu1 %v13689_v54  ;;  %17680 = vst [vmem:[#allocation252_spill] sm:$0xff] %v13713_v50  ;;  %v1480_v54 = vld [vmem:[#allocation7 + $0xa98] sm:$0xff]  ;;  %17682 = vst [vmem:[#allocation254_spill] sm:$0xff] %v13720_v20 }
 0x261   :  { %v1608_v16 = vld [vmem:[#allocation7 + $0xe98] sm:$0xff]  ;;  %v13722_v22 = vcombine.high %v1480_v54, %v1484_v59  ;;  %v13728_v36 = vcombine.low %v1480_v54, %v1484_v59 }
 0x262   :  { %3469 = vmatpush2.bf16.msra.mxu0 %v13692_v8  ;;  %v13725_v27 = vcombine.high %v1608_v16, %v1612_v48  ;;  %v1604_v8 = vld [vmem:[#allocation7 + $0xe78] sm:$0xff]  ;;  %v13732_v5 = vcombine.low %v1608_v16, %v1612_v48 }
 0x263   :  { %3512 = vmatpush2.bf16.msra.mxu1 %v13696_v18  ;;  %3470 = vmatprep.subr.bf16.mxu0 %v13698_v15  ;;  %17683 = vst [vmem:[#allocation255_spill] sm:$0xff] %v13722_v22  ;;  %v1476_v15 = vld [vmem:[#allocation7 + $0xa78] sm:$0xff]  ;;  %17685 = vst [vmem:[#allocation257_spill] sm:$0xff] %v13728_v36 }
 0x264   :  { %3513 = vmatprep.subr.bf16.mxu1 %v13701_v1  ;;  %17684 = vst [vmem:[#allocation256_spill] sm:$0xff] %v13725_v27  ;;  %v1472_v1 = vld [vmem:[#allocation7 + $0xa58] sm:$0xff]  ;;  %17686 = vst [vmem:[#allocation258_spill] sm:$0xff] %v13732_v5 }
 0x265   :  { %v1600_v18 = vld [vmem:[#allocation7 + $0xe58] sm:$0xff]  ;;  %v13734_v3 = vcombine.high %v1472_v1, %v1476_v15  ;;  %v13740_v59 = vcombine.low %v1472_v1, %v1476_v15 }
 0x266   :  { %3471 = vmatpush2.bf16.msra.mxu0 %v13704_v60  ;;  %v13737_v30 = vcombine.high %v1600_v18, %v1604_v8  ;;  %v1596_v60 = vld [vmem:[#allocation7 + $0xe38] sm:$0xff]  ;;  %v13744_v48 = vcombine.low %v1600_v18, %v1604_v8 }
 0x267   :  { %3514 = vmatpush2.bf16.msra.mxu1 %v13708_v13  ;;  %3472 = vmatprep.subr.bf16.mxu0 %v13710_v26  ;;  %17687 = vst [vmem:[#allocation259_spill] sm:$0xff] %v13734_v3  ;;  %v1468_v26 = vld [vmem:[#allocation7 + $0xa38] sm:$0xff]  ;;  %17689 = vst [vmem:[#allocation261_spill] sm:$0xff] %v13740_v59 }
 0x268   :  { %3515 = vmatprep.subr.bf16.mxu1 %v13713_v50  ;;  %17688 = vst [vmem:[#allocation260_spill] sm:$0xff] %v13737_v30  ;;  %v1464_v50 = vld [vmem:[#allocation7 + $0xa18] sm:$0xff]  ;;  %17690 = vst [vmem:[#allocation262_spill] sm:$0xff] %v13744_v48 }
 0x269   :  { %v1592_v13 = vld [vmem:[#allocation7 + $0xe18] sm:$0xff]  ;;  %v13746_v16 = vcombine.high %v1464_v50, %v1468_v26  ;;  %v13752_v15 = vcombine.low %v1464_v50, %v1468_v26  ;;  %v1101_v26 = vrot.slane %v13211_v10, 6  ;;  %v1107_v50 = vrot.slane %v13213_v33, 6 }
 0x26a   :  { %3473 = vmatpush2.bf16.msra.mxu0 %v13716_v34  ;;  %v13749_v54 = vcombine.high %v1592_v13, %v1596_v60  ;;  %v1328_v34 = vld [vmem:[#allocation7 + $0x5e0] sm:$0xff]  ;;  %v13756_v8 = vcombine.low %v1592_v13, %v1596_v60 }
 0x26b   :  { %3516 = vmatpush2.bf16.msra.mxu1 %v13720_v20  ;;  %3474 = vmatprep.subr.bf16.mxu0 %v13722_v22  ;;  %17691 = vst [vmem:[#allocation263_spill] sm:$0xff] %v13746_v16  ;;  %v1200_v22 = vld [vmem:[#allocation7 + $0x1e0] sm:$0xff]  ;;  %17693 = vst [vmem:[#allocation265_spill] sm:$0xff] %v13752_v15 }
 0x26c   :  { %3517 = vmatprep.subr.bf16.mxu1 %v13725_v27  ;;  %17692 = vst [vmem:[#allocation264_spill] sm:$0xff] %v13749_v54  ;;  %v1196_v27 = vld [vmem:[#allocation7 + $0x1c0] sm:$0xff]  ;;  %17694 = vst [vmem:[#allocation266_spill] sm:$0xff] %v13756_v8 }
 0x26d   :  { %v1324_v20 = vld [vmem:[#allocation7 + $0x5c0] sm:$0xff]  ;;  %v13758_v18 = vcombine.high %v1196_v27, %v1200_v22 }
 0x26e   :  { %3475 = vmatpush2.bf16.msra.mxu0 %v13728_v36  ;;  %v13761_v1 = vcombine.high %v1324_v20, %v1328_v34  ;;  %v13770_v60 = vcombine.low %v1324_v20, %v1328_v34  ;;  %v1308_v20 = vld [vmem:[#allocation7 + $0x540] sm:$0xff] }
 0x26f   :  { %3518 = vmatpush2.bf16.msra.mxu1 %v13732_v5  ;;  %3476 = vmatprep.subr.bf16.mxu0 %v13734_v3  ;;  %17695 = vst [vmem:[#allocation267_spill] sm:$0xff] %v13758_v18  ;;  %v1192_v3 = vld [vmem:[#allocation7 + $0x1a0] sm:$0xff]  ;;  %v13764_v5 = vcombine.low %v1196_v27, %v1200_v22  ;;  %v1100_v22 = vrot.slane %v13145_v4, 6  ;;  %v1106_v27 = vrot.slane %v13153_v49, 6 }
 0x270   :  { %3519 = vmatprep.subr.bf16.mxu1 %v13737_v30  ;;  %17696 = vst [vmem:[#allocation268_spill] sm:$0xff] %v13761_v1  ;;  %v1188_v30 = vld [vmem:[#allocation7 + $0x180] sm:$0xff]  ;;  %17698 = vst [vmem:[#allocation270_spill] sm:$0xff] %v13770_v60 }
 0x271   :  { %17697 = vst [vmem:[#allocation269_spill] sm:$0xff] %v13764_v5  ;;  %v13791_v32 = vsel %vm1096_vm2, %v1106_v27, %v1107_v50  ;;  %v13793_v37 = vcombine.low %v1188_v30, %v1192_v3 }
 0x272   :  { %3477 = vmatpush2.bf16.msra.mxu0 %v13740_v59  ;;  %v1184_v59 = vld [vmem:[#allocation7 + $0x160] sm:$0xff] }
 0x273   :  { %3520 = vmatpush2.bf16.msra.mxu1 %v13744_v48  ;;  %3478 = vmatprep.subr.bf16.mxu0 %v13746_v16  ;;  %v1316_v48 = vld [vmem:[#allocation7 + $0x580] sm:$0xff]  ;;  %17703 = vst [vmem:[#allocation273_spill] sm:$0xff] %v13793_v37 }
 0x274   :  { %3521 = vmatprep.subr.bf16.mxu1 %v13749_v54  ;;  %v1320_v16 = vld [vmem:[#allocation7 + $0x5a0] sm:$0xff] }
 0x275   :  { %v1180_v54 = vld [vmem:[#allocation7 + $0x140] sm:$0xff]  ;;  %v13783_v34 = vcombine.high %v1316_v48, %v1320_v16  ;;  %v13801_v28 = vcombine.low %v1316_v48, %v1320_v16 }
 0x276   :  { %3479 = vmatpush2.bf16.msra.mxu0 %v13752_v15  ;;  %v13780_v15 = vcombine.high %v1188_v30, %v1192_v3  ;;  %v1172_v3 = vld [vmem:[#allocation7 + $0x100] sm:$0xff]  ;;  %v13815_v27 = vcombine.low %v1180_v54, %v1184_v59 }
 0x277   :  { %3522 = vmatpush2.bf16.msra.mxu1 %v13756_v8  ;;  %4814 = vmatprep.subr.bf16.mxu0 %v13758_v18  ;;  %17702 = vst [vmem:[#allocation272_spill] sm:$0xff] %v13783_v34  ;;  %v1312_v8 = vld [vmem:[#allocation7 + $0x560] sm:$0xff]  ;;  %17704 = vst [vmem:[#allocation274_spill] sm:$0xff] %v13801_v28 }
 0x278   :  { %4857 = vmatprep.subr.bf16.mxu1 %v13761_v1  ;;  %17701 = vst [vmem:[#allocation271_spill] sm:$0xff] %v13780_v15  ;;  %v13788_v1 = vsel %vm1096_vm2, %v1100_v22, %v1101_v26  ;;  %v1176_v30 = vld [vmem:[#allocation7 + $0x120] sm:$0xff]  ;;  %17707 = vst [vmem:[#allocation277_spill] sm:$0xff] %v13815_v27 }
 0x279   :  { %3481 = vmatmul.mubr.bf16.vlgmr.msra.gmra.mxu0 %v13151_v0  ;;  %v3224_v18 = vpop.f32.mrf.mxu0  ;;  %v1300_v48 = vld [vmem:[#allocation7 + $0x500] sm:$0xff] }
 0x27a   :  { %3524 = vmatmul.mubr.bf16.vlgmr.msra.gmra.mxu1 %v13160_v53  ;;  %v3267_v36 = vpop.f32.mrf.mxu1  ;;  %4815 = vmatpush1.bf16.msra.mxu0 %v13764_v5  ;;  %v13803_v5 = vcombine.high %v1180_v54, %v1184_v59  ;;  %v1304_v16 = vld [vmem:[#allocation7 + $0x520] sm:$0xff]  ;;  %v13829_v59 = vcombine.low %v1172_v3, %v1176_v30 }
 0x27b   :  { %v13795_v25 = vadd.f32 %v3267_v36, %v3224_v18  ;;  %11066 = vmatprep.mubr.msk.bf16.mxu0 %vm13773_vm1, %v13788_v1  ;;  %4858 = vmatpush1.bf16.msra.mxu1 %v13770_v60  ;;  %v3226_v7 = vpop.f32.mrf.mxu0  ;;  %v13809_v36 = vcombine.high %v1308_v20, %v1312_v8  ;;  %v13833_v54 = vcombine.low %v1300_v48, %v1304_v16 }
 0x27c   :  { %17705 = vst [vmem:[#allocation275_spill] sm:$0xff] %v13803_v5  ;;  %11070 = vmatprep.mubr.msk.bf16.mxu1 %vm13773_vm1, %v13791_v32  ;;  %v3269_v26 = vpop.f32.mrf.mxu1  ;;  %4816 = vmatprep.subr.bf16.mxu0 %v13780_v15  ;;  %v13821_v15 = vcombine.low %v1308_v20, %v1312_v8  ;;  %17711 = vst [vmem:[#allocation281_spill] sm:$0xff] %v13829_v59 }
 0x27d   :  { %17706 = vst [vmem:[#allocation276_spill] sm:$0xff] %v13809_v36  ;;  %v13811_v18 = vadd.f32 %v3269_v26, %v3226_v7  ;;  %4859 = vmatprep.subr.bf16.mxu1 %v13783_v34  ;;  %v3228_v50 = vpop.f32.mrf.mxu0  ;;  %v13823_v7 = vcombine.high %v1172_v3, %v1176_v30  ;;  %v13826_v26 = vcombine.high %v1300_v48, %v1304_v16  ;;  %v1164_v34 = vld [vmem:[#allocation7 + $0xc0] sm:$0xff]  ;;  %17712 = vst [vmem:[#allocation282_spill] sm:$0xff] %v13833_v54 }
 0x27e   :  { %v3271_v22 = vpop.f32.mrf.mxu1  ;;  %4817 = vmatpush1.bf16.msra.mxu0 %v13793_v37  ;;  %17708 = vst [vmem:[#allocation278_spill] sm:$0xff] %v13821_v15  ;;  %v1296_v37 = vld [vmem:[#allocation7 + $0x4e0] sm:$0xff]  ;;  %v13835_v8 = vcombine.high %v1164_v34, %v1168_v12  ;;  %v13841_v3 = vcombine.low %v1164_v34, %v1168_v12 }
 0x27f   :  { %v13817_v60 = vadd.f32 %v3271_v22, %v3228_v50  ;;  %4860 = vmatpush1.bf16.msra.mxu1 %v13801_v28  ;;  %4818 = vmatprep.subr.bf16.mxu0 %v13803_v5  ;;  %17709 = vst [vmem:[#allocation279_spill] sm:$0xff] %v13823_v7  ;;  %17710 = vst [vmem:[#allocation280_spill] sm:$0xff] %v13826_v26  ;;  %v13838_v20 = vcombine.high %v1292_v56, %v1296_v37  ;;  %v1156_v50 = vld [vmem:[#allocation7 + $0x80] sm:$0xff]  ;;  %v1185_v28 = vld [vmem:[#allocation7 + $0x168] sm:$0xff] }
 0x280   :  { %4861 = vmatprep.subr.bf16.mxu1 %v13809_v36  ;;  %17713 = vst [vmem:[#allocation283_spill] sm:$0xff] %v13835_v8  ;;  %v1160_v22 = vld [vmem:[#allocation7 + $0xa0] sm:$0xff]  ;;  %17715 = vst [vmem:[#allocation285_spill] sm:$0xff] %v13841_v3  ;;  %v13845_v30 = vcombine.low %v1292_v56, %v1296_v37 }
 0x281   :  { %17714 = vst [vmem:[#allocation284_spill] sm:$0xff] %v13838_v20  ;;  %v1284_v36 = vld [vmem:[#allocation7 + $0x480] sm:$0xff]  ;;  %v13847_v48 = vcombine.high %v1156_v50, %v1160_v22  ;;  %v13853_v12 = vcombine.low %v1156_v50, %v1160_v22 }
 0x282   :  { %4819 = vmatpush1.bf16.msra.mxu0 %v13815_v27  ;;  %v1288_v5 = vld [vmem:[#allocation7 + $0x4a0] sm:$0xff]  ;;  %17716 = vst [vmem:[#allocation286_spill] sm:$0xff] %v13845_v30 }
 0x283   :  { %4862 = vmatpush1.bf16.msra.mxu1 %v13821_v15  ;;  %4820 = vmatprep.subr.bf16.mxu0 %v13823_v7  ;;  %17717 = vst [vmem:[#allocation287_spill] sm:$0xff] %v13847_v48  ;;  %v13850_v16 = vcombine.high %v1284_v36, %v1288_v5  ;;  %v1152_v7 = vld [vmem:[#allocation7 + $0x60] sm:$0xff]  ;;  %17719 = vst [vmem:[#allocation289_spill] sm:$0xff] %v13853_v12  ;;  %v13857_v56 = vcombine.low %v1284_v36, %v1288_v5 }
 0x284   :  { %4863 = vmatprep.subr.bf16.mxu1 %v13826_v26  ;;  %v1148_v26 = vld [vmem:[#allocation7 + $0x40] sm:$0xff] }
 0x285   :  { %17718 = vst [vmem:[#allocation288_spill] sm:$0xff] %v13850_v16  ;;  %v1276_v15 = vld [vmem:[#allocation7 + $0x440] sm:$0xff]  ;;  %17720 = vst [vmem:[#allocation290_spill] sm:$0xff] %v13857_v56  ;;  %v13859_v37 = vcombine.high %v1148_v26, %v1152_v7  ;;  %v13865_v50 = vcombine.low %v1148_v26, %v1152_v7 }
 0x286   :  { %4821 = vmatpush1.bf16.msra.mxu0 %v13829_v59  ;;  %v1280_v27 = vld [vmem:[#allocation7 + $0x460] sm:$0xff] }
 0x287   :  { %4864 = vmatpush1.bf16.msra.mxu1 %v13833_v54  ;;  %4822 = vmatprep.subr.bf16.mxu0 %v13835_v8  ;;  %17721 = vst [vmem:[#allocation291_spill] sm:$0xff] %v13859_v37  ;;  %v13862_v34 = vcombine.high %v1276_v15, %v1280_v27  ;;  %v1144_v8 = vld [vmem:[#allocation7 + $0x20] sm:$0xff]  ;;  %17723 = vst [vmem:[#allocation293_spill] sm:$0xff] %v13865_v50  ;;  %v13869_v5 = vcombine.low %v1276_v15, %v1280_v27 }
 0x288   :  { %4865 = vmatprep.subr.bf16.mxu1 %v13838_v20  ;;  %v1140_v20 = vld [vmem:[#allocation7] sm:$0xff] }
 0x289   :  { %17722 = vst [vmem:[#allocation292_spill] sm:$0xff] %v13862_v34  ;;  %v1268_v54 = vld [vmem:[#allocation7 + $0x400] sm:$0xff]  ;;  %17724 = vst [vmem:[#allocation294_spill] sm:$0xff] %v13869_v5  ;;  %v13871_v36 = vcombine.high %v1140_v20, %v1144_v8  ;;  %v13877_v7 = vcombine.low %v1140_v20, %v1144_v8 }
 0x28a   :  { %4823 = vmatpush1.bf16.msra.mxu0 %v13841_v3  ;;  %v1272_v59 = vld [vmem:[#allocation7 + $0x420] sm:$0xff] }
 0x28b   :  { %4866 = vmatpush1.bf16.msra.mxu1 %v13845_v30  ;;  %4824 = vmatprep.subr.bf16.mxu0 %v13847_v48  ;;  %17725 = vst [vmem:[#allocation295_spill] sm:$0xff] %v13871_v36  ;;  %v13874_v22 = vcombine.high %v1268_v54, %v1272_v59  ;;  %v1264_v48 = vld [vmem:[#allocation7 + $0x3e0] sm:$0xff]  ;;  %17727 = vst [vmem:[#allocation297_spill] sm:$0xff] %v13877_v7  ;;  %v13881_v15 = vcombine.low %v1268_v54, %v1272_v59 }
 0x28c   :  { %4867 = vmatprep.subr.bf16.mxu1 %v13850_v16  ;;  %v1260_v16 = vld [vmem:[#allocation7 + $0x3c0] sm:$0xff] }
 0x28d   :  { %17726 = vst [vmem:[#allocation296_spill] sm:$0xff] %v13874_v22  ;;  %v1388_v30 = vld [vmem:[#allocation7 + $0x7c0] sm:$0xff]  ;;  %17728 = vst [vmem:[#allocation298_spill] sm:$0xff] %v13881_v15  ;;  %v13883_v27 = vcombine.high %v1260_v16, %v1264_v48  ;;  %v13889_v8 = vcombine.low %v1260_v16, %v1264_v48 }
 0x28e   :  { %4825 = vmatpush1.bf16.msra.mxu0 %v13853_v12  ;;  %v1392_v3 = vld [vmem:[#allocation7 + $0x7e0] sm:$0xff] }
 0x28f   :  { %4868 = vmatpush1.bf16.msra.mxu1 %v13857_v56  ;;  %4826 = vmatprep.subr.bf16.mxu0 %v13859_v37  ;;  %17729 = vst [vmem:[#allocation299_spill] sm:$0xff] %v13883_v27  ;;  %v13886_v26 = vcombine.high %v1388_v30, %v1392_v3  ;;  %v1256_v37 = vld [vmem:[#allocation7 + $0x3a0] sm:$0xff]  ;;  %17731 = vst [vmem:[#allocation301_spill] sm:$0xff] %v13889_v8  ;;  %v13893_v59 = vcombine.low %v1388_v30, %v1392_v3 }
 0x290   :  { %4869 = vmatprep.subr.bf16.mxu1 %v13862_v34  ;;  %v1252_v34 = vld [vmem:[#allocation7 + $0x380] sm:$0xff] }
 0x291   :  { %17730 = vst [vmem:[#allocation300_spill] sm:$0xff] %v13886_v26  ;;  %v1380_v56 = vld [vmem:[#allocation7 + $0x780] sm:$0xff]  ;;  %17732 = vst [vmem:[#allocation302_spill] sm:$0xff] %v13893_v59  ;;  %v13895_v54 = vcombine.high %v1252_v34, %v1256_v37  ;;  %v13901_v48 = vcombine.low %v1252_v34, %v1256_v37 }
 0x292   :  { %4827 = vmatpush1.bf16.msra.mxu0 %v13865_v50  ;;  %v1384_v12 = vld [vmem:[#allocation7 + $0x7a0] sm:$0xff] }
 0x293   :  { %4870 = vmatpush1.bf16.msra.mxu1 %v13869_v5  ;;  %4828 = vmatprep.subr.bf16.mxu0 %v13871_v36  ;;  %17733 = vst [vmem:[#allocation303_spill] sm:$0xff] %v13895_v54  ;;  %v13898_v20 = vcombine.high %v1380_v56, %v1384_v12  ;;  %v1248_v36 = vld [vmem:[#allocation7 + $0x360] sm:$0xff]  ;;  %17735 = vst [vmem:[#allocation305_spill] sm:$0xff] %v13901_v48  ;;  %v13905_v3 = vcombine.low %v1380_v56, %v1384_v12 }
 0x294   :  { %4871 = vmatprep.subr.bf16.mxu1 %v13874_v22  ;;  %v1244_v22 = vld [vmem:[#allocation7 + $0x340] sm:$0xff] }
 0x295   :  { %17734 = vst [vmem:[#allocation304_spill] sm:$0xff] %v13898_v20  ;;  %v1372_v5 = vld [vmem:[#allocation7 + $0x740] sm:$0xff]  ;;  %17736 = vst [vmem:[#allocation306_spill] sm:$0xff] %v13905_v3  ;;  %v13907_v30 = vcombine.high %v1244_v22, %v1248_v36  ;;  %v13913_v37 = vcombine.low %v1244_v22, %v1248_v36 }
 0x296   :  { %4829 = vmatpush1.bf16.msra.mxu0 %v13877_v7  ;;  %v1376_v50 = vld [vmem:[#allocation7 + $0x760] sm:$0xff] }
 0x297   :  { %4872 = vmatpush1.bf16.msra.mxu1 %v13881_v15  ;;  %4830 = vmatprep.subr.bf16.mxu0 %v13883_v27  ;;  %17737 = vst [vmem:[#allocation307_spill] sm:$0xff] %v13907_v30  ;;  %v13910_v16 = vcombine.high %v1372_v5, %v1376_v50  ;;  %v1240_v27 = vld [vmem:[#allocation7 + $0x320] sm:$0xff]  ;;  %17739 = vst [vmem:[#allocation309_spill] sm:$0xff] %v13913_v37  ;;  %v13917_v12 = vcombine.low %v1372_v5, %v1376_v50 }
 0x298   :  { %4873 = vmatprep.subr.bf16.mxu1 %v13886_v26  ;;  %v1236_v26 = vld [vmem:[#allocation7 + $0x300] sm:$0xff] }
 0x299   :  { %17738 = vst [vmem:[#allocation308_spill] sm:$0xff] %v13910_v16  ;;  %v1364_v15 = vld [vmem:[#allocation7 + $0x700] sm:$0xff]  ;;  %17740 = vst [vmem:[#allocation310_spill] sm:$0xff] %v13917_v12  ;;  %v13919_v56 = vcombine.high %v1236_v26, %v1240_v27  ;;  %v13925_v36 = vcombine.low %v1236_v26, %v1240_v27 }
 0x29a   :  { %4831 = vmatpush2.bf16.msra.mxu0 %v13889_v8  ;;  %v1368_v7 = vld [vmem:[#allocation7 + $0x720] sm:$0xff] }
 0x29b   :  { %4874 = vmatpush2.bf16.msra.mxu1 %v13893_v59  ;;  %4832 = vmatprep.subr.bf16.mxu0 %v13895_v54  ;;  %17741 = vst [vmem:[#allocation311_spill] sm:$0xff] %v13919_v56  ;;  %v13922_v34 = vcombine.high %v1364_v15, %v1368_v7  ;;  %v1232_v54 = vld [vmem:[#allocation7 + $0x2e0] sm:$0xff]  ;;  %17743 = vst [vmem:[#allocation313_spill] sm:$0xff] %v13925_v36  ;;  %v13929_v50 = vcombine.low %v1364_v15, %v1368_v7 }
 0x29c   :  { %4875 = vmatprep.subr.bf16.mxu1 %v13898_v20  ;;  %v1228_v20 = vld [vmem:[#allocation7 + $0x2c0] sm:$0xff] }
 0x29d   :  { %17742 = vst [vmem:[#allocation312_spill] sm:$0xff] %v13922_v34  ;;  %v1356_v59 = vld [vmem:[#allocation7 + $0x6c0] sm:$0xff]  ;;  %17744 = vst [vmem:[#allocation314_spill] sm:$0xff] %v13929_v50  ;;  %v13931_v5 = vcombine.high %v1228_v20, %v1232_v54  ;;  %v13937_v27 = vcombine.low %v1228_v20, %v1232_v54 }
 0x29e   :  { %4833 = vmatpush2.bf16.msra.mxu0 %v13901_v48  ;;  %v1360_v8 = vld [vmem:[#allocation7 + $0x6e0] sm:$0xff] }
 0x29f   :  { %4876 = vmatpush2.bf16.msra.mxu1 %v13905_v3  ;;  %4834 = vmatprep.subr.bf16.mxu0 %v13907_v30  ;;  %17745 = vst [vmem:[#allocation315_spill] sm:$0xff] %v13931_v5  ;;  %v13934_v22 = vcombine.high %v1356_v59, %v1360_v8  ;;  %v1224_v30 = vld [vmem:[#allocation7 + $0x2a0] sm:$0xff]  ;;  %17747 = vst [vmem:[#allocation317_spill] sm:$0xff] %v13937_v27  ;;  %v13941_v7 = vcombine.low %v1356_v59, %v1360_v8 }
 0x2a0   :  { %4877 = vmatprep.subr.bf16.mxu1 %v13910_v16  ;;  %v1220_v16 = vld [vmem:[#allocation7 + $0x280] sm:$0xff] }
 0x2a1   :  { %17746 = vst [vmem:[#allocation316_spill] sm:$0xff] %v13934_v22  ;;  %v1348_v3 = vld [vmem:[#allocation7 + $0x680] sm:$0xff]  ;;  %17748 = vst [vmem:[#allocation318_spill] sm:$0xff] %v13941_v7  ;;  %v13943_v15 = vcombine.high %v1220_v16, %v1224_v30  ;;  %v13949_v54 = vcombine.low %v1220_v16, %v1224_v30 }
 0x2a2   :  { %4835 = vmatpush2.bf16.msra.mxu0 %v13913_v37  ;;  %v1352_v48 = vld [vmem:[#allocation7 + $0x6a0] sm:$0xff] }
 0x2a3   :  { %4878 = vmatpush2.bf16.msra.mxu1 %v13917_v12  ;;  %4836 = vmatprep.subr.bf16.mxu0 %v13919_v56  ;;  %17749 = vst [vmem:[#allocation319_spill] sm:$0xff] %v13943_v15  ;;  %v13946_v26 = vcombine.high %v1348_v3, %v1352_v48  ;;  %v1216_v56 = vld [vmem:[#allocation7 + $0x260] sm:$0xff]  ;;  %17751 = vst [vmem:[#allocation321_spill] sm:$0xff] %v13949_v54  ;;  %v13953_v8 = vcombine.low %v1348_v3, %v1352_v48 }
 0x2a4   :  { %4879 = vmatprep.subr.bf16.mxu1 %v13922_v34  ;;  %v1212_v34 = vld [vmem:[#allocation7 + $0x240] sm:$0xff] }
 0x2a5   :  { %17750 = vst [vmem:[#allocation320_spill] sm:$0xff] %v13946_v26  ;;  %v1340_v12 = vld [vmem:[#allocation7 + $0x640] sm:$0xff]  ;;  %17752 = vst [vmem:[#allocation322_spill] sm:$0xff] %v13953_v8  ;;  %v13955_v59 = vcombine.high %v1212_v34, %v1216_v56  ;;  %v13961_v30 = vcombine.low %v1212_v34, %v1216_v56  ;;  %v1098_v34 = vrot.slane %v13198_v57, 6 }
 0x2a6   :  { %4837 = vmatpush2.bf16.msra.mxu0 %v13925_v36  ;;  %v1344_v37 = vld [vmem:[#allocation7 + $0x660] sm:$0xff] }
 0x2a7   :  { %4880 = vmatpush2.bf16.msra.mxu1 %v13929_v50  ;;  %4838 = vmatprep.subr.bf16.mxu0 %v13931_v5  ;;  %17753 = vst [vmem:[#allocation323_spill] sm:$0xff] %v13955_v59  ;;  %v13958_v20 = vcombine.high %v1340_v12, %v1344_v37  ;;  %v1208_v5 = vld [vmem:[#allocation7 + $0x220] sm:$0xff]  ;;  %17755 = vst [vmem:[#allocation325_spill] sm:$0xff] %v13961_v30  ;;  %v13965_v48 = vcombine.low %v1340_v12, %v1344_v37 }
 0x2a8   :  { %4881 = vmatprep.subr.bf16.mxu1 %v13934_v22  ;;  %v1204_v22 = vld [vmem:[#allocation7 + $0x200] sm:$0xff] }
 0x2a9   :  { %17754 = vst [vmem:[#allocation324_spill] sm:$0xff] %v13958_v20  ;;  %v1332_v50 = vld [vmem:[#allocation7 + $0x600] sm:$0xff]  ;;  %17756 = vst [vmem:[#allocation326_spill] sm:$0xff] %v13965_v48  ;;  %v13967_v3 = vcombine.high %v1204_v22, %v1208_v5  ;;  %v13973_v56 = vcombine.low %v1204_v22, %v1208_v5  ;;  %v1097_v5 = vrot.slane %v13151_v0, 6 }
 0x2aa   :  { %4839 = vmatpush2.bf16.msra.mxu0 %v13937_v27  ;;  %v1336_v36 = vld [vmem:[#allocation7 + $0x620] sm:$0xff]  ;;  %v1329_v27 = vld [vmem:[#allocation7 + $0x5e8] sm:$0xff] }
 0x2ab   :  { %4882 = vmatpush2.bf16.msra.mxu1 %v13941_v7  ;;  %4840 = vmatprep.subr.bf16.mxu0 %v13943_v15  ;;  %17757 = vst [vmem:[#allocation327_spill] sm:$0xff] %v13967_v3  ;;  %v13970_v16 = vcombine.high %v1332_v50, %v1336_v36  ;;  %v1201_v15 = vld [vmem:[#allocation7 + $0x1e8] sm:$0xff]  ;;  %17759 = vst [vmem:[#allocation329_spill] sm:$0xff] %v13973_v56  ;;  %v13977_v37 = vcombine.low %v1332_v50, %v1336_v36 }
 0x2ac   :  { %4883 = vmatprep.subr.bf16.mxu1 %v13946_v26  ;;  %v1197_v26 = vld [vmem:[#allocation7 + $0x1c8] sm:$0xff] }
 0x2ad   :  { %17758 = vst [vmem:[#allocation328_spill] sm:$0xff] %v13970_v16  ;;  %v1325_v7 = vld [vmem:[#allocation7 + $0x5c8] sm:$0xff]  ;;  %17760 = vst [vmem:[#allocation330_spill] sm:$0xff] %v13977_v37  ;;  %v13979_v12 = vcombine.high %v1197_v26, %v1201_v15  ;;  %v13988_v22 = vcombine.low %v1197_v26, %v1201_v15 }
 0x2ae   :  { %4841 = vmatpush2.bf16.msra.mxu0 %v13949_v54  ;;  %v1317_v36 = vld [vmem:[#allocation7 + $0x588] sm:$0xff]  ;;  %v13997_v54 = vpop.f32.mrf.mxu1 }
 0x2af   :  { %4884 = vmatpush2.bf16.msra.mxu1 %v13953_v8  ;;  %4842 = vmatprep.subr.bf16.mxu0 %v13955_v59  ;;  %17761 = vst [vmem:[#allocation331_spill] sm:$0xff] %v13979_v12  ;;  %v1104_v59 = vrot.slane %v13206_v62, 6  ;;  %v1189_v8 = vld [vmem:[#allocation7 + $0x188] sm:$0xff]  ;;  %17763 = vst [vmem:[#allocation333_spill] sm:$0xff] %v13988_v22 }
 0x2b0   :  { %4885 = vmatprep.subr.bf16.mxu1 %v13958_v20  ;;  %v13983_v20 = vcombine.high %v1325_v7, %v1329_v27  ;;  %v1321_v50 = vld [vmem:[#allocation7 + $0x5a8] sm:$0xff] }
 0x2b1   :  { %v1181_v26 = vld [vmem:[#allocation7 + $0x148] sm:$0xff] }
 0x2b2   :  { %4843 = vmatpush2.bf16.msra.mxu0 %v13961_v30  ;;  %17762 = vst [vmem:[#allocation332_spill] sm:$0xff] %v13983_v20  ;;  %v1193_v30 = vld [vmem:[#allocation7 + $0x1a8] sm:$0xff]  ;;  %v14027_v11 = vcombine.high %v1181_v26, %v1185_v28  ;;  %v14039_v23 = vcombine.low %v1181_v26, %v1185_v28 }
 0x2b3   :  { %4886 = vmatpush2.bf16.msra.mxu1 %v13965_v48  ;;  %4844 = vmatprep.subr.bf16.mxu0 %v13967_v3  ;;  %v13990_v3 = vpop.f32.mrf.mxu0  ;;  %v13995_v48 = vcombine.low %v1325_v7, %v1329_v27  ;;  %v14003_v15 = vcombine.high %v1189_v8, %v1193_v30  ;;  %v14011_v27 = vcombine.high %v1317_v36, %v1321_v50  ;;  %v1309_v7 = vld [vmem:[#allocation7 + $0x548] sm:$0xff] }
 0x2b4   :  { %4887 = vmatprep.subr.bf16.mxu1 %v13970_v16  ;;  %v1103_v16 = vrot.slane %v13160_v53, 6  ;;  %17769 = vst [vmem:[#allocation339_spill] sm:$0xff] %v14027_v11  ;;  %17771 = vst [vmem:[#allocation341_spill] sm:$0xff] %v14039_v23  ;;  %v1157_v26 = vld [vmem:[#allocation7 + $0x88] sm:$0xff] }
 0x2b5   :  { %17764 = vst [vmem:[#allocation334_spill] sm:$0xff] %v13995_v48  ;;  %17765 = vst [vmem:[#allocation335_spill] sm:$0xff] %v14003_v15 }
 0x2b6   :  { %4845 = vmatpush2.bf16.msra.mxu0 %v13973_v56  ;;  %v14000_v56 = vsel %vm1096_vm2, %v1097_v5, %v1098_v34  ;;  %17766 = vst [vmem:[#allocation336_spill] sm:$0xff] %v14011_v27  ;;  %v14017_v5 = vcombine.low %v1189_v8, %v1193_v30  ;;  %v1173_v8 = vld [vmem:[#allocation7 + $0x108] sm:$0xff] }
 0x2b7   :  { %4888 = vmatpush2.bf16.msra.mxu1 %v13977_v37  ;;  %4900 = vmatprep.subr.bf16.mxu0 %v13979_v12  ;;  %v14009_v12 = vsel %vm1096_vm2, %v1103_v16, %v1104_v59  ;;  %v1313_v37 = vld [vmem:[#allocation7 + $0x568] sm:$0xff]  ;;  %v14025_v16 = vcombine.low %v1317_v36, %v1321_v50 }
 0x2b8   :  { %4943 = vmatprep.subr.bf16.mxu1 %v13983_v20  ;;  %17767 = vst [vmem:[#allocation337_spill] sm:$0xff] %v14017_v5  ;;  %v1177_v30 = vld [vmem:[#allocation7 + $0x128] sm:$0xff] }
 0x2b9   :  { %v3310_v24 = vpop.f32.mrf.mxu0  ;;  %11068 = vmatmul.mubr.msk.bf16.vlgmr.msra.gmra.mxu0 %vm13773_vm1, %v14000_v56  ;;  %17768 = vst [vmem:[#allocation338_spill] sm:$0xff] %v14025_v16  ;;  %v1301_v36 = vld [vmem:[#allocation7 + $0x508] sm:$0xff] }
 0x2ba   :  { %v3353_v34 = vpop.f32.mrf.mxu1  ;;  %11072 = vmatmul.mubr.msk.bf16.vlgmr.msra.gmra.mxu1 %vm13773_vm1, %v14009_v12  ;;  %4901 = vmatpush1.bf16.msra.mxu0 %v13988_v22  ;;  %v1305_v50 = vld [vmem:[#allocation7 + $0x528] sm:$0xff] }
 0x2bb   :  { %v14019_v20 = vadd.f32 %v3353_v34, %v3310_v24  ;;  %11074 = vmatprep.mubr.msk.bf16.mxu0 %vm13773_vm1, %v13788_v1  ;;  %4944 = vmatpush1.bf16.msra.mxu1 %v13995_v48  ;;  %v3312_v59 = vpop.f32.mrf.mxu0  ;;  %v14033_v24 = vcombine.high %v1309_v7, %v1313_v37  ;;  %v14057_v28 = vcombine.low %v1301_v36, %v1305_v50 }
 0x2bc   :  { %11078 = vmatprep.mubr.msk.bf16.mxu1 %vm13773_vm1, %v13791_v32  ;;  %v3355_v22 = vpop.f32.mrf.mxu1  ;;  %4902 = vmatprep.subr.bf16.mxu0 %v14003_v15  ;;  %v14045_v15 = vcombine.low %v1309_v7, %v1313_v37  ;;  %v1161_v7 = vld [vmem:[#allocation7 + $0xa8] sm:$0xff] }
 0x2bd   :  { %17770 = vst [vmem:[#allocation340_spill] sm:$0xff] %v14033_v24  ;;  %v14035_v34 = vadd.f32 %v3355_v22, %v3312_v59  ;;  %v3314_v61 = vpop.f32.mrf.mxu0  ;;  %4945 = vmatprep.subr.bf16.mxu1 %v14011_v27  ;;  %v14047_v22 = vcombine.high %v1173_v8, %v1177_v30  ;;  %v14050_v59 = vcombine.high %v1301_v36, %v1305_v50  ;;  %v1165_v27 = vld [vmem:[#allocation7 + $0xc8] sm:$0xff]  ;;  %17776 = vst [vmem:[#allocation346_spill] sm:$0xff] %v14057_v28 }
 0x2be   :  { %v3357_v48 = vpop.f32.mrf.mxu1  ;;  %4903 = vmatpush1.bf16.msra.mxu0 %v14017_v5  ;;  %17772 = vst [vmem:[#allocation342_spill] sm:$0xff] %v14045_v15  ;;  %v1297_v5 = vld [vmem:[#allocation7 + $0x4e8] sm:$0xff]  ;;  %v14071_v36 = vcombine.high %v1157_v26, %v1161_v7 }
 0x2bf   :  { %v14041_v38 = vadd.f32 %v3357_v48, %v3314_v61  ;;  %4946 = vmatpush1.bf16.msra.mxu1 %v14025_v16  ;;  %4904 = vmatprep.subr.bf16.mxu0 %v14027_v11  ;;  %17773 = vst [vmem:[#allocation343_spill] sm:$0xff] %v14047_v22  ;;  %17774 = vst [vmem:[#allocation344_spill] sm:$0xff] %v14050_v59  ;;  %v14053_v61 = vcombine.low %v1173_v8, %v1177_v30  ;;  %v1289_v11 = vld [vmem:[#allocation7 + $0x4a8] sm:$0xff] }
 0x2c0   :  { %4947 = vmatprep.subr.bf16.mxu1 %v14033_v24  ;;  %v14059_v48 = vcombine.high %v1165_v27, %v1169_v14  ;;  %v14062_v37 = vcombine.high %v1293_v44, %v1297_v5  ;;  %v1285_v24 = vld [vmem:[#allocation7 + $0x488] sm:$0xff]  ;;  %v14065_v8 = vcombine.low %v1165_v27, %v1169_v14  ;;  %v14069_v30 = vcombine.low %v1293_v44, %v1297_v5 }
 0x2c1   :  { %17775 = vst [vmem:[#allocation345_spill] sm:$0xff] %v14053_v61  ;;  %17781 = vst [vmem:[#allocation351_spill] sm:$0xff] %v14071_v36  ;;  %v14074_v50 = vcombine.high %v1285_v24, %v1289_v11  ;;  %v14077_v14 = vcombine.low %v1157_v26, %v1161_v7  ;;  %v14081_v44 = vcombine.low %v1285_v24, %v1289_v11 }
 0x2c2   :  { %4905 = vmatpush1.bf16.msra.mxu0 %v14039_v23  ;;  %17777 = vst [vmem:[#allocation347_spill] sm:$0xff] %v14059_v48  ;;  %17778 = vst [vmem:[#allocation348_spill] sm:$0xff] %v14062_v37  ;;  %v1281_v23 = vld [vmem:[#allocation7 + $0x468] sm:$0xff] }
 0x2c3   :  { %4948 = vmatpush1.bf16.msra.mxu1 %v14045_v15  ;;  %4906 = vmatprep.subr.bf16.mxu0 %v14047_v22  ;;  %17779 = vst [vmem:[#allocation349_spill] sm:$0xff] %v14065_v8  ;;  %17780 = vst [vmem:[#allocation350_spill] sm:$0xff] %v14069_v30  ;;  %v1153_v22 = vld [vmem:[#allocation7 + $0x68] sm:$0xff] }
 0x2c4   :  { %4949 = vmatprep.subr.bf16.mxu1 %v14050_v59  ;;  %17782 = vst [vmem:[#allocation352_spill] sm:$0xff] %v14074_v50  ;;  %v1149_v59 = vld [vmem:[#allocation7 + $0x48] sm:$0xff]  ;;  %17783 = vst [vmem:[#allocation353_spill] sm:$0xff] %v14077_v14 }
 0x2c5   :  { %v1277_v15 = vld [vmem:[#allocation7 + $0x448] sm:$0xff]  ;;  %17784 = vst [vmem:[#allocation354_spill] sm:$0xff] %v14081_v44  ;;  %v14083_v27 = vcombine.high %v1149_v59, %v1153_v22  ;;  %v14089_v26 = vcombine.low %v1149_v59, %v1153_v22 }
 0x2c6   :  { %4907 = vmatpush1.bf16.msra.mxu0 %v14053_v61  ;;  %v14086_v5 = vcombine.high %v1277_v15, %v1281_v23  ;;  %v1273_v61 = vld [vmem:[#allocation7 + $0x428] sm:$0xff]  ;;  %v14093_v11 = vcombine.low %v1277_v15, %v1281_v23 }
 0x2c7   :  { %4950 = vmatpush1.bf16.msra.mxu1 %v14057_v28  ;;  %4908 = vmatprep.subr.bf16.mxu0 %v14059_v48  ;;  %17785 = vst [vmem:[#allocation355_spill] sm:$0xff] %v14083_v27  ;;  %v1145_v48 = vld [vmem:[#allocation7 + $0x28] sm:$0xff]  ;;  %17787 = vst [vmem:[#allocation357_spill] sm:$0xff] %v14089_v26 }
 0x2c8   :  { %4951 = vmatprep.subr.bf16.mxu1 %v14062_v37  ;;  %17786 = vst [vmem:[#allocation356_spill] sm:$0xff] %v14086_v5  ;;  %v1141_v37 = vld [vmem:[#allocation7 + $0x8] sm:$0xff]  ;;  %17788 = vst [vmem:[#allocation358_spill] sm:$0xff] %v14093_v11 }
 0x2c9   :  { %v1269_v28 = vld [vmem:[#allocation7 + $0x408] sm:$0xff]  ;;  %v14095_v24 = vcombine.high %v1141_v37, %v1145_v48  ;;  %v14101_v22 = vcombine.low %v1141_v37, %v1145_v48 }
 0x2ca   :  { %4909 = vmatpush1.bf16.msra.mxu0 %v14065_v8  ;;  %v14098_v7 = vcombine.high %v1269_v28, %v1273_v61  ;;  %v1393_v8 = vld [vmem:[#allocation7 + $0x7e8] sm:$0xff]  ;;  %v14105_v23 = vcombine.low %v1269_v28, %v1273_v61 }
 0x2cb   :  { %4952 = vmatpush1.bf16.msra.mxu1 %v14069_v30  ;;  %4910 = vmatprep.subr.bf16.mxu0 %v14071_v36  ;;  %17789 = vst [vmem:[#allocation359_spill] sm:$0xff] %v14095_v24  ;;  %v1265_v36 = vld [vmem:[#allocation7 + $0x3e8] sm:$0xff]  ;;  %17791 = vst [vmem:[#allocation361_spill] sm:$0xff] %v14101_v22 }
 0x2cc   :  { %4953 = vmatprep.subr.bf16.mxu1 %v14074_v50  ;;  %17790 = vst [vmem:[#allocation360_spill] sm:$0xff] %v14098_v7  ;;  %v1261_v50 = vld [vmem:[#allocation7 + $0x3c8] sm:$0xff]  ;;  %17792 = vst [vmem:[#allocation362_spill] sm:$0xff] %v14105_v23 }
 0x2cd   :  { %v1389_v30 = vld [vmem:[#allocation7 + $0x7c8] sm:$0xff]  ;;  %v14107_v15 = vcombine.high %v1261_v50, %v1265_v36  ;;  %v14113_v48 = vcombine.low %v1261_v50, %v1265_v36 }
 0x2ce   :  { %4911 = vmatpush1.bf16.msra.mxu0 %v14077_v14  ;;  %v14110_v59 = vcombine.high %v1389_v30, %v1393_v8  ;;  %v1385_v14 = vld [vmem:[#allocation7 + $0x7a8] sm:$0xff]  ;;  %v14117_v61 = vcombine.low %v1389_v30, %v1393_v8 }
 0x2cf   :  { %4954 = vmatpush1.bf16.msra.mxu1 %v14081_v44  ;;  %4912 = vmatprep.subr.bf16.mxu0 %v14083_v27  ;;  %17793 = vst [vmem:[#allocation363_spill] sm:$0xff] %v14107_v15  ;;  %v1257_v27 = vld [vmem:[#allocation7 + $0x3a8] sm:$0xff]  ;;  %17795 = vst [vmem:[#allocation365_spill] sm:$0xff] %v14113_v48 }
 0x2d0   :  { %4955 = vmatprep.subr.bf16.mxu1 %v14086_v5  ;;  %17794 = vst [vmem:[#allocation364_spill] sm:$0xff] %v14110_v59  ;;  %v1253_v5 = vld [vmem:[#allocation7 + $0x388] sm:$0xff]  ;;  %17796 = vst [vmem:[#allocation366_spill] sm:$0xff] %v14117_v61 }
 0x2d1   :  { %v1381_v44 = vld [vmem:[#allocation7 + $0x788] sm:$0xff]  ;;  %v14119_v28 = vcombine.high %v1253_v5, %v1257_v27  ;;  %v14125_v36 = vcombine.low %v1253_v5, %v1257_v27 }
 0x2d2   :  { %4913 = vmatpush1.bf16.msra.mxu0 %v14089_v26  ;;  %v14122_v37 = vcombine.high %v1381_v44, %v1385_v14  ;;  %v1377_v26 = vld [vmem:[#allocation7 + $0x768] sm:$0xff]  ;;  %v14129_v8 = vcombine.low %v1381_v44, %v1385_v14 }
 0x2d3   :  { %4956 = vmatpush1.bf16.msra.mxu1 %v14093_v11  ;;  %4914 = vmatprep.subr.bf16.mxu0 %v14095_v24  ;;  %17797 = vst [vmem:[#allocation367_spill] sm:$0xff] %v14119_v28  ;;  %v1249_v24 = vld [vmem:[#allocation7 + $0x368] sm:$0xff]  ;;  %17799 = vst [vmem:[#allocation369_spill] sm:$0xff] %v14125_v36 }
 0x2d4   :  { %4957 = vmatprep.subr.bf16.mxu1 %v14098_v7  ;;  %17798 = vst [vmem:[#allocation368_spill] sm:$0xff] %v14122_v37  ;;  %v1245_v7 = vld [vmem:[#allocation7 + $0x348] sm:$0xff]  ;;  %17800 = vst [vmem:[#allocation370_spill] sm:$0xff] %v14129_v8 }
 0x2d5   :  { %v1373_v11 = vld [vmem:[#allocation7 + $0x748] sm:$0xff]  ;;  %v14131_v30 = vcombine.high %v1245_v7, %v1249_v24  ;;  %v14137_v27 = vcombine.low %v1245_v7, %v1249_v24 }
 0x2d6   :  { %4915 = vmatpush1.bf16.msra.mxu0 %v14101_v22  ;;  %v14134_v50 = vcombine.high %v1373_v11, %v1377_v26  ;;  %v1369_v22 = vld [vmem:[#allocation7 + $0x728] sm:$0xff]  ;;  %v14141_v14 = vcombine.low %v1373_v11, %v1377_v26 }
 0x2d7   :  { %4958 = vmatpush1.bf16.msra.mxu1 %v14105_v23  ;;  %4916 = vmatprep.subr.bf16.mxu0 %v14107_v15  ;;  %17801 = vst [vmem:[#allocation371_spill] sm:$0xff] %v14131_v30  ;;  %v1241_v15 = vld [vmem:[#allocation7 + $0x328] sm:$0xff]  ;;  %17803 = vst [vmem:[#allocation373_spill] sm:$0xff] %v14137_v27 }
 0x2d8   :  { %4959 = vmatprep.subr.bf16.mxu1 %v14110_v59  ;;  %17802 = vst [vmem:[#allocation372_spill] sm:$0xff] %v14134_v50  ;;  %v1237_v59 = vld [vmem:[#allocation7 + $0x308] sm:$0xff]  ;;  %17804 = vst [vmem:[#allocation374_spill] sm:$0xff] %v14141_v14 }
 0x2d9   :  { %v1365_v23 = vld [vmem:[#allocation7 + $0x708] sm:$0xff]  ;;  %v14143_v44 = vcombine.high %v1237_v59, %v1241_v15  ;;  %v14149_v24 = vcombine.low %v1237_v59, %v1241_v15 }
 0x2da   :  { %4917 = vmatpush2.bf16.msra.mxu0 %v14113_v48  ;;  %v14146_v5 = vcombine.high %v1365_v23, %v1369_v22  ;;  %v1361_v48 = vld [vmem:[#allocation7 + $0x6e8] sm:$0xff]  ;;  %v14153_v26 = vcombine.low %v1365_v23, %v1369_v22 }
 0x2db   :  { %4960 = vmatpush2.bf16.msra.mxu1 %v14117_v61  ;;  %4918 = vmatprep.subr.bf16.mxu0 %v14119_v28  ;;  %17805 = vst [vmem:[#allocation375_spill] sm:$0xff] %v14143_v44  ;;  %v1233_v28 = vld [vmem:[#allocation7 + $0x2e8] sm:$0xff]  ;;  %17807 = vst [vmem:[#allocation377_spill] sm:$0xff] %v14149_v24 }
 0x2dc   :  { %4961 = vmatprep.subr.bf16.mxu1 %v14122_v37  ;;  %17806 = vst [vmem:[#allocation376_spill] sm:$0xff] %v14146_v5  ;;  %v1229_v37 = vld [vmem:[#allocation7 + $0x2c8] sm:$0xff]  ;;  %17808 = vst [vmem:[#allocation378_spill] sm:$0xff] %v14153_v26 }
 0x2dd   :  { %v1357_v61 = vld [vmem:[#allocation7 + $0x6c8] sm:$0xff]  ;;  %v14155_v11 = vcombine.high %v1229_v37, %v1233_v28  ;;  %v14161_v15 = vcombine.low %v1229_v37, %v1233_v28 }
 0x2de   :  { %4919 = vmatpush2.bf16.msra.mxu0 %v14125_v36  ;;  %v14158_v7 = vcombine.high %v1357_v61, %v1361_v48  ;;  %v1353_v36 = vld [vmem:[#allocation7 + $0x6a8] sm:$0xff]  ;;  %v14165_v22 = vcombine.low %v1357_v61, %v1361_v48 }
 0x2df   :  { %4962 = vmatpush2.bf16.msra.mxu1 %v14129_v8  ;;  %4920 = vmatprep.subr.bf16.mxu0 %v14131_v30  ;;  %17809 = vst [vmem:[#allocation379_spill] sm:$0xff] %v14155_v11  ;;  %v1225_v30 = vld [vmem:[#allocation7 + $0x2a8] sm:$0xff]  ;;  %17811 = vst [vmem:[#allocation381_spill] sm:$0xff] %v14161_v15 }
 0x2e0   :  { %4963 = vmatprep.subr.bf16.mxu1 %v14134_v50  ;;  %17810 = vst [vmem:[#allocation380_spill] sm:$0xff] %v14158_v7  ;;  %v1221_v50 = vld [vmem:[#allocation7 + $0x288] sm:$0xff]  ;;  %17812 = vst [vmem:[#allocation382_spill] sm:$0xff] %v14165_v22 }
 0x2e1   :  { %v1349_v8 = vld [vmem:[#allocation7 + $0x688] sm:$0xff]  ;;  %v14167_v23 = vcombine.high %v1221_v50, %v1225_v30  ;;  %v14173_v28 = vcombine.low %v1221_v50, %v1225_v30 }
 0x2e2   :  { %4921 = vmatpush2.bf16.msra.mxu0 %v14137_v27  ;;  %v14170_v59 = vcombine.high %v1349_v8, %v1353_v36  ;;  %v1345_v27 = vld [vmem:[#allocation7 + $0x668] sm:$0xff]  ;;  %v14177_v48 = vcombine.low %v1349_v8, %v1353_v36 }
 0x2e3   :  { %4964 = vmatpush2.bf16.msra.mxu1 %v14141_v14  ;;  %4922 = vmatprep.subr.bf16.mxu0 %v14143_v44  ;;  %17813 = vst [vmem:[#allocation383_spill] sm:$0xff] %v14167_v23  ;;  %v1217_v44 = vld [vmem:[#allocation7 + $0x268] sm:$0xff]  ;;  %17815 = vst [vmem:[#allocation385_spill] sm:$0xff] %v14173_v28 }
 0x2e4   :  { %4965 = vmatprep.subr.bf16.mxu1 %v14146_v5  ;;  %17814 = vst [vmem:[#allocation384_spill] sm:$0xff] %v14170_v59  ;;  %v1213_v5 = vld [vmem:[#allocation7 + $0x248] sm:$0xff]  ;;  %17816 = vst [vmem:[#allocation386_spill] sm:$0xff] %v14177_v48 }
 0x2e5   :  { %v1341_v14 = vld [vmem:[#allocation7 + $0x648] sm:$0xff]  ;;  %v14179_v61 = vcombine.high %v1213_v5, %v1217_v44  ;;  %v14185_v30 = vcombine.low %v1213_v5, %v1217_v44 }
 0x2e6   :  { %4923 = vmatpush2.bf16.msra.mxu0 %v14149_v24  ;;  %v14182_v37 = vcombine.high %v1341_v14, %v1345_v27  ;;  %v1337_v24 = vld [vmem:[#allocation7 + $0x628] sm:$0xff]  ;;  %v14189_v36 = vcombine.low %v1341_v14, %v1345_v27 }
 0x2e7   :  { %4966 = vmatpush2.bf16.msra.mxu1 %v14153_v26  ;;  %4924 = vmatprep.subr.bf16.mxu0 %v14155_v11  ;;  %17817 = vst [vmem:[#allocation387_spill] sm:$0xff] %v14179_v61  ;;  %v1209_v11 = vld [vmem:[#allocation7 + $0x228] sm:$0xff]  ;;  %17819 = vst [vmem:[#allocation389_spill] sm:$0xff] %v14185_v30 }
 0x2e8   :  { %4967 = vmatprep.subr.bf16.mxu1 %v14158_v7  ;;  %17818 = vst [vmem:[#allocation388_spill] sm:$0xff] %v14182_v37  ;;  %v1205_v7 = vld [vmem:[#allocation7 + $0x208] sm:$0xff]  ;;  %17820 = vst [vmem:[#allocation390_spill] sm:$0xff] %v14189_v36 }
 0x2e9   :  { %v1333_v26 = vld [vmem:[#allocation7 + $0x608] sm:$0xff]  ;;  %v14191_v8 = vcombine.high %v1205_v7, %v1209_v11  ;;  %v14197_v44 = vcombine.low %v1205_v7, %v1209_v11  ;;  %v1318_v11 = vld [vmem:[#allocation7 + $0x590] sm:$0xff] }
 0x2ea   :  { %4925 = vmatpush2.bf16.msra.mxu0 %v14161_v15  ;;  %v14194_v50 = vcombine.high %v1333_v26, %v1337_v24  ;;  %v1330_v15 = vld [vmem:[#allocation7 + $0x5f0] sm:$0xff]  ;;  %v14201_v27 = vcombine.low %v1333_v26, %v1337_v24  ;;  %v14217_v26 = vpop.f32.mrf.mxu1 }
 0x2eb   :  { %4968 = vmatpush2.bf16.msra.mxu1 %v14165_v22  ;;  %4926 = vmatprep.subr.bf16.mxu0 %v14167_v23  ;;  %17821 = vst [vmem:[#allocation391_spill] sm:$0xff] %v14191_v8  ;;  %v1202_v23 = vld [vmem:[#allocation7 + $0x1f0] sm:$0xff]  ;;  %17823 = vst [vmem:[#allocation393_spill] sm:$0xff] %v14197_v44 }
 0x2ec   :  { %4969 = vmatprep.subr.bf16.mxu1 %v14170_v59  ;;  %17822 = vst [vmem:[#allocation392_spill] sm:$0xff] %v14194_v50  ;;  %v1198_v59 = vld [vmem:[#allocation7 + $0x1d0] sm:$0xff]  ;;  %17824 = vst [vmem:[#allocation394_spill] sm:$0xff] %v14201_v27 }
 0x2ed   :  { %v1326_v22 = vld [vmem:[#allocation7 + $0x5d0] sm:$0xff]  ;;  %v14203_v14 = vcombine.high %v1198_v59, %v1202_v23 }
 0x2ee   :  { %4927 = vmatpush2.bf16.msra.mxu0 %v14173_v28  ;;  %v14206_v5 = vcombine.high %v1326_v22, %v1330_v15  ;;  %v1322_v7 = vld [vmem:[#allocation7 + $0x5b0] sm:$0xff]  ;;  %v14215_v24 = vcombine.low %v1326_v22, %v1330_v15 }
 0x2ef   :  { %4970 = vmatpush2.bf16.msra.mxu1 %v14177_v48  ;;  %4928 = vmatprep.subr.bf16.mxu0 %v14179_v61  ;;  %17825 = vst [vmem:[#allocation395_spill] sm:$0xff] %v14203_v14  ;;  %v1194_v61 = vld [vmem:[#allocation7 + $0x1b0] sm:$0xff]  ;;  %v14209_v48 = vcombine.low %v1198_v59, %v1202_v23  ;;  %v14225_v59 = vcombine.high %v1318_v11, %v1322_v7 }
 0x2f0   :  { %4971 = vmatprep.subr.bf16.mxu1 %v14182_v37  ;;  %17826 = vst [vmem:[#allocation396_spill] sm:$0xff] %v14206_v5  ;;  %v1190_v37 = vld [vmem:[#allocation7 + $0x190] sm:$0xff]  ;;  %17828 = vst [vmem:[#allocation398_spill] sm:$0xff] %v14215_v24  ;;  %v14239_v28 = vcombine.low %v1318_v11, %v1322_v7 }
 0x2f1   :  { %17827 = vst [vmem:[#allocation397_spill] sm:$0xff] %v14209_v48  ;;  %17830 = vst [vmem:[#allocation400_spill] sm:$0xff] %v14225_v59  ;;  %v14231_v15 = vcombine.low %v1190_v37, %v1194_v61  ;;  %v1302_v11 = vld [vmem:[#allocation7 + $0x510] sm:$0xff] }
 0x2f2   :  { %4929 = vmatpush2.bf16.msra.mxu0 %v14185_v30  ;;  %v14211_v30 = vpop.f32.mrf.mxu0  ;;  %17832 = vst [vmem:[#allocation402_spill] sm:$0xff] %v14239_v28  ;;  %v1306_v7 = vld [vmem:[#allocation7 + $0x530] sm:$0xff] }
 0x2f3   :  { %4972 = vmatpush2.bf16.msra.mxu1 %v14189_v36  ;;  %4930 = vmatprep.subr.bf16.mxu0 %v14191_v8  ;;  %v1182_v8 = vld [vmem:[#allocation7 + $0x150] sm:$0xff]  ;;  %17831 = vst [vmem:[#allocation401_spill] sm:$0xff] %v14231_v15 }
 0x2f4   :  { %4973 = vmatprep.subr.bf16.mxu1 %v14194_v50  ;;  %v14220_v50 = vcombine.high %v1190_v37, %v1194_v61  ;;  %v1314_v36 = vld [vmem:[#allocation7 + $0x570] sm:$0xff] }
 0x2f5   :  { %v1174_v37 = vld [vmem:[#allocation7 + $0x110] sm:$0xff] }
 0x2f6   :  { %4931 = vmatpush2.bf16.msra.mxu0 %v14197_v44  ;;  %17829 = vst [vmem:[#allocation399_spill] sm:$0xff] %v14220_v50  ;;  %v1186_v44 = vld [vmem:[#allocation7 + $0x170] sm:$0xff] }
 0x2f7   :  { %4974 = vmatpush2.bf16.msra.mxu1 %v14201_v27  ;;  %4986 = vmatprep.subr.bf16.mxu0 %v14203_v14  ;;  %v1310_v27 = vld [vmem:[#allocation7 + $0x550] sm:$0xff]  ;;  %v14241_v16 = vcombine.high %v1182_v8, %v1186_v44  ;;  %v14253_v42 = vcombine.low %v1182_v8, %v1186_v44 }
 0x2f8   :  { %5029 = vmatprep.subr.bf16.mxu1 %v14206_v5  ;;  %v14247_v61 = vcombine.high %v1310_v27, %v1314_v36 }
 0x2f9   :  { %v3396_v23 = vpop.f32.mrf.mxu0  ;;  %11076 = vmatmul.mubr.msk.bf16.vlgmr.msra.gmra.mxu0 %vm13773_vm1, %v14000_v56  ;;  %17833 = vst [vmem:[#allocation403_spill] sm:$0xff] %v14241_v16  ;;  %17835 = vst [vmem:[#allocation405_spill] sm:$0xff] %v14253_v42 }
 0x2fa   :  { %v3439_v14 = vpop.f32.mrf.mxu1  ;;  %11080 = vmatmul.mubr.msk.bf16.vlgmr.msra.gmra.mxu1 %vm13773_vm1, %v14009_v12  ;;  %4987 = vmatpush1.bf16.msra.mxu0 %v14209_v48  ;;  %17834 = vst [vmem:[#allocation404_spill] sm:$0xff] %v14247_v61 }
 0x2fb   :  { %v14233_v22 = vadd.f32 %v3439_v14, %v3396_v23  ;;  %11082 = vmatprep.mubr.msk.bf16.mxu0 %vm13773_vm1, %v13788_v1  ;;  %5030 = vmatpush1.bf16.msra.mxu1 %v14215_v24  ;;  %v3398_v5 = vpop.f32.mrf.mxu0  ;;  %v1178_v14 = vld [vmem:[#allocation7 + $0x130] sm:$0xff] }
 0x2fc   :  { %11086 = vmatprep.mubr.msk.bf16.mxu1 %vm13773_vm1, %v13791_v32  ;;  %v3441_v48 = vpop.f32.mrf.mxu1  ;;  %4988 = vmatprep.subr.bf16.mxu0 %v14220_v50  ;;  %v14259_v50 = vcombine.low %v1310_v27, %v1314_v36  ;;  %v14271_v36 = vcombine.low %v1302_v11, %v1306_v7  ;;  %v1158_v27 = vld [vmem:[#allocation7 + $0x90] sm:$0xff] }
 0x2fd   :  { %v14249_v23 = vadd.f32 %v3441_v48, %v3398_v5  ;;  %v3400_v21 = vpop.f32.mrf.mxu0  ;;  %5031 = vmatprep.subr.bf16.mxu1 %v14225_v59  ;;  %v14261_v48 = vcombine.high %v1174_v37, %v1178_v14  ;;  %v14264_v5 = vcombine.high %v1302_v11, %v1306_v7  ;;  %v1166_v59 = vld [vmem:[#allocation7 + $0xd0] sm:$0xff] }
 0x2fe   :  { %v3443_v24 = vpop.f32.mrf.mxu1  ;;  %4989 = vmatpush1.bf16.msra.mxu0 %v14231_v15  ;;  %17836 = vst [vmem:[#allocation406_spill] sm:$0xff] %v14259_v50  ;;  %v1298_v15 = vld [vmem:[#allocation7 + $0x4f0] sm:$0xff]  ;;  %17840 = vst [vmem:[#allocation410_spill] sm:$0xff] %v14271_v36  ;;  %v14273_v8 = vcombine.high %v1166_v59, %v1170_v35 }
 0x2ff   :  { %v14255_v2 = vadd.f32 %v3443_v24, %v3400_v21  ;;  %5032 = vmatpush1.bf16.msra.mxu1 %v14239_v28  ;;  %4990 = vmatprep.subr.bf16.mxu0 %v14241_v16  ;;  %17837 = vst [vmem:[#allocation407_spill] sm:$0xff] %v14261_v48  ;;  %17838 = vst [vmem:[#allocation408_spill] sm:$0xff] %v14264_v5  ;;  %v14267_v21 = vcombine.low %v1174_v37, %v1178_v14  ;;  %v1162_v24 = vld [vmem:[#allocation7 + $0xb0] sm:$0xff] }
 0x300   :  { %5033 = vmatprep.subr.bf16.mxu1 %v14247_v61  ;;  %17841 = vst [vmem:[#allocation411_spill] sm:$0xff] %v14273_v8  ;;  %v14276_v44 = vcombine.high %v1294_v63, %v1298_v15  ;;  %v1286_v61 = vld [vmem:[#allocation7 + $0x490] sm:$0xff]  ;;  %v14279_v37 = vcombine.low %v1166_v59, %v1170_v35  ;;  %v14283_v14 = vcombine.low %v1294_v63, %v1298_v15 }
 0x301   :  { %17839 = vst [vmem:[#allocation409_spill] sm:$0xff] %v14267_v21  ;;  %v1290_v16 = vld [vmem:[#allocation7 + $0x4b0] sm:$0xff]  ;;  %v14285_v11 = vcombine.high %v1158_v27, %v1162_v24  ;;  %v14291_v35 = vcombine.low %v1158_v27, %v1162_v24 }
 0x302   :  { %4991 = vmatpush1.bf16.msra.mxu0 %v14253_v42  ;;  %17842 = vst [vmem:[#allocation412_spill] sm:$0xff] %v14276_v44  ;;  %17843 = vst [vmem:[#allocation413_spill] sm:$0xff] %v14279_v37  ;;  %v14288_v7 = vcombine.high %v1286_v61, %v1290_v16  ;;  %v1282_v42 = vld [vmem:[#allocation7 + $0x470] sm:$0xff]  ;;  %v14295_v63 = vcombine.low %v1286_v61, %v1290_v16 }
 0x303   :  { %5034 = vmatpush1.bf16.msra.mxu1 %v14259_v50  ;;  %4992 = vmatprep.subr.bf16.mxu0 %v14261_v48  ;;  %17844 = vst [vmem:[#allocation414_spill] sm:$0xff] %v14283_v14  ;;  %17845 = vst [vmem:[#allocation415_spill] sm:$0xff] %v14285_v11  ;;  %v1154_v48 = vld [vmem:[#allocation7 + $0x70] sm:$0xff] }
 0x304   :  { %5035 = vmatprep.subr.bf16.mxu1 %v14264_v5  ;;  %17846 = vst [vmem:[#allocation416_spill] sm:$0xff] %v14288_v7  ;;  %v1150_v5 = vld [vmem:[#allocation7 + $0x50] sm:$0xff]  ;;  %17847 = vst [vmem:[#allocation417_spill] sm:$0xff] %v14291_v35 }
 0x305   :  { %v1278_v50 = vld [vmem:[#allocation7 + $0x450] sm:$0xff]  ;;  %17848 = vst [vmem:[#allocation418_spill] sm:$0xff] %v14295_v63  ;;  %v14297_v59 = vcombine.high %v1150_v5, %v1154_v48  ;;  %v14303_v27 = vcombine.low %v1150_v5, %v1154_v48 }
 0x306   :  { %4993 = vmatpush1.bf16.msra.mxu0 %v14267_v21  ;;  %v14300_v15 = vcombine.high %v1278_v50, %v1282_v42  ;;  %v1274_v21 = vld [vmem:[#allocation7 + $0x430] sm:$0xff]  ;;  %v14307_v16 = vcombine.low %v1278_v50, %v1282_v42 }
 0x307   :  { %5036 = vmatpush1.bf16.msra.mxu1 %v14271_v36  ;;  %4994 = vmatprep.subr.bf16.mxu0 %v14273_v8  ;;  %17849 = vst [vmem:[#allocation419_spill] sm:$0xff] %v14297_v59  ;;  %v1146_v8 = vld [vmem:[#allocation7 + $0x30] sm:$0xff]  ;;  %17851 = vst [vmem:[#allocation421_spill] sm:$0xff] %v14303_v27 }
 0x308   :  { %5037 = vmatprep.subr.bf16.mxu1 %v14276_v44  ;;  %17850 = vst [vmem:[#allocation420_spill] sm:$0xff] %v14300_v15  ;;  %v1142_v44 = vld [vmem:[#allocation7 + $0x10] sm:$0xff]  ;;  %17852 = vst [vmem:[#allocation422_spill] sm:$0xff] %v14307_v16 }
 0x309   :  { %v1270_v36 = vld [vmem:[#allocation7 + $0x410] sm:$0xff]  ;;  %v14309_v61 = vcombine.high %v1142_v44, %v1146_v8  ;;  %v14315_v48 = vcombine.low %v1142_v44, %v1146_v8 }
 0x30a   :  { %4995 = vmatpush1.bf16.msra.mxu0 %v14279_v37  ;;  %v14312_v24 = vcombine.high %v1270_v36, %v1274_v21  ;;  %v1394_v37 = vld [vmem:[#allocation7 + $0x7f0] sm:$0xff]  ;;  %v14319_v42 = vcombine.low %v1270_v36, %v1274_v21 }
 0x30b   :  { %5038 = vmatpush1.bf16.msra.mxu1 %v14283_v14  ;;  %4996 = vmatprep.subr.bf16.mxu0 %v14285_v11  ;;  %17853 = vst [vmem:[#allocation423_spill] sm:$0xff] %v14309_v61  ;;  %v1266_v11 = vld [vmem:[#allocation7 + $0x3f0] sm:$0xff]  ;;  %17855 = vst [vmem:[#allocation425_spill] sm:$0xff] %v14315_v48 }
 0x30c   :  { %5039 = vmatprep.subr.bf16.mxu1 %v14288_v7  ;;  %17854 = vst [vmem:[#allocation424_spill] sm:$0xff] %v14312_v24  ;;  %v1262_v7 = vld [vmem:[#allocation7 + $0x3d0] sm:$0xff]  ;;  %17856 = vst [vmem:[#allocation426_spill] sm:$0xff] %v14319_v42 }
 0x30d   :  { %v1390_v14 = vld [vmem:[#allocation7 + $0x7d0] sm:$0xff]  ;;  %v14321_v50 = vcombine.high %v1262_v7, %v1266_v11  ;;  %v14327_v8 = vcombine.low %v1262_v7, %v1266_v11 }
 0x30e   :  { %4997 = vmatpush1.bf16.msra.mxu0 %v14291_v35  ;;  %v14324_v5 = vcombine.high %v1390_v14, %v1394_v37  ;;  %v1386_v35 = vld [vmem:[#allocation7 + $0x7b0] sm:$0xff]  ;;  %v14331_v21 = vcombine.low %v1390_v14, %v1394_v37 }
 0x30f   :  { %5040 = vmatpush1.bf16.msra.mxu1 %v14295_v63  ;;  %4998 = vmatprep.subr.bf16.mxu0 %v14297_v59  ;;  %17857 = vst [vmem:[#allocation427_spill] sm:$0xff] %v14321_v50  ;;  %v1258_v59 = vld [vmem:[#allocation7 + $0x3b0] sm:$0xff]  ;;  %17859 = vst [vmem:[#allocation429_spill] sm:$0xff] %v14327_v8 }
 0x310   :  { %5041 = vmatprep.subr.bf16.mxu1 %v14300_v15  ;;  %17858 = vst [vmem:[#allocation428_spill] sm:$0xff] %v14324_v5  ;;  %v1254_v15 = vld [vmem:[#allocation7 + $0x390] sm:$0xff]  ;;  %17860 = vst [vmem:[#allocation430_spill] sm:$0xff] %v14331_v21 }
 0x311   :  { %v1382_v63 = vld [vmem:[#allocation7 + $0x790] sm:$0xff]  ;;  %v14333_v36 = vcombine.high %v1254_v15, %v1258_v59  ;;  %v14339_v11 = vcombine.low %v1254_v15, %v1258_v59 }
 0x312   :  { %4999 = vmatpush1.bf16.msra.mxu0 %v14303_v27  ;;  %v14336_v44 = vcombine.high %v1382_v63, %v1386_v35  ;;  %v1378_v27 = vld [vmem:[#allocation7 + $0x770] sm:$0xff]  ;;  %v14343_v37 = vcombine.low %v1382_v63, %v1386_v35 }
 0x313   :  { %5042 = vmatpush1.bf16.msra.mxu1 %v14307_v16  ;;  %5000 = vmatprep.subr.bf16.mxu0 %v14309_v61  ;;  %17861 = vst [vmem:[#allocation431_spill] sm:$0xff] %v14333_v36  ;;  %v1250_v61 = vld [vmem:[#allocation7 + $0x370] sm:$0xff]  ;;  %17863 = vst [vmem:[#allocation433_spill] sm:$0xff] %v14339_v11 }
 0x314   :  { %5043 = vmatprep.subr.bf16.mxu1 %v14312_v24  ;;  %17862 = vst [vmem:[#allocation432_spill] sm:$0xff] %v14336_v44  ;;  %v1246_v24 = vld [vmem:[#allocation7 + $0x350] sm:$0xff]  ;;  %17864 = vst [vmem:[#allocation434_spill] sm:$0xff] %v14343_v37 }
 0x315   :  { %v1374_v16 = vld [vmem:[#allocation7 + $0x750] sm:$0xff]  ;;  %v14345_v14 = vcombine.high %v1246_v24, %v1250_v61  ;;  %v14351_v59 = vcombine.low %v1246_v24, %v1250_v61 }
 0x316   :  { %5001 = vmatpush1.bf16.msra.mxu0 %v14315_v48  ;;  %v14348_v7 = vcombine.high %v1374_v16, %v1378_v27  ;;  %v1370_v48 = vld [vmem:[#allocation7 + $0x730] sm:$0xff]  ;;  %v14355_v35 = vcombine.low %v1374_v16, %v1378_v27 }
 0x317   :  { %5044 = vmatpush1.bf16.msra.mxu1 %v14319_v42  ;;  %5002 = vmatprep.subr.bf16.mxu0 %v14321_v50  ;;  %17865 = vst [vmem:[#allocation435_spill] sm:$0xff] %v14345_v14  ;;  %v1242_v50 = vld [vmem:[#allocation7 + $0x330] sm:$0xff]  ;;  %17867 = vst [vmem:[#allocation437_spill] sm:$0xff] %v14351_v59 }
 0x318   :  { %5045 = vmatprep.subr.bf16.mxu1 %v14324_v5  ;;  %17866 = vst [vmem:[#allocation436_spill] sm:$0xff] %v14348_v7  ;;  %v1238_v5 = vld [vmem:[#allocation7 + $0x310] sm:$0xff]  ;;  %17868 = vst [vmem:[#allocation438_spill] sm:$0xff] %v14355_v35 }
 0x319   :  { %v1366_v42 = vld [vmem:[#allocation7 + $0x710] sm:$0xff]  ;;  %v14357_v63 = vcombine.high %v1238_v5, %v1242_v50  ;;  %v14363_v61 = vcombine.low %v1238_v5, %v1242_v50 }
 0x31a   :  { %5003 = vmatpush2.bf16.msra.mxu0 %v14327_v8  ;;  %v14360_v15 = vcombine.high %v1366_v42, %v1370_v48  ;;  %v1362_v8 = vld [vmem:[#allocation7 + $0x6f0] sm:$0xff]  ;;  %v14367_v27 = vcombine.low %v1366_v42, %v1370_v48 }
 0x31b   :  { %5046 = vmatpush2.bf16.msra.mxu1 %v14331_v21  ;;  %5004 = vmatprep.subr.bf16.mxu0 %v14333_v36  ;;  %17869 = vst [vmem:[#allocation439_spill] sm:$0xff] %v14357_v63  ;;  %v1234_v36 = vld [vmem:[#allocation7 + $0x2f0] sm:$0xff]  ;;  %17871 = vst [vmem:[#allocation441_spill] sm:$0xff] %v14363_v61 }
 0x31c   :  { %5047 = vmatprep.subr.bf16.mxu1 %v14336_v44  ;;  %17870 = vst [vmem:[#allocation440_spill] sm:$0xff] %v14360_v15  ;;  %v1230_v44 = vld [vmem:[#allocation7 + $0x2d0] sm:$0xff]  ;;  %17872 = vst [vmem:[#allocation442_spill] sm:$0xff] %v14367_v27 }
 0x31d   :  { %v1358_v21 = vld [vmem:[#allocation7 + $0x6d0] sm:$0xff]  ;;  %v14369_v16 = vcombine.high %v1230_v44, %v1234_v36  ;;  %v14375_v50 = vcombine.low %v1230_v44, %v1234_v36 }
 0x31e   :  { %5005 = vmatpush2.bf16.msra.mxu0 %v14339_v11  ;;  %v14372_v24 = vcombine.high %v1358_v21, %v1362_v8  ;;  %v1354_v11 = vld [vmem:[#allocation7 + $0x6b0] sm:$0xff]  ;;  %v14379_v48 = vcombine.low %v1358_v21, %v1362_v8 }
 0x31f   :  { %5048 = vmatpush2.bf16.msra.mxu1 %v14343_v37  ;;  %5006 = vmatprep.subr.bf16.mxu0 %v14345_v14  ;;  %17873 = vst [vmem:[#allocation443_spill] sm:$0xff] %v14369_v16  ;;  %v1226_v14 = vld [vmem:[#allocation7 + $0x2b0] sm:$0xff]  ;;  %17875 = vst [vmem:[#allocation445_spill] sm:$0xff] %v14375_v50 }
 0x320   :  { %5049 = vmatprep.subr.bf16.mxu1 %v14348_v7  ;;  %17874 = vst [vmem:[#allocation444_spill] sm:$0xff] %v14372_v24  ;;  %v1222_v7 = vld [vmem:[#allocation7 + $0x290] sm:$0xff]  ;;  %17876 = vst [vmem:[#allocation446_spill] sm:$0xff] %v14379_v48 }
 0x321   :  { %v1350_v37 = vld [vmem:[#allocation7 + $0x690] sm:$0xff]  ;;  %v14381_v42 = vcombine.high %v1222_v7, %v1226_v14  ;;  %v14387_v36 = vcombine.low %v1222_v7, %v1226_v14 }
 0x322   :  { %5007 = vmatpush2.bf16.msra.mxu0 %v14351_v59  ;;  %v14384_v5 = vcombine.high %v1350_v37, %v1354_v11  ;;  %v1346_v59 = vld [vmem:[#allocation7 + $0x670] sm:$0xff]  ;;  %v14391_v8 = vcombine.low %v1350_v37, %v1354_v11 }
 0x323   :  { %5050 = vmatpush2.bf16.msra.mxu1 %v14355_v35  ;;  %5008 = vmatprep.subr.bf16.mxu0 %v14357_v63  ;;  %17877 = vst [vmem:[#allocation447_spill] sm:$0xff] %v14381_v42  ;;  %v1218_v63 = vld [vmem:[#allocation7 + $0x270] sm:$0xff]  ;;  %17879 = vst [vmem:[#allocation449_spill] sm:$0xff] %v14387_v36 }
 0x324   :  { %5051 = vmatprep.subr.bf16.mxu1 %v14360_v15  ;;  %17878 = vst [vmem:[#allocation448_spill] sm:$0xff] %v14384_v5  ;;  %v1214_v15 = vld [vmem:[#allocation7 + $0x250] sm:$0xff]  ;;  %17880 = vst [vmem:[#allocation450_spill] sm:$0xff] %v14391_v8 }
 0x325   :  { %v1342_v35 = vld [vmem:[#allocation7 + $0x650] sm:$0xff]  ;;  %v14393_v21 = vcombine.high %v1214_v15, %v1218_v63  ;;  %v14399_v14 = vcombine.low %v1214_v15, %v1218_v63 }
 0x326   :  { %5009 = vmatpush2.bf16.msra.mxu0 %v14363_v61  ;;  %v14396_v44 = vcombine.high %v1342_v35, %v1346_v59  ;;  %v1338_v61 = vld [vmem:[#allocation7 + $0x630] sm:$0xff]  ;;  %v14403_v11 = vcombine.low %v1342_v35, %v1346_v59 }
 0x327   :  { %5052 = vmatpush2.bf16.msra.mxu1 %v14367_v27  ;;  %5010 = vmatprep.subr.bf16.mxu0 %v14369_v16  ;;  %17881 = vst [vmem:[#allocation451_spill] sm:$0xff] %v14393_v21  ;;  %v1210_v16 = vld [vmem:[#allocation7 + $0x230] sm:$0xff]  ;;  %17883 = vst [vmem:[#allocation453_spill] sm:$0xff] %v14399_v14 }
 0x328   :  { %5053 = vmatprep.subr.bf16.mxu1 %v14372_v24  ;;  %17882 = vst [vmem:[#allocation452_spill] sm:$0xff] %v14396_v44  ;;  %v1206_v24 = vld [vmem:[#allocation7 + $0x210] sm:$0xff]  ;;  %17884 = vst [vmem:[#allocation454_spill] sm:$0xff] %v14403_v11 }
 0x329   :  { %v1334_v27 = vld [vmem:[#allocation7 + $0x610] sm:$0xff]  ;;  %v14405_v37 = vcombine.high %v1206_v24, %v1210_v16  ;;  %v14411_v63 = vcombine.low %v1206_v24, %v1210_v16  ;;  %v1319_v16 = vld [vmem:[#allocation7 + $0x598] sm:$0xff] }
 0x32a   :  { %5011 = vmatpush2.bf16.msra.mxu0 %v14375_v50  ;;  %v14408_v7 = vcombine.high %v1334_v27, %v1338_v61  ;;  %v1331_v50 = vld [vmem:[#allocation7 + $0x5f8] sm:$0xff]  ;;  %v14415_v59 = vcombine.low %v1334_v27, %v1338_v61  ;;  %v14431_v27 = vpop.f32.mrf.mxu1 }
 0x32b   :  { %5054 = vmatpush2.bf16.msra.mxu1 %v14379_v48  ;;  %5012 = vmatprep.subr.bf16.mxu0 %v14381_v42  ;;  %17885 = vst [vmem:[#allocation455_spill] sm:$0xff] %v14405_v37  ;;  %v1203_v42 = vld [vmem:[#allocation7 + $0x1f8] sm:$0xff]  ;;  %17887 = vst [vmem:[#allocation457_spill] sm:$0xff] %v14411_v63 }
 0x32c   :  { %5055 = vmatprep.subr.bf16.mxu1 %v14384_v5  ;;  %17886 = vst [vmem:[#allocation456_spill] sm:$0xff] %v14408_v7  ;;  %v1199_v5 = vld [vmem:[#allocation7 + $0x1d8] sm:$0xff]  ;;  %17888 = vst [vmem:[#allocation458_spill] sm:$0xff] %v14415_v59 }
 0x32d   :  { %v1327_v48 = vld [vmem:[#allocation7 + $0x5d8] sm:$0xff]  ;;  %v14417_v35 = vcombine.high %v1199_v5, %v1203_v42 }
 0x32e   :  { %5013 = vmatpush2.bf16.msra.mxu0 %v14387_v36  ;;  %v14420_v15 = vcombine.high %v1327_v48, %v1331_v50  ;;  %v1323_v24 = vld [vmem:[#allocation7 + $0x5b8] sm:$0xff]  ;;  %v14429_v61 = vcombine.low %v1327_v48, %v1331_v50 }
 0x32f   :  { %5056 = vmatpush2.bf16.msra.mxu1 %v14391_v8  ;;  %5014 = vmatprep.subr.bf16.mxu0 %v14393_v21  ;;  %17889 = vst [vmem:[#allocation459_spill] sm:$0xff] %v14417_v35  ;;  %v1195_v21 = vld [vmem:[#allocation7 + $0x1b8] sm:$0xff]  ;;  %v14423_v8 = vcombine.low %v1199_v5, %v1203_v42  ;;  %v14439_v5 = vcombine.high %v1319_v16, %v1323_v24 }
 0x330   :  { %5057 = vmatprep.subr.bf16.mxu1 %v14396_v44  ;;  %17890 = vst [vmem:[#allocation460_spill] sm:$0xff] %v14420_v15  ;;  %v1191_v44 = vld [vmem:[#allocation7 + $0x198] sm:$0xff]  ;;  %17892 = vst [vmem:[#allocation462_spill] sm:$0xff] %v14429_v61  ;;  %v14453_v36 = vcombine.low %v1319_v16, %v1323_v24 }
 0x331   :  { %17891 = vst [vmem:[#allocation461_spill] sm:$0xff] %v14423_v8  ;;  %17894 = vst [vmem:[#allocation464_spill] sm:$0xff] %v14439_v5  ;;  %v14445_v50 = vcombine.low %v1191_v44, %v1195_v21  ;;  %v1303_v16 = vld [vmem:[#allocation7 + $0x518] sm:$0xff] }
 0x332   :  { %5015 = vmatpush2.bf16.msra.mxu0 %v14399_v14  ;;  %v14425_v14 = vpop.f32.mrf.mxu0  ;;  %17896 = vst [vmem:[#allocation466_spill] sm:$0xff] %v14453_v36  ;;  %v1307_v24 = vld [vmem:[#allocation7 + $0x538] sm:$0xff] }
 0x333   :  { %5058 = vmatpush2.bf16.msra.mxu1 %v14403_v11  ;;  %5016 = vmatprep.subr.bf16.mxu0 %v14405_v37  ;;  %v1183_v37 = vld [vmem:[#allocation7 + $0x158] sm:$0xff]  ;;  %17895 = vst [vmem:[#allocation465_spill] sm:$0xff] %v14445_v50 }
 0x334   :  { %5059 = vmatprep.subr.bf16.mxu1 %v14408_v7  ;;  %v14434_v7 = vcombine.high %v1191_v44, %v1195_v21  ;;  %v1315_v11 = vld [vmem:[#allocation7 + $0x578] sm:$0xff] }
 0x335   :  { %v1175_v44 = vld [vmem:[#allocation7 + $0x118] sm:$0xff] }
 0x336   :  { %5017 = vmatpush2.bf16.msra.mxu0 %v14411_v63  ;;  %17893 = vst [vmem:[#allocation463_spill] sm:$0xff] %v14434_v7  ;;  %v1187_v63 = vld [vmem:[#allocation7 + $0x178] sm:$0xff] }
 0x337   :  { %5060 = vmatpush2.bf16.msra.mxu1 %v14415_v59  ;;  %5072 = vmatprep.subr.bf16.mxu0 %v14417_v35  ;;  %v1311_v59 = vld [vmem:[#allocation7 + $0x558] sm:$0xff]  ;;  %v14455_v28 = vcombine.high %v1183_v37, %v1187_v63  ;;  %v14467_v39 = vcombine.low %v1183_v37, %v1187_v63 }
 0x338   :  { %5115 = vmatprep.subr.bf16.mxu1 %v14420_v15  ;;  %v14461_v21 = vcombine.high %v1311_v59, %v1315_v11 }
 0x339   :  { %v3482_v42 = vpop.f32.mrf.mxu0  ;;  %11084 = vmatmul.mubr.msk.bf16.vlgmr.msra.gmra.mxu0 %vm13773_vm1, %v14000_v56  ;;  %17897 = vst [vmem:[#allocation467_spill] sm:$0xff] %v14455_v28  ;;  %17899 = vst [vmem:[#allocation469_spill] sm:$0xff] %v14467_v39 }
 0x33a   :  { %v3525_v35 = vpop.f32.mrf.mxu1  ;;  %11088 = vmatmul.mubr.msk.bf16.vlgmr.msra.gmra.mxu1 %vm13773_vm1, %v14009_v12  ;;  %5073 = vmatpush1.bf16.msra.mxu0 %v14423_v8  ;;  %17898 = vst [vmem:[#allocation468_spill] sm:$0xff] %v14461_v21 }
 0x33b   :  { %v14447_v48 = vadd.f32 %v3525_v35, %v3482_v42  ;;  %11090 = vmatprep.mubr.msk.bf16.mxu0 %vm13773_vm1, %v13788_v1  ;;  %5116 = vmatpush1.bf16.msra.mxu1 %v14429_v61  ;;  %v3484_v15 = vpop.f32.mrf.mxu0  ;;  %v1179_v35 = vld [vmem:[#allocation7 + $0x138] sm:$0xff] }
 0x33c   :  { %11094 = vmatprep.mubr.msk.bf16.mxu1 %vm13773_vm1, %v13791_v32  ;;  %v3527_v8 = vpop.f32.mrf.mxu1  ;;  %5074 = vmatprep.subr.bf16.mxu0 %v14434_v7  ;;  %v14473_v7 = vcombine.low %v1311_v59, %v1315_v11  ;;  %v14481_v37 = vcombine.low %v1175_v44, %v1179_v35  ;;  %v14485_v11 = vcombine.low %v1303_v16, %v1307_v24 }
 0x33d   :  { %v14463_v42 = vadd.f32 %v3527_v8, %v3484_v15  ;;  %v3486_v1 = vpop.f32.mrf.mxu0  ;;  %5117 = vmatprep.subr.bf16.mxu1 %v14439_v5  ;;  %v14475_v8 = vcombine.high %v1175_v44, %v1179_v35  ;;  %v14478_v15 = vcombine.high %v1303_v16, %v1307_v24  ;;  %v1167_v5 = vld [vmem:[#allocation7 + $0xd8] sm:$0xff] }
 0x33e   :  { %v3529_v61 = vpop.f32.mrf.mxu1  ;;  %5075 = vmatpush1.bf16.msra.mxu0 %v14445_v50  ;;  %17900 = vst [vmem:[#allocation470_spill] sm:$0xff] %v14473_v7  ;;  %v1299_v50 = vld [vmem:[#allocation7 + $0x4f8] sm:$0xff]  ;;  %17903 = vst [vmem:[#allocation473_spill] sm:$0xff] %v14481_v37  ;;  %v14487_v63 = vcombine.high %v1167_v5, %v1171_v41  ;;  %v14493_v44 = vcombine.low %v1167_v5, %v1171_v41 }
 0x33f   :  { %v14469_v32 = vadd.f32 %v3529_v61, %v3486_v1  ;;  %5118 = vmatpush1.bf16.msra.mxu1 %v14453_v36  ;;  %5076 = vmatprep.subr.bf16.mxu0 %v14455_v28  ;;  %17901 = vst [vmem:[#allocation471_spill] sm:$0xff] %v14475_v8  ;;  %17902 = vst [vmem:[#allocation472_spill] sm:$0xff] %v14478_v15  ;;  %v14490_v59 = vcombine.high %v1295_v40, %v1299_v50  ;;  %v1159_v61 = vld [vmem:[#allocation7 + $0x98] sm:$0xff] }
 0x340   :  { %5119 = vmatprep.subr.bf16.mxu1 %v14461_v21  ;;  %17904 = vst [vmem:[#allocation474_spill] sm:$0xff] %v14485_v11  ;;  %17905 = vst [vmem:[#allocation475_spill] sm:$0xff] %v14487_v63  ;;  %v1163_v1 = vld [vmem:[#allocation7 + $0xb8] sm:$0xff]  ;;  %v14497_v35 = vcombine.low %v1295_v40, %v1299_v50 }
 0x341   :  { %17906 = vst [vmem:[#allocation476_spill] sm:$0xff] %v14490_v59  ;;  %v1287_v21 = vld [vmem:[#allocation7 + $0x498] sm:$0xff]  ;;  %17907 = vst [vmem:[#allocation477_spill] sm:$0xff] %v14493_v44  ;;  %v14499_v16 = vcombine.high %v1159_v61, %v1163_v1  ;;  %v14505_v41 = vcombine.low %v1159_v61, %v1163_v1 }
 0x342   :  { %5077 = vmatpush1.bf16.msra.mxu0 %v14467_v39  ;;  %v1291_v28 = vld [vmem:[#allocation7 + $0x4b8] sm:$0xff]  ;;  %17908 = vst [vmem:[#allocation478_spill] sm:$0xff] %v14497_v35 }
 0x343   :  { %5120 = vmatpush1.bf16.msra.mxu1 %v14473_v7  ;;  %5078 = vmatprep.subr.bf16.mxu0 %v14475_v8  ;;  %17909 = vst [vmem:[#allocation479_spill] sm:$0xff] %v14499_v16  ;;  %v14502_v24 = vcombine.high %v1287_v21, %v1291_v28  ;;  %v1155_v8 = vld [vmem:[#allocation7 + $0x78] sm:$0xff]  ;;  %17911 = vst [vmem:[#allocation481_spill] sm:$0xff] %v14505_v41  ;;  %v14509_v40 = vcombine.low %v1287_v21, %v1291_v28 }
 0x344   :  { %5121 = vmatprep.subr.bf16.mxu1 %v14478_v15  ;;  %v1151_v15 = vld [vmem:[#allocation7 + $0x58] sm:$0xff] }
 0x345   :  { %17910 = vst [vmem:[#allocation480_spill] sm:$0xff] %v14502_v24  ;;  %v1279_v7 = vld [vmem:[#allocation7 + $0x458] sm:$0xff]  ;;  %17912 = vst [vmem:[#allocation482_spill] sm:$0xff] %v14509_v40  ;;  %v14511_v5 = vcombine.high %v1151_v15, %v1155_v8  ;;  %v14517_v61 = vcombine.low %v1151_v15, %v1155_v8 }
 0x346   :  { %5079 = vmatpush1.bf16.msra.mxu0 %v14481_v37  ;;  %v1283_v39 = vld [vmem:[#allocation7 + $0x478] sm:$0xff] }
 0x347   :  { %5122 = vmatpush1.bf16.msra.mxu1 %v14485_v11  ;;  %5080 = vmatprep.subr.bf16.mxu0 %v14487_v63  ;;  %17913 = vst [vmem:[#allocation483_spill] sm:$0xff] %v14511_v5  ;;  %v14514_v50 = vcombine.high %v1279_v7, %v1283_v39  ;;  %v1147_v63 = vld [vmem:[#allocation7 + $0x38] sm:$0xff]  ;;  %17915 = vst [vmem:[#allocation485_spill] sm:$0xff] %v14517_v61  ;;  %v14521_v28 = vcombine.low %v1279_v7, %v1283_v39 }
 0x348   :  { %5123 = vmatprep.subr.bf16.mxu1 %v14490_v59  ;;  %v1143_v59 = vld [vmem:[#allocation7 + $0x18] sm:$0xff] }
 0x349   :  { %17914 = vst [vmem:[#allocation484_spill] sm:$0xff] %v14514_v50  ;;  %v1271_v11 = vld [vmem:[#allocation7 + $0x418] sm:$0xff]  ;;  %17916 = vst [vmem:[#allocation486_spill] sm:$0xff] %v14521_v28  ;;  %v14523_v21 = vcombine.high %v1143_v59, %v1147_v63  ;;  %v14529_v8 = vcombine.low %v1143_v59, %v1147_v63 }
 0x34a   :  { %5081 = vmatpush1.bf16.msra.mxu0 %v14493_v44  ;;  %v1275_v37 = vld [vmem:[#allocation7 + $0x438] sm:$0xff] }
 0x34b   :  { %5124 = vmatpush1.bf16.msra.mxu1 %v14497_v35  ;;  %5082 = vmatprep.subr.bf16.mxu0 %v14499_v16  ;;  %17917 = vst [vmem:[#allocation487_spill] sm:$0xff] %v14523_v21  ;;  %v14526_v1 = vcombine.high %v1271_v11, %v1275_v37  ;;  %v1267_v16 = vld [vmem:[#allocation7 + $0x3f8] sm:$0xff]  ;;  %17919 = vst [vmem:[#allocation489_spill] sm:$0xff] %v14529_v8  ;;  %v14533_v39 = vcombine.low %v1271_v11, %v1275_v37 }
 0x34c   :  { %5125 = vmatprep.subr.bf16.mxu1 %v14502_v24  ;;  %v1263_v24 = vld [vmem:[#allocation7 + $0x3d8] sm:$0xff] }
 0x34d   :  { %17918 = vst [vmem:[#allocation488_spill] sm:$0xff] %v14526_v1  ;;  %v1391_v35 = vld [vmem:[#allocation7 + $0x7d8] sm:$0xff]  ;;  %17920 = vst [vmem:[#allocation490_spill] sm:$0xff] %v14533_v39  ;;  %v14535_v7 = vcombine.high %v1263_v24, %v1267_v16  ;;  %v14541_v63 = vcombine.low %v1263_v24, %v1267_v16 }
 0x34e   :  { %5083 = vmatpush1.bf16.msra.mxu0 %v14505_v41  ;;  %v1395_v44 = vld [vmem:[#allocation7 + $0x7f8] sm:$0xff] }
 0x34f   :  { %5126 = vmatpush1.bf16.msra.mxu1 %v14509_v40  ;;  %5084 = vmatprep.subr.bf16.mxu0 %v14511_v5  ;;  %17921 = vst [vmem:[#allocation491_spill] sm:$0xff] %v14535_v7  ;;  %v14538_v15 = vcombine.high %v1391_v35, %v1395_v44  ;;  %v1259_v5 = vld [vmem:[#allocation7 + $0x3b8] sm:$0xff]  ;;  %17923 = vst [vmem:[#allocation493_spill] sm:$0xff] %v14541_v63  ;;  %v14545_v37 = vcombine.low %v1391_v35, %v1395_v44 }
 0x350   :  { %5127 = vmatprep.subr.bf16.mxu1 %v14514_v50  ;;  %v1255_v50 = vld [vmem:[#allocation7 + $0x398] sm:$0xff] }
 0x351   :  { %17922 = vst [vmem:[#allocation492_spill] sm:$0xff] %v14538_v15  ;;  %v1383_v40 = vld [vmem:[#allocation7 + $0x798] sm:$0xff]  ;;  %17924 = vst [vmem:[#allocation494_spill] sm:$0xff] %v14545_v37  ;;  %v14547_v11 = vcombine.high %v1255_v50, %v1259_v5  ;;  %v14553_v16 = vcombine.low %v1255_v50, %v1259_v5 }
 0x352   :  { %5085 = vmatpush1.bf16.msra.mxu0 %v14517_v61  ;;  %v1387_v41 = vld [vmem:[#allocation7 + $0x7b8] sm:$0xff] }
 0x353   :  { %5128 = vmatpush1.bf16.msra.mxu1 %v14521_v28  ;;  %5086 = vmatprep.subr.bf16.mxu0 %v14523_v21  ;;  %17925 = vst [vmem:[#allocation495_spill] sm:$0xff] %v14547_v11  ;;  %v14550_v59 = vcombine.high %v1383_v40, %v1387_v41  ;;  %v1251_v21 = vld [vmem:[#allocation7 + $0x378] sm:$0xff]  ;;  %17927 = vst [vmem:[#allocation497_spill] sm:$0xff] %v14553_v16  ;;  %v14557_v44 = vcombine.low %v1383_v40, %v1387_v41 }
 0x354   :  { %5129 = vmatprep.subr.bf16.mxu1 %v14526_v1  ;;  %v1247_v1 = vld [vmem:[#allocation7 + $0x358] sm:$0xff] }
 0x355   :  { %17926 = vst [vmem:[#allocation496_spill] sm:$0xff] %v14550_v59  ;;  %v1375_v28 = vld [vmem:[#allocation7 + $0x758] sm:$0xff]  ;;  %17928 = vst [vmem:[#allocation498_spill] sm:$0xff] %v14557_v44  ;;  %v14559_v35 = vcombine.high %v1247_v1, %v1251_v21  ;;  %v14565_v5 = vcombine.low %v1247_v1, %v1251_v21 }
 0x356   :  { %5087 = vmatpush1.bf16.msra.mxu0 %v14529_v8  ;;  %v1379_v61 = vld [vmem:[#allocation7 + $0x778] sm:$0xff] }
 0x357   :  { %5130 = vmatpush1.bf16.msra.mxu1 %v14533_v39  ;;  %5088 = vmatprep.subr.bf16.mxu0 %v14535_v7  ;;  %17929 = vst [vmem:[#allocation499_spill] sm:$0xff] %v14559_v35  ;;  %v14562_v24 = vcombine.high %v1375_v28, %v1379_v61  ;;  %v1243_v7 = vld [vmem:[#allocation7 + $0x338] sm:$0xff]  ;;  %17931 = vst [vmem:[#allocation501_spill] sm:$0xff] %v14565_v5  ;;  %v14569_v41 = vcombine.low %v1375_v28, %v1379_v61 }
 0x358   :  { %5131 = vmatprep.subr.bf16.mxu1 %v14538_v15  ;;  %v1239_v15 = vld [vmem:[#allocation7 + $0x318] sm:$0xff] }
 0x359   :  { %17930 = vst [vmem:[#allocation500_spill] sm:$0xff] %v14562_v24  ;;  %v1367_v39 = vld [vmem:[#allocation7 + $0x718] sm:$0xff]  ;;  %17932 = vst [vmem:[#allocation502_spill] sm:$0xff] %v14569_v41  ;;  %v14571_v40 = vcombine.high %v1239_v15, %v1243_v7  ;;  %v14577_v21 = vcombine.low %v1239_v15, %v1243_v7 }
 0x35a   :  { %5089 = vmatpush2.bf16.msra.mxu0 %v14541_v63  ;;  %v1371_v8 = vld [vmem:[#allocation7 + $0x738] sm:$0xff] }
 0x35b   :  { %5132 = vmatpush2.bf16.msra.mxu1 %v14545_v37  ;;  %5090 = vmatprep.subr.bf16.mxu0 %v14547_v11  ;;  %17933 = vst [vmem:[#allocation503_spill] sm:$0xff] %v14571_v40  ;;  %v14574_v50 = vcombine.high %v1367_v39, %v1371_v8  ;;  %v1235_v11 = vld [vmem:[#allocation7 + $0x2f8] sm:$0xff]  ;;  %17935 = vst [vmem:[#allocation505_spill] sm:$0xff] %v14577_v21  ;;  %v14581_v61 = vcombine.low %v1367_v39, %v1371_v8 }
 0x35c   :  { %5133 = vmatprep.subr.bf16.mxu1 %v14550_v59  ;;  %v1231_v59 = vld [vmem:[#allocation7 + $0x2d8] sm:$0xff] }
 0x35d   :  { %17934 = vst [vmem:[#allocation504_spill] sm:$0xff] %v14574_v50  ;;  %v1359_v37 = vld [vmem:[#allocation7 + $0x6d8] sm:$0xff]  ;;  %17936 = vst [vmem:[#allocation506_spill] sm:$0xff] %v14581_v61  ;;  %v14583_v28 = vcombine.high %v1231_v59, %v1235_v11  ;;  %v14589_v7 = vcombine.low %v1231_v59, %v1235_v11 }
 0x35e   :  { %5091 = vmatpush2.bf16.msra.mxu0 %v14553_v16  ;;  %v1363_v63 = vld [vmem:[#allocation7 + $0x6f8] sm:$0xff] }
 0x35f   :  { %5134 = vmatpush2.bf16.msra.mxu1 %v14557_v44  ;;  %5092 = vmatprep.subr.bf16.mxu0 %v14559_v35  ;;  %17937 = vst [vmem:[#allocation507_spill] sm:$0xff] %v14583_v28  ;;  %v14586_v1 = vcombine.high %v1359_v37, %v1363_v63  ;;  %v1227_v35 = vld [vmem:[#allocation7 + $0x2b8] sm:$0xff]  ;;  %17939 = vst [vmem:[#allocation509_spill] sm:$0xff] %v14589_v7  ;;  %v14593_v8 = vcombine.low %v1359_v37, %v1363_v63 }
 0x360   :  { %5135 = vmatprep.subr.bf16.mxu1 %v14562_v24  ;;  %v1223_v24 = vld [vmem:[#allocation7 + $0x298] sm:$0xff] }
 0x361   :  { %17938 = vst [vmem:[#allocation508_spill] sm:$0xff] %v14586_v1  ;;  %v1351_v44 = vld [vmem:[#allocation7 + $0x698] sm:$0xff]  ;;  %17940 = vst [vmem:[#allocation510_spill] sm:$0xff] %v14593_v8  ;;  %v14595_v39 = vcombine.high %v1223_v24, %v1227_v35  ;;  %v14601_v11 = vcombine.low %v1223_v24, %v1227_v35 }
 0x362   :  { %5093 = vmatpush2.bf16.msra.mxu0 %v14565_v5  ;;  %v1355_v16 = vld [vmem:[#allocation7 + $0x6b8] sm:$0xff] }
 0x363   :  { %5136 = vmatpush2.bf16.msra.mxu1 %v14569_v41  ;;  %5094 = vmatprep.subr.bf16.mxu0 %v14571_v40  ;;  %17941 = vst [vmem:[#allocation511_spill] sm:$0xff] %v14595_v39  ;;  %v14598_v15 = vcombine.high %v1351_v44, %v1355_v16  ;;  %v1219_v40 = vld [vmem:[#allocation7 + $0x278] sm:$0xff]  ;;  %17943 = vst [vmem:[#allocation513_spill] sm:$0xff] %v14601_v11  ;;  %v14605_v63 = vcombine.low %v1351_v44, %v1355_v16 }
 0x364   :  { %5137 = vmatprep.subr.bf16.mxu1 %v14574_v50  ;;  %v1215_v50 = vld [vmem:[#allocation7 + $0x258] sm:$0xff] }
 0x365   :  { %17942 = vst [vmem:[#allocation512_spill] sm:$0xff] %v14598_v15  ;;  %v1343_v41 = vld [vmem:[#allocation7 + $0x658] sm:$0xff]  ;;  %17944 = vst [vmem:[#allocation514_spill] sm:$0xff] %v14605_v63  ;;  %v14607_v37 = vcombine.high %v1215_v50, %v1219_v40  ;;  %v14613_v35 = vcombine.low %v1215_v50, %v1219_v40 }
 0x366   :  { %5095 = vmatpush2.bf16.msra.mxu0 %v14577_v21  ;;  %v1347_v5 = vld [vmem:[#allocation7 + $0x678] sm:$0xff] }
 0x367   :  { %5138 = vmatpush2.bf16.msra.mxu1 %v14581_v61  ;;  %5096 = vmatprep.subr.bf16.mxu0 %v14583_v28  ;;  %17945 = vst [vmem:[#allocation515_spill] sm:$0xff] %v14607_v37  ;;  %v14610_v59 = vcombine.high %v1343_v41, %v1347_v5  ;;  %v1211_v28 = vld [vmem:[#allocation7 + $0x238] sm:$0xff]  ;;  %17947 = vst [vmem:[#allocation517_spill] sm:$0xff] %v14613_v35  ;;  %v14617_v16 = vcombine.low %v1343_v41, %v1347_v5 }
 0x368   :  { %5139 = vmatprep.subr.bf16.mxu1 %v14586_v1  ;;  %v1207_v1 = vld [vmem:[#allocation7 + $0x218] sm:$0xff] }
 0x369   :  { %17946 = vst [vmem:[#allocation516_spill] sm:$0xff] %v14610_v59  ;;  %v1335_v61 = vld [vmem:[#allocation7 + $0x618] sm:$0xff]  ;;  %17948 = vst [vmem:[#allocation518_spill] sm:$0xff] %v14617_v16  ;;  %v14619_v44 = vcombine.high %v1207_v1, %v1211_v28  ;;  %v14625_v40 = vcombine.low %v1207_v1, %v1211_v28  ;;  %v1830_v1 = vld [vmem:[#allocation7 + $0x1580] sm:$0xff] }
 0x36a   :  { %5097 = vmatpush2.bf16.msra.mxu0 %v14589_v7  ;;  %v1339_v21 = vld [vmem:[#allocation7 + $0x638] sm:$0xff]  ;;  %v1842_v7 = vld [vmem:[#allocation7 + $0x15e0] sm:$0xff] }
 0x36b   :  { %5140 = vmatpush2.bf16.msra.mxu1 %v14593_v8  ;;  %5098 = vmatprep.subr.bf16.mxu0 %v14595_v39  ;;  %17949 = vst [vmem:[#allocation519_spill] sm:$0xff] %v14619_v44  ;;  %v14622_v24 = vcombine.high %v1335_v61, %v1339_v21  ;;  %v1714_v39 = vld [vmem:[#allocation7 + $0x11e0] sm:$0xff]  ;;  %17951 = vst [vmem:[#allocation521_spill] sm:$0xff] %v14625_v40  ;;  %v14629_v5 = vcombine.low %v1335_v61, %v1339_v21  ;;  %v14641_v21 = vpop.f32.mrf.mxu0 }
 0x36c   :  { %5141 = vmatprep.subr.bf16.mxu1 %v14598_v15  ;;  %v1710_v15 = vld [vmem:[#allocation7 + $0x11c0] sm:$0xff] }
 0x36d   :  { %17950 = vst [vmem:[#allocation520_spill] sm:$0xff] %v14622_v24  ;;  %v1838_v8 = vld [vmem:[#allocation7 + $0x15c0] sm:$0xff]  ;;  %17952 = vst [vmem:[#allocation522_spill] sm:$0xff] %v14629_v5  ;;  %v14631_v41 = vcombine.high %v1710_v15, %v1714_v39  ;;  %v14638_v28 = vcombine.low %v1710_v15, %v1714_v39 }
 0x36e   :  { %5099 = vmatpush2.bf16.msra.mxu0 %v14601_v11  ;;  %v14634_v50 = vcombine.high %v1838_v8, %v1842_v7  ;;  %v14645_v61 = vcombine.low %v1838_v8, %v1842_v7  ;;  %v1694_v39 = vld [vmem:[#allocation7 + $0x1140] sm:$0xff] }
 0x36f   :  { %5142 = vmatpush2.bf16.msra.mxu1 %v14605_v63  ;;  %5100 = vmatprep.subr.bf16.mxu0 %v14607_v37  ;;  %17953 = vst [vmem:[#allocation523_spill] sm:$0xff] %v14631_v41  ;;  %v1706_v37 = vld [vmem:[#allocation7 + $0x11a0] sm:$0xff]  ;;  %v5163_v63 = vrot.slane %v13211_v10, 7  ;;  %17955 = vst [vmem:[#allocation525_spill] sm:$0xff] %v14638_v28 }
 0x370   :  { %5143 = vmatprep.subr.bf16.mxu1 %v14610_v59  ;;  %17954 = vst [vmem:[#allocation524_spill] sm:$0xff] %v14634_v50  ;;  %v1702_v59 = vld [vmem:[#allocation7 + $0x1180] sm:$0xff]  ;;  %17956 = vst [vmem:[#allocation526_spill] sm:$0xff] %v14645_v61 }
 0x371   :  { %v14651_v10 = vcombine.high %v1702_v59, %v1706_v37  ;;  %v1698_v15 = vld [vmem:[#allocation7 + $0x1160] sm:$0xff]  ;;  %v14667_v36 = vcombine.low %v1702_v59, %v1706_v37 }
 0x372   :  { %5101 = vmatpush2.bf16.msra.mxu0 %v14613_v35  ;;  %v14648_v35 = vpop.f32.mrf.mxu1  ;;  %v1822_v7 = vld [vmem:[#allocation7 + $0x1540] sm:$0xff] }
 0x373   :  { %5144 = vmatpush2.bf16.msra.mxu1 %v14617_v16  ;;  %5102 = vmatprep.subr.bf16.mxu0 %v14619_v44  ;;  %v1834_v16 = vld [vmem:[#allocation7 + $0x15a0] sm:$0xff]  ;;  %v5169_v44 = vrot.slane %v13213_v33, 7  ;;  %17957 = vst [vmem:[#allocation527_spill] sm:$0xff] %v14651_v10  ;;  %v5168_v33 = vrot.slane %v13153_v49, 7 }
 0x374   :  { %5145 = vmatprep.subr.bf16.mxu1 %v14622_v24  ;;  %v5162_v24 = vrot.slane %v13145_v4, 7  ;;  %v1826_v8 = vld [vmem:[#allocation7 + $0x1560] sm:$0xff] }
 0x375   :  { %v14683_v37 = vcombine.high %v1822_v7, %v1826_v8  ;;  %v1686_v59 = vld [vmem:[#allocation7 + $0x1100] sm:$0xff] }
 0x376   :  { %5103 = vmatpush2.bf16.msra.mxu0 %v14625_v40 }
 0x377   :  { %5146 = vmatpush2.bf16.msra.mxu1 %v14629_v5  ;;  %6455 = vmatprep.subr.bf16.mxu0 %v14631_v41  ;;  %v14657_v41 = vcombine.high %v1830_v1, %v1834_v16  ;;  %v14660_v5 = vsel %vm1109_vm0, %v5162_v24, %v5163_v63  ;;  %v14674_v24 = vcombine.low %v1830_v1, %v1834_v16  ;;  %v1814_v16 = vld [vmem:[#allocation7 + $0x1500] sm:$0xff] }
 0x378   :  { %6498 = vmatprep.subr.bf16.mxu1 %v14634_v50  ;;  %17961 = vst [vmem:[#allocation531_spill] sm:$0xff] %v14683_v37  ;;  %v1818_v1 = vld [vmem:[#allocation7 + $0x1520] sm:$0xff] }
 0x379   :  { %v4848_v40 = vpop.f32.mrf.mxu0  ;;  %11092 = vmatmul.mubr.msk.bf16.vlgmr.msra.gmra.mxu0 %vm13773_vm1, %v14000_v56  ;;  %17958 = vst [vmem:[#allocation528_spill] sm:$0xff] %v14657_v41  ;;  %v14670_v56 = vsel %vm1109_vm0, %v5168_v33, %v5169_v44  ;;  %17959 = vst [vmem:[#allocation529_spill] sm:$0xff] %v14674_v24  ;;  %v1690_v44 = vld [vmem:[#allocation7 + $0x1120] sm:$0xff] }
 0x37a   :  { %v4849_v50 = vadd.f32 %v4848_v40, %v13795_v25  ;;  %v4891_v11 = vpop.f32.mrf.mxu1  ;;  %11096 = vmatmul.mubr.msk.bf16.vlgmr.msra.gmra.mxu1 %vm13773_vm1, %v14009_v12  ;;  %6456 = vmatpush1.bf16.msra.mxu0 %v14638_v28  ;;  %v14676_v25 = vcombine.high %v1694_v39, %v1698_v15  ;;  %v14698_v28 = vcombine.high %v1686_v59, %v1690_v44 }
 0x37b   :  { %6487 = vmatprep.mubr.bf16.mxu0 %v14660_v5  ;;  %6499 = vmatpush1.bf16.msra.mxu1 %v14645_v61  ;;  %v4850_v63 = vpop.f32.mrf.mxu0 }
 0x37c   :  { %17960 = vst [vmem:[#allocation530_spill] sm:$0xff] %v14676_v25  ;;  %v14678_v40 = vadd.f32 %v4891_v11, %v4849_v50  ;;  %6530 = vmatprep.mubr.bf16.mxu1 %v14670_v56  ;;  %v4851_v13 = vadd.f32 %v4850_v63, %v13811_v18  ;;  %v4893_v12 = vpop.f32.mrf.mxu1  ;;  %6457 = vmatprep.subr.bf16.mxu0 %v14651_v10  ;;  %17964 = vst [vmem:[#allocation534_spill] sm:$0xff] %v14698_v28 }
 0x37d   :  { %v4852_v33 = vpop.f32.mrf.mxu0  ;;  %6500 = vmatprep.subr.bf16.mxu1 %v14657_v41  ;;  %v3274_v11 = vadd.f32 %v13997_v54, %v13990_v3  ;;  %v14692_v63 = vcombine.low %v1694_v39, %v1698_v15  ;;  %v14696_v41 = vcombine.low %v1822_v7, %v1826_v8  ;;  %v1678_v3 = vld [vmem:[#allocation7 + $0x10c0] sm:$0xff]  ;;  %v14708_v7 = vcombine.low %v1686_v59, %v1690_v44 }
 0x37e   :  { %v14688_v50 = vadd.f32 %v4893_v12, %v4851_v13  ;;  %v4853_v61 = vadd.f32 %v4852_v33, %v13817_v60  ;;  %v4895_v18 = vpop.f32.mrf.mxu1  ;;  %6458 = vmatpush1.bf16.msra.mxu0 %v14667_v36  ;;  %v14703_v60 = vcombine.high %v1814_v16, %v1818_v1  ;;  %v1682_v13 = vld [vmem:[#allocation7 + $0x10e0] sm:$0xff] }
 0x37f   :  { %17962 = vst [vmem:[#allocation532_spill] sm:$0xff] %v14692_v63  ;;  %6501 = vmatpush1.bf16.msra.mxu1 %v14674_v24  ;;  %v4854_v10 = vpop.f32.mrf.mxu0  ;;  %6459 = vmatprep.subr.bf16.mxu0 %v14676_v25  ;;  %17963 = vst [vmem:[#allocation533_spill] sm:$0xff] %v14696_v41  ;;  %v1806_v15 = vld [vmem:[#allocation7 + $0x14c0] sm:$0xff]  ;;  %v14720_v59 = vcombine.low %v1678_v3, %v1682_v13 }
 0x380   :  { %v14700_v49 = vadd.f32 %v4895_v18, %v4853_v61  ;;  %v4855_v54 = vadd.f32 %v4854_v10, %v3274_v11  ;;  %6502 = vmatprep.subr.bf16.mxu1 %v14683_v37  ;;  %17965 = vst [vmem:[#allocation535_spill] sm:$0xff] %v14703_v60  ;;  %v4897_v39 = vpop.f32.mrf.mxu1  ;;  %v1810_v12 = vld [vmem:[#allocation7 + $0x14e0] sm:$0xff]  ;;  %17966 = vst [vmem:[#allocation536_spill] sm:$0xff] %v14708_v7  ;;  %v14712_v61 = vcombine.low %v1814_v16, %v1818_v1 }
 0x381   :  { %v14714_v10 = vcombine.high %v1678_v3, %v1682_v13  ;;  %v14717_v8 = vcombine.high %v1806_v15, %v1810_v12  ;;  %v1670_v11 = vld [vmem:[#allocation7 + $0x1080] sm:$0xff]  ;;  %17970 = vst [vmem:[#allocation540_spill] sm:$0xff] %v14720_v59  ;;  %v14724_v44 = vcombine.low %v1806_v15, %v1810_v12 }
 0x382   :  { %v14705_v33 = vadd.f32 %v4897_v39, %v4855_v54  ;;  %6460 = vmatpush1.bf16.msra.mxu0 %v14692_v63  ;;  %17967 = vst [vmem:[#allocation537_spill] sm:$0xff] %v14712_v61  ;;  %v1674_v18 = vld [vmem:[#allocation7 + $0x10a0] sm:$0xff] }
 0x383   :  { %6503 = vmatpush1.bf16.msra.mxu1 %v14696_v41  ;;  %6461 = vmatprep.subr.bf16.mxu0 %v14698_v28  ;;  %17968 = vst [vmem:[#allocation538_spill] sm:$0xff] %v14714_v10  ;;  %17969 = vst [vmem:[#allocation539_spill] sm:$0xff] %v14717_v8  ;;  %v1798_v54 = vld [vmem:[#allocation7 + $0x1480] sm:$0xff]  ;;  %v14726_v16 = vcombine.high %v1670_v11, %v1674_v18  ;;  %v14732_v3 = vcombine.low %v1670_v11, %v1674_v18 }
 0x384   :  { %6504 = vmatprep.subr.bf16.mxu1 %v14703_v60  ;;  %v1802_v39 = vld [vmem:[#allocation7 + $0x14a0] sm:$0xff]  ;;  %17971 = vst [vmem:[#allocation541_spill] sm:$0xff] %v14724_v44 }
 0x385   :  { %17972 = vst [vmem:[#allocation542_spill] sm:$0xff] %v14726_v16  ;;  %v14729_v1 = vcombine.high %v1798_v54, %v1802_v39  ;;  %v1662_v60 = vld [vmem:[#allocation7 + $0x1040] sm:$0xff]  ;;  %17974 = vst [vmem:[#allocation544_spill] sm:$0xff] %v14732_v3  ;;  %v14736_v13 = vcombine.low %v1798_v54, %v1802_v39 }
 0x386   :  { %6462 = vmatpush1.bf16.msra.mxu0 %v14708_v7  ;;  %v1666_v28 = vld [vmem:[#allocation7 + $0x1060] sm:$0xff] }
 0x387   :  { %6505 = vmatpush1.bf16.msra.mxu1 %v14712_v61  ;;  %6463 = vmatprep.subr.bf16.mxu0 %v14714_v10  ;;  %17973 = vst [vmem:[#allocation543_spill] sm:$0xff] %v14729_v1  ;;  %v1790_v41 = vld [vmem:[#allocation7 + $0x1440] sm:$0xff]  ;;  %17975 = vst [vmem:[#allocation545_spill] sm:$0xff] %v14736_v13  ;;  %v14738_v15 = vcombine.high %v1662_v60, %v1666_v28  ;;  %v14744_v11 = vcombine.low %v1662_v60, %v1666_v28 }
 0x388   :  { %6506 = vmatprep.subr.bf16.mxu1 %v14717_v8  ;;  %v1794_v63 = vld [vmem:[#allocation7 + $0x1460] sm:$0xff] }
 0x389   :  { %17976 = vst [vmem:[#allocation546_spill] sm:$0xff] %v14738_v15  ;;  %v14741_v12 = vcombine.high %v1790_v41, %v1794_v63  ;;  %v1654_v8 = vld [vmem:[#allocation7 + $0x1000] sm:$0xff]  ;;  %17978 = vst [vmem:[#allocation548_spill] sm:$0xff] %v14744_v11  ;;  %v14748_v18 = vcombine.low %v1790_v41, %v1794_v63 }
 0x38a   :  { %6464 = vmatpush1.bf16.msra.mxu0 %v14720_v59  ;;  %v1658_v10 = vld [vmem:[#allocation7 + $0x1020] sm:$0xff] }
 0x38b   :  { %6507 = vmatpush1.bf16.msra.mxu1 %v14724_v44  ;;  %6465 = vmatprep.subr.bf16.mxu0 %v14726_v16  ;;  %17977 = vst [vmem:[#allocation547_spill] sm:$0xff] %v14741_v12  ;;  %v1782_v61 = vld [vmem:[#allocation7 + $0x1400] sm:$0xff]  ;;  %17979 = vst [vmem:[#allocation549_spill] sm:$0xff] %v14748_v18  ;;  %v14750_v54 = vcombine.high %v1654_v8, %v1658_v10  ;;  %v14756_v28 = vcombine.low %v1654_v8, %v1658_v10 }
 0x38c   :  { %6508 = vmatprep.subr.bf16.mxu1 %v14729_v1  ;;  %v1786_v7 = vld [vmem:[#allocation7 + $0x1420] sm:$0xff] }
 0x38d   :  { %17980 = vst [vmem:[#allocation550_spill] sm:$0xff] %v14750_v54  ;;  %v14753_v39 = vcombine.high %v1782_v61, %v1786_v7  ;;  %v1774_v1 = vld [vmem:[#allocation7 + $0x13c0] sm:$0xff]  ;;  %17982 = vst [vmem:[#allocation552_spill] sm:$0xff] %v14756_v28  ;;  %v14760_v41 = vcombine.low %v1782_v61, %v1786_v7 }
 0x38e   :  { %6466 = vmatpush1.bf16.msra.mxu0 %v14732_v3  ;;  %v1778_v16 = vld [vmem:[#allocation7 + $0x13e0] sm:$0xff] }
 0x38f   :  { %6509 = vmatpush1.bf16.msra.mxu1 %v14736_v13  ;;  %6467 = vmatprep.subr.bf16.mxu0 %v14738_v15  ;;  %17981 = vst [vmem:[#allocation551_spill] sm:$0xff] %v14753_v39  ;;  %v1902_v44 = vld [vmem:[#allocation7 + $0x17c0] sm:$0xff]  ;;  %17983 = vst [vmem:[#allocation553_spill] sm:$0xff] %v14760_v41  ;;  %v14762_v63 = vcombine.high %v1774_v1, %v1778_v16  ;;  %v14768_v10 = vcombine.low %v1774_v1, %v1778_v16 }
 0x390   :  { %6510 = vmatprep.subr.bf16.mxu1 %v14741_v12  ;;  %v1906_v59 = vld [vmem:[#allocation7 + $0x17e0] sm:$0xff] }
 0x391   :  { %17984 = vst [vmem:[#allocation554_spill] sm:$0xff] %v14762_v63  ;;  %v14765_v60 = vcombine.high %v1902_v44, %v1906_v59  ;;  %v1766_v12 = vld [vmem:[#allocation7 + $0x1380] sm:$0xff]  ;;  %17986 = vst [vmem:[#allocation556_spill] sm:$0xff] %v14768_v10  ;;  %v14772_v7 = vcombine.low %v1902_v44, %v1906_v59 }
 0x392   :  { %6468 = vmatpush1.bf16.msra.mxu0 %v14744_v11  ;;  %v1770_v15 = vld [vmem:[#allocation7 + $0x13a0] sm:$0xff] }
 0x393   :  { %6511 = vmatpush1.bf16.msra.mxu1 %v14748_v18  ;;  %6469 = vmatprep.subr.bf16.mxu0 %v14750_v54  ;;  %17985 = vst [vmem:[#allocation555_spill] sm:$0xff] %v14765_v60  ;;  %v1894_v13 = vld [vmem:[#allocation7 + $0x1780] sm:$0xff]  ;;  %17987 = vst [vmem:[#allocation557_spill] sm:$0xff] %v14772_v7  ;;  %v14774_v61 = vcombine.high %v1766_v12, %v1770_v15  ;;  %v14780_v16 = vcombine.low %v1766_v12, %v1770_v15 }
 0x394   :  { %6512 = vmatprep.subr.bf16.mxu1 %v14753_v39  ;;  %v1898_v3 = vld [vmem:[#allocation7 + $0x17a0] sm:$0xff] }
 0x395   :  { %17988 = vst [vmem:[#allocation558_spill] sm:$0xff] %v14774_v61  ;;  %v14777_v8 = vcombine.high %v1894_v13, %v1898_v3  ;;  %v1758_v39 = vld [vmem:[#allocation7 + $0x1340] sm:$0xff]  ;;  %17990 = vst [vmem:[#allocation560_spill] sm:$0xff] %v14780_v16  ;;  %v14784_v59 = vcombine.low %v1894_v13, %v1898_v3 }
 0x396   :  { %6470 = vmatpush1.bf16.msra.mxu0 %v14756_v28  ;;  %v1762_v54 = vld [vmem:[#allocation7 + $0x1360] sm:$0xff] }
 0x397   :  { %6513 = vmatpush1.bf16.msra.mxu1 %v14760_v41  ;;  %6471 = vmatprep.subr.bf16.mxu0 %v14762_v63  ;;  %17989 = vst [vmem:[#allocation559_spill] sm:$0xff] %v14777_v8  ;;  %v1886_v18 = vld [vmem:[#allocation7 + $0x1740] sm:$0xff]  ;;  %17991 = vst [vmem:[#allocation561_spill] sm:$0xff] %v14784_v59  ;;  %v14786_v44 = vcombine.high %v1758_v39, %v1762_v54  ;;  %v14792_v15 = vcombine.low %v1758_v39, %v1762_v54 }
 0x398   :  { %6514 = vmatprep.subr.bf16.mxu1 %v14765_v60  ;;  %v1890_v11 = vld [vmem:[#allocation7 + $0x1760] sm:$0xff] }
 0x399   :  { %17992 = vst [vmem:[#allocation562_spill] sm:$0xff] %v14786_v44  ;;  %v14789_v1 = vcombine.high %v1886_v18, %v1890_v11  ;;  %v1750_v60 = vld [vmem:[#allocation7 + $0x1300] sm:$0xff]  ;;  %17994 = vst [vmem:[#allocation564_spill] sm:$0xff] %v14792_v15  ;;  %v14796_v3 = vcombine.low %v1886_v18, %v1890_v11 }
 0x39a   :  { %6472 = vmatpush2.bf16.msra.mxu0 %v14768_v10  ;;  %v1754_v63 = vld [vmem:[#allocation7 + $0x1320] sm:$0xff] }
 0x39b   :  { %6515 = vmatpush2.bf16.msra.mxu1 %v14772_v7  ;;  %6473 = vmatprep.subr.bf16.mxu0 %v14774_v61  ;;  %17993 = vst [vmem:[#allocation563_spill] sm:$0xff] %v14789_v1  ;;  %v1878_v41 = vld [vmem:[#allocation7 + $0x1700] sm:$0xff]  ;;  %17995 = vst [vmem:[#allocation565_spill] sm:$0xff] %v14796_v3  ;;  %v14798_v13 = vcombine.high %v1750_v60, %v1754_v63  ;;  %v14804_v54 = vcombine.low %v1750_v60, %v1754_v63 }
 0x39c   :  { %6516 = vmatprep.subr.bf16.mxu1 %v14777_v8  ;;  %v1882_v28 = vld [vmem:[#allocation7 + $0x1720] sm:$0xff] }
 0x39d   :  { %17996 = vst [vmem:[#allocation566_spill] sm:$0xff] %v14798_v13  ;;  %v14801_v12 = vcombine.high %v1878_v41, %v1882_v28  ;;  %v1742_v8 = vld [vmem:[#allocation7 + $0x12c0] sm:$0xff]  ;;  %17998 = vst [vmem:[#allocation568_spill] sm:$0xff] %v14804_v54  ;;  %v14808_v11 = vcombine.low %v1878_v41, %v1882_v28 }
 0x39e   :  { %6474 = vmatpush2.bf16.msra.mxu0 %v14780_v16  ;;  %v1746_v61 = vld [vmem:[#allocation7 + $0x12e0] sm:$0xff] }
 0x39f   :  { %6517 = vmatpush2.bf16.msra.mxu1 %v14784_v59  ;;  %6475 = vmatprep.subr.bf16.mxu0 %v14786_v44  ;;  %17997 = vst [vmem:[#allocation567_spill] sm:$0xff] %v14801_v12  ;;  %v1870_v7 = vld [vmem:[#allocation7 + $0x16c0] sm:$0xff]  ;;  %17999 = vst [vmem:[#allocation569_spill] sm:$0xff] %v14808_v11  ;;  %v14810_v18 = vcombine.high %v1742_v8, %v1746_v61  ;;  %v14816_v63 = vcombine.low %v1742_v8, %v1746_v61 }
 0x3a0   :  { %6518 = vmatprep.subr.bf16.mxu1 %v14789_v1  ;;  %v1874_v10 = vld [vmem:[#allocation7 + $0x16e0] sm:$0xff] }
 0x3a1   :  { %18000 = vst [vmem:[#allocation570_spill] sm:$0xff] %v14810_v18  ;;  %v14813_v39 = vcombine.high %v1870_v7, %v1874_v10  ;;  %v1734_v1 = vld [vmem:[#allocation7 + $0x1280] sm:$0xff]  ;;  %18002 = vst [vmem:[#allocation572_spill] sm:$0xff] %v14816_v63  ;;  %v14820_v28 = vcombine.low %v1870_v7, %v1874_v10 }
 0x3a2   :  { %6476 = vmatpush2.bf16.msra.mxu0 %v14792_v15  ;;  %v1738_v44 = vld [vmem:[#allocation7 + $0x12a0] sm:$0xff] }
 0x3a3   :  { %6519 = vmatpush2.bf16.msra.mxu1 %v14796_v3  ;;  %6477 = vmatprep.subr.bf16.mxu0 %v14798_v13  ;;  %18001 = vst [vmem:[#allocation571_spill] sm:$0xff] %v14813_v39  ;;  %v1862_v59 = vld [vmem:[#allocation7 + $0x1680] sm:$0xff]  ;;  %18003 = vst [vmem:[#allocation573_spill] sm:$0xff] %v14820_v28  ;;  %v14822_v41 = vcombine.high %v1734_v1, %v1738_v44  ;;  %v14828_v61 = vcombine.low %v1734_v1, %v1738_v44 }
 0x3a4   :  { %6520 = vmatprep.subr.bf16.mxu1 %v14801_v12  ;;  %v1866_v16 = vld [vmem:[#allocation7 + $0x16a0] sm:$0xff] }
 0x3a5   :  { %18004 = vst [vmem:[#allocation574_spill] sm:$0xff] %v14822_v41  ;;  %v14825_v60 = vcombine.high %v1862_v59, %v1866_v16  ;;  %v1726_v12 = vld [vmem:[#allocation7 + $0x1240] sm:$0xff]  ;;  %18006 = vst [vmem:[#allocation576_spill] sm:$0xff] %v14828_v61  ;;  %v14832_v10 = vcombine.low %v1862_v59, %v1866_v16 }
 0x3a6   :  { %6478 = vmatpush2.bf16.msra.mxu0 %v14804_v54  ;;  %v1730_v13 = vld [vmem:[#allocation7 + $0x1260] sm:$0xff] }
 0x3a7   :  { %6521 = vmatpush2.bf16.msra.mxu1 %v14808_v11  ;;  %6479 = vmatprep.subr.bf16.mxu0 %v14810_v18  ;;  %18005 = vst [vmem:[#allocation575_spill] sm:$0xff] %v14825_v60  ;;  %v1854_v3 = vld [vmem:[#allocation7 + $0x1640] sm:$0xff]  ;;  %18007 = vst [vmem:[#allocation577_spill] sm:$0xff] %v14832_v10  ;;  %v14834_v7 = vcombine.high %v1726_v12, %v1730_v13  ;;  %v14840_v44 = vcombine.low %v1726_v12, %v1730_v13  ;;  %v5160_v12 = vrot.slane %v13198_v57, 7 }
 0x3a8   :  { %6522 = vmatprep.subr.bf16.mxu1 %v14813_v39  ;;  %v1858_v15 = vld [vmem:[#allocation7 + $0x1660] sm:$0xff] }
 0x3a9   :  { %18008 = vst [vmem:[#allocation578_spill] sm:$0xff] %v14834_v7  ;;  %v14837_v8 = vcombine.high %v1854_v3, %v1858_v15  ;;  %v1718_v39 = vld [vmem:[#allocation7 + $0x1200] sm:$0xff]  ;;  %18010 = vst [vmem:[#allocation580_spill] sm:$0xff] %v14840_v44  ;;  %v14844_v16 = vcombine.low %v1854_v3, %v1858_v15 }
 0x3aa   :  { %6480 = vmatpush2.bf16.msra.mxu0 %v14816_v63  ;;  %v1722_v18 = vld [vmem:[#allocation7 + $0x1220] sm:$0xff]  ;;  %v1843_v63 = vld [vmem:[#allocation7 + $0x15e8] sm:$0xff] }
 0x3ab   :  { %6523 = vmatpush2.bf16.msra.mxu1 %v14820_v28  ;;  %6481 = vmatprep.subr.bf16.mxu0 %v14822_v41  ;;  %18009 = vst [vmem:[#allocation579_spill] sm:$0xff] %v14837_v8  ;;  %v1846_v11 = vld [vmem:[#allocation7 + $0x1600] sm:$0xff]  ;;  %18011 = vst [vmem:[#allocation581_spill] sm:$0xff] %v14844_v16  ;;  %v14846_v59 = vcombine.high %v1718_v39, %v1722_v18  ;;  %v1715_v41 = vld [vmem:[#allocation7 + $0x11e8] sm:$0xff]  ;;  %v14852_v13 = vcombine.low %v1718_v39, %v1722_v18  ;;  %v5159_v18 = vrot.slane %v13151_v0, 7 }
 0x3ac   :  { %6524 = vmatprep.subr.bf16.mxu1 %v14825_v60  ;;  %v1850_v54 = vld [vmem:[#allocation7 + $0x1620] sm:$0xff]  ;;  %v1711_v60 = vld [vmem:[#allocation7 + $0x11c8] sm:$0xff] }
 0x3ad   :  { %18012 = vst [vmem:[#allocation582_spill] sm:$0xff] %v14846_v59  ;;  %v14849_v1 = vcombine.high %v1846_v11, %v1850_v54  ;;  %v1839_v28 = vld [vmem:[#allocation7 + $0x15c8] sm:$0xff]  ;;  %18014 = vst [vmem:[#allocation584_spill] sm:$0xff] %v14852_v13  ;;  %v14856_v15 = vcombine.low %v1846_v11, %v1850_v54  ;;  %v14858_v3 = vcombine.high %v1711_v60, %v1715_v41 }
 0x3ae   :  { %6482 = vmatpush2.bf16.msra.mxu0 %v14828_v61  ;;  %v14867_v39 = vcombine.low %v1711_v60, %v1715_v41  ;;  %v1831_v54 = vld [vmem:[#allocation7 + $0x1588] sm:$0xff]  ;;  %v14872_v57 = vcombine.low %v1839_v28, %v1843_v63 }
 0x3af   :  { %6525 = vmatpush2.bf16.msra.mxu1 %v14832_v10  ;;  %6483 = vmatprep.subr.bf16.mxu0 %v14834_v7  ;;  %18013 = vst [vmem:[#allocation583_spill] sm:$0xff] %v14849_v1  ;;  %18015 = vst [vmem:[#allocation585_spill] sm:$0xff] %v14856_v15  ;;  %v5166_v7 = vrot.slane %v13206_v62, 7  ;;  %v1703_v10 = vld [vmem:[#allocation7 + $0x1188] sm:$0xff]  ;;  %v14875_v62 = vsel %vm1109_vm0, %v5159_v18, %v5160_v12 }
 0x3b0   :  { %6526 = vmatprep.subr.bf16.mxu1 %v14837_v8  ;;  %18016 = vst [vmem:[#allocation586_spill] sm:$0xff] %v14858_v3  ;;  %v14862_v8 = vcombine.high %v1839_v28, %v1843_v63  ;;  %18018 = vst [vmem:[#allocation588_spill] sm:$0xff] %v14867_v39  ;;  %v1835_v11 = vld [vmem:[#allocation7 + $0x15a8] sm:$0xff] }
 0x3b1   :  { %18019 = vst [vmem:[#allocation589_spill] sm:$0xff] %v14872_v57  ;;  %v1699_v41 = vld [vmem:[#allocation7 + $0x1168] sm:$0xff] }
 0x3b2   :  { %6484 = vmatpush2.bf16.msra.mxu0 %v14840_v44  ;;  %18017 = vst [vmem:[#allocation587_spill] sm:$0xff] %v14862_v8  ;;  %v1707_v44 = vld [vmem:[#allocation7 + $0x11a8] sm:$0xff] }
 0x3b3   :  { %6527 = vmatpush2.bf16.msra.mxu1 %v14844_v16  ;;  %6485 = vmatprep.subr.bf16.mxu0 %v14846_v59  ;;  %v5165_v59 = vrot.slane %v13160_v53, 7  ;;  %v1827_v63 = vld [vmem:[#allocation7 + $0x1568] sm:$0xff]  ;;  %v14889_v18 = vcombine.low %v1703_v10, %v1707_v44 }
 0x3b4   :  { %6528 = vmatprep.subr.bf16.mxu1 %v14849_v1  ;;  %v14878_v1 = vcombine.high %v1703_v10, %v1707_v44  ;;  %v1687_v44 = vld [vmem:[#allocation7 + $0x1108] sm:$0xff] }
 0x3b5   :  { %v14881_v60 = vsel %vm1109_vm0, %v5165_v59, %v5166_v7  ;;  %v14893_v59 = vcombine.low %v1831_v54, %v1835_v11 }
 0x3b6   :  { %6486 = vmatpush2.bf16.msra.mxu0 %v14852_v13  ;;  %18020 = vst [vmem:[#allocation590_spill] sm:$0xff] %v14878_v1  ;;  %v1695_v13 = vld [vmem:[#allocation7 + $0x1148] sm:$0xff] }
 0x3b7   :  { %6529 = vmatpush2.bf16.msra.mxu1 %v14856_v15  ;;  %6541 = vmatprep.subr.bf16.mxu0 %v14858_v3  ;;  %v14884_v15 = vcombine.high %v1831_v54, %v1835_v11  ;;  %v1823_v3 = vld [vmem:[#allocation7 + $0x1548] sm:$0xff]  ;;  %18022 = vst [vmem:[#allocation592_spill] sm:$0xff] %v14893_v59 }
 0x3b8   :  { %6584 = vmatprep.subr.bf16.mxu1 %v14862_v8  ;;  %v14895_v8 = vcombine.high %v1695_v13, %v1699_v41  ;;  %v14902_v10 = vcombine.high %v1823_v3, %v1827_v63  ;;  %v1815_v54 = vld [vmem:[#allocation7 + $0x1508] sm:$0xff] }
 0x3b9   :  { %v4934_v16 = vpop.f32.mrf.mxu0  ;;  %6488 = vmatmul.mubr.bf16.vlgmr.msra.gmra.mxu0 %v14875_v62  ;;  %18021 = vst [vmem:[#allocation591_spill] sm:$0xff] %v14884_v15  ;;  %v1819_v11 = vld [vmem:[#allocation7 + $0x1528] sm:$0xff] }
 0x3ba   :  { %v4935_v28 = vadd.f32 %v4934_v16, %v14019_v20  ;;  %v4977_v12 = vpop.f32.mrf.mxu1  ;;  %6531 = vmatmul.mubr.bf16.vlgmr.msra.gmra.mxu1 %v14881_v60  ;;  %6542 = vmatpush1.bf16.msra.mxu0 %v14867_v39  ;;  %18023 = vst [vmem:[#allocation593_spill] sm:$0xff] %v14895_v8  ;;  %18024 = vst [vmem:[#allocation594_spill] sm:$0xff] %v14902_v10  ;;  %v1691_v39 = vld [vmem:[#allocation7 + $0x1128] sm:$0xff] }
 0x3bb   :  { %6573 = vmatprep.mubr.bf16.mxu0 %v14660_v5  ;;  %6585 = vmatpush1.bf16.msra.mxu1 %v14872_v57  ;;  %v4936_v7 = vpop.f32.mrf.mxu0  ;;  %v14917_v25 = vcombine.high %v1687_v44, %v1691_v39 }
 0x3bc   :  { %v14897_v61 = vadd.f32 %v4977_v12, %v4935_v28  ;;  %6616 = vmatprep.mubr.bf16.mxu1 %v14670_v56  ;;  %v4937_v20 = vadd.f32 %v4936_v7, %v14035_v34  ;;  %v4979_v16 = vpop.f32.mrf.mxu1  ;;  %6543 = vmatprep.subr.bf16.mxu0 %v14878_v1  ;;  %v3360_v28 = vadd.f32 %v14217_v26, %v14211_v30  ;;  %v1679_v26 = vld [vmem:[#allocation7 + $0x10c8] sm:$0xff] }
 0x3bd   :  { %v4938_v37 = vpop.f32.mrf.mxu0  ;;  %6586 = vmatprep.subr.bf16.mxu1 %v14884_v15  ;;  %v14911_v7 = vcombine.low %v1695_v13, %v1699_v41  ;;  %v14915_v15 = vcombine.low %v1823_v3, %v1827_v63  ;;  %18027 = vst [vmem:[#allocation597_spill] sm:$0xff] %v14917_v25  ;;  %v1807_v41 = vld [vmem:[#allocation7 + $0x14c8] sm:$0xff]  ;;  %v14927_v3 = vcombine.low %v1687_v44, %v1691_v39 }
 0x3be   :  { %v14907_v12 = vadd.f32 %v4979_v16, %v4937_v20  ;;  %v4939_v57 = vadd.f32 %v4938_v37, %v14041_v38  ;;  %v4981_v34 = vpop.f32.mrf.mxu1  ;;  %6544 = vmatpush1.bf16.msra.mxu0 %v14889_v18  ;;  %v14922_v38 = vcombine.high %v1815_v54, %v1819_v11  ;;  %v1683_v37 = vld [vmem:[#allocation7 + $0x10e8] sm:$0xff] }
 0x3bf   :  { %18025 = vst [vmem:[#allocation595_spill] sm:$0xff] %v14911_v7  ;;  %6587 = vmatpush1.bf16.msra.mxu1 %v14893_v59  ;;  %v4940_v1 = vpop.f32.mrf.mxu0  ;;  %6545 = vmatprep.subr.bf16.mxu0 %v14895_v8  ;;  %18026 = vst [vmem:[#allocation596_spill] sm:$0xff] %v14915_v15  ;;  %v1811_v20 = vld [vmem:[#allocation7 + $0x14e8] sm:$0xff]  ;;  %v14939_v39 = vcombine.low %v1679_v26, %v1683_v37 }
 0x3c0   :  { %v14919_v24 = vadd.f32 %v4981_v34, %v4939_v57  ;;  %v4941_v30 = vadd.f32 %v4940_v1, %v3360_v28  ;;  %6588 = vmatprep.subr.bf16.mxu1 %v14902_v10  ;;  %18028 = vst [vmem:[#allocation598_spill] sm:$0xff] %v14922_v38  ;;  %v4983_v13 = vpop.f32.mrf.mxu1  ;;  %18029 = vst [vmem:[#allocation599_spill] sm:$0xff] %v14927_v3  ;;  %v14931_v1 = vcombine.low %v1815_v54, %v1819_v11  ;;  %v1671_v28 = vld [vmem:[#allocation7 + $0x1088] sm:$0xff] }
 0x3c1   :  { %v14933_v57 = vcombine.high %v1679_v26, %v1683_v37  ;;  %v14936_v63 = vcombine.high %v1807_v41, %v1811_v20  ;;  %v1675_v34 = vld [vmem:[#allocation7 + $0x10a8] sm:$0xff]  ;;  %18033 = vst [vmem:[#allocation603_spill] sm:$0xff] %v14939_v39  ;;  %v14943_v44 = vcombine.low %v1807_v41, %v1811_v20 }
 0x3c2   :  { %v14924_v16 = vadd.f32 %v4983_v13, %v4941_v30  ;;  %6546 = vmatpush1.bf16.msra.mxu0 %v14911_v7  ;;  %18030 = vst [vmem:[#allocation600_spill] sm:$0xff] %v14931_v1  ;;  %v1799_v30 = vld [vmem:[#allocation7 + $0x1488] sm:$0xff]  ;;  %v14945_v54 = vcombine.high %v1671_v28, %v1675_v34  ;;  %v14951_v26 = vcombine.low %v1671_v28, %v1675_v34 }
 0x3c3   :  { %6589 = vmatpush1.bf16.msra.mxu1 %v14915_v15  ;;  %6547 = vmatprep.subr.bf16.mxu0 %v14917_v25  ;;  %18031 = vst [vmem:[#allocation601_spill] sm:$0xff] %v14933_v57  ;;  %18032 = vst [vmem:[#allocation602_spill] sm:$0xff] %v14936_v63  ;;  %v1803_v13 = vld [vmem:[#allocation7 + $0x14a8] sm:$0xff] }
 0x3c4   :  { %6590 = vmatprep.subr.bf16.mxu1 %v14922_v38  ;;  %18034 = vst [vmem:[#allocation604_spill] sm:$0xff] %v14943_v44  ;;  %18035 = vst [vmem:[#allocation605_spill] sm:$0xff] %v14945_v54  ;;  %v14948_v11 = vcombine.high %v1799_v30, %v1803_v13  ;;  %v1663_v38 = vld [vmem:[#allocation7 + $0x1048] sm:$0xff]  ;;  %v14955_v37 = vcombine.low %v1799_v30, %v1803_v13 }
 0x3c5   :  { %v1667_v25 = vld [vmem:[#allocation7 + $0x1068] sm:$0xff]  ;;  %18037 = vst [vmem:[#allocation607_spill] sm:$0xff] %v14951_v26 }
 0x3c6   :  { %6548 = vmatpush1.bf16.msra.mxu0 %v14927_v3  ;;  %18036 = vst [vmem:[#allocation606_spill] sm:$0xff] %v14948_v11  ;;  %v1791_v15 = vld [vmem:[#allocation7 + $0x1448] sm:$0xff]  ;;  %18038 = vst [vmem:[#allocation608_spill] sm:$0xff] %v14955_v37  ;;  %v14957_v41 = vcombine.high %v1663_v38, %v1667_v25  ;;  %v14963_v28 = vcombine.low %v1663_v38, %v1667_v25 }
 0x3c7   :  { %6591 = vmatpush1.bf16.msra.mxu1 %v14931_v1  ;;  %6549 = vmatprep.subr.bf16.mxu0 %v14933_v57  ;;  %v1795_v7 = vld [vmem:[#allocation7 + $0x1468] sm:$0xff] }
 0x3c8   :  { %6592 = vmatprep.subr.bf16.mxu1 %v14936_v63  ;;  %18039 = vst [vmem:[#allocation609_spill] sm:$0xff] %v14957_v41  ;;  %v14960_v20 = vcombine.high %v1791_v15, %v1795_v7  ;;  %v1655_v63 = vld [vmem:[#allocation7 + $0x1008] sm:$0xff]  ;;  %18041 = vst [vmem:[#allocation611_spill] sm:$0xff] %v14963_v28  ;;  %v14967_v34 = vcombine.low %v1791_v15, %v1795_v7 }
 0x3c9   :  { %v1659_v57 = vld [vmem:[#allocation7 + $0x1028] sm:$0xff] }
 0x3ca   :  { %6550 = vmatpush1.bf16.msra.mxu0 %v14939_v39  ;;  %18040 = vst [vmem:[#allocation610_spill] sm:$0xff] %v14960_v20  ;;  %v1783_v1 = vld [vmem:[#allocation7 + $0x1408] sm:$0xff]  ;;  %18042 = vst [vmem:[#allocation612_spill] sm:$0xff] %v14967_v34  ;;  %v14969_v30 = vcombine.high %v1655_v63, %v1659_v57  ;;  %v14975_v25 = vcombine.low %v1655_v63, %v1659_v57 }
 0x3cb   :  { %6593 = vmatpush1.bf16.msra.mxu1 %v14943_v44  ;;  %6551 = vmatprep.subr.bf16.mxu0 %v14945_v54  ;;  %v1787_v3 = vld [vmem:[#allocation7 + $0x1428] sm:$0xff] }
 0x3cc   :  { %6594 = vmatprep.subr.bf16.mxu1 %v14948_v11  ;;  %18043 = vst [vmem:[#allocation613_spill] sm:$0xff] %v14969_v30  ;;  %v14972_v13 = vcombine.high %v1783_v1, %v1787_v3  ;;  %v1775_v11 = vld [vmem:[#allocation7 + $0x13c8] sm:$0xff]  ;;  %18045 = vst [vmem:[#allocation615_spill] sm:$0xff] %v14975_v25  ;;  %v14979_v15 = vcombine.low %v1783_v1, %v1787_v3 }
 0x3cd   :  { %v1779_v54 = vld [vmem:[#allocation7 + $0x13e8] sm:$0xff] }
 0x3ce   :  { %6552 = vmatpush1.bf16.msra.mxu0 %v14951_v26  ;;  %18044 = vst [vmem:[#allocation614_spill] sm:$0xff] %v14972_v13  ;;  %v1903_v44 = vld [vmem:[#allocation7 + $0x17c8] sm:$0xff]  ;;  %18046 = vst [vmem:[#allocation616_spill] sm:$0xff] %v14979_v15  ;;  %v14981_v7 = vcombine.high %v1775_v11, %v1779_v54  ;;  %v14987_v57 = vcombine.low %v1775_v11, %v1779_v54 }
 0x3cf   :  { %6595 = vmatpush1.bf16.msra.mxu1 %v14955_v37  ;;  %6553 = vmatprep.subr.bf16.mxu0 %v14957_v41  ;;  %v1907_v39 = vld [vmem:[#allocation7 + $0x17e8] sm:$0xff] }
 0x3d0   :  { %6596 = vmatprep.subr.bf16.mxu1 %v14960_v20  ;;  %18047 = vst [vmem:[#allocation617_spill] sm:$0xff] %v14981_v7  ;;  %v14984_v38 = vcombine.high %v1903_v44, %v1907_v39  ;;  %v1767_v20 = vld [vmem:[#allocation7 + $0x1388] sm:$0xff]  ;;  %18049 = vst [vmem:[#allocation619_spill] sm:$0xff] %v14987_v57  ;;  %v14991_v3 = vcombine.low %v1903_v44, %v1907_v39 }
 0x3d1   :  { %v1771_v41 = vld [vmem:[#allocation7 + $0x13a8] sm:$0xff] }
 0x3d2   :  { %6554 = vmatpush1.bf16.msra.mxu0 %v14963_v28  ;;  %18048 = vst [vmem:[#allocation618_spill] sm:$0xff] %v14984_v38  ;;  %v1895_v37 = vld [vmem:[#allocation7 + $0x1788] sm:$0xff]  ;;  %18050 = vst [vmem:[#allocation620_spill] sm:$0xff] %v14991_v3  ;;  %v14993_v1 = vcombine.high %v1767_v20, %v1771_v41  ;;  %v14999_v54 = vcombine.low %v1767_v20, %v1771_v41 }
 0x3d3   :  { %6597 = vmatpush1.bf16.msra.mxu1 %v14967_v34  ;;  %6555 = vmatprep.subr.bf16.mxu0 %v14969_v30  ;;  %v1899_v26 = vld [vmem:[#allocation7 + $0x17a8] sm:$0xff] }
 0x3d4   :  { %6598 = vmatprep.subr.bf16.mxu1 %v14972_v13  ;;  %18051 = vst [vmem:[#allocation621_spill] sm:$0xff] %v14993_v1  ;;  %v14996_v63 = vcombine.high %v1895_v37, %v1899_v26  ;;  %v1759_v13 = vld [vmem:[#allocation7 + $0x1348] sm:$0xff]  ;;  %18053 = vst [vmem:[#allocation623_spill] sm:$0xff] %v14999_v54  ;;  %v15003_v39 = vcombine.low %v1895_v37, %v1899_v26 }
 0x3d5   :  { %v1763_v30 = vld [vmem:[#allocation7 + $0x1368] sm:$0xff] }
 0x3d6   :  { %6556 = vmatpush1.bf16.msra.mxu0 %v14975_v25  ;;  %18052 = vst [vmem:[#allocation622_spill] sm:$0xff] %v14996_v63  ;;  %v1887_v34 = vld [vmem:[#allocation7 + $0x1748] sm:$0xff]  ;;  %18054 = vst [vmem:[#allocation624_spill] sm:$0xff] %v15003_v39  ;;  %v15005_v44 = vcombine.high %v1759_v13, %v1763_v30  ;;  %v15011_v41 = vcombine.low %v1759_v13, %v1763_v30 }
 0x3d7   :  { %6599 = vmatpush1.bf16.msra.mxu1 %v14979_v15  ;;  %6557 = vmatprep.subr.bf16.mxu0 %v14981_v7  ;;  %v1891_v28 = vld [vmem:[#allocation7 + $0x1768] sm:$0xff] }
 0x3d8   :  { %6600 = vmatprep.subr.bf16.mxu1 %v14984_v38  ;;  %18055 = vst [vmem:[#allocation625_spill] sm:$0xff] %v15005_v44  ;;  %v15008_v11 = vcombine.high %v1887_v34, %v1891_v28  ;;  %v1751_v38 = vld [vmem:[#allocation7 + $0x1308] sm:$0xff]  ;;  %18057 = vst [vmem:[#allocation627_spill] sm:$0xff] %v15011_v41  ;;  %v15015_v26 = vcombine.low %v1887_v34, %v1891_v28 }
 0x3d9   :  { %v1755_v7 = vld [vmem:[#allocation7 + $0x1328] sm:$0xff] }
 0x3da   :  { %6558 = vmatpush2.bf16.msra.mxu0 %v14987_v57  ;;  %18056 = vst [vmem:[#allocation626_spill] sm:$0xff] %v15008_v11  ;;  %v1879_v15 = vld [vmem:[#allocation7 + $0x1708] sm:$0xff]  ;;  %18058 = vst [vmem:[#allocation628_spill] sm:$0xff] %v15015_v26  ;;  %v15017_v37 = vcombine.high %v1751_v38, %v1755_v7  ;;  %v15023_v30 = vcombine.low %v1751_v38, %v1755_v7 }
 0x3db   :  { %6601 = vmatpush2.bf16.msra.mxu1 %v14991_v3  ;;  %6559 = vmatprep.subr.bf16.mxu0 %v14993_v1  ;;  %v1883_v25 = vld [vmem:[#allocation7 + $0x1728] sm:$0xff] }
 0x3dc   :  { %6602 = vmatprep.subr.bf16.mxu1 %v14996_v63  ;;  %18059 = vst [vmem:[#allocation629_spill] sm:$0xff] %v15017_v37  ;;  %v15020_v20 = vcombine.high %v1879_v15, %v1883_v25  ;;  %v1743_v63 = vld [vmem:[#allocation7 + $0x12c8] sm:$0xff]  ;;  %18061 = vst [vmem:[#allocation631_spill] sm:$0xff] %v15023_v30  ;;  %v15027_v28 = vcombine.low %v1879_v15, %v1883_v25 }
 0x3dd   :  { %v1747_v1 = vld [vmem:[#allocation7 + $0x12e8] sm:$0xff] }
 0x3de   :  { %6560 = vmatpush2.bf16.msra.mxu0 %v14999_v54  ;;  %18060 = vst [vmem:[#allocation630_spill] sm:$0xff] %v15020_v20  ;;  %v1871_v3 = vld [vmem:[#allocation7 + $0x16c8] sm:$0xff]  ;;  %18062 = vst [vmem:[#allocation632_spill] sm:$0xff] %v15027_v28  ;;  %v15029_v34 = vcombine.high %v1743_v63, %v1747_v1  ;;  %v15035_v7 = vcombine.low %v1743_v63, %v1747_v1 }
 0x3df   :  { %6603 = vmatpush2.bf16.msra.mxu1 %v15003_v39  ;;  %6561 = vmatprep.subr.bf16.mxu0 %v15005_v44  ;;  %v1875_v57 = vld [vmem:[#allocation7 + $0x16e8] sm:$0xff] }
 0x3e0   :  { %6604 = vmatprep.subr.bf16.mxu1 %v15008_v11  ;;  %18063 = vst [vmem:[#allocation633_spill] sm:$0xff] %v15029_v34  ;;  %v15032_v13 = vcombine.high %v1871_v3, %v1875_v57  ;;  %v1735_v11 = vld [vmem:[#allocation7 + $0x1288] sm:$0xff]  ;;  %18065 = vst [vmem:[#allocation635_spill] sm:$0xff] %v15035_v7  ;;  %v15039_v25 = vcombine.low %v1871_v3, %v1875_v57 }
 0x3e1   :  { %v1739_v44 = vld [vmem:[#allocation7 + $0x12a8] sm:$0xff] }
 0x3e2   :  { %6562 = vmatpush2.bf16.msra.mxu0 %v15011_v41  ;;  %18064 = vst [vmem:[#allocation634_spill] sm:$0xff] %v15032_v13  ;;  %v1863_v39 = vld [vmem:[#allocation7 + $0x1688] sm:$0xff]  ;;  %18066 = vst [vmem:[#allocation636_spill] sm:$0xff] %v15039_v25  ;;  %v15041_v15 = vcombine.high %v1735_v11, %v1739_v44  ;;  %v15047_v1 = vcombine.low %v1735_v11, %v1739_v44 }
 0x3e3   :  { %6605 = vmatpush2.bf16.msra.mxu1 %v15015_v26  ;;  %6563 = vmatprep.subr.bf16.mxu0 %v15017_v37  ;;  %v1867_v54 = vld [vmem:[#allocation7 + $0x16a8] sm:$0xff] }
 0x3e4   :  { %6606 = vmatprep.subr.bf16.mxu1 %v15020_v20  ;;  %18067 = vst [vmem:[#allocation637_spill] sm:$0xff] %v15041_v15  ;;  %v15044_v38 = vcombine.high %v1863_v39, %v1867_v54  ;;  %v1727_v20 = vld [vmem:[#allocation7 + $0x1248] sm:$0xff]  ;;  %18069 = vst [vmem:[#allocation639_spill] sm:$0xff] %v15047_v1  ;;  %v15051_v57 = vcombine.low %v1863_v39, %v1867_v54 }
 0x3e5   :  { %v1731_v37 = vld [vmem:[#allocation7 + $0x1268] sm:$0xff] }
 0x3e6   :  { %6564 = vmatpush2.bf16.msra.mxu0 %v15023_v30  ;;  %18068 = vst [vmem:[#allocation638_spill] sm:$0xff] %v15044_v38  ;;  %v1855_v26 = vld [vmem:[#allocation7 + $0x1648] sm:$0xff]  ;;  %18070 = vst [vmem:[#allocation640_spill] sm:$0xff] %v15051_v57  ;;  %v15053_v3 = vcombine.high %v1727_v20, %v1731_v37  ;;  %v15059_v44 = vcombine.low %v1727_v20, %v1731_v37 }
 0x3e7   :  { %6607 = vmatpush2.bf16.msra.mxu1 %v15027_v28  ;;  %6565 = vmatprep.subr.bf16.mxu0 %v15029_v34  ;;  %v1859_v41 = vld [vmem:[#allocation7 + $0x1668] sm:$0xff] }
 0x3e8   :  { %6608 = vmatprep.subr.bf16.mxu1 %v15032_v13  ;;  %18071 = vst [vmem:[#allocation641_spill] sm:$0xff] %v15053_v3  ;;  %v15056_v63 = vcombine.high %v1855_v26, %v1859_v41  ;;  %v1719_v13 = vld [vmem:[#allocation7 + $0x1208] sm:$0xff]  ;;  %18073 = vst [vmem:[#allocation643_spill] sm:$0xff] %v15059_v44  ;;  %v15063_v54 = vcombine.low %v1855_v26, %v1859_v41 }
 0x3e9   :  { %v1723_v34 = vld [vmem:[#allocation7 + $0x1228] sm:$0xff] }
 0x3ea   :  { %6566 = vmatpush2.bf16.msra.mxu0 %v15035_v7  ;;  %18072 = vst [vmem:[#allocation642_spill] sm:$0xff] %v15056_v63  ;;  %v1847_v28 = vld [vmem:[#allocation7 + $0x1608] sm:$0xff]  ;;  %18074 = vst [vmem:[#allocation644_spill] sm:$0xff] %v15063_v54  ;;  %v15065_v39 = vcombine.high %v1719_v13, %v1723_v34  ;;  %v1844_v7 = vld [vmem:[#allocation7 + $0x15f0] sm:$0xff]  ;;  %v15071_v37 = vcombine.low %v1719_v13, %v1723_v34 }
 0x3eb   :  { %6609 = vmatpush2.bf16.msra.mxu1 %v15039_v25  ;;  %6567 = vmatprep.subr.bf16.mxu0 %v15041_v15  ;;  %v1851_v30 = vld [vmem:[#allocation7 + $0x1628] sm:$0xff]  ;;  %v1716_v15 = vld [vmem:[#allocation7 + $0x11f0] sm:$0xff] }
 0x3ec   :  { %6610 = vmatprep.subr.bf16.mxu1 %v15044_v38  ;;  %18075 = vst [vmem:[#allocation645_spill] sm:$0xff] %v15065_v39  ;;  %v15068_v11 = vcombine.high %v1847_v28, %v1851_v30  ;;  %v1712_v38 = vld [vmem:[#allocation7 + $0x11d0] sm:$0xff]  ;;  %18077 = vst [vmem:[#allocation647_spill] sm:$0xff] %v15071_v37  ;;  %v15075_v41 = vcombine.low %v1847_v28, %v1851_v30 }
 0x3ed   :  { %v1840_v25 = vld [vmem:[#allocation7 + $0x15d0] sm:$0xff]  ;;  %v15077_v26 = vcombine.high %v1712_v38, %v1716_v15 }
 0x3ee   :  { %6568 = vmatpush2.bf16.msra.mxu0 %v15047_v1  ;;  %18076 = vst [vmem:[#allocation646_spill] sm:$0xff] %v15068_v11  ;;  %18078 = vst [vmem:[#allocation648_spill] sm:$0xff] %v15075_v41  ;;  %v15080_v20 = vcombine.high %v1840_v25, %v1844_v7  ;;  %v1832_v34 = vld [vmem:[#allocation7 + $0x1590] sm:$0xff]  ;;  %v15087_v30 = vcombine.low %v1840_v25, %v1844_v7 }
 0x3ef   :  { %6611 = vmatpush2.bf16.msra.mxu1 %v15051_v57  ;;  %6569 = vmatprep.subr.bf16.mxu0 %v15053_v3  ;;  %18079 = vst [vmem:[#allocation649_spill] sm:$0xff] %v15077_v26  ;;  %v1708_v3 = vld [vmem:[#allocation7 + $0x11b0] sm:$0xff]  ;;  %v15083_v57 = vcombine.low %v1712_v38, %v1716_v15 }
 0x3f0   :  { %6612 = vmatprep.subr.bf16.mxu1 %v15056_v63  ;;  %18080 = vst [vmem:[#allocation650_spill] sm:$0xff] %v15080_v20  ;;  %v1704_v63 = vld [vmem:[#allocation7 + $0x1190] sm:$0xff]  ;;  %18082 = vst [vmem:[#allocation652_spill] sm:$0xff] %v15087_v30 }
 0x3f1   :  { %18081 = vst [vmem:[#allocation651_spill] sm:$0xff] %v15083_v57  ;;  %v1836_v13 = vld [vmem:[#allocation7 + $0x15b0] sm:$0xff]  ;;  %v15090_v28 = vcombine.high %v1704_v63, %v1708_v3  ;;  %v15098_v7 = vcombine.low %v1704_v63, %v1708_v3 }
 0x3f2   :  { %6570 = vmatpush2.bf16.msra.mxu0 %v15059_v44  ;;  %v1824_v15 = vld [vmem:[#allocation7 + $0x1550] sm:$0xff] }
 0x3f3   :  { %6613 = vmatpush2.bf16.msra.mxu1 %v15063_v54  ;;  %6571 = vmatprep.subr.bf16.mxu0 %v15065_v39  ;;  %18083 = vst [vmem:[#allocation653_spill] sm:$0xff] %v15090_v28  ;;  %v1700_v39 = vld [vmem:[#allocation7 + $0x1170] sm:$0xff] }
 0x3f4   :  { %6614 = vmatprep.subr.bf16.mxu1 %v15068_v11  ;;  %v1696_v11 = vld [vmem:[#allocation7 + $0x1150] sm:$0xff] }
 0x3f5   :  { %v1828_v38 = vld [vmem:[#allocation7 + $0x1570] sm:$0xff] }
 0x3f6   :  { %6572 = vmatpush2.bf16.msra.mxu0 %v15071_v37  ;;  %v15093_v37 = vcombine.high %v1832_v34, %v1836_v13  ;;  %v15111_v3 = vcombine.high %v1824_v15, %v1828_v38  ;;  %v1688_v63 = vld [vmem:[#allocation7 + $0x1110] sm:$0xff] }
 0x3f7   :  { %6615 = vmatpush2.bf16.msra.mxu1 %v15075_v41  ;;  %6627 = vmatprep.subr.bf16.mxu0 %v15077_v26  ;;  %v15104_v26 = vcombine.high %v1696_v11, %v1700_v39 }
 0x3f8   :  { %6670 = vmatprep.subr.bf16.mxu1 %v15080_v20  ;;  %18084 = vst [vmem:[#allocation654_spill] sm:$0xff] %v15093_v37  ;;  %v15102_v20 = vcombine.low %v1832_v34, %v1836_v13  ;;  %18087 = vst [vmem:[#allocation657_spill] sm:$0xff] %v15111_v3  ;;  %v1816_v34 = vld [vmem:[#allocation7 + $0x1510] sm:$0xff] }
 0x3f9   :  { %v5020_v54 = vpop.f32.mrf.mxu0  ;;  %6574 = vmatmul.mubr.bf16.vlgmr.msra.gmra.mxu0 %v14875_v62  ;;  %18086 = vst [vmem:[#allocation656_spill] sm:$0xff] %v15104_v26  ;;  %v1820_v13 = vld [vmem:[#allocation7 + $0x1530] sm:$0xff] }
 0x3fa   :  { %v5021_v44 = vadd.f32 %v5020_v54, %v14233_v22  ;;  %v5063_v41 = vpop.f32.mrf.mxu1  ;;  %6617 = vmatmul.mubr.bf16.vlgmr.msra.gmra.mxu1 %v14881_v60  ;;  %6628 = vmatpush1.bf16.msra.mxu0 %v15083_v57  ;;  %18085 = vst [vmem:[#allocation655_spill] sm:$0xff] %v15102_v20  ;;  %v1692_v57 = vld [vmem:[#allocation7 + $0x1130] sm:$0xff] }
 0x3fb   :  { %6659 = vmatprep.mubr.bf16.mxu0 %v14660_v5  ;;  %6671 = vmatpush1.bf16.msra.mxu1 %v15087_v30  ;;  %v5022_v25 = vpop.f32.mrf.mxu0  ;;  %v15126_v8 = vcombine.high %v1688_v63, %v1692_v57 }
 0x3fc   :  { %v15106_v1 = vadd.f32 %v5063_v41, %v5021_v44  ;;  %6702 = vmatprep.mubr.bf16.mxu1 %v14670_v56  ;;  %v5023_v22 = vadd.f32 %v5022_v25, %v14249_v23  ;;  %v5065_v54 = vpop.f32.mrf.mxu1  ;;  %6629 = vmatprep.subr.bf16.mxu0 %v15090_v28  ;;  %v3446_v44 = vadd.f32 %v14431_v27, %v14425_v14  ;;  %v1680_v27 = vld [vmem:[#allocation7 + $0x10d0] sm:$0xff] }
 0x3fd   :  { %v5024_v10 = vpop.f32.mrf.mxu0  ;;  %6672 = vmatprep.subr.bf16.mxu1 %v15093_v37  ;;  %v15120_v25 = vcombine.low %v1696_v11, %v1700_v39  ;;  %v15124_v37 = vcombine.low %v1824_v15, %v1828_v38  ;;  %18090 = vst [vmem:[#allocation660_spill] sm:$0xff] %v15126_v8  ;;  %v1808_v11 = vld [vmem:[#allocation7 + $0x14d0] sm:$0xff]  ;;  %v15136_v15 = vcombine.low %v1688_v63, %v1692_v57 }
 0x3fe   :  { %v15116_v41 = vadd.f32 %v5065_v54, %v5023_v22  ;;  %v5025_v30 = vadd.f32 %v5024_v10, %v14255_v2  ;;  %v5067_v23 = vpop.f32.mrf.mxu1  ;;  %6630 = vmatpush1.bf16.msra.mxu0 %v15098_v7  ;;  %v15131_v2 = vcombine.high %v1816_v34, %v1820_v13  ;;  %v1684_v10 = vld [vmem:[#allocation7 + $0x10f0] sm:$0xff] }
 0x3ff   :  { %18088 = vst [vmem:[#allocation658_spill] sm:$0xff] %v15120_v25  ;;  %6673 = vmatpush1.bf16.msra.mxu1 %v15102_v20  ;;  %v5026_v28 = vpop.f32.mrf.mxu0  ;;  %6631 = vmatprep.subr.bf16.mxu0 %v15104_v26  ;;  %18089 = vst [vmem:[#allocation659_spill] sm:$0xff] %v15124_v37  ;;  %v1812_v22 = vld [vmem:[#allocation7 + $0x14f0] sm:$0xff]  ;;  %v15148_v57 = vcombine.low %v1680_v27, %v1684_v10 }
 0x400   :  { %v15128_v59 = vadd.f32 %v5067_v23, %v5025_v30  ;;  %v5027_v14 = vadd.f32 %v5026_v28, %v3446_v44  ;;  %6674 = vmatprep.subr.bf16.mxu1 %v15111_v3  ;;  %18091 = vst [vmem:[#allocation661_spill] sm:$0xff] %v15131_v2  ;;  %v5069_v39 = vpop.f32.mrf.mxu1  ;;  %18092 = vst [vmem:[#allocation662_spill] sm:$0xff] %v15136_v15  ;;  %v15140_v30 = vcombine.low %v1816_v34, %v1820_v13  ;;  %v1672_v44 = vld [vmem:[#allocation7 + $0x1090] sm:$0xff] }
 0x401   :  { %v15142_v28 = vcombine.high %v1680_v27, %v1684_v10  ;;  %v15145_v38 = vcombine.high %v1808_v11, %v1812_v22  ;;  %v1676_v23 = vld [vmem:[#allocation7 + $0x10b0] sm:$0xff]  ;;  %18096 = vst [vmem:[#allocation666_spill] sm:$0xff] %v15148_v57  ;;  %v15152_v63 = vcombine.low %v1808_v11, %v1812_v22 }
 0x402   :  { %v15133_v54 = vadd.f32 %v5069_v39, %v5027_v14  ;;  %6632 = vmatpush1.bf16.msra.mxu0 %v15120_v25  ;;  %18093 = vst [vmem:[#allocation663_spill] sm:$0xff] %v15140_v30  ;;  %v1800_v14 = vld [vmem:[#allocation7 + $0x1490] sm:$0xff]  ;;  %v15154_v34 = vcombine.high %v1672_v44, %v1676_v23  ;;  %v15160_v27 = vcombine.low %v1672_v44, %v1676_v23 }
 0x403   :  { %6675 = vmatpush1.bf16.msra.mxu1 %v15124_v37  ;;  %6633 = vmatprep.subr.bf16.mxu0 %v15126_v8  ;;  %18094 = vst [vmem:[#allocation664_spill] sm:$0xff] %v15142_v28  ;;  %18095 = vst [vmem:[#allocation665_spill] sm:$0xff] %v15145_v38  ;;  %v1804_v39 = vld [vmem:[#allocation7 + $0x14b0] sm:$0xff] }
 0x404   :  { %6676 = vmatprep.subr.bf16.mxu1 %v15131_v2  ;;  %18097 = vst [vmem:[#allocation667_spill] sm:$0xff] %v15152_v63  ;;  %18098 = vst [vmem:[#allocation668_spill] sm:$0xff] %v15154_v34  ;;  %v15157_v13 = vcombine.high %v1800_v14, %v1804_v39  ;;  %v1664_v2 = vld [vmem:[#allocation7 + $0x1050] sm:$0xff]  ;;  %v15164_v10 = vcombine.low %v1800_v14, %v1804_v39 }
 0x405   :  { %v1668_v8 = vld [vmem:[#allocation7 + $0x1070] sm:$0xff]  ;;  %18100 = vst [vmem:[#allocation670_spill] sm:$0xff] %v15160_v27 }
 0x406   :  { %6634 = vmatpush1.bf16.msra.mxu0 %v15136_v15  ;;  %18099 = vst [vmem:[#allocation669_spill] sm:$0xff] %v15157_v13  ;;  %v1792_v37 = vld [vmem:[#allocation7 + $0x1450] sm:$0xff]  ;;  %18101 = vst [vmem:[#allocation671_spill] sm:$0xff] %v15164_v10  ;;  %v15166_v11 = vcombine.high %v1664_v2, %v1668_v8  ;;  %v15172_v44 = vcombine.low %v1664_v2, %v1668_v8 }
 0x407   :  { %6677 = vmatpush1.bf16.msra.mxu1 %v15140_v30  ;;  %6635 = vmatprep.subr.bf16.mxu0 %v15142_v28  ;;  %v1796_v25 = vld [vmem:[#allocation7 + $0x1470] sm:$0xff] }
 0x408   :  { %6678 = vmatprep.subr.bf16.mxu1 %v15145_v38  ;;  %18102 = vst [vmem:[#allocation672_spill] sm:$0xff] %v15166_v11  ;;  %v15169_v22 = vcombine.high %v1792_v37, %v1796_v25  ;;  %v1656_v38 = vld [vmem:[#allocation7 + $0x1010] sm:$0xff]  ;;  %18104 = vst [vmem:[#allocation674_spill] sm:$0xff] %v15172_v44  ;;  %v15176_v23 = vcombine.low %v1792_v37, %v1796_v25 }
 0x409   :  { %v1660_v28 = vld [vmem:[#allocation7 + $0x1030] sm:$0xff] }
 0x40a   :  { %6636 = vmatpush1.bf16.msra.mxu0 %v15148_v57  ;;  %18103 = vst [vmem:[#allocation673_spill] sm:$0xff] %v15169_v22  ;;  %v1784_v30 = vld [vmem:[#allocation7 + $0x1410] sm:$0xff]  ;;  %18105 = vst [vmem:[#allocation675_spill] sm:$0xff] %v15176_v23  ;;  %v15178_v14 = vcombine.high %v1656_v38, %v1660_v28  ;;  %v15184_v8 = vcombine.low %v1656_v38, %v1660_v28 }
 0x40b   :  { %6679 = vmatpush1.bf16.msra.mxu1 %v15152_v63  ;;  %6637 = vmatprep.subr.bf16.mxu0 %v15154_v34  ;;  %v1788_v15 = vld [vmem:[#allocation7 + $0x1430] sm:$0xff] }
 0x40c   :  { %6680 = vmatprep.subr.bf16.mxu1 %v15157_v13  ;;  %18106 = vst [vmem:[#allocation676_spill] sm:$0xff] %v15178_v14  ;;  %v15181_v39 = vcombine.high %v1784_v30, %v1788_v15  ;;  %v1776_v13 = vld [vmem:[#allocation7 + $0x13d0] sm:$0xff]  ;;  %18108 = vst [vmem:[#allocation678_spill] sm:$0xff] %v15184_v8  ;;  %v15188_v37 = vcombine.low %v1784_v30, %v1788_v15 }
 0x40d   :  { %v1780_v34 = vld [vmem:[#allocation7 + $0x13f0] sm:$0xff] }
 0x40e   :  { %6638 = vmatpush1.bf16.msra.mxu0 %v15160_v27  ;;  %18107 = vst [vmem:[#allocation677_spill] sm:$0xff] %v15181_v39  ;;  %v1904_v63 = vld [vmem:[#allocation7 + $0x17d0] sm:$0xff]  ;;  %18109 = vst [vmem:[#allocation679_spill] sm:$0xff] %v15188_v37  ;;  %v15190_v25 = vcombine.high %v1776_v13, %v1780_v34  ;;  %v15196_v28 = vcombine.low %v1776_v13, %v1780_v34 }
 0x40f   :  { %6681 = vmatpush1.bf16.msra.mxu1 %v15164_v10  ;;  %6639 = vmatprep.subr.bf16.mxu0 %v15166_v11  ;;  %v1908_v57 = vld [vmem:[#allocation7 + $0x17f0] sm:$0xff] }
 0x410   :  { %6682 = vmatprep.subr.bf16.mxu1 %v15169_v22  ;;  %18110 = vst [vmem:[#allocation680_spill] sm:$0xff] %v15190_v25  ;;  %v15193_v2 = vcombine.high %v1904_v63, %v1908_v57  ;;  %v1768_v22 = vld [vmem:[#allocation7 + $0x1390] sm:$0xff]  ;;  %18112 = vst [vmem:[#allocation682_spill] sm:$0xff] %v15196_v28  ;;  %v15200_v15 = vcombine.low %v1904_v63, %v1908_v57 }
 0x411   :  { %v1772_v11 = vld [vmem:[#allocation7 + $0x13b0] sm:$0xff] }
 0x412   :  { %6640 = vmatpush1.bf16.msra.mxu0 %v15172_v44  ;;  %18111 = vst [vmem:[#allocation681_spill] sm:$0xff] %v15193_v2  ;;  %v1896_v10 = vld [vmem:[#allocation7 + $0x1790] sm:$0xff]  ;;  %18113 = vst [vmem:[#allocation683_spill] sm:$0xff] %v15200_v15  ;;  %v15202_v30 = vcombine.high %v1768_v22, %v1772_v11  ;;  %v15208_v34 = vcombine.low %v1768_v22, %v1772_v11 }
 0x413   :  { %6683 = vmatpush1.bf16.msra.mxu1 %v15176_v23  ;;  %6641 = vmatprep.subr.bf16.mxu0 %v15178_v14  ;;  %v1900_v27 = vld [vmem:[#allocation7 + $0x17b0] sm:$0xff] }
 0x414   :  { %6684 = vmatprep.subr.bf16.mxu1 %v15181_v39  ;;  %18114 = vst [vmem:[#allocation684_spill] sm:$0xff] %v15202_v30  ;;  %v15205_v38 = vcombine.high %v1896_v10, %v1900_v27  ;;  %v1760_v39 = vld [vmem:[#allocation7 + $0x1350] sm:$0xff]  ;;  %18116 = vst [vmem:[#allocation686_spill] sm:$0xff] %v15208_v34  ;;  %v15212_v57 = vcombine.low %v1896_v10, %v1900_v27 }
 0x415   :  { %v1764_v14 = vld [vmem:[#allocation7 + $0x1370] sm:$0xff] }
 0x416   :  { %6642 = vmatpush1.bf16.msra.mxu0 %v15184_v8  ;;  %18115 = vst [vmem:[#allocation685_spill] sm:$0xff] %v15205_v38  ;;  %v1888_v23 = vld [vmem:[#allocation7 + $0x1750] sm:$0xff]  ;;  %18117 = vst [vmem:[#allocation687_spill] sm:$0xff] %v15212_v57  ;;  %v15214_v63 = vcombine.high %v1760_v39, %v1764_v14  ;;  %v15220_v11 = vcombine.low %v1760_v39, %v1764_v14 }
 0x417   :  { %6685 = vmatpush1.bf16.msra.mxu1 %v15188_v37  ;;  %6643 = vmatprep.subr.bf16.mxu0 %v15190_v25  ;;  %v1892_v44 = vld [vmem:[#allocation7 + $0x1770] sm:$0xff] }
 0x418   :  { %6686 = vmatprep.subr.bf16.mxu1 %v15193_v2  ;;  %18118 = vst [vmem:[#allocation688_spill] sm:$0xff] %v15214_v63  ;;  %v15217_v13 = vcombine.high %v1888_v23, %v1892_v44  ;;  %v1752_v2 = vld [vmem:[#allocation7 + $0x1310] sm:$0xff]  ;;  %18120 = vst [vmem:[#allocation690_spill] sm:$0xff] %v15220_v11  ;;  %v15224_v27 = vcombine.low %v1888_v23, %v1892_v44 }
 0x419   :  { %v1756_v25 = vld [vmem:[#allocation7 + $0x1330] sm:$0xff] }
 0x41a   :  { %6644 = vmatpush2.bf16.msra.mxu0 %v15196_v28  ;;  %18119 = vst [vmem:[#allocation689_spill] sm:$0xff] %v15217_v13  ;;  %v1880_v37 = vld [vmem:[#allocation7 + $0x1710] sm:$0xff]  ;;  %18121 = vst [vmem:[#allocation691_spill] sm:$0xff] %v15224_v27  ;;  %v15226_v10 = vcombine.high %v1752_v2, %v1756_v25  ;;  %v15232_v14 = vcombine.low %v1752_v2, %v1756_v25 }
 0x41b   :  { %6687 = vmatpush2.bf16.msra.mxu1 %v15200_v15  ;;  %6645 = vmatprep.subr.bf16.mxu0 %v15202_v30  ;;  %v1884_v8 = vld [vmem:[#allocation7 + $0x1730] sm:$0xff] }
 0x41c   :  { %6688 = vmatprep.subr.bf16.mxu1 %v15205_v38  ;;  %18122 = vst [vmem:[#allocation692_spill] sm:$0xff] %v15226_v10  ;;  %v15229_v22 = vcombine.high %v1880_v37, %v1884_v8  ;;  %v1744_v38 = vld [vmem:[#allocation7 + $0x12d0] sm:$0xff]  ;;  %18124 = vst [vmem:[#allocation694_spill] sm:$0xff] %v15232_v14  ;;  %v15236_v44 = vcombine.low %v1880_v37, %v1884_v8 }
 0x41d   :  { %v1748_v30 = vld [vmem:[#allocation7 + $0x12f0] sm:$0xff] }
 0x41e   :  { %6646 = vmatpush2.bf16.msra.mxu0 %v15208_v34  ;;  %18123 = vst [vmem:[#allocation693_spill] sm:$0xff] %v15229_v22  ;;  %v1872_v15 = vld [vmem:[#allocation7 + $0x16d0] sm:$0xff]  ;;  %18125 = vst [vmem:[#allocation695_spill] sm:$0xff] %v15236_v44  ;;  %v15238_v23 = vcombine.high %v1744_v38, %v1748_v30  ;;  %v15244_v25 = vcombine.low %v1744_v38, %v1748_v30 }
 0x41f   :  { %6689 = vmatpush2.bf16.msra.mxu1 %v15212_v57  ;;  %6647 = vmatprep.subr.bf16.mxu0 %v15214_v63  ;;  %v1876_v28 = vld [vmem:[#allocation7 + $0x16f0] sm:$0xff] }
 0x420   :  { %6690 = vmatprep.subr.bf16.mxu1 %v15217_v13  ;;  %18126 = vst [vmem:[#allocation696_spill] sm:$0xff] %v15238_v23  ;;  %v15241_v39 = vcombine.high %v1872_v15, %v1876_v28  ;;  %v1736_v13 = vld [vmem:[#allocation7 + $0x1290] sm:$0xff]  ;;  %18128 = vst [vmem:[#allocation698_spill] sm:$0xff] %v15244_v25  ;;  %v15248_v8 = vcombine.low %v1872_v15, %v1876_v28 }
 0x421   :  { %v1740_v63 = vld [vmem:[#allocation7 + $0x12b0] sm:$0xff] }
 0x422   :  { %6648 = vmatpush2.bf16.msra.mxu0 %v15220_v11  ;;  %18127 = vst [vmem:[#allocation697_spill] sm:$0xff] %v15241_v39  ;;  %v1864_v57 = vld [vmem:[#allocation7 + $0x1690] sm:$0xff]  ;;  %18129 = vst [vmem:[#allocation699_spill] sm:$0xff] %v15248_v8  ;;  %v15250_v37 = vcombine.high %v1736_v13, %v1740_v63  ;;  %v15256_v30 = vcombine.low %v1736_v13, %v1740_v63 }
 0x423   :  { %6691 = vmatpush2.bf16.msra.mxu1 %v15224_v27  ;;  %6649 = vmatprep.subr.bf16.mxu0 %v15226_v10  ;;  %v1868_v34 = vld [vmem:[#allocation7 + $0x16b0] sm:$0xff] }
 0x424   :  { %6692 = vmatprep.subr.bf16.mxu1 %v15229_v22  ;;  %18130 = vst [vmem:[#allocation700_spill] sm:$0xff] %v15250_v37  ;;  %v15253_v2 = vcombine.high %v1864_v57, %v1868_v34  ;;  %v1728_v22 = vld [vmem:[#allocation7 + $0x1250] sm:$0xff]  ;;  %18132 = vst [vmem:[#allocation702_spill] sm:$0xff] %v15256_v30  ;;  %v15260_v28 = vcombine.low %v1864_v57, %v1868_v34 }
 0x425   :  { %v1732_v10 = vld [vmem:[#allocation7 + $0x1270] sm:$0xff] }
 0x426   :  { %6650 = vmatpush2.bf16.msra.mxu0 %v15232_v14  ;;  %18131 = vst [vmem:[#allocation701_spill] sm:$0xff] %v15253_v2  ;;  %v1856_v27 = vld [vmem:[#allocation7 + $0x1650] sm:$0xff]  ;;  %18133 = vst [vmem:[#allocation703_spill] sm:$0xff] %v15260_v28  ;;  %v15262_v15 = vcombine.high %v1728_v22, %v1732_v10  ;;  %v15268_v63 = vcombine.low %v1728_v22, %v1732_v10 }
 0x427   :  { %6693 = vmatpush2.bf16.msra.mxu1 %v15236_v44  ;;  %6651 = vmatprep.subr.bf16.mxu0 %v15238_v23  ;;  %v1860_v11 = vld [vmem:[#allocation7 + $0x1670] sm:$0xff] }
 0x428   :  { %6694 = vmatprep.subr.bf16.mxu1 %v15241_v39  ;;  %18134 = vst [vmem:[#allocation704_spill] sm:$0xff] %v15262_v15  ;;  %v15265_v38 = vcombine.high %v1856_v27, %v1860_v11  ;;  %v1720_v39 = vld [vmem:[#allocation7 + $0x1210] sm:$0xff]  ;;  %18136 = vst [vmem:[#allocation706_spill] sm:$0xff] %v15268_v63  ;;  %v15272_v34 = vcombine.low %v1856_v27, %v1860_v11 }
 0x429   :  { %v1724_v23 = vld [vmem:[#allocation7 + $0x1230] sm:$0xff] }
 0x42a   :  { %6652 = vmatpush2.bf16.msra.mxu0 %v15244_v25  ;;  %18135 = vst [vmem:[#allocation705_spill] sm:$0xff] %v15265_v38  ;;  %v1848_v44 = vld [vmem:[#allocation7 + $0x1610] sm:$0xff]  ;;  %18137 = vst [vmem:[#allocation707_spill] sm:$0xff] %v15272_v34  ;;  %v15274_v57 = vcombine.high %v1720_v39, %v1724_v23  ;;  %v1845_v25 = vld [vmem:[#allocation7 + $0x15f8] sm:$0xff]  ;;  %v15280_v10 = vcombine.low %v1720_v39, %v1724_v23 }
 0x42b   :  { %6695 = vmatpush2.bf16.msra.mxu1 %v15248_v8  ;;  %6653 = vmatprep.subr.bf16.mxu0 %v15250_v37  ;;  %v1852_v14 = vld [vmem:[#allocation7 + $0x1630] sm:$0xff]  ;;  %v1717_v37 = vld [vmem:[#allocation7 + $0x11f8] sm:$0xff] }
 0x42c   :  { %6696 = vmatprep.subr.bf16.mxu1 %v15253_v2  ;;  %18138 = vst [vmem:[#allocation708_spill] sm:$0xff] %v15274_v57  ;;  %v15277_v13 = vcombine.high %v1848_v44, %v1852_v14  ;;  %v1713_v2 = vld [vmem:[#allocation7 + $0x11d8] sm:$0xff]  ;;  %18140 = vst [vmem:[#allocation710_spill] sm:$0xff] %v15280_v10  ;;  %v15284_v11 = vcombine.low %v1848_v44, %v1852_v14 }
 0x42d   :  { %v1841_v8 = vld [vmem:[#allocation7 + $0x15d8] sm:$0xff]  ;;  %v15286_v27 = vcombine.high %v1713_v2, %v1717_v37 }
 0x42e   :  { %6654 = vmatpush2.bf16.msra.mxu0 %v15256_v30  ;;  %18139 = vst [vmem:[#allocation709_spill] sm:$0xff] %v15277_v13  ;;  %18141 = vst [vmem:[#allocation711_spill] sm:$0xff] %v15284_v11  ;;  %v15289_v22 = vcombine.high %v1841_v8, %v1845_v25  ;;  %v1833_v23 = vld [vmem:[#allocation7 + $0x1598] sm:$0xff]  ;;  %v15296_v14 = vcombine.low %v1841_v8, %v1845_v25 }
 0x42f   :  { %6697 = vmatpush2.bf16.msra.mxu1 %v15260_v28  ;;  %6655 = vmatprep.subr.bf16.mxu0 %v15262_v15  ;;  %18142 = vst [vmem:[#allocation712_spill] sm:$0xff] %v15286_v27  ;;  %v1709_v15 = vld [vmem:[#allocation7 + $0x11b8] sm:$0xff]  ;;  %v15292_v28 = vcombine.low %v1713_v2, %v1717_v37 }
 0x430   :  { %6698 = vmatprep.subr.bf16.mxu1 %v15265_v38  ;;  %18143 = vst [vmem:[#allocation713_spill] sm:$0xff] %v15289_v22  ;;  %v1705_v38 = vld [vmem:[#allocation7 + $0x1198] sm:$0xff]  ;;  %18145 = vst [vmem:[#allocation715_spill] sm:$0xff] %v15296_v14 }
 0x431   :  { %18144 = vst [vmem:[#allocation714_spill] sm:$0xff] %v15292_v28  ;;  %v1837_v39 = vld [vmem:[#allocation7 + $0x15b8] sm:$0xff]  ;;  %v15299_v44 = vcombine.high %v1705_v38, %v1709_v15  ;;  %v15307_v25 = vcombine.low %v1705_v38, %v1709_v15 }
 0x432   :  { %6656 = vmatpush2.bf16.msra.mxu0 %v15268_v63  ;;  %v1825_v37 = vld [vmem:[#allocation7 + $0x1558] sm:$0xff] }
 0x433   :  { %6699 = vmatpush2.bf16.msra.mxu1 %v15272_v34  ;;  %6657 = vmatprep.subr.bf16.mxu0 %v15274_v57  ;;  %18146 = vst [vmem:[#allocation716_spill] sm:$0xff] %v15299_v44  ;;  %v1701_v57 = vld [vmem:[#allocation7 + $0x1178] sm:$0xff] }
 0x434   :  { %6700 = vmatprep.subr.bf16.mxu1 %v15277_v13  ;;  %v1697_v13 = vld [vmem:[#allocation7 + $0x1158] sm:$0xff] }
 0x435   :  { %v1829_v2 = vld [vmem:[#allocation7 + $0x1578] sm:$0xff] }
 0x436   :  { %6658 = vmatpush2.bf16.msra.mxu0 %v15280_v10  ;;  %v15302_v10 = vcombine.high %v1833_v23, %v1837_v39  ;;  %v15320_v15 = vcombine.high %v1825_v37, %v1829_v2  ;;  %v1689_v38 = vld [vmem:[#allocation7 + $0x1118] sm:$0xff] }
 0x437   :  { %6701 = vmatpush2.bf16.msra.mxu1 %v15284_v11  ;;  %6713 = vmatprep.subr.bf16.mxu0 %v15286_v27  ;;  %v15313_v27 = vcombine.high %v1697_v13, %v1701_v57 }
 0x438   :  { %6756 = vmatprep.subr.bf16.mxu1 %v15289_v22  ;;  %18147 = vst [vmem:[#allocation717_spill] sm:$0xff] %v15302_v10  ;;  %v15311_v22 = vcombine.low %v1833_v23, %v1837_v39  ;;  %v1817_v23 = vld [vmem:[#allocation7 + $0x1518] sm:$0xff] }
 0x439   :  { %v5106_v34 = vpop.f32.mrf.mxu0  ;;  %6660 = vmatmul.mubr.bf16.vlgmr.msra.gmra.mxu0 %v14875_v62  ;;  %v1821_v39 = vld [vmem:[#allocation7 + $0x1538] sm:$0xff] }
 0x43a   :  { %v5107_v63 = vadd.f32 %v5106_v34, %v14447_v48  ;;  %v5149_v11 = vpop.f32.mrf.mxu1  ;;  %6703 = vmatmul.mubr.bf16.vlgmr.msra.gmra.mxu1 %v14881_v60  ;;  %6714 = vmatpush1.bf16.msra.mxu0 %v15292_v28  ;;  %v1693_v28 = vld [vmem:[#allocation7 + $0x1138] sm:$0xff] }
 0x43b   :  { %6745 = vmatprep.mubr.bf16.mxu0 %v14660_v5  ;;  %6757 = vmatpush1.bf16.msra.mxu1 %v15296_v14  ;;  %v5108_v8 = vpop.f32.mrf.mxu0  ;;  %v15335_v26 = vcombine.high %v1689_v38, %v1693_v28 }
 0x43c   :  { %v15315_v30 = vadd.f32 %v5149_v11, %v5107_v63  ;;  %6788 = vmatprep.mubr.bf16.mxu1 %v14670_v56  ;;  %v5109_v48 = vadd.f32 %v5108_v8, %v14463_v42  ;;  %v5151_v34 = vpop.f32.mrf.mxu1  ;;  %6715 = vmatprep.subr.bf16.mxu0 %v15299_v44  ;;  %v3532_v63 = vadd.f32 %v14648_v35, %v14641_v21  ;;  %v1681_v21 = vld [vmem:[#allocation7 + $0x10d8] sm:$0xff] }
 0x43d   :  { %v5110_v3 = vpop.f32.mrf.mxu0  ;;  %6758 = vmatprep.subr.bf16.mxu1 %v15302_v10  ;;  %v15329_v8 = vcombine.low %v1697_v13, %v1701_v57  ;;  %v15333_v10 = vcombine.low %v1825_v37, %v1829_v2  ;;  %18150 = vst [vmem:[#allocation720_spill] sm:$0xff] %v15335_v26  ;;  %v1809_v13 = vld [vmem:[#allocation7 + $0x14d8] sm:$0xff]  ;;  %v15345_v37 = vcombine.low %v1689_v38, %v1693_v28 }
 0x43e   :  { %v15325_v11 = vadd.f32 %v5151_v34, %v5109_v48  ;;  %v5111_v14 = vadd.f32 %v5110_v3, %v14469_v32  ;;  %v5153_v42 = vpop.f32.mrf.mxu1  ;;  %6716 = vmatpush1.bf16.msra.mxu0 %v15307_v25  ;;  %v15340_v32 = vcombine.high %v1817_v23, %v1821_v39  ;;  %v1685_v3 = vld [vmem:[#allocation7 + $0x10f8] sm:$0xff] }
 0x43f   :  { %18148 = vst [vmem:[#allocation718_spill] sm:$0xff] %v15329_v8  ;;  %6759 = vmatpush1.bf16.msra.mxu1 %v15311_v22  ;;  %v5112_v44 = vpop.f32.mrf.mxu0  ;;  %6717 = vmatprep.subr.bf16.mxu0 %v15313_v27  ;;  %18149 = vst [vmem:[#allocation719_spill] sm:$0xff] %v15333_v10  ;;  %v1813_v48 = vld [vmem:[#allocation7 + $0x14f8] sm:$0xff]  ;;  %v15357_v28 = vcombine.low %v1681_v21, %v1685_v3 }
 0x440   :  { %v15337_v20 = vadd.f32 %v5153_v42, %v5111_v14  ;;  %v5113_v35 = vadd.f32 %v5112_v44, %v3532_v63  ;;  %6760 = vmatprep.subr.bf16.mxu1 %v15320_v15  ;;  %18151 = vst [vmem:[#allocation721_spill] sm:$0xff] %v15340_v32  ;;  %v5155_v57 = vpop.f32.mrf.mxu1  ;;  %18152 = vst [vmem:[#allocation722_spill] sm:$0xff] %v15345_v37  ;;  %v15349_v14 = vcombine.low %v1817_v23, %v1821_v39  ;;  %v1673_v63 = vld [vmem:[#allocation7 + $0x1098] sm:$0xff] }
 0x441   :  { %v15351_v44 = vcombine.high %v1681_v21, %v1685_v3  ;;  %v15354_v2 = vcombine.high %v1809_v13, %v1813_v48  ;;  %v1677_v42 = vld [vmem:[#allocation7 + $0x10b8] sm:$0xff]  ;;  %18156 = vst [vmem:[#allocation726_spill] sm:$0xff] %v15357_v28  ;;  %v15361_v38 = vcombine.low %v1809_v13, %v1813_v48 }
 0x442   :  { %v15342_v34 = vadd.f32 %v5155_v57, %v5113_v35  ;;  %6718 = vmatpush1.bf16.msra.mxu0 %v15329_v8  ;;  %18153 = vst [vmem:[#allocation723_spill] sm:$0xff] %v15349_v14  ;;  %v1801_v35 = vld [vmem:[#allocation7 + $0x1498] sm:$0xff]  ;;  %v15363_v23 = vcombine.high %v1673_v63, %v1677_v42  ;;  %v15369_v21 = vcombine.low %v1673_v63, %v1677_v42 }
 0x443   :  { %6761 = vmatpush1.bf16.msra.mxu1 %v15333_v10  ;;  %6719 = vmatprep.subr.bf16.mxu0 %v15335_v26  ;;  %18154 = vst [vmem:[#allocation724_spill] sm:$0xff] %v15351_v44  ;;  %18155 = vst [vmem:[#allocation725_spill] sm:$0xff] %v15354_v2  ;;  %v1805_v57 = vld [vmem:[#allocation7 + $0x14b8] sm:$0xff] }
 0x444   :  { %6762 = vmatprep.subr.bf16.mxu1 %v15340_v32  ;;  %18157 = vst [vmem:[#allocation727_spill] sm:$0xff] %v15361_v38  ;;  %18158 = vst [vmem:[#allocation728_spill] sm:$0xff] %v15363_v23  ;;  %v15366_v39 = vcombine.high %v1801_v35, %v1805_v57  ;;  %v1665_v32 = vld [vmem:[#allocation7 + $0x1058] sm:$0xff]  ;;  %v15373_v3 = vcombine.low %v1801_v35, %v1805_v57 }
 0x445   :  { %v1669_v26 = vld [vmem:[#allocation7 + $0x1078] sm:$0xff]  ;;  %18160 = vst [vmem:[#allocation730_spill] sm:$0xff] %v15369_v21 }
 0x446   :  { %6720 = vmatpush1.bf16.msra.mxu0 %v15345_v37  ;;  %18159 = vst [vmem:[#allocation729_spill] sm:$0xff] %v15366_v39  ;;  %v1793_v10 = vld [vmem:[#allocation7 + $0x1458] sm:$0xff]  ;;  %18161 = vst [vmem:[#allocation731_spill] sm:$0xff] %v15373_v3  ;;  %v15375_v13 = vcombine.high %v1665_v32, %v1669_v26  ;;  %v15381_v63 = vcombine.low %v1665_v32, %v1669_v26 }
 0x447   :  { %6763 = vmatpush1.bf16.msra.mxu1 %v15349_v14  ;;  %6721 = vmatprep.subr.bf16.mxu0 %v15351_v44  ;;  %v1797_v8 = vld [vmem:[#allocation7 + $0x1478] sm:$0xff] }
 0x448   :  { %6764 = vmatprep.subr.bf16.mxu1 %v15354_v2  ;;  %18162 = vst [vmem:[#allocation732_spill] sm:$0xff] %v15375_v13  ;;  %v15378_v48 = vcombine.high %v1793_v10, %v1797_v8  ;;  %v1657_v2 = vld [vmem:[#allocation7 + $0x1018] sm:$0xff]  ;;  %18164 = vst [vmem:[#allocation734_spill] sm:$0xff] %v15381_v63  ;;  %v15385_v42 = vcombine.low %v1793_v10, %v1797_v8 }
 0x449   :  { %v1661_v44 = vld [vmem:[#allocation7 + $0x1038] sm:$0xff] }
 0x44a   :  { %6722 = vmatpush1.bf16.msra.mxu0 %v15357_v28  ;;  %18163 = vst [vmem:[#allocation733_spill] sm:$0xff] %v15378_v48  ;;  %v1785_v14 = vld [vmem:[#allocation7 + $0x1418] sm:$0xff]  ;;  %18165 = vst [vmem:[#allocation735_spill] sm:$0xff] %v15385_v42  ;;  %v15387_v35 = vcombine.high %v1657_v2, %v1661_v44  ;;  %v15393_v26 = vcombine.low %v1657_v2, %v1661_v44 }
 0x44b   :  { %6765 = vmatpush1.bf16.msra.mxu1 %v15361_v38  ;;  %6723 = vmatprep.subr.bf16.mxu0 %v15363_v23  ;;  %v1789_v37 = vld [vmem:[#allocation7 + $0x1438] sm:$0xff] }
 0x44c   :  { %6766 = vmatprep.subr.bf16.mxu1 %v15366_v39  ;;  %18166 = vst [vmem:[#allocation736_spill] sm:$0xff] %v15387_v35  ;;  %v15390_v57 = vcombine.high %v1785_v14, %v1789_v37  ;;  %v1777_v39 = vld [vmem:[#allocation7 + $0x13d8] sm:$0xff]  ;;  %18168 = vst [vmem:[#allocation738_spill] sm:$0xff] %v15393_v26  ;;  %v15397_v10 = vcombine.low %v1785_v14, %v1789_v37 }
 0x44d   :  { %v1781_v23 = vld [vmem:[#allocation7 + $0x13f8] sm:$0xff] }
 0x44e   :  { %6724 = vmatpush1.bf16.msra.mxu0 %v15369_v21  ;;  %18167 = vst [vmem:[#allocation737_spill] sm:$0xff] %v15390_v57  ;;  %v1905_v38 = vld [vmem:[#allocation7 + $0x17d8] sm:$0xff]  ;;  %18169 = vst [vmem:[#allocation739_spill] sm:$0xff] %v15397_v10  ;;  %v15399_v8 = vcombine.high %v1777_v39, %v1781_v23  ;;  %v15405_v44 = vcombine.low %v1777_v39, %v1781_v23 }
 0x44f   :  { %6767 = vmatpush1.bf16.msra.mxu1 %v15373_v3  ;;  %6725 = vmatprep.subr.bf16.mxu0 %v15375_v13  ;;  %v1909_v28 = vld [vmem:[#allocation7 + $0x17f8] sm:$0xff] }
 0x450   :  { %6768 = vmatprep.subr.bf16.mxu1 %v15378_v48  ;;  %18170 = vst [vmem:[#allocation740_spill] sm:$0xff] %v15399_v8  ;;  %v15402_v32 = vcombine.high %v1905_v38, %v1909_v28  ;;  %v1769_v48 = vld [vmem:[#allocation7 + $0x1398] sm:$0xff]  ;;  %18172 = vst [vmem:[#allocation742_spill] sm:$0xff] %v15405_v44  ;;  %v15409_v37 = vcombine.low %v1905_v38, %v1909_v28 }
 0x451   :  { %v1773_v13 = vld [vmem:[#allocation7 + $0x13b8] sm:$0xff] }
 0x452   :  { %6726 = vmatpush1.bf16.msra.mxu0 %v15381_v63  ;;  %18171 = vst [vmem:[#allocation741_spill] sm:$0xff] %v15402_v32  ;;  %v1897_v3 = vld [vmem:[#allocation7 + $0x1798] sm:$0xff]  ;;  %18173 = vst [vmem:[#allocation743_spill] sm:$0xff] %v15409_v37  ;;  %v15411_v14 = vcombine.high %v1769_v48, %v1773_v13  ;;  %v15417_v23 = vcombine.low %v1769_v48, %v1773_v13 }
 0x453   :  { %6769 = vmatpush1.bf16.msra.mxu1 %v15385_v42  ;;  %6727 = vmatprep.subr.bf16.mxu0 %v15387_v35  ;;  %v1901_v21 = vld [vmem:[#allocation7 + $0x17b8] sm:$0xff] }
 0x454   :  { %6770 = vmatprep.subr.bf16.mxu1 %v15390_v57  ;;  %18174 = vst [vmem:[#allocation744_spill] sm:$0xff] %v15411_v14  ;;  %v15414_v2 = vcombine.high %v1897_v3, %v1901_v21  ;;  %v1761_v57 = vld [vmem:[#allocation7 + $0x1358] sm:$0xff]  ;;  %18176 = vst [vmem:[#allocation746_spill] sm:$0xff] %v15417_v23  ;;  %v15421_v28 = vcombine.low %v1897_v3, %v1901_v21 }
 0x455   :  { %v1765_v35 = vld [vmem:[#allocation7 + $0x1378] sm:$0xff] }
 0x456   :  { %6728 = vmatpush1.bf16.msra.mxu0 %v15393_v26  ;;  %18175 = vst [vmem:[#allocation745_spill] sm:$0xff] %v15414_v2  ;;  %v1889_v42 = vld [vmem:[#allocation7 + $0x1758] sm:$0xff]  ;;  %18177 = vst [vmem:[#allocation747_spill] sm:$0xff] %v15421_v28  ;;  %v15423_v38 = vcombine.high %v1761_v57, %v1765_v35  ;;  %v15429_v13 = vcombine.low %v1761_v57, %v1765_v35 }
 0x457   :  { %6771 = vmatpush1.bf16.msra.mxu1 %v15397_v10  ;;  %6729 = vmatprep.subr.bf16.mxu0 %v15399_v8  ;;  %v1893_v63 = vld [vmem:[#allocation7 + $0x1778] sm:$0xff] }
 0x458   :  { %6772 = vmatprep.subr.bf16.mxu1 %v15402_v32  ;;  %18178 = vst [vmem:[#allocation748_spill] sm:$0xff] %v15423_v38  ;;  %v15426_v39 = vcombine.high %v1889_v42, %v1893_v63  ;;  %v1753_v32 = vld [vmem:[#allocation7 + $0x1318] sm:$0xff]  ;;  %18180 = vst [vmem:[#allocation750_spill] sm:$0xff] %v15429_v13  ;;  %v15433_v21 = vcombine.low %v1889_v42, %v1893_v63 }
 0x459   :  { %v1757_v8 = vld [vmem:[#allocation7 + $0x1338] sm:$0xff] }
 0x45a   :  { %6730 = vmatpush2.bf16.msra.mxu0 %v15405_v44  ;;  %18179 = vst [vmem:[#allocation749_spill] sm:$0xff] %v15426_v39  ;;  %v1881_v10 = vld [vmem:[#allocation7 + $0x1718] sm:$0xff]  ;;  %18181 = vst [vmem:[#allocation751_spill] sm:$0xff] %v15433_v21  ;;  %v15435_v3 = vcombine.high %v1753_v32, %v1757_v8  ;;  %v15441_v35 = vcombine.low %v1753_v32, %v1757_v8 }
 0x45b   :  { %6773 = vmatpush2.bf16.msra.mxu1 %v15409_v37  ;;  %6731 = vmatprep.subr.bf16.mxu0 %v15411_v14  ;;  %v1885_v26 = vld [vmem:[#allocation7 + $0x1738] sm:$0xff] }
 0x45c   :  { %6774 = vmatprep.subr.bf16.mxu1 %v15414_v2  ;;  %18182 = vst [vmem:[#allocation752_spill] sm:$0xff] %v15435_v3  ;;  %v15438_v48 = vcombine.high %v1881_v10, %v1885_v26  ;;  %v1745_v2 = vld [vmem:[#allocation7 + $0x12d8] sm:$0xff]  ;;  %18184 = vst [vmem:[#allocation754_spill] sm:$0xff] %v15441_v35  ;;  %v15445_v63 = vcombine.low %v1881_v10, %v1885_v26 }
 0x45d   :  { %v1749_v14 = vld [vmem:[#allocation7 + $0x12f8] sm:$0xff] }
 0x45e   :  { %6732 = vmatpush2.bf16.msra.mxu0 %v15417_v23  ;;  %18183 = vst [vmem:[#allocation753_spill] sm:$0xff] %v15438_v48  ;;  %v1873_v37 = vld [vmem:[#allocation7 + $0x16d8] sm:$0xff]  ;;  %18185 = vst [vmem:[#allocation755_spill] sm:$0xff] %v15445_v63  ;;  %v15447_v42 = vcombine.high %v1745_v2, %v1749_v14  ;;  %v15453_v8 = vcombine.low %v1745_v2, %v1749_v14 }
 0x45f   :  { %6775 = vmatpush2.bf16.msra.mxu1 %v15421_v28  ;;  %6733 = vmatprep.subr.bf16.mxu0 %v15423_v38  ;;  %v1877_v44 = vld [vmem:[#allocation7 + $0x16f8] sm:$0xff] }
 0x460   :  { %6776 = vmatprep.subr.bf16.mxu1 %v15426_v39  ;;  %18186 = vst [vmem:[#allocation756_spill] sm:$0xff] %v15447_v42  ;;  %v15450_v57 = vcombine.high %v1873_v37, %v1877_v44  ;;  %v1737_v39 = vld [vmem:[#allocation7 + $0x1298] sm:$0xff]  ;;  %v15457_v26 = vcombine.low %v1873_v37, %v1877_v44 }
 0x461   :  { %v1741_v38 = vld [vmem:[#allocation7 + $0x12b8] sm:$0xff] }
 0x462   :  { %6734 = vmatpush2.bf16.msra.mxu0 %v15429_v13  ;;  %18187 = vst [vmem:[#allocation757_spill] sm:$0xff] %v15450_v57  ;;  %v1865_v28 = vld [vmem:[#allocation7 + $0x1698] sm:$0xff]  ;;  %v15459_v10 = vcombine.high %v1737_v39, %v1741_v38  ;;  %v15465_v14 = vcombine.low %v1737_v39, %v1741_v38 }
 0x463   :  { %6777 = vmatpush2.bf16.msra.mxu1 %v15433_v21  ;;  %6735 = vmatprep.subr.bf16.mxu0 %v15435_v3  ;;  %v1869_v23 = vld [vmem:[#allocation7 + $0x16b8] sm:$0xff] }
 0x464   :  { %6778 = vmatprep.subr.bf16.mxu1 %v15438_v48  ;;  %v15462_v32 = vcombine.high %v1865_v28, %v1869_v23  ;;  %v1729_v48 = vld [vmem:[#allocation7 + $0x1258] sm:$0xff]  ;;  %v15469_v44 = vcombine.low %v1865_v28, %v1869_v23 }
 0x465   :  { %v1733_v3 = vld [vmem:[#allocation7 + $0x1278] sm:$0xff] }
 0x466   :  { %6736 = vmatpush2.bf16.msra.mxu0 %v15441_v35  ;;  %18188 = vst [vmem:[#allocation758_spill] sm:$0xff] %v15462_v32  ;;  %v1857_v21 = vld [vmem:[#allocation7 + $0x1658] sm:$0xff]  ;;  %18189 = vst [vmem:[#allocation759_spill] sm:$0xff] %v15469_v44  ;;  %v15471_v37 = vcombine.high %v1729_v48, %v1733_v3  ;;  %v15477_v38 = vcombine.low %v1729_v48, %v1733_v3 }
 0x467   :  { %6779 = vmatpush2.bf16.msra.mxu1 %v15445_v63  ;;  %6737 = vmatprep.subr.bf16.mxu0 %v15447_v42  ;;  %v1861_v13 = vld [vmem:[#allocation7 + $0x1678] sm:$0xff] }
 0x468   :  { %6780 = vmatprep.subr.bf16.mxu1 %v15450_v57  ;;  %18190 = vst [vmem:[#allocation760_spill] sm:$0xff] %v15471_v37  ;;  %v15474_v2 = vcombine.high %v1857_v21, %v1861_v13  ;;  %v1721_v57 = vld [vmem:[#allocation7 + $0x1218] sm:$0xff]  ;;  %18192 = vst [vmem:[#allocation762_spill] sm:$0xff] %v15477_v38  ;;  %v15481_v23 = vcombine.low %v1857_v21, %v1861_v13  ;;  %v18199_v21 = vld [vmem:[#allocation26_spill] sm:$0xff] }
 0x469   :  { %v1725_v42 = vld [vmem:[#allocation7 + $0x1238] sm:$0xff] }
 0x46a   :  { %6738 = vmatpush2.bf16.msra.mxu0 %v15453_v8  ;;  %18191 = vst [vmem:[#allocation761_spill] sm:$0xff] %v15474_v2  ;;  %v1849_v63 = vld [vmem:[#allocation7 + $0x1618] sm:$0xff]  ;;  %18193 = vst [vmem:[#allocation763_spill] sm:$0xff] %v15481_v23  ;;  %v15483_v28 = vcombine.high %v1721_v57, %v1725_v42 }
 0x46b   :  { %6781 = vmatpush2.bf16.msra.mxu1 %v15457_v26  ;;  %6739 = vmatprep.subr.bf16.mxu0 %v15459_v10  ;;  %v1853_v35 = vld [vmem:[#allocation7 + $0x1638] sm:$0xff] }
 0x46c   :  { %6782 = vmatprep.subr.bf16.mxu1 %v15462_v32  ;;  %18194 = vst [vmem:[#allocation764_spill] sm:$0xff] %v15483_v28  ;;  %v15486_v39 = vcombine.high %v1849_v63, %v1853_v35  ;;  %v15489_v32 = vcombine.low %v1721_v57, %v1725_v42  ;;  %v15493_v3 = vcombine.low %v1849_v63, %v1853_v35  ;;  %v18198_v13 = vld [vmem:[#allocation24_spill] sm:$0xff]  ;;  %v18200_v57 = vld [vmem:[#allocation23_spill] sm:$0xff]  ;;  %v18201_v63 = vld [vmem:[#allocation25_spill] sm:$0xff] }
 0x46e   :  { %6740 = vmatpush2.bf16.msra.mxu0 %v15465_v14  ;;  %18195 = vst [vmem:[#allocation765_spill] sm:$0xff] %v15486_v39  ;;  %18196 = vst [vmem:[#allocation766_spill] sm:$0xff] %v15489_v32 }
 0x46f   :  { %6783 = vmatpush2.bf16.msra.mxu1 %v15469_v44  ;;  %6741 = vmatprep.subr.bf16.mxu0 %v15471_v37  ;;  %18197 = vst [vmem:[#allocation767_spill] sm:$0xff] %v15493_v3  ;;  %v18206_v37 = vld [vmem:[#allocation32_spill] sm:$0xff]  ;;  %v18207_v44 = vld [vmem:[#allocation34_spill] sm:$0xff] }
 0x470   :  { %6784 = vmatprep.subr.bf16.mxu1 %v15474_v2 }
 0x472   :  { %6742 = vmatpush2.bf16.msra.mxu0 %v15477_v38 }
 0x473   :  { %6785 = vmatpush2.bf16.msra.mxu1 %v15481_v23  ;;  %6743 = vmatprep.subr.bf16.mxu0 %v15483_v28  ;;  %v18203_v23 = vld [vmem:[#allocation30_spill] sm:$0xff] }
 0x474   :  { %6786 = vmatprep.subr.bf16.mxu1 %v15486_v39 }
 0x476   :  { %6744 = vmatpush2.bf16.msra.mxu0 %v15489_v32 }
 0x477   :  { %6787 = vmatpush2.bf16.msra.mxu1 %v15493_v3  ;;  %6815 = vmatprep.subr.bf16.mxu0 %v18198_v13  ;;  %v18202_v13 = vld [vmem:[#allocation28_spill] sm:$0xff] }
 0x478   :  { %6858 = vmatprep.subr.bf16.mxu1 %v18199_v21 }
 0x479   :  { %v6489_v48 = vpop.f32.mrf.mxu0  ;;  %6746 = vmatmul.mubr.bf16.vlgmr.msra.gmra.mxu0 %v14875_v62 }
 0x47a   :  { %v6532_v42 = vpop.f32.mrf.mxu1  ;;  %6789 = vmatmul.mubr.bf16.vlgmr.msra.gmra.mxu1 %v14881_v60  ;;  %6816 = vmatpush1.bf16.msra.mxu0 %v18200_v57  ;;  %v18204_v57 = vld [vmem:[#allocation27_spill] sm:$0xff] }
 0x47b   :  { %v6533_v35 = vadd.f32 %v6532_v42, %v6489_v48  ;;  %6847 = vmatprep.mubr.bf16.mxu0 %v14660_v5  ;;  %6859 = vmatpush1.bf16.msra.mxu1 %v18201_v63  ;;  %v6491_v32 = vpop.f32.mrf.mxu0  ;;  %v18205_v63 = vld [vmem:[#allocation29_spill] sm:$0xff] }
 0x47c   :  { %6890 = vmatprep.mubr.bf16.mxu1 %v14670_v56  ;;  %v6534_v3 = vpop.f32.mrf.mxu1  ;;  %6817 = vmatprep.subr.bf16.mxu0 %v18202_v13 }
 0x47d   :  { %v15508_v21 = vadd.f32 %v6533_v35, %v14678_v40  ;;  %v6535_v39 = vadd.f32 %v6534_v3, %v6491_v32  ;;  %v6493_v28 = vpop.f32.mrf.mxu0  ;;  %6860 = vmatprep.subr.bf16.mxu1 %v18203_v23  ;;  %v18208_v23 = vld [vmem:[#allocation31_spill] sm:$0xff]  ;;  %v18217_v35 = vld [vmem:[#allocation41_spill] sm:$0xff] }
 0x47e   :  { %v6536_v38 = vpop.f32.mrf.mxu1  ;;  %6818 = vmatpush1.bf16.msra.mxu0 %v18204_v57  ;;  %v18219_v57 = vld [vmem:[#allocation46_spill] sm:$0xff] }
 0x47f   :  { %v15513_v48 = vadd.f32 %v6535_v39, %v14688_v50  ;;  %v6537_v42 = vadd.f32 %v6536_v38, %v6493_v28  ;;  %6861 = vmatpush1.bf16.msra.mxu1 %v18205_v63  ;;  %v6495_v2 = vpop.f32.mrf.mxu0  ;;  %6819 = vmatprep.subr.bf16.mxu0 %v18206_v37  ;;  %v18209_v50 = vld [vmem:[#allocation33_spill] sm:$0xff]  ;;  %v18210_v38 = vld [vmem:[#allocation35_spill] sm:$0xff]  ;;  %v18211_v28 = vld [vmem:[#allocation36_spill] sm:$0xff] }
 0x480   :  { %v6538_v13 = vpop.f32.mrf.mxu1  ;;  %6862 = vmatprep.subr.bf16.mxu1 %v18207_v44  ;;  %v18212_v39 = vld [vmem:[#allocation37_spill] sm:$0xff]  ;;  %v18213_v37 = vld [vmem:[#allocation38_spill] sm:$0xff]  ;;  %v18214_v44 = vld [vmem:[#allocation39_spill] sm:$0xff] }
 0x481   :  { %v15519_v40 = vadd.f32 %v6537_v42, %v14700_v49  ;;  %v6539_v32 = vadd.f32 %v6538_v13, %v6495_v2  ;;  %v18215_v49 = vld [vmem:[#allocation42_spill] sm:$0xff]  ;;  %v18216_v2 = vld [vmem:[#allocation40_spill] sm:$0xff]  ;;  %v18221_v63 = vld [vmem:[#allocation45_spill] sm:$0xff] }
 0x482   :  { %6820 = vmatpush1.bf16.msra.mxu0 %v18208_v23  ;;  %v18220_v42 = vld [vmem:[#allocation44_spill] sm:$0xff]  ;;  %v18222_v13 = vld [vmem:[#allocation47_spill] sm:$0xff] }
 0x483   :  { %v15523_v3 = vadd.f32 %v6539_v32, %v14705_v33  ;;  %6863 = vmatpush1.bf16.msra.mxu1 %v18209_v50  ;;  %6821 = vmatprep.subr.bf16.mxu0 %v18210_v38  ;;  %v18218_v33 = vld [vmem:[#allocation43_spill] sm:$0xff]  ;;  %v18223_v32 = vld [vmem:[#allocation50_spill] sm:$0xff]  ;;  %v18224_v23 = vld [vmem:[#allocation48_spill] sm:$0xff] }
 0x484   :  { %6864 = vmatprep.subr.bf16.mxu1 %v18211_v28  ;;  %v18225_v50 = vld [vmem:[#allocation49_spill] sm:$0xff]  ;;  %v18226_v38 = vld [vmem:[#allocation51_spill] sm:$0xff]  ;;  %v18227_v28 = vld [vmem:[#allocation54_spill] sm:$0xff] }
 0x486   :  { %6822 = vmatpush1.bf16.msra.mxu0 %v18212_v39  ;;  %v18228_v39 = vld [vmem:[#allocation52_spill] sm:$0xff] }
 0x487   :  { %6865 = vmatpush1.bf16.msra.mxu1 %v18213_v37  ;;  %6823 = vmatprep.subr.bf16.mxu0 %v18214_v44  ;;  %v18229_v37 = vld [vmem:[#allocation53_spill] sm:$0xff]  ;;  %v18230_v44 = vld [vmem:[#allocation56_spill] sm:$0xff] }
 0x488   :  { %6866 = vmatprep.subr.bf16.mxu1 %v18215_v49  ;;  %v18231_v49 = vld [vmem:[#allocation58_spill] sm:$0xff] }
 0x48a   :  { %6824 = vmatpush1.bf16.msra.mxu0 %v18216_v2  ;;  %v18232_v2 = vld [vmem:[#allocation55_spill] sm:$0xff] }
 0x48b   :  { %6867 = vmatpush1.bf16.msra.mxu1 %v18217_v35  ;;  %6825 = vmatprep.subr.bf16.mxu0 %v18218_v33  ;;  %v18233_v35 = vld [vmem:[#allocation57_spill] sm:$0xff]  ;;  %v18234_v33 = vld [vmem:[#allocation59_spill] sm:$0xff] }
 0x48c   :  { %6868 = vmatprep.subr.bf16.mxu1 %v18219_v57  ;;  %v18235_v57 = vld [vmem:[#allocation60_spill] sm:$0xff] }
 0x48e   :  { %6826 = vmatpush1.bf16.msra.mxu0 %v18220_v42  ;;  %v18236_v42 = vld [vmem:[#allocation61_spill] sm:$0xff] }
 0x48f   :  { %6869 = vmatpush1.bf16.msra.mxu1 %v18221_v63  ;;  %6827 = vmatprep.subr.bf16.mxu0 %v18222_v13  ;;  %v18237_v63 = vld [vmem:[#allocation62_spill] sm:$0xff]  ;;  %v18238_v13 = vld [vmem:[#allocation63_spill] sm:$0xff] }
 0x490   :  { %6870 = vmatprep.subr.bf16.mxu1 %v18223_v32  ;;  %v18239_v32 = vld [vmem:[#allocation64_spill] sm:$0xff] }
 0x492   :  { %6828 = vmatpush1.bf16.msra.mxu0 %v18224_v23  ;;  %v18240_v23 = vld [vmem:[#allocation65_spill] sm:$0xff] }
 0x493   :  { %6871 = vmatpush1.bf16.msra.mxu1 %v18225_v50  ;;  %6829 = vmatprep.subr.bf16.mxu0 %v18226_v38  ;;  %v18241_v50 = vld [vmem:[#allocation66_spill] sm:$0xff]  ;;  %v18242_v38 = vld [vmem:[#allocation67_spill] sm:$0xff] }
 0x494   :  { %6872 = vmatprep.subr.bf16.mxu1 %v18227_v28  ;;  %v18243_v28 = vld [vmem:[#allocation68_spill] sm:$0xff] }
 0x496   :  { %6830 = vmatpush1.bf16.msra.mxu0 %v18228_v39  ;;  %v18244_v39 = vld [vmem:[#allocation69_spill] sm:$0xff] }
 0x497   :  { %6873 = vmatpush1.bf16.msra.mxu1 %v18229_v37  ;;  %6831 = vmatprep.subr.bf16.mxu0 %v18230_v44  ;;  %v18245_v37 = vld [vmem:[#allocation70_spill] sm:$0xff]  ;;  %v18246_v44 = vld [vmem:[#allocation71_spill] sm:$0xff] }
 0x498   :  { %6874 = vmatprep.subr.bf16.mxu1 %v18231_v49  ;;  %v18247_v49 = vld [vmem:[#allocation74_spill] sm:$0xff] }
 0x49a   :  { %6832 = vmatpush2.bf16.msra.mxu0 %v18232_v2  ;;  %v18248_v2 = vld [vmem:[#allocation72_spill] sm:$0xff] }
 0x49b   :  { %6875 = vmatpush2.bf16.msra.mxu1 %v18233_v35  ;;  %6833 = vmatprep.subr.bf16.mxu0 %v18234_v33  ;;  %v18249_v35 = vld [vmem:[#allocation73_spill] sm:$0xff]  ;;  %v18250_v33 = vld [vmem:[#allocation76_spill] sm:$0xff] }
 0x49c   :  { %6876 = vmatprep.subr.bf16.mxu1 %v18235_v57  ;;  %v18251_v57 = vld [vmem:[#allocation78_spill] sm:$0xff] }
 0x49e   :  { %6834 = vmatpush2.bf16.msra.mxu0 %v18236_v42  ;;  %v18252_v42 = vld [vmem:[#allocation75_spill] sm:$0xff] }
 0x49f   :  { %6877 = vmatpush2.bf16.msra.mxu1 %v18237_v63  ;;  %6835 = vmatprep.subr.bf16.mxu0 %v18238_v13  ;;  %v18253_v63 = vld [vmem:[#allocation77_spill] sm:$0xff]  ;;  %v18254_v13 = vld [vmem:[#allocation79_spill] sm:$0xff] }
 0x4a0   :  { %6878 = vmatprep.subr.bf16.mxu1 %v18239_v32  ;;  %v18255_v32 = vld [vmem:[#allocation82_spill] sm:$0xff] }
 0x4a2   :  { %6836 = vmatpush2.bf16.msra.mxu0 %v18240_v23  ;;  %v18256_v23 = vld [vmem:[#allocation80_spill] sm:$0xff] }
 0x4a3   :  { %6879 = vmatpush2.bf16.msra.mxu1 %v18241_v50  ;;  %6837 = vmatprep.subr.bf16.mxu0 %v18242_v38  ;;  %v18257_v50 = vld [vmem:[#allocation81_spill] sm:$0xff]  ;;  %v18258_v38 = vld [vmem:[#allocation83_spill] sm:$0xff] }
 0x4a4   :  { %6880 = vmatprep.subr.bf16.mxu1 %v18243_v28  ;;  %v18259_v28 = vld [vmem:[#allocation86_spill] sm:$0xff] }
 0x4a6   :  { %6838 = vmatpush2.bf16.msra.mxu0 %v18244_v39  ;;  %v18260_v39 = vld [vmem:[#allocation84_spill] sm:$0xff] }
 0x4a7   :  { %6881 = vmatpush2.bf16.msra.mxu1 %v18245_v37  ;;  %6839 = vmatprep.subr.bf16.mxu0 %v18246_v44  ;;  %v18261_v37 = vld [vmem:[#allocation85_spill] sm:$0xff]  ;;  %v18262_v44 = vld [vmem:[#allocation87_spill] sm:$0xff] }
 0x4a8   :  { %6882 = vmatprep.subr.bf16.mxu1 %v18247_v49  ;;  %v18263_v49 = vld [vmem:[#allocation90_spill] sm:$0xff] }
 0x4aa   :  { %6840 = vmatpush2.bf16.msra.mxu0 %v18248_v2 }
 0x4ab   :  { %6883 = vmatpush2.bf16.msra.mxu1 %v18249_v35  ;;  %6841 = vmatprep.subr.bf16.mxu0 %v18250_v33 }
 0x4ac   :  { %6884 = vmatprep.subr.bf16.mxu1 %v18251_v57 }
 0x4ae   :  { %6842 = vmatpush2.bf16.msra.mxu0 %v18252_v42 }
 0x4af   :  { %6885 = vmatpush2.bf16.msra.mxu1 %v18253_v63  ;;  %6843 = vmatprep.subr.bf16.mxu0 %v18254_v13 }
 0x4b0   :  { %6886 = vmatprep.subr.bf16.mxu1 %v18255_v32 }
 0x4b2   :  { %6844 = vmatpush2.bf16.msra.mxu0 %v18256_v23 }
 0x4b3   :  { %6887 = vmatpush2.bf16.msra.mxu1 %v18257_v50  ;;  %6845 = vmatprep.subr.bf16.mxu0 %v18258_v38 }
 0x4b4   :  { %6888 = vmatprep.subr.bf16.mxu1 %v18259_v28  ;;  %v18277_v28 = vld [vmem:[#allocation104_spill] sm:$0xff] }
 0x4b6   :  { %6846 = vmatpush2.bf16.msra.mxu0 %v18260_v39  ;;  %v18278_v39 = vld [vmem:[#allocation105_spill] sm:$0xff] }
 0x4b7   :  { %6889 = vmatpush2.bf16.msra.mxu1 %v18261_v37  ;;  %6901 = vmatprep.subr.bf16.mxu0 %v18262_v44  ;;  %v18279_v37 = vld [vmem:[#allocation106_spill] sm:$0xff]  ;;  %v18280_v44 = vld [vmem:[#allocation107_spill] sm:$0xff] }
 0x4b8   :  { %6944 = vmatprep.subr.bf16.mxu1 %v18263_v49  ;;  %v18281_v49 = vld [vmem:[#allocation108_spill] sm:$0xff] }
 0x4b9   :  { %v6575_v2 = vpop.f32.mrf.mxu0  ;;  %6848 = vmatmul.mubr.bf16.vlgmr.msra.gmra.mxu0 %v14875_v62 }
 0x4ba   :  { %v6618_v35 = vpop.f32.mrf.mxu1  ;;  %6891 = vmatmul.mubr.bf16.vlgmr.msra.gmra.mxu1 %v14881_v60  ;;  %6902 = vmatpush1.bf16.msra.mxu0 %v17517_v47 }
 0x4bb   :  { %v6619_v33 = vadd.f32 %v6618_v35, %v6575_v2  ;;  %6933 = vmatprep.mubr.bf16.mxu0 %v14660_v5  ;;  %6945 = vmatpush1.bf16.msra.mxu1 %v17518_v19  ;;  %v6577_v57 = vpop.f32.mrf.mxu0  ;;  %v18282_v2 = vld [vmem:[#allocation109_spill] sm:$0xff]  ;;  %v18283_v35 = vld [vmem:[#allocation110_spill] sm:$0xff] }
 0x4bc   :  { %6976 = vmatprep.mubr.bf16.mxu1 %v14670_v56  ;;  %v6620_v42 = vpop.f32.mrf.mxu1  ;;  %6903 = vmatprep.subr.bf16.mxu0 %v13102_v45 }
 0x4bd   :  { %v15588_v63 = vadd.f32 %v6619_v33, %v14897_v61  ;;  %v6621_v13 = vadd.f32 %v6620_v42, %v6577_v57  ;;  %v6579_v32 = vpop.f32.mrf.mxu0  ;;  %6946 = vmatprep.subr.bf16.mxu1 %v13156_v43  ;;  %v18264_v43 = vld [vmem:[#allocation91_spill] sm:$0xff]  ;;  %v18285_v57 = vld [vmem:[#allocation112_spill] sm:$0xff]  ;;  %v18286_v42 = vld [vmem:[#allocation113_spill] sm:$0xff] }
 0x4be   :  { %v6622_v23 = vpop.f32.mrf.mxu1  ;;  %6904 = vmatpush1.bf16.msra.mxu0 %v13110_v46  ;;  %v18284_v33 = vld [vmem:[#allocation111_spill] sm:$0xff] }
 0x4bf   :  { %v15593_v47 = vadd.f32 %v6621_v13, %v14907_v12  ;;  %v6623_v19 = vadd.f32 %v6622_v23, %v6579_v32  ;;  %6947 = vmatpush1.bf16.msra.mxu1 %v13179_v51  ;;  %v6581_v50 = vpop.f32.mrf.mxu0  ;;  %6905 = vmatprep.subr.bf16.mxu0 %v13183_v58  ;;  %v18265_v51 = vld [vmem:[#allocation92_spill] sm:$0xff]  ;;  %v18275_v12 = vld [vmem:[#allocation102_spill] sm:$0xff]  ;;  %v18288_v32 = vld [vmem:[#allocation115_spill] sm:$0xff] }
 0x4c0   :  { %v6624_v45 = vpop.f32.mrf.mxu1  ;;  %6948 = vmatprep.subr.bf16.mxu1 %v13188_v29  ;;  %v18266_v58 = vld [vmem:[#allocation88_spill] sm:$0xff]  ;;  %v18267_v29 = vld [vmem:[#allocation89_spill] sm:$0xff]  ;;  %v18287_v13 = vld [vmem:[#allocation114_spill] sm:$0xff] }
 0x4c1   :  { %v15599_v61 = vadd.f32 %v6623_v19, %v14919_v24  ;;  %v6625_v38 = vadd.f32 %v6624_v45, %v6581_v50  ;;  %v18269_v24 = vld [vmem:[#allocation96_spill] sm:$0xff]  ;;  %v18290_v19 = vld [vmem:[#allocation117_spill] sm:$0xff]  ;;  %v18291_v50 = vld [vmem:[#allocation118_spill] sm:$0xff] }
 0x4c2   :  { %6906 = vmatpush1.bf16.msra.mxu0 %v13193_v9  ;;  %v18268_v9 = vld [vmem:[#allocation95_spill] sm:$0xff]  ;;  %v18289_v23 = vld [vmem:[#allocation116_spill] sm:$0xff] }
 0x4c3   :  { %v15603_v46 = vadd.f32 %v6625_v38, %v14924_v16  ;;  %6949 = vmatpush1.bf16.msra.mxu1 %v13195_v52  ;;  %6907 = vmatprep.subr.bf16.mxu0 %v13201_v31  ;;  %v18270_v52 = vld [vmem:[#allocation97_spill] sm:$0xff]  ;;  %v18271_v31 = vld [vmem:[#allocation98_spill] sm:$0xff]  ;;  %v18276_v16 = vld [vmem:[#allocation103_spill] sm:$0xff] }
 0x4c4   :  { %6950 = vmatprep.subr.bf16.mxu1 %v13209_v6  ;;  %v18272_v6 = vld [vmem:[#allocation99_spill] sm:$0xff]  ;;  %v18293_v38 = vld [vmem:[#allocation120_spill] sm:$0xff] }
 0x4c5   :  { %v18292_v45 = vld [vmem:[#allocation119_spill] sm:$0xff] }
 0x4c6   :  { %6908 = vmatpush1.bf16.msra.mxu0 %v13216_v55  ;;  %v18273_v55 = vld [vmem:[#allocation100_spill] sm:$0xff] }
 0x4c7   :  { %6951 = vmatpush1.bf16.msra.mxu1 %v13220_v17  ;;  %6909 = vmatprep.subr.bf16.mxu0 %v18264_v43  ;;  %v18274_v17 = vld [vmem:[#allocation101_spill] sm:$0xff] }
 0x4c8   :  { %6952 = vmatprep.subr.bf16.mxu1 %v18265_v51  ;;  %v18294_v43 = vld [vmem:[#allocation121_spill] sm:$0xff]  ;;  %v18295_v51 = vld [vmem:[#allocation122_spill] sm:$0xff] }
 0x4ca   :  { %6910 = vmatpush1.bf16.msra.mxu0 %v18266_v58  ;;  %v18296_v58 = vld [vmem:[#allocation123_spill] sm:$0xff] }
 0x4cb   :  { %6953 = vmatpush1.bf16.msra.mxu1 %v18267_v29  ;;  %6911 = vmatprep.subr.bf16.mxu0 %v18268_v9  ;;  %v18297_v29 = vld [vmem:[#allocation124_spill] sm:$0xff]  ;;  %v18298_v9 = vld [vmem:[#allocation125_spill] sm:$0xff] }
 0x4cc   :  { %6954 = vmatprep.subr.bf16.mxu1 %v18269_v24  ;;  %v18299_v24 = vld [vmem:[#allocation126_spill] sm:$0xff] }
 0x4ce   :  { %6912 = vmatpush1.bf16.msra.mxu0 %v18270_v52  ;;  %v18300_v52 = vld [vmem:[#allocation127_spill] sm:$0xff] }
 0x4cf   :  { %6955 = vmatpush1.bf16.msra.mxu1 %v18271_v31  ;;  %6913 = vmatprep.subr.bf16.mxu0 %v18272_v6  ;;  %v18301_v31 = vld [vmem:[#allocation128_spill] sm:$0xff]  ;;  %v18302_v6 = vld [vmem:[#allocation129_spill] sm:$0xff] }
 0x4d0   :  { %6956 = vmatprep.subr.bf16.mxu1 %v18273_v55  ;;  %v18303_v55 = vld [vmem:[#allocation130_spill] sm:$0xff] }
 0x4d2   :  { %6914 = vmatpush1.bf16.msra.mxu0 %v18274_v17  ;;  %v18304_v17 = vld [vmem:[#allocation131_spill] sm:$0xff] }
 0x4d3   :  { %6957 = vmatpush1.bf16.msra.mxu1 %v18275_v12  ;;  %6915 = vmatprep.subr.bf16.mxu0 %v18276_v16  ;;  %v18305_v12 = vld [vmem:[#allocation132_spill] sm:$0xff]  ;;  %v18306_v16 = vld [vmem:[#allocation133_spill] sm:$0xff] }
 0x4d4   :  { %6958 = vmatprep.subr.bf16.mxu1 %v18277_v28  ;;  %v18307_v28 = vld [vmem:[#allocation134_spill] sm:$0xff] }
 0x4d6   :  { %6916 = vmatpush1.bf16.msra.mxu0 %v18278_v39  ;;  %v18308_v39 = vld [vmem:[#allocation135_spill] sm:$0xff] }
 0x4d7   :  { %6959 = vmatpush1.bf16.msra.mxu1 %v18279_v37  ;;  %6917 = vmatprep.subr.bf16.mxu0 %v18280_v44  ;;  %v18309_v37 = vld [vmem:[#allocation136_spill] sm:$0xff]  ;;  %v18310_v44 = vld [vmem:[#allocation137_spill] sm:$0xff] }
 0x4d8   :  { %6960 = vmatprep.subr.bf16.mxu1 %v18281_v49  ;;  %v18311_v49 = vld [vmem:[#allocation138_spill] sm:$0xff] }
 0x4da   :  { %6918 = vmatpush2.bf16.msra.mxu0 %v18282_v2  ;;  %v18312_v2 = vld [vmem:[#allocation139_spill] sm:$0xff] }
 0x4db   :  { %6961 = vmatpush2.bf16.msra.mxu1 %v18283_v35  ;;  %6919 = vmatprep.subr.bf16.mxu0 %v18284_v33  ;;  %v18313_v35 = vld [vmem:[#allocation140_spill] sm:$0xff] }
 0x4dc   :  { %6962 = vmatprep.subr.bf16.mxu1 %v18285_v57 }
 0x4de   :  { %6920 = vmatpush2.bf16.msra.mxu0 %v18286_v42  ;;  %v18314_v42 = vld [vmem:[#allocation141_spill] sm:$0xff] }
 0x4df   :  { %6963 = vmatpush2.bf16.msra.mxu1 %v18287_v13  ;;  %6921 = vmatprep.subr.bf16.mxu0 %v18288_v32  ;;  %v18315_v32 = vld [vmem:[#allocation142_spill] sm:$0xff] }
 0x4e0   :  { %6964 = vmatprep.subr.bf16.mxu1 %v18289_v23 }
 0x4e2   :  { %6922 = vmatpush2.bf16.msra.mxu0 %v18290_v19 }
 0x4e3   :  { %6965 = vmatpush2.bf16.msra.mxu1 %v18291_v50  ;;  %6923 = vmatprep.subr.bf16.mxu0 %v18292_v45  ;;  %v18316_v50 = vld [vmem:[#allocation143_spill] sm:$0xff] }
 0x4e4   :  { %6966 = vmatprep.subr.bf16.mxu1 %v18293_v38 }
 0x4e6   :  { %6924 = vmatpush2.bf16.msra.mxu0 %v18294_v43 }
 0x4e7   :  { %6967 = vmatpush2.bf16.msra.mxu1 %v18295_v51  ;;  %6925 = vmatprep.subr.bf16.mxu0 %v18296_v58  ;;  %v18318_v51 = vld [vmem:[#allocation144_spill] sm:$0xff] }
 0x4e8   :  { %6968 = vmatprep.subr.bf16.mxu1 %v18297_v29  ;;  %v18319_v29 = vld [vmem:[#allocation145_spill] sm:$0xff] }
 0x4ea   :  { %6926 = vmatpush2.bf16.msra.mxu0 %v18298_v9 }
 0x4eb   :  { %6969 = vmatpush2.bf16.msra.mxu1 %v18299_v24  ;;  %6927 = vmatprep.subr.bf16.mxu0 %v18300_v52  ;;  %v18321_v52 = vld [vmem:[#allocation146_spill] sm:$0xff] }
 0x4ec   :  { %6970 = vmatprep.subr.bf16.mxu1 %v18301_v31 }
 0x4ee   :  { %6928 = vmatpush2.bf16.msra.mxu0 %v18302_v6  ;;  %v18322_v6 = vld [vmem:[#allocation147_spill] sm:$0xff] }
 0x4ef   :  { %6971 = vmatpush2.bf16.msra.mxu1 %v18303_v55  ;;  %6929 = vmatprep.subr.bf16.mxu0 %v18304_v17  ;;  %v18323_v17 = vld [vmem:[#allocation148_spill] sm:$0xff] }
 0x4f0   :  { %6972 = vmatprep.subr.bf16.mxu1 %v18305_v12 }
 0x4f2   :  { %6930 = vmatpush2.bf16.msra.mxu0 %v18306_v16  ;;  %v18325_v16 = vld [vmem:[#allocation149_spill] sm:$0xff] }
 0x4f3   :  { %6973 = vmatpush2.bf16.msra.mxu1 %v18307_v28  ;;  %6931 = vmatprep.subr.bf16.mxu0 %v18308_v39  ;;  %v18328_v39 = vld [vmem:[#allocation151_spill] sm:$0xff] }
 0x4f4   :  { %6974 = vmatprep.subr.bf16.mxu1 %v18309_v37  ;;  %v18329_v37 = vld [vmem:[#allocation152_spill] sm:$0xff] }
 0x4f6   :  { %6932 = vmatpush2.bf16.msra.mxu0 %v18310_v44  ;;  %v18330_v44 = vld [vmem:[#allocation153_spill] sm:$0xff] }
 0x4f7   :  { %6975 = vmatpush2.bf16.msra.mxu1 %v18311_v49  ;;  %6987 = vmatprep.subr.bf16.mxu0 %v18312_v2  ;;  %v18331_v49 = vld [vmem:[#allocation154_spill] sm:$0xff]  ;;  %v18332_v2 = vld [vmem:[#allocation155_spill] sm:$0xff] }
 0x4f8   :  { %7030 = vmatprep.subr.bf16.mxu1 %v18313_v35  ;;  %v18334_v35 = vld [vmem:[#allocation157_spill] sm:$0xff] }
 0x4f9   :  { %v6661_v33 = vpop.f32.mrf.mxu0  ;;  %6934 = vmatmul.mubr.bf16.vlgmr.msra.gmra.mxu0 %v14875_v62 }
 0x4fa   :  { %v6704_v57 = vpop.f32.mrf.mxu1  ;;  %6977 = vmatmul.mubr.bf16.vlgmr.msra.gmra.mxu1 %v14881_v60  ;;  %6988 = vmatpush1.bf16.msra.mxu0 %v18314_v42  ;;  %v18338_v42 = vld [vmem:[#allocation161_spill] sm:$0xff] }
 0x4fb   :  { %v6705_v13 = vadd.f32 %v6704_v57, %v6661_v33  ;;  %7019 = vmatprep.mubr.bf16.mxu0 %v14660_v5  ;;  %7031 = vmatpush1.bf16.msra.mxu1 %v18315_v32  ;;  %v6663_v23 = vpop.f32.mrf.mxu0  ;;  %v18335_v33 = vld [vmem:[#allocation158_spill] sm:$0xff]  ;;  %v18337_v57 = vld [vmem:[#allocation160_spill] sm:$0xff]  ;;  %v18340_v32 = vld [vmem:[#allocation163_spill] sm:$0xff] }
 0x4fc   :  { %7062 = vmatprep.mubr.bf16.mxu1 %v14670_v56  ;;  %v6706_v19 = vpop.f32.mrf.mxu1  ;;  %6989 = vmatprep.subr.bf16.mxu0 %v18316_v50  ;;  %v18343_v50 = vld [vmem:[#allocation166_spill] sm:$0xff] }
 0x4fd   :  { %v15668_v45 = vadd.f32 %v6705_v13, %v15106_v1  ;;  %v6707_v38 = vadd.f32 %v6706_v19, %v6663_v23  ;;  %v6665_v43 = vpop.f32.mrf.mxu0  ;;  %7032 = vmatprep.subr.bf16.mxu1 %v18318_v51  ;;  %v18339_v13 = vld [vmem:[#allocation162_spill] sm:$0xff]  ;;  %v18341_v23 = vld [vmem:[#allocation164_spill] sm:$0xff]  ;;  %v18342_v19 = vld [vmem:[#allocation165_spill] sm:$0xff] }
 0x4fe   :  { %v6708_v58 = vpop.f32.mrf.mxu1  ;;  %6990 = vmatpush1.bf16.msra.mxu0 %v18319_v29  ;;  %v18346_v51 = vld [vmem:[#allocation169_spill] sm:$0xff]  ;;  %v18348_v29 = vld [vmem:[#allocation171_spill] sm:$0xff] }
 0x4ff   :  { %18317 = vst [vmem:[#allocation24_spill] sm:$0xff] %v15668_v45  ;;  %v15673_v9 = vadd.f32 %v6707_v38, %v15116_v41  ;;  %v6709_v24 = vadd.f32 %v6708_v58, %v6665_v43  ;;  %7033 = vmatpush1.bf16.msra.mxu1 %v18321_v52  ;;  %v6667_v31 = vpop.f32.mrf.mxu0  ;;  %6991 = vmatprep.subr.bf16.mxu0 %v18322_v6  ;;  %v18327_v41 = vld [vmem:[#allocation150_spill] sm:$0xff]  ;;  %v18344_v38 = vld [vmem:[#allocation167_spill] sm:$0xff]  ;;  %v18345_v43 = vld [vmem:[#allocation168_spill] sm:$0xff] }
 0x500   :  { %v6710_v55 = vpop.f32.mrf.mxu1  ;;  %7034 = vmatprep.subr.bf16.mxu1 %v18323_v17  ;;  %v18347_v58 = vld [vmem:[#allocation170_spill] sm:$0xff]  ;;  %v18350_v52 = vld [vmem:[#allocation173_spill] sm:$0xff]  ;;  %v18352_v6 = vld [vmem:[#allocation175_spill] sm:$0xff] }
 0x501   :  { %18320 = vst [vmem:[#allocation26_spill] sm:$0xff] %v15673_v9  ;;  %v15679_v1 = vadd.f32 %v6709_v24, %v15128_v59  ;;  %v6711_v12 = vadd.f32 %v6710_v55, %v6667_v31  ;;  %v18333_v59 = vld [vmem:[#allocation156_spill] sm:$0xff]  ;;  %v18351_v31 = vld [vmem:[#allocation174_spill] sm:$0xff]  ;;  %v18354_v17 = vld [vmem:[#allocation177_spill] sm:$0xff] }
 0x502   :  { %6992 = vmatpush1.bf16.msra.mxu0 %v18325_v16  ;;  %v18349_v24 = vld [vmem:[#allocation172_spill] sm:$0xff]  ;;  %v18356_v16 = vld [vmem:[#allocation179_spill] sm:$0xff] }
 0x503   :  { %18324 = vst [vmem:[#allocation23_spill] sm:$0xff] %v15679_v1  ;;  %v15683_v28 = vadd.f32 %v6711_v12, %v15133_v54  ;;  %7035 = vmatpush1.bf16.msra.mxu1 %v18327_v41  ;;  %6993 = vmatprep.subr.bf16.mxu0 %v18328_v39  ;;  %v18336_v54 = vld [vmem:[#allocation159_spill] sm:$0xff]  ;;  %v18353_v55 = vld [vmem:[#allocation176_spill] sm:$0xff]  ;;  %v18355_v12 = vld [vmem:[#allocation178_spill] sm:$0xff] }
 0x504   :  { %7036 = vmatprep.subr.bf16.mxu1 %v18329_v37  ;;  %v18357_v41 = vld [vmem:[#allocation180_spill] sm:$0xff]  ;;  %v18358_v39 = vld [vmem:[#allocation181_spill] sm:$0xff]  ;;  %v18359_v37 = vld [vmem:[#allocation182_spill] sm:$0xff] }
 0x505   :  { %18326 = vst [vmem:[#allocation25_spill] sm:$0xff] %v15683_v28 }
 0x506   :  { %6994 = vmatpush1.bf16.msra.mxu0 %v18330_v44  ;;  %v18360_v44 = vld [vmem:[#allocation183_spill] sm:$0xff] }
 0x507   :  { %7037 = vmatpush1.bf16.msra.mxu1 %v18331_v49  ;;  %6995 = vmatprep.subr.bf16.mxu0 %v18332_v2  ;;  %v18361_v49 = vld [vmem:[#allocation184_spill] sm:$0xff]  ;;  %v18362_v2 = vld [vmem:[#allocation185_spill] sm:$0xff] }
 0x508   :  { %7038 = vmatprep.subr.bf16.mxu1 %v18333_v59  ;;  %v18363_v59 = vld [vmem:[#allocation186_spill] sm:$0xff] }
 0x50a   :  { %6996 = vmatpush1.bf16.msra.mxu0 %v18334_v35  ;;  %v18364_v35 = vld [vmem:[#allocation187_spill] sm:$0xff] }
 0x50b   :  { %7039 = vmatpush1.bf16.msra.mxu1 %v18335_v33  ;;  %6997 = vmatprep.subr.bf16.mxu0 %v18336_v54  ;;  %v18365_v33 = vld [vmem:[#allocation188_spill] sm:$0xff]  ;;  %v18366_v54 = vld [vmem:[#allocation189_spill] sm:$0xff] }
 0x50c   :  { %7040 = vmatprep.subr.bf16.mxu1 %v18337_v57  ;;  %v18367_v57 = vld [vmem:[#allocation190_spill] sm:$0xff] }
 0x50e   :  { %6998 = vmatpush1.bf16.msra.mxu0 %v18338_v42  ;;  %v18368_v42 = vld [vmem:[#allocation191_spill] sm:$0xff] }
 0x50f   :  { %7041 = vmatpush1.bf16.msra.mxu1 %v18339_v13  ;;  %6999 = vmatprep.subr.bf16.mxu0 %v18340_v32  ;;  %v18369_v13 = vld [vmem:[#allocation192_spill] sm:$0xff]  ;;  %v18370_v32 = vld [vmem:[#allocation193_spill] sm:$0xff] }
 0x510   :  { %7042 = vmatprep.subr.bf16.mxu1 %v18341_v23  ;;  %v18371_v23 = vld [vmem:[#allocation194_spill] sm:$0xff] }
 0x512   :  { %7000 = vmatpush1.bf16.msra.mxu0 %v18342_v19  ;;  %v18372_v19 = vld [vmem:[#allocation195_spill] sm:$0xff] }
 0x513   :  { %7043 = vmatpush1.bf16.msra.mxu1 %v18343_v50  ;;  %7001 = vmatprep.subr.bf16.mxu0 %v18344_v38  ;;  %v18373_v50 = vld [vmem:[#allocation196_spill] sm:$0xff]  ;;  %v18374_v38 = vld [vmem:[#allocation197_spill] sm:$0xff] }
 0x514   :  { %7044 = vmatprep.subr.bf16.mxu1 %v18345_v43  ;;  %v18375_v43 = vld [vmem:[#allocation198_spill] sm:$0xff] }
 0x516   :  { %7002 = vmatpush1.bf16.msra.mxu0 %v18346_v51  ;;  %v18376_v51 = vld [vmem:[#allocation199_spill] sm:$0xff] }
 0x517   :  { %7045 = vmatpush1.bf16.msra.mxu1 %v18347_v58  ;;  %7003 = vmatprep.subr.bf16.mxu0 %v18348_v29  ;;  %v18377_v58 = vld [vmem:[#allocation200_spill] sm:$0xff]  ;;  %v18378_v29 = vld [vmem:[#allocation201_spill] sm:$0xff] }
 0x518   :  { %7046 = vmatprep.subr.bf16.mxu1 %v18349_v24  ;;  %v18379_v24 = vld [vmem:[#allocation202_spill] sm:$0xff] }
 0x51a   :  { %7004 = vmatpush2.bf16.msra.mxu0 %v18350_v52  ;;  %v18380_v52 = vld [vmem:[#allocation203_spill] sm:$0xff] }
 0x51b   :  { %7047 = vmatpush2.bf16.msra.mxu1 %v18351_v31  ;;  %7005 = vmatprep.subr.bf16.mxu0 %v18352_v6  ;;  %v18381_v31 = vld [vmem:[#allocation204_spill] sm:$0xff] }
 0x51c   :  { %7048 = vmatprep.subr.bf16.mxu1 %v18353_v55 }
 0x51e   :  { %7006 = vmatpush2.bf16.msra.mxu0 %v18354_v17  ;;  %v18382_v17 = vld [vmem:[#allocation205_spill] sm:$0xff] }
 0x51f   :  { %7049 = vmatpush2.bf16.msra.mxu1 %v18355_v12  ;;  %7007 = vmatprep.subr.bf16.mxu0 %v18356_v16  ;;  %v18383_v16 = vld [vmem:[#allocation206_spill] sm:$0xff] }
 0x520   :  { %7050 = vmatprep.subr.bf16.mxu1 %v18357_v41 }
 0x522   :  { %7008 = vmatpush2.bf16.msra.mxu0 %v18358_v39 }
 0x523   :  { %7051 = vmatpush2.bf16.msra.mxu1 %v18359_v37  ;;  %7009 = vmatprep.subr.bf16.mxu0 %v18360_v44  ;;  %v18384_v37 = vld [vmem:[#allocation207_spill] sm:$0xff] }
 0x524   :  { %7052 = vmatprep.subr.bf16.mxu1 %v18361_v49 }
 0x526   :  { %7010 = vmatpush2.bf16.msra.mxu0 %v18362_v2 }
 0x527   :  { %7053 = vmatpush2.bf16.msra.mxu1 %v18363_v59  ;;  %7011 = vmatprep.subr.bf16.mxu0 %v18364_v35  ;;  %v18386_v59 = vld [vmem:[#allocation208_spill] sm:$0xff] }
 0x528   :  { %7054 = vmatprep.subr.bf16.mxu1 %v18365_v33  ;;  %v18387_v33 = vld [vmem:[#allocation209_spill] sm:$0xff] }
 0x52a   :  { %7012 = vmatpush2.bf16.msra.mxu0 %v18366_v54 }
 0x52b   :  { %7055 = vmatpush2.bf16.msra.mxu1 %v18367_v57  ;;  %7013 = vmatprep.subr.bf16.mxu0 %v18368_v42  ;;  %v18389_v57 = vld [vmem:[#allocation210_spill] sm:$0xff]  ;;  %v18390_v42 = vld [vmem:[#allocation211_spill] sm:$0xff] }
 0x52c   :  { %7056 = vmatprep.subr.bf16.mxu1 %v18369_v13 }
 0x52e   :  { %7014 = vmatpush2.bf16.msra.mxu0 %v18370_v32  ;;  %v18391_v32 = vld [vmem:[#allocation212_spill] sm:$0xff] }
 0x52f   :  { %7057 = vmatpush2.bf16.msra.mxu1 %v18371_v23  ;;  %7015 = vmatprep.subr.bf16.mxu0 %v18372_v19  ;;  %v18393_v19 = vld [vmem:[#allocation213_spill] sm:$0xff] }
 0x530   :  { %7058 = vmatprep.subr.bf16.mxu1 %v18373_v50 }
 0x532   :  { %7016 = vmatpush2.bf16.msra.mxu0 %v18374_v38  ;;  %v18396_v38 = vld [vmem:[#allocation215_spill] sm:$0xff] }
 0x533   :  { %7059 = vmatpush2.bf16.msra.mxu1 %v18375_v43  ;;  %7017 = vmatprep.subr.bf16.mxu0 %v18376_v51  ;;  %v18397_v43 = vld [vmem:[#allocation216_spill] sm:$0xff]  ;;  %v18398_v51 = vld [vmem:[#allocation217_spill] sm:$0xff] }
 0x534   :  { %7060 = vmatprep.subr.bf16.mxu1 %v18377_v58  ;;  %v18399_v58 = vld [vmem:[#allocation218_spill] sm:$0xff] }
 0x536   :  { %7018 = vmatpush2.bf16.msra.mxu0 %v18378_v29  ;;  %v18400_v29 = vld [vmem:[#allocation219_spill] sm:$0xff] }
 0x537   :  { %7061 = vmatpush2.bf16.msra.mxu1 %v18379_v24  ;;  %7073 = vmatprep.subr.bf16.mxu0 %v18380_v52  ;;  %v18402_v24 = vld [vmem:[#allocation221_spill] sm:$0xff]  ;;  %v18403_v52 = vld [vmem:[#allocation222_spill] sm:$0xff] }
 0x538   :  { %7116 = vmatprep.subr.bf16.mxu1 %v18381_v31  ;;  %v18405_v31 = vld [vmem:[#allocation224_spill] sm:$0xff] }
 0x539   :  { %v6747_v6 = vpop.f32.mrf.mxu0  ;;  %7020 = vmatmul.mubr.bf16.vlgmr.msra.gmra.mxu0 %v14875_v62 }
 0x53a   :  { %v6790_v55 = vpop.f32.mrf.mxu1  ;;  %7063 = vmatmul.mubr.bf16.vlgmr.msra.gmra.mxu1 %v14881_v60  ;;  %7074 = vmatpush1.bf16.msra.mxu0 %v18382_v17  ;;  %v18408_v17 = vld [vmem:[#allocation227_spill] sm:$0xff] }
 0x53b   :  { %v6791_v12 = vadd.f32 %v6790_v55, %v6747_v6  ;;  %7105 = vmatprep.mubr.bf16.mxu0 %v14660_v5  ;;  %7117 = vmatpush1.bf16.msra.mxu1 %v18383_v16  ;;  %v6749_v41 = vpop.f32.mrf.mxu0  ;;  %v18406_v6 = vld [vmem:[#allocation225_spill] sm:$0xff]  ;;  %v18407_v55 = vld [vmem:[#allocation226_spill] sm:$0xff] }
 0x53c   :  { %7148 = vmatprep.mubr.bf16.mxu1 %v14670_v56  ;;  %v6792_v39 = vpop.f32.mrf.mxu1  ;;  %7075 = vmatprep.subr.bf16.mxu0 %v18384_v37  ;;  %v18410_v16 = vld [vmem:[#allocation229_spill] sm:$0xff]  ;;  %v18413_v37 = vld [vmem:[#allocation232_spill] sm:$0xff] }
 0x53d   :  { %v15748_v44 = vadd.f32 %v6791_v12, %v15315_v30  ;;  %v6793_v49 = vadd.f32 %v6792_v39, %v6749_v41  ;;  %v6751_v2 = vpop.f32.mrf.mxu0  ;;  %7118 = vmatprep.subr.bf16.mxu1 %v18386_v59  ;;  %v18409_v12 = vld [vmem:[#allocation228_spill] sm:$0xff]  ;;  %v18411_v41 = vld [vmem:[#allocation230_spill] sm:$0xff]  ;;  %v18412_v39 = vld [vmem:[#allocation231_spill] sm:$0xff] }
 0x53e   :  { %v6794_v35 = vpop.f32.mrf.mxu1  ;;  %7076 = vmatpush1.bf16.msra.mxu0 %v18387_v33  ;;  %v18416_v59 = vld [vmem:[#allocation235_spill] sm:$0xff]  ;;  %v18418_v33 = vld [vmem:[#allocation237_spill] sm:$0xff] }
 0x53f   :  { %18385 = vst [vmem:[#allocation28_spill] sm:$0xff] %v15748_v44  ;;  %v15753_v5 = vadd.f32 %v6793_v49, %v15325_v11  ;;  %v6795_v54 = vadd.f32 %v6794_v35, %v6751_v2  ;;  %7119 = vmatpush1.bf16.msra.mxu1 %v18389_v57  ;;  %v6753_v56 = vpop.f32.mrf.mxu0  ;;  %7077 = vmatprep.subr.bf16.mxu0 %v18390_v42  ;;  %v18395_v11 = vld [vmem:[#allocation214_spill] sm:$0xff]  ;;  %v18414_v49 = vld [vmem:[#allocation233_spill] sm:$0xff]  ;;  %v18417_v35 = vld [vmem:[#allocation236_spill] sm:$0xff] }
 0x540   :  { %v6796_v13 = vpop.f32.mrf.mxu1  ;;  %7120 = vmatprep.subr.bf16.mxu1 %v18391_v32  ;;  %v18415_v2 = vld [vmem:[#allocation234_spill] sm:$0xff]  ;;  %v18420_v57 = vld [vmem:[#allocation239_spill] sm:$0xff]  ;;  %v18422_v42 = vld [vmem:[#allocation241_spill] sm:$0xff] }
 0x541   :  { %18388 = vst [vmem:[#allocation30_spill] sm:$0xff] %v15753_v5  ;;  %v15759_v30 = vadd.f32 %v6795_v54, %v15337_v20  ;;  %v6797_v23 = vadd.f32 %v6796_v13, %v6753_v56  ;;  %v18401_v20 = vld [vmem:[#allocation220_spill] sm:$0xff]  ;;  %v18419_v54 = vld [vmem:[#allocation238_spill] sm:$0xff]  ;;  %v18424_v32 = vld [vmem:[#allocation243_spill] sm:$0xff] }
 0x542   :  { %7078 = vmatpush1.bf16.msra.mxu0 %v18393_v19  ;;  %v18421_v56 = vld [vmem:[#allocation240_spill] sm:$0xff]  ;;  %v18423_v13 = vld [vmem:[#allocation242_spill] sm:$0xff]  ;;  %v18426_v19 = vld [vmem:[#allocation245_spill] sm:$0xff] }
 0x543   :  { %18392 = vst [vmem:[#allocation27_spill] sm:$0xff] %v15759_v30  ;;  %v15763_v50 = vadd.f32 %v6797_v23, %v15342_v34  ;;  %7121 = vmatpush1.bf16.msra.mxu1 %v18395_v11  ;;  %7079 = vmatprep.subr.bf16.mxu0 %v18396_v38  ;;  %v18404_v34 = vld [vmem:[#allocation223_spill] sm:$0xff]  ;;  %v18425_v23 = vld [vmem:[#allocation244_spill] sm:$0xff]  ;;  %v18427_v11 = vld [vmem:[#allocation246_spill] sm:$0xff] }
 0x544   :  { %7122 = vmatprep.subr.bf16.mxu1 %v18397_v43  ;;  %v18428_v38 = vld [vmem:[#allocation247_spill] sm:$0xff]  ;;  %v18429_v43 = vld [vmem:[#allocation248_spill] sm:$0xff] }
 0x545   :  { %18394 = vst [vmem:[#allocation29_spill] sm:$0xff] %v15763_v50  ;;  %v18773_v30 = vld [vmem:[#allocation591_spill] sm:$0xff] }
 0x546   :  { %7080 = vmatpush1.bf16.msra.mxu0 %v18398_v51  ;;  %v18430_v51 = vld [vmem:[#allocation249_spill] sm:$0xff] }
 0x547   :  { %7123 = vmatpush1.bf16.msra.mxu1 %v18399_v58  ;;  %7081 = vmatprep.subr.bf16.mxu0 %v18400_v29  ;;  %v18431_v58 = vld [vmem:[#allocation250_spill] sm:$0xff]  ;;  %v18432_v29 = vld [vmem:[#allocation251_spill] sm:$0xff] }
 0x548   :  { %7124 = vmatprep.subr.bf16.mxu1 %v18401_v20  ;;  %v18433_v20 = vld [vmem:[#allocation252_spill] sm:$0xff] }
 0x54a   :  { %7082 = vmatpush1.bf16.msra.mxu0 %v18402_v24  ;;  %v18434_v24 = vld [vmem:[#allocation253_spill] sm:$0xff] }
 0x54b   :  { %7125 = vmatpush1.bf16.msra.mxu1 %v18403_v52  ;;  %7083 = vmatprep.subr.bf16.mxu0 %v18404_v34  ;;  %v18435_v52 = vld [vmem:[#allocation254_spill] sm:$0xff]  ;;  %v18436_v34 = vld [vmem:[#allocation255_spill] sm:$0xff] }
 0x54c   :  { %7126 = vmatprep.subr.bf16.mxu1 %v18405_v31  ;;  %v18437_v31 = vld [vmem:[#allocation256_spill] sm:$0xff] }
 0x54e   :  { %7084 = vmatpush1.bf16.msra.mxu0 %v18406_v6  ;;  %v18438_v6 = vld [vmem:[#allocation257_spill] sm:$0xff] }
 0x54f   :  { %7127 = vmatpush1.bf16.msra.mxu1 %v18407_v55  ;;  %7085 = vmatprep.subr.bf16.mxu0 %v18408_v17  ;;  %v18439_v55 = vld [vmem:[#allocation258_spill] sm:$0xff]  ;;  %v18440_v17 = vld [vmem:[#allocation259_spill] sm:$0xff] }
 0x550   :  { %7128 = vmatprep.subr.bf16.mxu1 %v18409_v12  ;;  %v18441_v12 = vld [vmem:[#allocation260_spill] sm:$0xff] }
 0x552   :  { %7086 = vmatpush1.bf16.msra.mxu0 %v18410_v16  ;;  %v18442_v16 = vld [vmem:[#allocation261_spill] sm:$0xff] }
 0x553   :  { %7129 = vmatpush1.bf16.msra.mxu1 %v18411_v41  ;;  %7087 = vmatprep.subr.bf16.mxu0 %v18412_v39  ;;  %v18443_v41 = vld [vmem:[#allocation262_spill] sm:$0xff]  ;;  %v18444_v39 = vld [vmem:[#allocation263_spill] sm:$0xff] }
 0x554   :  { %7130 = vmatprep.subr.bf16.mxu1 %v18413_v37  ;;  %v18445_v37 = vld [vmem:[#allocation264_spill] sm:$0xff] }
 0x556   :  { %7088 = vmatpush1.bf16.msra.mxu0 %v18414_v49  ;;  %v18446_v49 = vld [vmem:[#allocation265_spill] sm:$0xff] }
 0x557   :  { %7131 = vmatpush1.bf16.msra.mxu1 %v18415_v2  ;;  %7089 = vmatprep.subr.bf16.mxu0 %v18416_v59  ;;  %v18447_v2 = vld [vmem:[#allocation266_spill] sm:$0xff]  ;;  %v18448_v59 = vld [vmem:[#allocation267_spill] sm:$0xff] }
 0x558   :  { %7132 = vmatprep.subr.bf16.mxu1 %v18417_v35  ;;  %v18449_v35 = vld [vmem:[#allocation268_spill] sm:$0xff] }
 0x55a   :  { %7090 = vmatpush2.bf16.msra.mxu0 %v18418_v33 }
 0x55b   :  { %7133 = vmatpush2.bf16.msra.mxu1 %v18419_v54  ;;  %7091 = vmatprep.subr.bf16.mxu0 %v18420_v57  ;;  %v18450_v57 = vld [vmem:[#allocation269_spill] sm:$0xff] }
 0x55c   :  { %7134 = vmatprep.subr.bf16.mxu1 %v18421_v56 }
 0x55e   :  { %7092 = vmatpush2.bf16.msra.mxu0 %v18422_v42  ;;  %v18451_v42 = vld [vmem:[#allocation270_spill] sm:$0xff] }
 0x55f   :  { %7135 = vmatpush2.bf16.msra.mxu1 %v18423_v13  ;;  %7093 = vmatprep.subr.bf16.mxu0 %v18424_v32  ;;  %v18452_v32 = vld [vmem:[#allocation94_spill] sm:$0xff] }
 0x560   :  { %7136 = vmatprep.subr.bf16.mxu1 %v18425_v23 }
 0x562   :  { %7094 = vmatpush2.bf16.msra.mxu0 %v18426_v19  ;;  %v18453_v19 = vld [vmem:[#allocation271_spill] sm:$0xff] }
 0x563   :  { %7137 = vmatpush2.bf16.msra.mxu1 %v18427_v11  ;;  %7095 = vmatprep.subr.bf16.mxu0 %v18428_v38  ;;  %v18454_v38 = vld [vmem:[#allocation272_spill] sm:$0xff] }
 0x564   :  { %7138 = vmatprep.subr.bf16.mxu1 %v18429_v43  ;;  %v18455_v43 = vld [vmem:[#allocation273_spill] sm:$0xff] }
 0x566   :  { %7096 = vmatpush2.bf16.msra.mxu0 %v18430_v51 }
 0x567   :  { %7139 = vmatpush2.bf16.msra.mxu1 %v18431_v58  ;;  %7097 = vmatprep.subr.bf16.mxu0 %v18432_v29  ;;  %v18456_v58 = vld [vmem:[#allocation274_spill] sm:$0xff] }
 0x568   :  { %7140 = vmatprep.subr.bf16.mxu1 %v18433_v20  ;;  %v18457_v20 = vld [vmem:[#allocation275_spill] sm:$0xff] }
 0x56a   :  { %7098 = vmatpush2.bf16.msra.mxu0 %v18434_v24 }
 0x56b   :  { %7141 = vmatpush2.bf16.msra.mxu1 %v18435_v52  ;;  %7099 = vmatprep.subr.bf16.mxu0 %v18436_v34  ;;  %v18458_v52 = vld [vmem:[#allocation276_spill] sm:$0xff] }
 0x56c   :  { %7142 = vmatprep.subr.bf16.mxu1 %v18437_v31  ;;  %v18459_v31 = vld [vmem:[#allocation277_spill] sm:$0xff] }
 0x56e   :  { %7100 = vmatpush2.bf16.msra.mxu0 %v18438_v6  ;;  %v18460_v6 = vld [vmem:[#allocation278_spill] sm:$0xff] }
 0x56f   :  { %7143 = vmatpush2.bf16.msra.mxu1 %v18439_v55  ;;  %7101 = vmatprep.subr.bf16.mxu0 %v18440_v17  ;;  %v18461_v55 = vld [vmem:[#allocation279_spill] sm:$0xff]  ;;  %v18462_v17 = vld [vmem:[#allocation280_spill] sm:$0xff] }
 0x570   :  { %7144 = vmatprep.subr.bf16.mxu1 %v18441_v12  ;;  %v18463_v12 = vld [vmem:[#allocation281_spill] sm:$0xff] }
 0x572   :  { %7102 = vmatpush2.bf16.msra.mxu0 %v18442_v16  ;;  %v18464_v16 = vld [vmem:[#allocation282_spill] sm:$0xff] }
 0x573   :  { %7145 = vmatpush2.bf16.msra.mxu1 %v18443_v41  ;;  %7103 = vmatprep.subr.bf16.mxu0 %v18444_v39  ;;  %v18465_v41 = vld [vmem:[#allocation283_spill] sm:$0xff]  ;;  %v18466_v39 = vld [vmem:[#allocation284_spill] sm:$0xff] }
 0x574   :  { %7146 = vmatprep.subr.bf16.mxu1 %v18445_v37  ;;  %v18467_v37 = vld [vmem:[#allocation285_spill] sm:$0xff] }
 0x576   :  { %7104 = vmatpush2.bf16.msra.mxu0 %v18446_v49  ;;  %v18468_v49 = vld [vmem:[#allocation286_spill] sm:$0xff] }
 0x577   :  { %7147 = vmatpush2.bf16.msra.mxu1 %v18447_v2  ;;  %7159 = vmatprep.subr.bf16.mxu0 %v18448_v59  ;;  %v18469_v2 = vld [vmem:[#allocation287_spill] sm:$0xff]  ;;  %v18470_v59 = vld [vmem:[#allocation288_spill] sm:$0xff] }
 0x578   :  { %7202 = vmatprep.subr.bf16.mxu1 %v18449_v35  ;;  %v18471_v35 = vld [vmem:[#allocation289_spill] sm:$0xff] }
 0x579   :  { %v6849_v33 = vpop.f32.mrf.mxu0  ;;  %7106 = vmatmul.mubr.bf16.vlgmr.msra.gmra.mxu0 %v14875_v62 }
 0x57a   :  { %v6892_v54 = vpop.f32.mrf.mxu1  ;;  %7149 = vmatmul.mubr.bf16.vlgmr.msra.gmra.mxu1 %v14881_v60  ;;  %7160 = vmatpush1.bf16.msra.mxu0 %v18450_v57  ;;  %v18474_v57 = vld [vmem:[#allocation292_spill] sm:$0xff] }
 0x57b   :  { %v15823_v56 = vadd.f32 %v6892_v54, %v6849_v33  ;;  %7191 = vmatprep.mubr.bf16.mxu0 %v13145_v4  ;;  %7203 = vmatpush1.bf16.msra.mxu1 %v18451_v42  ;;  %v6851_v13 = vpop.f32.mrf.mxu0  ;;  %v18472_v33 = vld [vmem:[#allocation290_spill] sm:$0xff]  ;;  %v18473_v54 = vld [vmem:[#allocation291_spill] sm:$0xff]  ;;  %v18475_v42 = vld [vmem:[#allocation293_spill] sm:$0xff] }
 0x57c   :  { %7234 = vmatprep.mubr.bf16.mxu1 %v18452_v32  ;;  %v6894_v23 = vpop.f32.mrf.mxu1  ;;  %7161 = vmatprep.subr.bf16.mxu0 %v18453_v19  ;;  %v18478_v19 = vld [vmem:[#allocation296_spill] sm:$0xff] }
 0x57d   :  { %v15829_v11 = vadd.f32 %v6894_v23, %v6851_v13  ;;  %v6853_v62 = vpop.f32.mrf.mxu0  ;;  %7204 = vmatprep.subr.bf16.mxu1 %v18454_v38  ;;  %v18476_v13 = vld [vmem:[#allocation294_spill] sm:$0xff]  ;;  %v18477_v23 = vld [vmem:[#allocation295_spill] sm:$0xff] }
 0x57e   :  { %v6896_v60 = vpop.f32.mrf.mxu1  ;;  %7162 = vmatpush1.bf16.msra.mxu0 %v18455_v43  ;;  %v18480_v38 = vld [vmem:[#allocation298_spill] sm:$0xff]  ;;  %v18482_v43 = vld [vmem:[#allocation300_spill] sm:$0xff] }
 0x57f   :  { %v15833_v51 = vadd.f32 %v6896_v60, %v6853_v62  ;;  %7205 = vmatpush1.bf16.msra.mxu1 %v18456_v58  ;;  %v6855_v29 = vpop.f32.mrf.mxu0  ;;  %7163 = vmatprep.subr.bf16.mxu0 %v18457_v20  ;;  %v18479_v62 = vld [vmem:[#allocation297_spill] sm:$0xff]  ;;  %v18481_v60 = vld [vmem:[#allocation299_spill] sm:$0xff] }
 0x580   :  { %v6898_v24 = vpop.f32.mrf.mxu1  ;;  %7206 = vmatprep.subr.bf16.mxu1 %v18458_v52  ;;  %v18483_v58 = vld [vmem:[#allocation301_spill] sm:$0xff]  ;;  %v18485_v20 = vld [vmem:[#allocation303_spill] sm:$0xff] }
 0x581   :  { %v15838_v34 = vadd.f32 %v6898_v24, %v6855_v29  ;;  %v18484_v29 = vld [vmem:[#allocation302_spill] sm:$0xff]  ;;  %v18486_v24 = vld [vmem:[#allocation304_spill] sm:$0xff]  ;;  %v18487_v52 = vld [vmem:[#allocation305_spill] sm:$0xff] }
 0x582   :  { %7164 = vmatpush1.bf16.msra.mxu0 %v18459_v31  ;;  %v18488_v31 = vld [vmem:[#allocation306_spill] sm:$0xff] }
 0x583   :  { %7207 = vmatpush1.bf16.msra.mxu1 %v18460_v6  ;;  %7165 = vmatprep.subr.bf16.mxu0 %v18461_v55  ;;  %v18489_v6 = vld [vmem:[#allocation307_spill] sm:$0xff]  ;;  %v18490_v55 = vld [vmem:[#allocation308_spill] sm:$0xff] }
 0x584   :  { %7208 = vmatprep.subr.bf16.mxu1 %v18462_v17  ;;  %v18491_v17 = vld [vmem:[#allocation309_spill] sm:$0xff] }
 0x586   :  { %7166 = vmatpush1.bf16.msra.mxu0 %v18463_v12  ;;  %v18492_v12 = vld [vmem:[#allocation310_spill] sm:$0xff] }
 0x587   :  { %7209 = vmatpush1.bf16.msra.mxu1 %v18464_v16  ;;  %7167 = vmatprep.subr.bf16.mxu0 %v18465_v41  ;;  %v18493_v16 = vld [vmem:[#allocation311_spill] sm:$0xff]  ;;  %v18494_v41 = vld [vmem:[#allocation312_spill] sm:$0xff] }
 0x588   :  { %7210 = vmatprep.subr.bf16.mxu1 %v18466_v39  ;;  %v18495_v39 = vld [vmem:[#allocation313_spill] sm:$0xff] }
 0x58a   :  { %7168 = vmatpush1.bf16.msra.mxu0 %v18467_v37  ;;  %v18496_v37 = vld [vmem:[#allocation314_spill] sm:$0xff] }
 0x58b   :  { %7211 = vmatpush1.bf16.msra.mxu1 %v18468_v49  ;;  %7169 = vmatprep.subr.bf16.mxu0 %v18469_v2  ;;  %v18497_v49 = vld [vmem:[#allocation315_spill] sm:$0xff]  ;;  %v18498_v2 = vld [vmem:[#allocation316_spill] sm:$0xff] }
 0x58c   :  { %7212 = vmatprep.subr.bf16.mxu1 %v18470_v59  ;;  %v18499_v59 = vld [vmem:[#allocation317_spill] sm:$0xff] }
 0x58e   :  { %7170 = vmatpush1.bf16.msra.mxu0 %v18471_v35  ;;  %v18500_v35 = vld [vmem:[#allocation318_spill] sm:$0xff] }
 0x58f   :  { %7213 = vmatpush1.bf16.msra.mxu1 %v18472_v33  ;;  %7171 = vmatprep.subr.bf16.mxu0 %v18473_v54  ;;  %v18501_v33 = vld [vmem:[#allocation319_spill] sm:$0xff]  ;;  %v18502_v54 = vld [vmem:[#allocation320_spill] sm:$0xff] }
 0x590   :  { %7214 = vmatprep.subr.bf16.mxu1 %v18474_v57  ;;  %v18503_v57 = vld [vmem:[#allocation321_spill] sm:$0xff] }
 0x592   :  { %7172 = vmatpush1.bf16.msra.mxu0 %v18475_v42  ;;  %v18504_v42 = vld [vmem:[#allocation322_spill] sm:$0xff] }
 0x593   :  { %7215 = vmatpush1.bf16.msra.mxu1 %v18476_v13  ;;  %7173 = vmatprep.subr.bf16.mxu0 %v18477_v23  ;;  %v18505_v13 = vld [vmem:[#allocation323_spill] sm:$0xff]  ;;  %v18506_v23 = vld [vmem:[#allocation324_spill] sm:$0xff] }
 0x594   :  { %7216 = vmatprep.subr.bf16.mxu1 %v18478_v19  ;;  %v18507_v19 = vld [vmem:[#allocation325_spill] sm:$0xff] }
 0x596   :  { %7174 = vmatpush1.bf16.msra.mxu0 %v18479_v62  ;;  %v18508_v62 = vld [vmem:[#allocation326_spill] sm:$0xff] }
 0x597   :  { %7217 = vmatpush1.bf16.msra.mxu1 %v18480_v38  ;;  %7175 = vmatprep.subr.bf16.mxu0 %v18481_v60  ;;  %v18509_v38 = vld [vmem:[#allocation327_spill] sm:$0xff]  ;;  %v18510_v60 = vld [vmem:[#allocation328_spill] sm:$0xff] }
 0x598   :  { %7218 = vmatprep.subr.bf16.mxu1 %v18482_v43  ;;  %v18511_v43 = vld [vmem:[#allocation329_spill] sm:$0xff] }
 0x59a   :  { %7176 = vmatpush2.bf16.msra.mxu0 %v18483_v58  ;;  %v18512_v58 = vld [vmem:[#allocation330_spill] sm:$0xff] }
 0x59b   :  { %7219 = vmatpush2.bf16.msra.mxu1 %v18484_v29  ;;  %7177 = vmatprep.subr.bf16.mxu0 %v18485_v20  ;;  %v18513_v29 = vld [vmem:[#allocation331_spill] sm:$0xff]  ;;  %v18514_v20 = vld [vmem:[#allocation332_spill] sm:$0xff] }
 0x59c   :  { %7220 = vmatprep.subr.bf16.mxu1 %v18486_v24 }
 0x59e   :  { %7178 = vmatpush2.bf16.msra.mxu0 %v18487_v52 }
 0x59f   :  { %7221 = vmatpush2.bf16.msra.mxu1 %v18488_v31  ;;  %7179 = vmatprep.subr.bf16.mxu0 %v18489_v6  ;;  %v18515_v31 = vld [vmem:[#allocation333_spill] sm:$0xff] }
 0x5a0   :  { %7222 = vmatprep.subr.bf16.mxu1 %v18490_v55  ;;  %v18516_v55 = vld [vmem:[#allocation334_spill] sm:$0xff] }
 0x5a2   :  { %7180 = vmatpush2.bf16.msra.mxu0 %v18491_v17 }
 0x5a3   :  { %7223 = vmatpush2.bf16.msra.mxu1 %v18492_v12  ;;  %7181 = vmatprep.subr.bf16.mxu0 %v18493_v16  ;;  %v18517_v16 = vld [vmem:[#allocation335_spill] sm:$0xff] }
 0x5a4   :  { %7224 = vmatprep.subr.bf16.mxu1 %v18494_v41 }
 0x5a6   :  { %7182 = vmatpush2.bf16.msra.mxu0 %v18495_v39 }
 0x5a7   :  { %7225 = vmatpush2.bf16.msra.mxu1 %v18496_v37  ;;  %7183 = vmatprep.subr.bf16.mxu0 %v18497_v49  ;;  %v18518_v37 = vld [vmem:[#allocation336_spill] sm:$0xff] }
 0x5a8   :  { %7226 = vmatprep.subr.bf16.mxu1 %v18498_v2  ;;  %v18519_v2 = vld [vmem:[#allocation337_spill] sm:$0xff] }
 0x5aa   :  { %7184 = vmatpush2.bf16.msra.mxu0 %v18499_v59 }
 0x5ab   :  { %7227 = vmatpush2.bf16.msra.mxu1 %v18500_v35  ;;  %7185 = vmatprep.subr.bf16.mxu0 %v18501_v33  ;;  %v18520_v35 = vld [vmem:[#allocation338_spill] sm:$0xff] }
 0x5ac   :  { %7228 = vmatprep.subr.bf16.mxu1 %v18502_v54  ;;  %v18521_v54 = vld [vmem:[#allocation339_spill] sm:$0xff] }
 0x5ae   :  { %7186 = vmatpush2.bf16.msra.mxu0 %v18503_v57 }
 0x5af   :  { %7229 = vmatpush2.bf16.msra.mxu1 %v18504_v42  ;;  %7187 = vmatprep.subr.bf16.mxu0 %v18505_v13  ;;  %v18522_v42 = vld [vmem:[#allocation340_spill] sm:$0xff] }
 0x5b0   :  { %7230 = vmatprep.subr.bf16.mxu1 %v18506_v23  ;;  %v18523_v23 = vld [vmem:[#allocation341_spill] sm:$0xff] }
 0x5b2   :  { %7188 = vmatpush2.bf16.msra.mxu0 %v18507_v19  ;;  %v18524_v19 = vld [vmem:[#allocation342_spill] sm:$0xff] }
 0x5b3   :  { %7231 = vmatpush2.bf16.msra.mxu1 %v18508_v62  ;;  %7189 = vmatprep.subr.bf16.mxu0 %v18509_v38  ;;  %v18525_v62 = vld [vmem:[#allocation343_spill] sm:$0xff]  ;;  %v18526_v38 = vld [vmem:[#allocation344_spill] sm:$0xff] }
 0x5b4   :  { %7232 = vmatprep.subr.bf16.mxu1 %v18510_v60  ;;  %v18527_v60 = vld [vmem:[#allocation345_spill] sm:$0xff] }
 0x5b6   :  { %7190 = vmatpush2.bf16.msra.mxu0 %v18511_v43  ;;  %v18528_v43 = vld [vmem:[#allocation346_spill] sm:$0xff] }
 0x5b7   :  { %7233 = vmatpush2.bf16.msra.mxu1 %v18512_v58  ;;  %7245 = vmatprep.subr.bf16.mxu0 %v18513_v29  ;;  %v18529_v58 = vld [vmem:[#allocation347_spill] sm:$0xff]  ;;  %v18530_v29 = vld [vmem:[#allocation348_spill] sm:$0xff] }
 0x5b8   :  { %7288 = vmatprep.subr.bf16.mxu1 %v18514_v20  ;;  %v18531_v20 = vld [vmem:[#allocation349_spill] sm:$0xff] }
 0x5b9   :  { %v6935_v24 = vpop.f32.mrf.mxu0  ;;  %7192 = vmatmul.mubr.bf16.vlgmr.msra.gmra.mxu0 %v13151_v0 }
 0x5ba   :  { %v6978_v52 = vpop.f32.mrf.mxu1  ;;  %7235 = vmatmul.mubr.bf16.vlgmr.msra.gmra.mxu1 %v13160_v53  ;;  %7246 = vmatpush1.bf16.msra.mxu0 %v18515_v31  ;;  %v18534_v31 = vld [vmem:[#allocation352_spill] sm:$0xff] }
 0x5bb   :  { %v15899_v6 = vadd.f32 %v6978_v52, %v6935_v24  ;;  %7277 = vmatprep.mubr.bf16.mxu0 %v13145_v4  ;;  %7289 = vmatpush1.bf16.msra.mxu1 %v18516_v55  ;;  %v6937_v17 = vpop.f32.mrf.mxu0  ;;  %v18532_v24 = vld [vmem:[#allocation350_spill] sm:$0xff]  ;;  %v18533_v52 = vld [vmem:[#allocation351_spill] sm:$0xff]  ;;  %v18535_v55 = vld [vmem:[#allocation353_spill] sm:$0xff] }
 0x5bc   :  { %7320 = vmatprep.mubr.bf16.mxu1 %v18452_v32  ;;  %v6980_v12 = vpop.f32.mrf.mxu1  ;;  %7247 = vmatprep.subr.bf16.mxu0 %v18517_v16  ;;  %v18538_v16 = vld [vmem:[#allocation356_spill] sm:$0xff] }
 0x5bd   :  { %v15905_v41 = vadd.f32 %v6980_v12, %v6937_v17  ;;  %v6939_v39 = vpop.f32.mrf.mxu0  ;;  %7290 = vmatprep.subr.bf16.mxu1 %v18518_v37  ;;  %v18536_v17 = vld [vmem:[#allocation354_spill] sm:$0xff]  ;;  %v18537_v12 = vld [vmem:[#allocation355_spill] sm:$0xff] }
 0x5be   :  { %v6982_v49 = vpop.f32.mrf.mxu1  ;;  %7248 = vmatpush1.bf16.msra.mxu0 %v18519_v2  ;;  %v18540_v37 = vld [vmem:[#allocation358_spill] sm:$0xff]  ;;  %v18542_v2 = vld [vmem:[#allocation360_spill] sm:$0xff] }
 0x5bf   :  { %v15909_v59 = vadd.f32 %v6982_v49, %v6939_v39  ;;  %7291 = vmatpush1.bf16.msra.mxu1 %v18520_v35  ;;  %v6941_v33 = vpop.f32.mrf.mxu0  ;;  %7249 = vmatprep.subr.bf16.mxu0 %v18521_v54  ;;  %v18539_v39 = vld [vmem:[#allocation357_spill] sm:$0xff]  ;;  %v18541_v49 = vld [vmem:[#allocation359_spill] sm:$0xff] }
 0x5c0   :  { %v6984_v57 = vpop.f32.mrf.mxu1  ;;  %7292 = vmatprep.subr.bf16.mxu1 %v18522_v42  ;;  %v18543_v35 = vld [vmem:[#allocation361_spill] sm:$0xff]  ;;  %v18545_v54 = vld [vmem:[#allocation363_spill] sm:$0xff] }
 0x5c1   :  { %v15914_v13 = vadd.f32 %v6984_v57, %v6941_v33  ;;  %v18544_v33 = vld [vmem:[#allocation362_spill] sm:$0xff]  ;;  %v18546_v57 = vld [vmem:[#allocation364_spill] sm:$0xff]  ;;  %v18547_v42 = vld [vmem:[#allocation365_spill] sm:$0xff] }
 0x5c2   :  { %7250 = vmatpush1.bf16.msra.mxu0 %v18523_v23  ;;  %v18548_v23 = vld [vmem:[#allocation366_spill] sm:$0xff] }
 0x5c3   :  { %7293 = vmatpush1.bf16.msra.mxu1 %v18524_v19  ;;  %7251 = vmatprep.subr.bf16.mxu0 %v18525_v62  ;;  %v18549_v19 = vld [vmem:[#allocation367_spill] sm:$0xff]  ;;  %v18550_v62 = vld [vmem:[#allocation368_spill] sm:$0xff] }
 0x5c4   :  { %7294 = vmatprep.subr.bf16.mxu1 %v18526_v38  ;;  %v18551_v38 = vld [vmem:[#allocation369_spill] sm:$0xff] }
 0x5c6   :  { %7252 = vmatpush1.bf16.msra.mxu0 %v18527_v60  ;;  %v18552_v60 = vld [vmem:[#allocation370_spill] sm:$0xff] }
 0x5c7   :  { %7295 = vmatpush1.bf16.msra.mxu1 %v18528_v43  ;;  %7253 = vmatprep.subr.bf16.mxu0 %v18529_v58  ;;  %v18553_v43 = vld [vmem:[#allocation371_spill] sm:$0xff]  ;;  %v18554_v58 = vld [vmem:[#allocation372_spill] sm:$0xff] }
 0x5c8   :  { %7296 = vmatprep.subr.bf16.mxu1 %v18530_v29  ;;  %v18555_v29 = vld [vmem:[#allocation373_spill] sm:$0xff] }
 0x5ca   :  { %7254 = vmatpush1.bf16.msra.mxu0 %v18531_v20  ;;  %v18556_v20 = vld [vmem:[#allocation374_spill] sm:$0xff] }
 0x5cb   :  { %7297 = vmatpush1.bf16.msra.mxu1 %v18532_v24  ;;  %7255 = vmatprep.subr.bf16.mxu0 %v18533_v52  ;;  %v18557_v24 = vld [vmem:[#allocation375_spill] sm:$0xff]  ;;  %v18558_v52 = vld [vmem:[#allocation376_spill] sm:$0xff] }
 0x5cc   :  { %7298 = vmatprep.subr.bf16.mxu1 %v18534_v31  ;;  %v18559_v31 = vld [vmem:[#allocation377_spill] sm:$0xff] }
 0x5ce   :  { %7256 = vmatpush1.bf16.msra.mxu0 %v18535_v55  ;;  %v18560_v55 = vld [vmem:[#allocation378_spill] sm:$0xff] }
 0x5cf   :  { %7299 = vmatpush1.bf16.msra.mxu1 %v18536_v17  ;;  %7257 = vmatprep.subr.bf16.mxu0 %v18537_v12  ;;  %v18561_v17 = vld [vmem:[#allocation379_spill] sm:$0xff]  ;;  %v18562_v12 = vld [vmem:[#allocation380_spill] sm:$0xff] }
 0x5d0   :  { %7300 = vmatprep.subr.bf16.mxu1 %v18538_v16  ;;  %v18563_v16 = vld [vmem:[#allocation381_spill] sm:$0xff] }
 0x5d2   :  { %7258 = vmatpush1.bf16.msra.mxu0 %v18539_v39  ;;  %v18564_v39 = vld [vmem:[#allocation382_spill] sm:$0xff] }
 0x5d3   :  { %7301 = vmatpush1.bf16.msra.mxu1 %v18540_v37  ;;  %7259 = vmatprep.subr.bf16.mxu0 %v18541_v49  ;;  %v18565_v37 = vld [vmem:[#allocation383_spill] sm:$0xff]  ;;  %v18566_v49 = vld [vmem:[#allocation384_spill] sm:$0xff] }
 0x5d4   :  { %7302 = vmatprep.subr.bf16.mxu1 %v18542_v2  ;;  %v18567_v2 = vld [vmem:[#allocation385_spill] sm:$0xff] }
 0x5d6   :  { %7260 = vmatpush1.bf16.msra.mxu0 %v18543_v35  ;;  %v18568_v35 = vld [vmem:[#allocation386_spill] sm:$0xff] }
 0x5d7   :  { %7303 = vmatpush1.bf16.msra.mxu1 %v18544_v33  ;;  %7261 = vmatprep.subr.bf16.mxu0 %v18545_v54  ;;  %v18569_v33 = vld [vmem:[#allocation387_spill] sm:$0xff]  ;;  %v18570_v54 = vld [vmem:[#allocation388_spill] sm:$0xff] }
 0x5d8   :  { %7304 = vmatprep.subr.bf16.mxu1 %v18546_v57  ;;  %v18571_v57 = vld [vmem:[#allocation389_spill] sm:$0xff] }
 0x5da   :  { %7262 = vmatpush2.bf16.msra.mxu0 %v18547_v42  ;;  %v18572_v42 = vld [vmem:[#allocation390_spill] sm:$0xff] }
 0x5db   :  { %7305 = vmatpush2.bf16.msra.mxu1 %v18548_v23  ;;  %7263 = vmatprep.subr.bf16.mxu0 %v18549_v19  ;;  %v18573_v23 = vld [vmem:[#allocation391_spill] sm:$0xff]  ;;  %v18574_v19 = vld [vmem:[#allocation392_spill] sm:$0xff] }
 0x5dc   :  { %7306 = vmatprep.subr.bf16.mxu1 %v18550_v62  ;;  %v18575_v62 = vld [vmem:[#allocation393_spill] sm:$0xff] }
 0x5de   :  { %7264 = vmatpush2.bf16.msra.mxu0 %v18551_v38  ;;  %v18576_v38 = vld [vmem:[#allocation394_spill] sm:$0xff] }
 0x5df   :  { %7307 = vmatpush2.bf16.msra.mxu1 %v18552_v60  ;;  %7265 = vmatprep.subr.bf16.mxu0 %v18553_v43  ;;  %v18577_v60 = vld [vmem:[#allocation395_spill] sm:$0xff]  ;;  %v18578_v43 = vld [vmem:[#allocation396_spill] sm:$0xff] }
 0x5e0   :  { %7308 = vmatprep.subr.bf16.mxu1 %v18554_v58 }
 0x5e2   :  { %7266 = vmatpush2.bf16.msra.mxu0 %v18555_v29 }
 0x5e3   :  { %7309 = vmatpush2.bf16.msra.mxu1 %v18556_v20  ;;  %7267 = vmatprep.subr.bf16.mxu0 %v18557_v24  ;;  %v18579_v20 = vld [vmem:[#allocation397_spill] sm:$0xff] }
 0x5e4   :  { %7310 = vmatprep.subr.bf16.mxu1 %v18558_v52  ;;  %v18580_v52 = vld [vmem:[#allocation398_spill] sm:$0xff] }
 0x5e6   :  { %7268 = vmatpush2.bf16.msra.mxu0 %v18559_v31 }
 0x5e7   :  { %7311 = vmatpush2.bf16.msra.mxu1 %v18560_v55  ;;  %7269 = vmatprep.subr.bf16.mxu0 %v18561_v17  ;;  %v18581_v17 = vld [vmem:[#allocation399_spill] sm:$0xff] }
 0x5e8   :  { %7312 = vmatprep.subr.bf16.mxu1 %v18562_v12 }
 0x5ea   :  { %7270 = vmatpush2.bf16.msra.mxu0 %v18563_v16  ;;  %v18582_v16 = vld [vmem:[#allocation400_spill] sm:$0xff] }
 0x5eb   :  { %7313 = vmatpush2.bf16.msra.mxu1 %v18564_v39  ;;  %7271 = vmatprep.subr.bf16.mxu0 %v18565_v37  ;;  %v18583_v39 = vld [vmem:[#allocation401_spill] sm:$0xff]  ;;  %v18584_v37 = vld [vmem:[#allocation402_spill] sm:$0xff] }
 0x5ec   :  { %7314 = vmatprep.subr.bf16.mxu1 %v18566_v49  ;;  %v18585_v49 = vld [vmem:[#allocation403_spill] sm:$0xff] }
 0x5ee   :  { %7272 = vmatpush2.bf16.msra.mxu0 %v18567_v2  ;;  %v18586_v2 = vld [vmem:[#allocation404_spill] sm:$0xff] }
 0x5ef   :  { %7315 = vmatpush2.bf16.msra.mxu1 %v18568_v35  ;;  %7273 = vmatprep.subr.bf16.mxu0 %v18569_v33  ;;  %v18587_v35 = vld [vmem:[#allocation405_spill] sm:$0xff]  ;;  %v18588_v33 = vld [vmem:[#allocation406_spill] sm:$0xff] }
 0x5f0   :  { %7316 = vmatprep.subr.bf16.mxu1 %v18570_v54  ;;  %v18589_v54 = vld [vmem:[#allocation407_spill] sm:$0xff] }
 0x5f2   :  { %7274 = vmatpush2.bf16.msra.mxu0 %v18571_v57  ;;  %v18590_v57 = vld [vmem:[#allocation408_spill] sm:$0xff] }
 0x5f3   :  { %7317 = vmatpush2.bf16.msra.mxu1 %v18572_v42  ;;  %7275 = vmatprep.subr.bf16.mxu0 %v18573_v23  ;;  %v18591_v42 = vld [vmem:[#allocation409_spill] sm:$0xff]  ;;  %v18592_v23 = vld [vmem:[#allocation410_spill] sm:$0xff] }
 0x5f4   :  { %7318 = vmatprep.subr.bf16.mxu1 %v18574_v19  ;;  %v18593_v19 = vld [vmem:[#allocation411_spill] sm:$0xff] }
 0x5f6   :  { %7276 = vmatpush2.bf16.msra.mxu0 %v18575_v62  ;;  %v18594_v62 = vld [vmem:[#allocation412_spill] sm:$0xff] }
 0x5f7   :  { %7319 = vmatpush2.bf16.msra.mxu1 %v18576_v38  ;;  %7331 = vmatprep.subr.bf16.mxu0 %v18577_v60  ;;  %v18595_v38 = vld [vmem:[#allocation413_spill] sm:$0xff]  ;;  %v18596_v60 = vld [vmem:[#allocation414_spill] sm:$0xff] }
 0x5f8   :  { %7374 = vmatprep.subr.bf16.mxu1 %v18578_v43  ;;  %v18597_v43 = vld [vmem:[#allocation415_spill] sm:$0xff] }
 0x5f9   :  { %v7021_v58 = vpop.f32.mrf.mxu0  ;;  %7278 = vmatmul.mubr.bf16.vlgmr.msra.gmra.mxu0 %v13151_v0 }
 0x5fa   :  { %v7064_v29 = vpop.f32.mrf.mxu1  ;;  %7321 = vmatmul.mubr.bf16.vlgmr.msra.gmra.mxu1 %v13160_v53  ;;  %7332 = vmatpush1.bf16.msra.mxu0 %v18579_v20  ;;  %v18600_v20 = vld [vmem:[#allocation418_spill] sm:$0xff] }
 0x5fb   :  { %v15975_v24 = vadd.f32 %v7064_v29, %v7021_v58  ;;  %7363 = vmatprep.mubr.bf16.mxu0 %v13145_v4  ;;  %7375 = vmatpush1.bf16.msra.mxu1 %v18580_v52  ;;  %v7023_v31 = vpop.f32.mrf.mxu0  ;;  %v18598_v58 = vld [vmem:[#allocation416_spill] sm:$0xff]  ;;  %v18599_v29 = vld [vmem:[#allocation417_spill] sm:$0xff]  ;;  %v18601_v52 = vld [vmem:[#allocation419_spill] sm:$0xff] }
 0x5fc   :  { %7406 = vmatprep.mubr.bf16.mxu1 %v18452_v32  ;;  %v7066_v55 = vpop.f32.mrf.mxu1  ;;  %7333 = vmatprep.subr.bf16.mxu0 %v18581_v17  ;;  %v18604_v17 = vld [vmem:[#allocation422_spill] sm:$0xff] }
 0x5fd   :  { %v15981_v12 = vadd.f32 %v7066_v55, %v7023_v31  ;;  %7376 = vmatprep.subr.bf16.mxu1 %v18582_v16  ;;  %v18602_v31 = vld [vmem:[#allocation420_spill] sm:$0xff]  ;;  %v18603_v55 = vld [vmem:[#allocation421_spill] sm:$0xff]  ;;  %v18605_v16 = vld [vmem:[#allocation423_spill] sm:$0xff] }
 0x5fe   :  { %7334 = vmatpush1.bf16.msra.mxu0 %v18583_v39  ;;  %v18606_v39 = vld [vmem:[#allocation424_spill] sm:$0xff] }
 0x5ff   :  { %7377 = vmatpush1.bf16.msra.mxu1 %v18584_v37  ;;  %7335 = vmatprep.subr.bf16.mxu0 %v18585_v49  ;;  %v18607_v37 = vld [vmem:[#allocation425_spill] sm:$0xff]  ;;  %v18608_v49 = vld [vmem:[#allocation426_spill] sm:$0xff] }
 0x600   :  { %7378 = vmatprep.subr.bf16.mxu1 %v18586_v2  ;;  %v18609_v2 = vld [vmem:[#allocation427_spill] sm:$0xff] }
 0x602   :  { %7336 = vmatpush1.bf16.msra.mxu0 %v18587_v35  ;;  %v18610_v35 = vld [vmem:[#allocation428_spill] sm:$0xff] }
 0x603   :  { %7379 = vmatpush1.bf16.msra.mxu1 %v18588_v33  ;;  %7337 = vmatprep.subr.bf16.mxu0 %v18589_v54  ;;  %v18611_v33 = vld [vmem:[#allocation429_spill] sm:$0xff]  ;;  %v18612_v54 = vld [vmem:[#allocation430_spill] sm:$0xff] }
 0x604   :  { %7380 = vmatprep.subr.bf16.mxu1 %v18590_v57  ;;  %v18613_v57 = vld [vmem:[#allocation431_spill] sm:$0xff] }
 0x606   :  { %7338 = vmatpush1.bf16.msra.mxu0 %v18591_v42  ;;  %v18614_v42 = vld [vmem:[#allocation432_spill] sm:$0xff] }
 0x607   :  { %7381 = vmatpush1.bf16.msra.mxu1 %v18592_v23  ;;  %7339 = vmatprep.subr.bf16.mxu0 %v18593_v19  ;;  %v18615_v23 = vld [vmem:[#allocation433_spill] sm:$0xff]  ;;  %v18616_v19 = vld [vmem:[#allocation434_spill] sm:$0xff] }
 0x608   :  { %7382 = vmatprep.subr.bf16.mxu1 %v18594_v62  ;;  %v18617_v62 = vld [vmem:[#allocation435_spill] sm:$0xff] }
 0x60a   :  { %7340 = vmatpush1.bf16.msra.mxu0 %v18595_v38  ;;  %v18618_v38 = vld [vmem:[#allocation436_spill] sm:$0xff] }
 0x60b   :  { %7383 = vmatpush1.bf16.msra.mxu1 %v18596_v60  ;;  %7341 = vmatprep.subr.bf16.mxu0 %v18597_v43  ;;  %v18619_v60 = vld [vmem:[#allocation437_spill] sm:$0xff]  ;;  %v18620_v43 = vld [vmem:[#allocation438_spill] sm:$0xff] }
 0x60c   :  { %7384 = vmatprep.subr.bf16.mxu1 %v18598_v58  ;;  %v18621_v58 = vld [vmem:[#allocation439_spill] sm:$0xff] }
 0x60e   :  { %7342 = vmatpush1.bf16.msra.mxu0 %v18599_v29  ;;  %v18622_v29 = vld [vmem:[#allocation440_spill] sm:$0xff] }
 0x60f   :  { %7385 = vmatpush1.bf16.msra.mxu1 %v18600_v20  ;;  %7343 = vmatprep.subr.bf16.mxu0 %v18601_v52  ;;  %v18623_v20 = vld [vmem:[#allocation441_spill] sm:$0xff]  ;;  %v18624_v52 = vld [vmem:[#allocation442_spill] sm:$0xff] }
 0x610   :  { %7386 = vmatprep.subr.bf16.mxu1 %v18602_v31  ;;  %v18625_v31 = vld [vmem:[#allocation443_spill] sm:$0xff] }
 0x612   :  { %7344 = vmatpush1.bf16.msra.mxu0 %v18603_v55  ;;  %v18626_v55 = vld [vmem:[#allocation444_spill] sm:$0xff] }
 0x613   :  { %7387 = vmatpush1.bf16.msra.mxu1 %v18604_v17  ;;  %7345 = vmatprep.subr.bf16.mxu0 %v18605_v16  ;;  %v18627_v17 = vld [vmem:[#allocation445_spill] sm:$0xff]  ;;  %v18628_v16 = vld [vmem:[#allocation446_spill] sm:$0xff] }
 0x614   :  { %7388 = vmatprep.subr.bf16.mxu1 %v18606_v39  ;;  %v18629_v39 = vld [vmem:[#allocation447_spill] sm:$0xff] }
 0x616   :  { %7346 = vmatpush1.bf16.msra.mxu0 %v18607_v37  ;;  %v18630_v37 = vld [vmem:[#allocation448_spill] sm:$0xff] }
 0x617   :  { %7389 = vmatpush1.bf16.msra.mxu1 %v18608_v49  ;;  %7347 = vmatprep.subr.bf16.mxu0 %v18609_v2  ;;  %v18631_v49 = vld [vmem:[#allocation449_spill] sm:$0xff]  ;;  %v18632_v2 = vld [vmem:[#allocation450_spill] sm:$0xff] }
 0x618   :  { %7390 = vmatprep.subr.bf16.mxu1 %v18610_v35  ;;  %v18633_v35 = vld [vmem:[#allocation451_spill] sm:$0xff] }
 0x61a   :  { %7348 = vmatpush2.bf16.msra.mxu0 %v18611_v33  ;;  %v18634_v33 = vld [vmem:[#allocation452_spill] sm:$0xff] }
 0x61b   :  { %7391 = vmatpush2.bf16.msra.mxu1 %v18612_v54  ;;  %7349 = vmatprep.subr.bf16.mxu0 %v18613_v57  ;;  %v18635_v54 = vld [vmem:[#allocation453_spill] sm:$0xff]  ;;  %v16037_v57 = vpop.f32.mrf.mxu0 }
 0x61c   :  { %7392 = vmatprep.subr.bf16.mxu1 %v18614_v42  ;;  %v18636_v42 = vld [vmem:[#allocation454_spill] sm:$0xff] }
 0x61e   :  { %7350 = vmatpush2.bf16.msra.mxu0 %v18615_v23  ;;  %v18637_v23 = vld [vmem:[#allocation455_spill] sm:$0xff] }
 0x61f   :  { %7393 = vmatpush2.bf16.msra.mxu1 %v18616_v19  ;;  %7351 = vmatprep.subr.bf16.mxu0 %v18617_v62  ;;  %v16041_v19 = vpop.f32.mrf.mxu1  ;;  %v18638_v62 = vld [vmem:[#allocation456_spill] sm:$0xff] }
 0x620   :  { %7394 = vmatprep.subr.bf16.mxu1 %v18618_v38  ;;  %v18639_v38 = vld [vmem:[#allocation457_spill] sm:$0xff] }
 0x622   :  { %7352 = vmatpush2.bf16.msra.mxu0 %v18619_v60  ;;  %v16045_v60 = vpop.f32.mrf.mxu0 }
 0x623   :  { %7395 = vmatpush2.bf16.msra.mxu1 %v18620_v43  ;;  %7353 = vmatprep.subr.bf16.mxu0 %v18621_v58  ;;  %v18640_v43 = vld [vmem:[#allocation458_spill] sm:$0xff]  ;;  %v18641_v58 = vld [vmem:[#allocation459_spill] sm:$0xff] }
 0x624   :  { %7396 = vmatprep.subr.bf16.mxu1 %v18622_v29  ;;  %v16049_v29 = vpop.f32.mrf.mxu1 }
 0x626   :  { %7354 = vmatpush2.bf16.msra.mxu0 %v18623_v20  ;;  %v18642_v20 = vld [vmem:[#allocation460_spill] sm:$0xff] }
 0x627   :  { %7397 = vmatpush2.bf16.msra.mxu1 %v18624_v52  ;;  %7355 = vmatprep.subr.bf16.mxu0 %v18625_v31 }
 0x628   :  { %7398 = vmatprep.subr.bf16.mxu1 %v18626_v55  ;;  %v18643_v55 = vld [vmem:[#allocation461_spill] sm:$0xff] }
 0x62a   :  { %7356 = vmatpush2.bf16.msra.mxu0 %v18627_v17 }
 0x62b   :  { %7399 = vmatpush2.bf16.msra.mxu1 %v18628_v16  ;;  %7357 = vmatprep.subr.bf16.mxu0 %v18629_v39  ;;  %v18644_v16 = vld [vmem:[#allocation462_spill] sm:$0xff] }
 0x62c   :  { %7400 = vmatprep.subr.bf16.mxu1 %v18630_v37 }
 0x62e   :  { %7358 = vmatpush2.bf16.msra.mxu0 %v18631_v49  ;;  %v18645_v49 = vld [vmem:[#allocation463_spill] sm:$0xff] }
 0x62f   :  { %7401 = vmatpush2.bf16.msra.mxu1 %v18632_v2  ;;  %7359 = vmatprep.subr.bf16.mxu0 %v18633_v35 }
 0x630   :  { %7402 = vmatprep.subr.bf16.mxu1 %v18634_v33  ;;  %v18646_v33 = vld [vmem:[#allocation464_spill] sm:$0xff] }
 0x632   :  { %7360 = vmatpush2.bf16.msra.mxu0 %v18635_v54 }
 0x633   :  { %7403 = vmatpush2.bf16.msra.mxu1 %v18636_v42  ;;  %7361 = vmatprep.subr.bf16.mxu0 %v18637_v23  ;;  %v18647_v42 = vld [vmem:[#allocation465_spill] sm:$0xff] }
 0x634   :  { %7404 = vmatprep.subr.bf16.mxu1 %v18638_v62  ;;  %v18648_v62 = vld [vmem:[#allocation466_spill] sm:$0xff] }
 0x636   :  { %7362 = vmatpush2.bf16.msra.mxu0 %v18639_v38 }
 0x637   :  { %7405 = vmatpush2.bf16.msra.mxu1 %v18640_v43  ;;  %7417 = vmatprep.subr.bf16.mxu0 %v18641_v58  ;;  %v18649_v43 = vld [vmem:[#allocation467_spill] sm:$0xff] }
 0x638   :  { %7460 = vmatprep.subr.bf16.mxu1 %v18642_v20  ;;  %v18650_v20 = vld [vmem:[#allocation468_spill] sm:$0xff] }
 0x639   :  { %v7107_v52 = vpop.f32.mrf.mxu0  ;;  %7364 = vmatmul.mubr.bf16.vlgmr.msra.gmra.mxu0 %v13151_v0 }
 0x63a   :  { %v7150_v31 = vpop.f32.mrf.mxu1  ;;  %7407 = vmatmul.mubr.bf16.vlgmr.msra.gmra.mxu1 %v13160_v53  ;;  %7418 = vmatpush1.bf16.msra.mxu0 %v18643_v55  ;;  %v18652_v55 = vld [vmem:[#allocation470_spill] sm:$0xff] }
 0x63b   :  { %v16055_v17 = vadd.f32 %v7150_v31, %v7107_v52  ;;  %7449 = vmatprep.mubr.bf16.mxu0 %v13145_v4  ;;  %7461 = vmatpush1.bf16.msra.mxu1 %v18644_v16  ;;  %v7109_v39 = vpop.f32.mrf.mxu0  ;;  %v18651_v31 = vld [vmem:[#allocation469_spill] sm:$0xff]  ;;  %v18653_v16 = vld [vmem:[#allocation471_spill] sm:$0xff] }
 0x63c   :  { %7492 = vmatprep.mubr.bf16.mxu1 %v18452_v32  ;;  %v7152_v37 = vpop.f32.mrf.mxu1  ;;  %7419 = vmatprep.subr.bf16.mxu0 %v18645_v49  ;;  %v18656_v49 = vld [vmem:[#allocation474_spill] sm:$0xff] }
 0x63d   :  { %v16061_v2 = vadd.f32 %v7152_v37, %v7109_v39  ;;  %v7111_v35 = vpop.f32.mrf.mxu0  ;;  %7462 = vmatprep.subr.bf16.mxu1 %v18646_v33  ;;  %v18654_v39 = vld [vmem:[#allocation472_spill] sm:$0xff]  ;;  %v18655_v37 = vld [vmem:[#allocation473_spill] sm:$0xff] }
 0x63e   :  { %v7154_v54 = vpop.f32.mrf.mxu1  ;;  %7420 = vmatpush1.bf16.msra.mxu0 %v18647_v42  ;;  %v18658_v33 = vld [vmem:[#allocation476_spill] sm:$0xff]  ;;  %v18660_v42 = vld [vmem:[#allocation478_spill] sm:$0xff] }
 0x63f   :  { %v16065_v23 = vadd.f32 %v7154_v54, %v7111_v35  ;;  %7463 = vmatpush1.bf16.msra.mxu1 %v18648_v62  ;;  %v7113_v38 = vpop.f32.mrf.mxu0  ;;  %7421 = vmatprep.subr.bf16.mxu0 %v18649_v43  ;;  %v18657_v35 = vld [vmem:[#allocation475_spill] sm:$0xff]  ;;  %v18659_v54 = vld [vmem:[#allocation477_spill] sm:$0xff] }
 0x640   :  { %v7156_v58 = vpop.f32.mrf.mxu1  ;;  %7464 = vmatprep.subr.bf16.mxu1 %v18650_v20  ;;  %v18661_v62 = vld [vmem:[#allocation479_spill] sm:$0xff]  ;;  %v18663_v43 = vld [vmem:[#allocation481_spill] sm:$0xff] }
 0x641   :  { %v16070_v52 = vadd.f32 %v7156_v58, %v7113_v38  ;;  %v18662_v38 = vld [vmem:[#allocation480_spill] sm:$0xff]  ;;  %v18664_v58 = vld [vmem:[#allocation482_spill] sm:$0xff]  ;;  %v18665_v20 = vld [vmem:[#allocation483_spill] sm:$0xff] }
 0x642   :  { %7422 = vmatpush1.bf16.msra.mxu0 %v18651_v31  ;;  %v18666_v31 = vld [vmem:[#allocation484_spill] sm:$0xff] }
 0x643   :  { %7465 = vmatpush1.bf16.msra.mxu1 %v18652_v55  ;;  %7423 = vmatprep.subr.bf16.mxu0 %v18653_v16  ;;  %v18667_v55 = vld [vmem:[#allocation485_spill] sm:$0xff]  ;;  %v18668_v16 = vld [vmem:[#allocation486_spill] sm:$0xff] }
 0x644   :  { %7466 = vmatprep.subr.bf16.mxu1 %v18654_v39  ;;  %v18669_v39 = vld [vmem:[#allocation487_spill] sm:$0xff] }
 0x646   :  { %7424 = vmatpush1.bf16.msra.mxu0 %v18655_v37  ;;  %v18670_v37 = vld [vmem:[#allocation488_spill] sm:$0xff] }
 0x647   :  { %7467 = vmatpush1.bf16.msra.mxu1 %v18656_v49  ;;  %7425 = vmatprep.subr.bf16.mxu0 %v18657_v35  ;;  %v18671_v49 = vld [vmem:[#allocation489_spill] sm:$0xff]  ;;  %v18672_v35 = vld [vmem:[#allocation490_spill] sm:$0xff] }
 0x648   :  { %7468 = vmatprep.subr.bf16.mxu1 %v18658_v33  ;;  %v18673_v33 = vld [vmem:[#allocation491_spill] sm:$0xff] }
 0x64a   :  { %7426 = vmatpush1.bf16.msra.mxu0 %v18659_v54  ;;  %v18674_v54 = vld [vmem:[#allocation492_spill] sm:$0xff] }
 0x64b   :  { %7469 = vmatpush1.bf16.msra.mxu1 %v18660_v42  ;;  %7427 = vmatprep.subr.bf16.mxu0 %v18661_v62  ;;  %v18675_v42 = vld [vmem:[#allocation493_spill] sm:$0xff]  ;;  %v18676_v62 = vld [vmem:[#allocation494_spill] sm:$0xff] }
 0x64c   :  { %7470 = vmatprep.subr.bf16.mxu1 %v18662_v38  ;;  %v18677_v38 = vld [vmem:[#allocation495_spill] sm:$0xff] }
 0x64e   :  { %7428 = vmatpush1.bf16.msra.mxu0 %v18663_v43  ;;  %v18678_v43 = vld [vmem:[#allocation496_spill] sm:$0xff] }
 0x64f   :  { %7471 = vmatpush1.bf16.msra.mxu1 %v18664_v58  ;;  %7429 = vmatprep.subr.bf16.mxu0 %v18665_v20  ;;  %v18679_v58 = vld [vmem:[#allocation497_spill] sm:$0xff]  ;;  %v18680_v20 = vld [vmem:[#allocation498_spill] sm:$0xff] }
 0x650   :  { %7472 = vmatprep.subr.bf16.mxu1 %v18666_v31  ;;  %v18681_v31 = vld [vmem:[#allocation499_spill] sm:$0xff] }
 0x652   :  { %7430 = vmatpush1.bf16.msra.mxu0 %v18667_v55  ;;  %v18682_v55 = vld [vmem:[#allocation500_spill] sm:$0xff] }
 0x653   :  { %7473 = vmatpush1.bf16.msra.mxu1 %v18668_v16  ;;  %7431 = vmatprep.subr.bf16.mxu0 %v18669_v39  ;;  %v18683_v16 = vld [vmem:[#allocation501_spill] sm:$0xff]  ;;  %v18684_v39 = vld [vmem:[#allocation502_spill] sm:$0xff] }
 0x654   :  { %7474 = vmatprep.subr.bf16.mxu1 %v18670_v37  ;;  %v18685_v37 = vld [vmem:[#allocation503_spill] sm:$0xff] }
 0x656   :  { %7432 = vmatpush1.bf16.msra.mxu0 %v18671_v49  ;;  %v18686_v49 = vld [vmem:[#allocation504_spill] sm:$0xff] }
 0x657   :  { %7475 = vmatpush1.bf16.msra.mxu1 %v18672_v35  ;;  %7433 = vmatprep.subr.bf16.mxu0 %v18673_v33  ;;  %v18687_v35 = vld [vmem:[#allocation505_spill] sm:$0xff]  ;;  %v18688_v33 = vld [vmem:[#allocation506_spill] sm:$0xff] }
 0x658   :  { %7476 = vmatprep.subr.bf16.mxu1 %v18674_v54  ;;  %v18689_v54 = vld [vmem:[#allocation507_spill] sm:$0xff] }
 0x65a   :  { %7434 = vmatpush2.bf16.msra.mxu0 %v18675_v42  ;;  %v18690_v42 = vld [vmem:[#allocation508_spill] sm:$0xff] }
 0x65b   :  { %7477 = vmatpush2.bf16.msra.mxu1 %v18676_v62  ;;  %7435 = vmatprep.subr.bf16.mxu0 %v18677_v38  ;;  %v18691_v62 = vld [vmem:[#allocation509_spill] sm:$0xff]  ;;  %v18692_v38 = vld [vmem:[#allocation510_spill] sm:$0xff] }
 0x65c   :  { %7478 = vmatprep.subr.bf16.mxu1 %v18678_v43  ;;  %v18693_v43 = vld [vmem:[#allocation511_spill] sm:$0xff] }
 0x65e   :  { %7436 = vmatpush2.bf16.msra.mxu0 %v18679_v58  ;;  %v18694_v58 = vld [vmem:[#allocation512_spill] sm:$0xff] }
 0x65f   :  { %7479 = vmatpush2.bf16.msra.mxu1 %v18680_v20  ;;  %7437 = vmatprep.subr.bf16.mxu0 %v18681_v31  ;;  %v18695_v20 = vld [vmem:[#allocation513_spill] sm:$0xff]  ;;  %v18696_v31 = vld [vmem:[#allocation514_spill] sm:$0xff] }
 0x660   :  { %7480 = vmatprep.subr.bf16.mxu1 %v18682_v55  ;;  %v18697_v55 = vld [vmem:[#allocation515_spill] sm:$0xff] }
 0x662   :  { %7438 = vmatpush2.bf16.msra.mxu0 %v18683_v16  ;;  %v18698_v16 = vld [vmem:[#allocation516_spill] sm:$0xff] }
 0x663   :  { %7481 = vmatpush2.bf16.msra.mxu1 %v18684_v39  ;;  %7439 = vmatprep.subr.bf16.mxu0 %v18685_v37  ;;  %v18699_v39 = vld [vmem:[#allocation517_spill] sm:$0xff]  ;;  %v18700_v37 = vld [vmem:[#allocation518_spill] sm:$0xff] }
 0x664   :  { %7482 = vmatprep.subr.bf16.mxu1 %v18686_v49  ;;  %v18701_v49 = vld [vmem:[#allocation519_spill] sm:$0xff] }
 0x666   :  { %7440 = vmatpush2.bf16.msra.mxu0 %v18687_v35  ;;  %v18702_v35 = vld [vmem:[#allocation520_spill] sm:$0xff] }
 0x667   :  { %7483 = vmatpush2.bf16.msra.mxu1 %v18688_v33  ;;  %7441 = vmatprep.subr.bf16.mxu0 %v18689_v54  ;;  %v18703_v33 = vld [vmem:[#allocation521_spill] sm:$0xff]  ;;  %v18704_v54 = vld [vmem:[#allocation522_spill] sm:$0xff] }
 0x668   :  { %7484 = vmatprep.subr.bf16.mxu1 %v18690_v42  ;;  %v18705_v42 = vld [vmem:[#allocation523_spill] sm:$0xff] }
 0x66a   :  { %7442 = vmatpush2.bf16.msra.mxu0 %v18691_v62  ;;  %v18706_v62 = vld [vmem:[#allocation524_spill] sm:$0xff] }
 0x66b   :  { %7485 = vmatpush2.bf16.msra.mxu1 %v18692_v38  ;;  %7443 = vmatprep.subr.bf16.mxu0 %v18693_v43  ;;  %v16130_v38 = vrot.slane %v13145_v4, 1  ;;  %v18707_v43 = vld [vmem:[#allocation525_spill] sm:$0xff] }
 0x66c   :  { %7486 = vmatprep.subr.bf16.mxu1 %v18694_v58  ;;  %v16135_v58 = vrot.slane %v18452_v32, 1  ;;  %v18711_v4 = vld [vmem:[#allocation529_spill] sm:$0xff]  ;;  %v18713_v32 = vld [vmem:[#allocation531_spill] sm:$0xff] }
 0x66e   :  { %7444 = vmatpush2.bf16.msra.mxu0 %v18695_v20  ;;  %v18708_v20 = vld [vmem:[#allocation526_spill] sm:$0xff] }
 0x66f   :  { %7487 = vmatpush2.bf16.msra.mxu1 %v18696_v31  ;;  %7445 = vmatprep.subr.bf16.mxu0 %v18697_v55  ;;  %v18709_v31 = vld [vmem:[#allocation527_spill] sm:$0xff]  ;;  %v18710_v55 = vld [vmem:[#allocation528_spill] sm:$0xff] }
 0x670   :  { %7488 = vmatprep.subr.bf16.mxu1 %v18698_v16  ;;  %v18712_v16 = vld [vmem:[#allocation530_spill] sm:$0xff] }
 0x672   :  { %7446 = vmatpush2.bf16.msra.mxu0 %v18699_v39  ;;  %v18714_v39 = vld [vmem:[#allocation532_spill] sm:$0xff] }
 0x673   :  { %7489 = vmatpush2.bf16.msra.mxu1 %v18700_v37  ;;  %7447 = vmatprep.subr.bf16.mxu0 %v18701_v49  ;;  %v18715_v37 = vld [vmem:[#allocation533_spill] sm:$0xff]  ;;  %v18716_v49 = vld [vmem:[#allocation534_spill] sm:$0xff] }
 0x674   :  { %7490 = vmatprep.subr.bf16.mxu1 %v18702_v35  ;;  %v18717_v35 = vld [vmem:[#allocation535_spill] sm:$0xff] }
 0x676   :  { %7448 = vmatpush2.bf16.msra.mxu0 %v18703_v33  ;;  %v18718_v33 = vld [vmem:[#allocation536_spill] sm:$0xff] }
 0x677   :  { %7491 = vmatpush2.bf16.msra.mxu1 %v18704_v54  ;;  %7503 = vmatprep.subr.bf16.mxu0 %v18705_v42  ;;  %v18719_v54 = vld [vmem:[#allocation537_spill] sm:$0xff]  ;;  %v18720_v42 = vld [vmem:[#allocation538_spill] sm:$0xff] }
 0x678   :  { %7546 = vmatprep.subr.bf16.mxu1 %v18706_v62  ;;  %v18722_v62 = vld [vmem:[#allocation540_spill] sm:$0xff] }
 0x679   :  { %7450 = vmatmul.mubr.bf16.vlgmr.msra.gmra.mxu0 %v13151_v0 }
 0x67a   :  { %7493 = vmatmul.mubr.bf16.vlgmr.msra.gmra.mxu1 %v13160_v53  ;;  %7504 = vmatpush1.bf16.msra.mxu0 %v18707_v43  ;;  %v18723_v43 = vld [vmem:[#allocation541_spill] sm:$0xff] }
 0x67b   :  { %11353 = vmatprep.mubr.msk.bf16.mxu0 %vm1127_vm3, %v16130_v38  ;;  %7547 = vmatpush1.bf16.msra.mxu1 %v18708_v20  ;;  %v18724_v20 = vld [vmem:[#allocation542_spill] sm:$0xff] }
 0x67c   :  { %11355 = vmatprep.mubr.msk.bf16.mxu1 %vm1127_vm3, %v16135_v58  ;;  %7505 = vmatprep.subr.bf16.mxu0 %v18709_v31  ;;  %v18725_v31 = vld [vmem:[#allocation543_spill] sm:$0xff] }
 0x67d   :  { %7548 = vmatprep.subr.bf16.mxu1 %v18710_v55  ;;  %v18726_v55 = vld [vmem:[#allocation544_spill] sm:$0xff] }
 0x67e   :  { %7506 = vmatpush1.bf16.msra.mxu0 %v14667_v36  ;;  %v18721_v36 = vld [vmem:[#allocation539_spill] sm:$0xff] }
 0x67f   :  { %7549 = vmatpush1.bf16.msra.mxu1 %v18711_v4  ;;  %7507 = vmatprep.subr.bf16.mxu0 %v18712_v16  ;;  %v18727_v4 = vld [vmem:[#allocation545_spill] sm:$0xff]  ;;  %v18728_v16 = vld [vmem:[#allocation546_spill] sm:$0xff] }
 0x680   :  { %7550 = vmatprep.subr.bf16.mxu1 %v18713_v32  ;;  %v18729_v32 = vld [vmem:[#allocation547_spill] sm:$0xff] }
 0x682   :  { %7508 = vmatpush1.bf16.msra.mxu0 %v18714_v39  ;;  %v18730_v39 = vld [vmem:[#allocation548_spill] sm:$0xff] }
 0x683   :  { %7551 = vmatpush1.bf16.msra.mxu1 %v18715_v37  ;;  %7509 = vmatprep.subr.bf16.mxu0 %v18716_v49  ;;  %v18731_v37 = vld [vmem:[#allocation549_spill] sm:$0xff]  ;;  %v18732_v49 = vld [vmem:[#allocation550_spill] sm:$0xff] }
 0x684   :  { %7552 = vmatprep.subr.bf16.mxu1 %v18717_v35  ;;  %v18733_v35 = vld [vmem:[#allocation551_spill] sm:$0xff] }
 0x686   :  { %7510 = vmatpush1.bf16.msra.mxu0 %v18718_v33  ;;  %v18734_v33 = vld [vmem:[#allocation552_spill] sm:$0xff] }
 0x687   :  { %7553 = vmatpush1.bf16.msra.mxu1 %v18719_v54  ;;  %7511 = vmatprep.subr.bf16.mxu0 %v18720_v42  ;;  %v18735_v54 = vld [vmem:[#allocation553_spill] sm:$0xff]  ;;  %v18736_v42 = vld [vmem:[#allocation554_spill] sm:$0xff] }
 0x688   :  { %7554 = vmatprep.subr.bf16.mxu1 %v18721_v36  ;;  %v18737_v36 = vld [vmem:[#allocation555_spill] sm:$0xff] }
 0x68a   :  { %7512 = vmatpush1.bf16.msra.mxu0 %v18722_v62  ;;  %v18738_v62 = vld [vmem:[#allocation556_spill] sm:$0xff] }
 0x68b   :  { %7555 = vmatpush1.bf16.msra.mxu1 %v18723_v43  ;;  %7513 = vmatprep.subr.bf16.mxu0 %v18724_v20  ;;  %v18739_v43 = vld [vmem:[#allocation557_spill] sm:$0xff]  ;;  %v18740_v20 = vld [vmem:[#allocation558_spill] sm:$0xff] }
 0x68c   :  { %7556 = vmatprep.subr.bf16.mxu1 %v18725_v31  ;;  %v18741_v31 = vld [vmem:[#allocation559_spill] sm:$0xff] }
 0x68e   :  { %7514 = vmatpush1.bf16.msra.mxu0 %v18726_v55  ;;  %v18742_v55 = vld [vmem:[#allocation560_spill] sm:$0xff] }
 0x68f   :  { %7557 = vmatpush1.bf16.msra.mxu1 %v18727_v4  ;;  %7515 = vmatprep.subr.bf16.mxu0 %v18728_v16  ;;  %v18743_v4 = vld [vmem:[#allocation561_spill] sm:$0xff]  ;;  %v18744_v16 = vld [vmem:[#allocation562_spill] sm:$0xff] }
 0x690   :  { %7558 = vmatprep.subr.bf16.mxu1 %v18729_v32  ;;  %v18745_v32 = vld [vmem:[#allocation563_spill] sm:$0xff] }
 0x692   :  { %7516 = vmatpush1.bf16.msra.mxu0 %v18730_v39  ;;  %v18746_v39 = vld [vmem:[#allocation564_spill] sm:$0xff] }
 0x693   :  { %7559 = vmatpush1.bf16.msra.mxu1 %v18731_v37  ;;  %7517 = vmatprep.subr.bf16.mxu0 %v18732_v49  ;;  %v18747_v37 = vld [vmem:[#allocation565_spill] sm:$0xff]  ;;  %v18748_v49 = vld [vmem:[#allocation566_spill] sm:$0xff] }
 0x694   :  { %7560 = vmatprep.subr.bf16.mxu1 %v18733_v35  ;;  %v18749_v35 = vld [vmem:[#allocation567_spill] sm:$0xff] }
 0x696   :  { %7518 = vmatpush1.bf16.msra.mxu0 %v18734_v33  ;;  %v18750_v33 = vld [vmem:[#allocation568_spill] sm:$0xff] }
 0x697   :  { %7561 = vmatpush1.bf16.msra.mxu1 %v18735_v54  ;;  %7519 = vmatprep.subr.bf16.mxu0 %v18736_v42  ;;  %v18751_v54 = vld [vmem:[#allocation569_spill] sm:$0xff]  ;;  %v18752_v42 = vld [vmem:[#allocation570_spill] sm:$0xff] }
 0x698   :  { %7562 = vmatprep.subr.bf16.mxu1 %v18737_v36  ;;  %v18753_v36 = vld [vmem:[#allocation571_spill] sm:$0xff] }
 0x69a   :  { %7520 = vmatpush2.bf16.msra.mxu0 %v18738_v62  ;;  %v18754_v62 = vld [vmem:[#allocation572_spill] sm:$0xff] }
 0x69b   :  { %7563 = vmatpush2.bf16.msra.mxu1 %v18739_v43  ;;  %7521 = vmatprep.subr.bf16.mxu0 %v18740_v20  ;;  %v16189_v43 = vpop.f32.mrf.mxu0  ;;  %v18755_v20 = vld [vmem:[#allocation573_spill] sm:$0xff] }
 0x69c   :  { %7564 = vmatprep.subr.bf16.mxu1 %v18741_v31  ;;  %v18756_v31 = vld [vmem:[#allocation574_spill] sm:$0xff] }
 0x69e   :  { %7522 = vmatpush2.bf16.msra.mxu0 %v18742_v55  ;;  %v16193_v55 = vpop.f32.mrf.mxu1 }
 0x69f   :  { %7565 = vmatpush2.bf16.msra.mxu1 %v18743_v4  ;;  %7523 = vmatprep.subr.bf16.mxu0 %v18744_v16  ;;  %v18757_v4 = vld [vmem:[#allocation575_spill] sm:$0xff]  ;;  %v18758_v16 = vld [vmem:[#allocation576_spill] sm:$0xff] }
 0x6a0   :  { %7566 = vmatprep.subr.bf16.mxu1 %v18745_v32  ;;  %v16197_v32 = vpop.f32.mrf.mxu0 }
 0x6a2   :  { %7524 = vmatpush2.bf16.msra.mxu0 %v18746_v39  ;;  %v18759_v39 = vld [vmem:[#allocation577_spill] sm:$0xff] }
 0x6a3   :  { %7567 = vmatpush2.bf16.msra.mxu1 %v18747_v37  ;;  %7525 = vmatprep.subr.bf16.mxu0 %v18748_v49  ;;  %v18760_v37 = vld [vmem:[#allocation578_spill] sm:$0xff]  ;;  %v16201_v49 = vpop.f32.mrf.mxu1 }
 0x6a4   :  { %7568 = vmatprep.subr.bf16.mxu1 %v18749_v35  ;;  %v18761_v35 = vld [vmem:[#allocation579_spill] sm:$0xff] }
 0x6a6   :  { %7526 = vmatpush2.bf16.msra.mxu0 %v18750_v33  ;;  %v18762_v33 = vld [vmem:[#allocation580_spill] sm:$0xff] }
 0x6a7   :  { %7569 = vmatpush2.bf16.msra.mxu1 %v18751_v54  ;;  %7527 = vmatprep.subr.bf16.mxu0 %v18752_v42  ;;  %v16205_v54 = vpop.f32.mrf.mxu0  ;;  %v18763_v42 = vld [vmem:[#allocation581_spill] sm:$0xff] }
 0x6a8   :  { %7570 = vmatprep.subr.bf16.mxu1 %v18753_v36  ;;  %v18764_v36 = vld [vmem:[#allocation582_spill] sm:$0xff] }
 0x6aa   :  { %7528 = vmatpush2.bf16.msra.mxu0 %v18754_v62  ;;  %v16209_v62 = vpop.f32.mrf.mxu1 }
 0x6ab   :  { %7571 = vmatpush2.bf16.msra.mxu1 %v18755_v20  ;;  %7529 = vmatprep.subr.bf16.mxu0 %v18756_v31  ;;  %v18765_v20 = vld [vmem:[#allocation583_spill] sm:$0xff]  ;;  %v18766_v31 = vld [vmem:[#allocation584_spill] sm:$0xff] }
 0x6ac   :  { %7572 = vmatprep.subr.bf16.mxu1 %v18757_v4  ;;  %v16213_v4 = vpop.f32.mrf.mxu0 }
 0x6ae   :  { %7530 = vmatpush2.bf16.msra.mxu0 %v18758_v16  ;;  %v18767_v16 = vld [vmem:[#allocation585_spill] sm:$0xff] }
 0x6af   :  { %7573 = vmatpush2.bf16.msra.mxu1 %v18759_v39  ;;  %7531 = vmatprep.subr.bf16.mxu0 %v18760_v37  ;;  %v16217_v39 = vrot.slane %v13151_v0, 1  ;;  %v18768_v37 = vld [vmem:[#allocation586_spill] sm:$0xff]  ;;  %v18770_v0 = vld [vmem:[#allocation588_spill] sm:$0xff] }
 0x6b0   :  { %7574 = vmatprep.subr.bf16.mxu1 %v18761_v35  ;;  %v16220_v35 = vpop.f32.mrf.mxu1 }
 0x6b2   :  { %7532 = vmatpush2.bf16.msra.mxu0 %v18762_v33  ;;  %v16223_v33 = vrot.slane %v13160_v53, 1 }
 0x6b3   :  { %7575 = vmatpush2.bf16.msra.mxu1 %v18763_v42  ;;  %7533 = vmatprep.subr.bf16.mxu0 %v18764_v36  ;;  %v18769_v42 = vld [vmem:[#allocation587_spill] sm:$0xff] }
 0x6b4   :  { %7576 = vmatprep.subr.bf16.mxu1 %v18765_v20 }
 0x6b6   :  { %7534 = vmatpush2.bf16.msra.mxu0 %v18766_v31 }
 0x6b7   :  { %7577 = vmatpush2.bf16.msra.mxu1 %v18767_v16  ;;  %7589 = vmatprep.subr.bf16.mxu0 %v18768_v37  ;;  %v18771_v16 = vld [vmem:[#allocation589_spill] sm:$0xff] }
 0x6b8   :  { %7632 = vmatprep.subr.bf16.mxu1 %v18769_v42 }
 0x6b9   :  { %v7279_v36 = vpop.f32.mrf.mxu0  ;;  %11354 = vmatmul.mubr.msk.bf16.vlgmr.msra.gmra.mxu0 %vm1127_vm3, %v16217_v39 }
 0x6ba   :  { %v7280_v20 = vadd.f32 %v7279_v36, %v15899_v6  ;;  %v7322_v31 = vpop.f32.mrf.mxu1  ;;  %11356 = vmatmul.mubr.msk.bf16.vlgmr.msra.gmra.mxu1 %vm1127_vm3, %v16223_v33  ;;  %7590 = vmatpush1.bf16.msra.mxu0 %v18770_v0  ;;  %v18772_v36 = vld [vmem:[#allocation590_spill] sm:$0xff] }
 0x6bb   :  { %11357 = vmatprep.mubr.msk.bf16.mxu0 %vm1127_vm3, %v16130_v38  ;;  %7633 = vmatpush1.bf16.msra.mxu1 %v18771_v16  ;;  %v7281_v53 = vpop.f32.mrf.mxu0  ;;  %v18775_v16 = vld [vmem:[#allocation593_spill] sm:$0xff] }
 0x6bc   :  { %v16235_v37 = vadd.f32 %v7322_v31, %v7280_v20  ;;  %11359 = vmatprep.mubr.msk.bf16.mxu1 %vm1127_vm3, %v16135_v58  ;;  %v7282_v42 = vadd.f32 %v7281_v53, %v15905_v41  ;;  %v7324_v6 = vpop.f32.mrf.mxu1  ;;  %7591 = vmatprep.subr.bf16.mxu0 %v18772_v36  ;;  %v18774_v20 = vld [vmem:[#allocation592_spill] sm:$0xff]  ;;  %v18776_v53 = vld [vmem:[#allocation594_spill] sm:$0xff] }
 0x6bd   :  { %v7283_v50 = vpop.f32.mrf.mxu0  ;;  %7634 = vmatprep.subr.bf16.mxu1 %v18773_v30 }
 0x6be   :  { %v16242_v0 = vadd.f32 %v7324_v6, %v7282_v42  ;;  %v7284_v5 = vadd.f32 %v7283_v50, %v15909_v59  ;;  %v7326_v44 = vpop.f32.mrf.mxu1  ;;  %7592 = vmatpush1.bf16.msra.mxu0 %v14889_v18  ;;  %v18777_v42 = vld [vmem:[#allocation595_spill] sm:$0xff]  ;;  %v18778_v50 = vld [vmem:[#allocation596_spill] sm:$0xff]  ;;  %v18779_v59 = vld [vmem:[#allocation597_spill] sm:$0xff] }
 0x6bf   :  { %7635 = vmatpush1.bf16.msra.mxu1 %v18774_v20  ;;  %v7285_v31 = vpop.f32.mrf.mxu0  ;;  %7593 = vmatprep.subr.bf16.mxu0 %v18775_v16  ;;  %v18780_v18 = vld [vmem:[#allocation598_spill] sm:$0xff]  ;;  %v18781_v6 = vld [vmem:[#allocation599_spill] sm:$0xff]  ;;  %v18782_v20 = vld [vmem:[#allocation600_spill] sm:$0xff] }
 0x6c0   :  { %v16248_v28 = vadd.f32 %v7326_v44, %v7284_v5  ;;  %v7286_v41 = vadd.f32 %v7285_v31, %v15914_v13  ;;  %7636 = vmatprep.subr.bf16.mxu1 %v18776_v53  ;;  %v7328_v36 = vpop.f32.mrf.mxu1  ;;  %v18783_v44 = vld [vmem:[#allocation601_spill] sm:$0xff]  ;;  %v18784_v5 = vld [vmem:[#allocation602_spill] sm:$0xff]  ;;  %v18785_v13 = vld [vmem:[#allocation603_spill] sm:$0xff] }
 0x6c1   :  { %v18786_v31 = vld [vmem:[#allocation604_spill] sm:$0xff]  ;;  %v18787_v16 = vld [vmem:[#allocation605_spill] sm:$0xff]  ;;  %v18789_v53 = vld [vmem:[#allocation607_spill] sm:$0xff] }
 0x6c2   :  { %v16252_v30 = vadd.f32 %v7328_v36, %v7286_v41  ;;  %7594 = vmatpush1.bf16.msra.mxu0 %v18777_v42  ;;  %v18788_v41 = vld [vmem:[#allocation606_spill] sm:$0xff]  ;;  %v18790_v36 = vld [vmem:[#allocation608_spill] sm:$0xff]  ;;  %v18791_v42 = vld [vmem:[#allocation609_spill] sm:$0xff] }
 0x6c3   :  { %7637 = vmatpush1.bf16.msra.mxu1 %v18778_v50  ;;  %7595 = vmatprep.subr.bf16.mxu0 %v18779_v59  ;;  %v18792_v50 = vld [vmem:[#allocation610_spill] sm:$0xff]  ;;  %v18793_v59 = vld [vmem:[#allocation611_spill] sm:$0xff] }
 0x6c4   :  { %7638 = vmatprep.subr.bf16.mxu1 %v18780_v18  ;;  %v18794_v18 = vld [vmem:[#allocation612_spill] sm:$0xff] }
 0x6c6   :  { %7596 = vmatpush1.bf16.msra.mxu0 %v18781_v6  ;;  %v18795_v6 = vld [vmem:[#allocation613_spill] sm:$0xff] }
 0x6c7   :  { %7639 = vmatpush1.bf16.msra.mxu1 %v18782_v20  ;;  %7597 = vmatprep.subr.bf16.mxu0 %v18783_v44  ;;  %v18796_v20 = vld [vmem:[#allocation614_spill] sm:$0xff]  ;;  %v18797_v44 = vld [vmem:[#allocation615_spill] sm:$0xff] }
 0x6c8   :  { %7640 = vmatprep.subr.bf16.mxu1 %v18784_v5  ;;  %v18798_v5 = vld [vmem:[#allocation616_spill] sm:$0xff] }
 0x6ca   :  { %7598 = vmatpush1.bf16.msra.mxu0 %v18785_v13  ;;  %v18799_v13 = vld [vmem:[#allocation617_spill] sm:$0xff] }
 0x6cb   :  { %7641 = vmatpush1.bf16.msra.mxu1 %v18786_v31  ;;  %7599 = vmatprep.subr.bf16.mxu0 %v18787_v16  ;;  %v18800_v31 = vld [vmem:[#allocation618_spill] sm:$0xff]  ;;  %v18801_v16 = vld [vmem:[#allocation619_spill] sm:$0xff] }
 0x6cc   :  { %7642 = vmatprep.subr.bf16.mxu1 %v18788_v41  ;;  %v18802_v41 = vld [vmem:[#allocation620_spill] sm:$0xff] }
 0x6ce   :  { %7600 = vmatpush1.bf16.msra.mxu0 %v18789_v53  ;;  %v18803_v53 = vld [vmem:[#allocation621_spill] sm:$0xff] }
 0x6cf   :  { %7643 = vmatpush1.bf16.msra.mxu1 %v18790_v36  ;;  %7601 = vmatprep.subr.bf16.mxu0 %v18791_v42  ;;  %v18804_v36 = vld [vmem:[#allocation622_spill] sm:$0xff]  ;;  %v18805_v42 = vld [vmem:[#allocation623_spill] sm:$0xff] }
 0x6d0   :  { %7644 = vmatprep.subr.bf16.mxu1 %v18792_v50  ;;  %v18806_v50 = vld [vmem:[#allocation624_spill] sm:$0xff] }
 0x6d2   :  { %7602 = vmatpush1.bf16.msra.mxu0 %v18793_v59  ;;  %v18807_v59 = vld [vmem:[#allocation625_spill] sm:$0xff] }
 0x6d3   :  { %7645 = vmatpush1.bf16.msra.mxu1 %v18794_v18  ;;  %7603 = vmatprep.subr.bf16.mxu0 %v18795_v6  ;;  %v18808_v18 = vld [vmem:[#allocation626_spill] sm:$0xff]  ;;  %v18809_v6 = vld [vmem:[#allocation627_spill] sm:$0xff] }
 0x6d4   :  { %7646 = vmatprep.subr.bf16.mxu1 %v18796_v20  ;;  %v18810_v20 = vld [vmem:[#allocation628_spill] sm:$0xff] }
 0x6d6   :  { %7604 = vmatpush1.bf16.msra.mxu0 %v18797_v44  ;;  %v18811_v44 = vld [vmem:[#allocation629_spill] sm:$0xff] }
 0x6d7   :  { %7647 = vmatpush1.bf16.msra.mxu1 %v18798_v5  ;;  %7605 = vmatprep.subr.bf16.mxu0 %v18799_v13  ;;  %v18812_v5 = vld [vmem:[#allocation630_spill] sm:$0xff]  ;;  %v18813_v13 = vld [vmem:[#allocation631_spill] sm:$0xff] }
 0x6d8   :  { %7648 = vmatprep.subr.bf16.mxu1 %v18800_v31  ;;  %v18814_v31 = vld [vmem:[#allocation632_spill] sm:$0xff] }
 0x6da   :  { %7606 = vmatpush2.bf16.msra.mxu0 %v18801_v16  ;;  %v18815_v16 = vld [vmem:[#allocation633_spill] sm:$0xff] }
 0x6db   :  { %7649 = vmatpush2.bf16.msra.mxu1 %v18802_v41  ;;  %7607 = vmatprep.subr.bf16.mxu0 %v18803_v53  ;;  %v18816_v41 = vld [vmem:[#allocation634_spill] sm:$0xff]  ;;  %v18817_v53 = vld [vmem:[#allocation635_spill] sm:$0xff] }
 0x6dc   :  { %7650 = vmatprep.subr.bf16.mxu1 %v18804_v36  ;;  %v18818_v36 = vld [vmem:[#allocation636_spill] sm:$0xff] }
 0x6de   :  { %7608 = vmatpush2.bf16.msra.mxu0 %v18805_v42  ;;  %v18819_v42 = vld [vmem:[#allocation637_spill] sm:$0xff] }
 0x6df   :  { %7651 = vmatpush2.bf16.msra.mxu1 %v18806_v50  ;;  %7609 = vmatprep.subr.bf16.mxu0 %v18807_v59  ;;  %v18820_v50 = vld [vmem:[#allocation638_spill] sm:$0xff]  ;;  %v18821_v59 = vld [vmem:[#allocation639_spill] sm:$0xff] }
 0x6e0   :  { %7652 = vmatprep.subr.bf16.mxu1 %v18808_v18  ;;  %v18822_v18 = vld [vmem:[#allocation640_spill] sm:$0xff] }
 0x6e2   :  { %7610 = vmatpush2.bf16.msra.mxu0 %v18809_v6  ;;  %v18823_v6 = vld [vmem:[#allocation641_spill] sm:$0xff] }
 0x6e3   :  { %7653 = vmatpush2.bf16.msra.mxu1 %v18810_v20  ;;  %7611 = vmatprep.subr.bf16.mxu0 %v18811_v44  ;;  %v18824_v20 = vld [vmem:[#allocation642_spill] sm:$0xff]  ;;  %v18825_v44 = vld [vmem:[#allocation643_spill] sm:$0xff] }
 0x6e4   :  { %7654 = vmatprep.subr.bf16.mxu1 %v18812_v5  ;;  %v18826_v5 = vld [vmem:[#allocation644_spill] sm:$0xff] }
 0x6e6   :  { %7612 = vmatpush2.bf16.msra.mxu0 %v18813_v13  ;;  %v18827_v13 = vld [vmem:[#allocation645_spill] sm:$0xff] }
 0x6e7   :  { %7655 = vmatpush2.bf16.msra.mxu1 %v18814_v31  ;;  %7613 = vmatprep.subr.bf16.mxu0 %v18815_v16  ;;  %v18828_v31 = vld [vmem:[#allocation646_spill] sm:$0xff]  ;;  %v18829_v16 = vld [vmem:[#allocation647_spill] sm:$0xff] }
 0x6e8   :  { %7656 = vmatprep.subr.bf16.mxu1 %v18816_v41  ;;  %v18830_v41 = vld [vmem:[#allocation648_spill] sm:$0xff] }
 0x6ea   :  { %7614 = vmatpush2.bf16.msra.mxu0 %v18817_v53  ;;  %v18831_v53 = vld [vmem:[#allocation649_spill] sm:$0xff] }
 0x6eb   :  { %7657 = vmatpush2.bf16.msra.mxu1 %v18818_v36  ;;  %7615 = vmatprep.subr.bf16.mxu0 %v18819_v42  ;;  %v18832_v36 = vld [vmem:[#allocation650_spill] sm:$0xff]  ;;  %v18833_v42 = vld [vmem:[#allocation651_spill] sm:$0xff] }
 0x6ec   :  { %7658 = vmatprep.subr.bf16.mxu1 %v18820_v50  ;;  %v18834_v50 = vld [vmem:[#allocation652_spill] sm:$0xff] }
 0x6ee   :  { %7616 = vmatpush2.bf16.msra.mxu0 %v18821_v59  ;;  %v18835_v59 = vld [vmem:[#allocation653_spill] sm:$0xff] }
 0x6ef   :  { %7659 = vmatpush2.bf16.msra.mxu1 %v18822_v18  ;;  %7617 = vmatprep.subr.bf16.mxu0 %v18823_v6  ;;  %v18836_v18 = vld [vmem:[#allocation654_spill] sm:$0xff]  ;;  %v18837_v6 = vld [vmem:[#allocation655_spill] sm:$0xff] }
 0x6f0   :  { %7660 = vmatprep.subr.bf16.mxu1 %v18824_v20  ;;  %v18838_v20 = vld [vmem:[#allocation656_spill] sm:$0xff] }
 0x6f2   :  { %7618 = vmatpush2.bf16.msra.mxu0 %v18825_v44  ;;  %v18839_v44 = vld [vmem:[#allocation657_spill] sm:$0xff] }
 0x6f3   :  { %7661 = vmatpush2.bf16.msra.mxu1 %v18826_v5  ;;  %7619 = vmatprep.subr.bf16.mxu0 %v18827_v13  ;;  %v18840_v5 = vld [vmem:[#allocation658_spill] sm:$0xff]  ;;  %v18841_v13 = vld [vmem:[#allocation659_spill] sm:$0xff] }
 0x6f4   :  { %7662 = vmatprep.subr.bf16.mxu1 %v18828_v31  ;;  %v18842_v31 = vld [vmem:[#allocation660_spill] sm:$0xff] }
 0x6f6   :  { %7620 = vmatpush2.bf16.msra.mxu0 %v18829_v16  ;;  %v18843_v16 = vld [vmem:[#allocation661_spill] sm:$0xff] }
 0x6f7   :  { %7663 = vmatpush2.bf16.msra.mxu1 %v18830_v41  ;;  %7675 = vmatprep.subr.bf16.mxu0 %v18831_v53  ;;  %v18844_v41 = vld [vmem:[#allocation662_spill] sm:$0xff]  ;;  %v18845_v53 = vld [vmem:[#allocation663_spill] sm:$0xff] }
 0x6f8   :  { %7718 = vmatprep.subr.bf16.mxu1 %v18832_v36  ;;  %v18846_v36 = vld [vmem:[#allocation664_spill] sm:$0xff] }
 0x6f9   :  { %11358 = vmatmul.mubr.msk.bf16.vlgmr.msra.gmra.mxu0 %vm1127_vm3, %v16217_v39 }
 0x6fa   :  { %11360 = vmatmul.mubr.msk.bf16.vlgmr.msra.gmra.mxu1 %vm1127_vm3, %v16223_v33  ;;  %7676 = vmatpush1.bf16.msra.mxu0 %v18833_v42  ;;  %v18848_v42 = vld [vmem:[#allocation666_spill] sm:$0xff] }
 0x6fb   :  { %11361 = vmatprep.mubr.msk.bf16.mxu0 %vm1127_vm3, %v16130_v38  ;;  %7719 = vmatpush1.bf16.msra.mxu1 %v18834_v50  ;;  %v18849_v50 = vld [vmem:[#allocation667_spill] sm:$0xff] }
 0x6fc   :  { %11363 = vmatprep.mubr.msk.bf16.mxu1 %vm1127_vm3, %v16135_v58  ;;  %7677 = vmatprep.subr.bf16.mxu0 %v18835_v59  ;;  %v18850_v59 = vld [vmem:[#allocation668_spill] sm:$0xff] }
 0x6fd   :  { %7720 = vmatprep.subr.bf16.mxu1 %v18836_v18  ;;  %v18851_v18 = vld [vmem:[#allocation669_spill] sm:$0xff] }
 0x6fe   :  { %7678 = vmatpush1.bf16.msra.mxu0 %v15098_v7  ;;  %v18847_v7 = vld [vmem:[#allocation665_spill] sm:$0xff] }
 0x6ff   :  { %7721 = vmatpush1.bf16.msra.mxu1 %v18837_v6  ;;  %7679 = vmatprep.subr.bf16.mxu0 %v18838_v20  ;;  %v18852_v6 = vld [vmem:[#allocation670_spill] sm:$0xff]  ;;  %v18853_v20 = vld [vmem:[#allocation671_spill] sm:$0xff] }
 0x700   :  { %7722 = vmatprep.subr.bf16.mxu1 %v18839_v44  ;;  %v18854_v44 = vld [vmem:[#allocation672_spill] sm:$0xff] }
 0x702   :  { %7680 = vmatpush1.bf16.msra.mxu0 %v18840_v5  ;;  %v18855_v5 = vld [vmem:[#allocation673_spill] sm:$0xff] }
 0x703   :  { %7723 = vmatpush1.bf16.msra.mxu1 %v18841_v13  ;;  %7681 = vmatprep.subr.bf16.mxu0 %v18842_v31  ;;  %v18856_v13 = vld [vmem:[#allocation674_spill] sm:$0xff]  ;;  %v18857_v31 = vld [vmem:[#allocation675_spill] sm:$0xff] }
 0x704   :  { %7724 = vmatprep.subr.bf16.mxu1 %v18843_v16  ;;  %v18858_v16 = vld [vmem:[#allocation676_spill] sm:$0xff] }
 0x706   :  { %7682 = vmatpush1.bf16.msra.mxu0 %v18844_v41  ;;  %v18859_v41 = vld [vmem:[#allocation677_spill] sm:$0xff] }
 0x707   :  { %7725 = vmatpush1.bf16.msra.mxu1 %v18845_v53  ;;  %7683 = vmatprep.subr.bf16.mxu0 %v18846_v36  ;;  %v18860_v53 = vld [vmem:[#allocation678_spill] sm:$0xff]  ;;  %v18861_v36 = vld [vmem:[#allocation679_spill] sm:$0xff] }
 0x708   :  { %7726 = vmatprep.subr.bf16.mxu1 %v18847_v7  ;;  %v18862_v7 = vld [vmem:[#allocation680_spill] sm:$0xff] }
 0x70a   :  { %7684 = vmatpush1.bf16.msra.mxu0 %v18848_v42  ;;  %v18863_v42 = vld [vmem:[#allocation681_spill] sm:$0xff] }
 0x70b   :  { %7727 = vmatpush1.bf16.msra.mxu1 %v18849_v50  ;;  %7685 = vmatprep.subr.bf16.mxu0 %v18850_v59  ;;  %v18864_v50 = vld [vmem:[#allocation682_spill] sm:$0xff]  ;;  %v18865_v59 = vld [vmem:[#allocation683_spill] sm:$0xff] }
 0x70c   :  { %7728 = vmatprep.subr.bf16.mxu1 %v18851_v18  ;;  %v18866_v18 = vld [vmem:[#allocation684_spill] sm:$0xff] }
 0x70e   :  { %7686 = vmatpush1.bf16.msra.mxu0 %v18852_v6  ;;  %v18867_v6 = vld [vmem:[#allocation685_spill] sm:$0xff] }
 0x70f   :  { %7729 = vmatpush1.bf16.msra.mxu1 %v18853_v20  ;;  %7687 = vmatprep.subr.bf16.mxu0 %v18854_v44  ;;  %v18868_v20 = vld [vmem:[#allocation686_spill] sm:$0xff]  ;;  %v18869_v44 = vld [vmem:[#allocation687_spill] sm:$0xff] }
 0x710   :  { %7730 = vmatprep.subr.bf16.mxu1 %v18855_v5  ;;  %v18870_v5 = vld [vmem:[#allocation688_spill] sm:$0xff] }
 0x712   :  { %7688 = vmatpush1.bf16.msra.mxu0 %v18856_v13  ;;  %v18871_v13 = vld [vmem:[#allocation689_spill] sm:$0xff] }
 0x713   :  { %7731 = vmatpush1.bf16.msra.mxu1 %v18857_v31  ;;  %7689 = vmatprep.subr.bf16.mxu0 %v18858_v16  ;;  %v18872_v31 = vld [vmem:[#allocation690_spill] sm:$0xff]  ;;  %v18873_v16 = vld [vmem:[#allocation691_spill] sm:$0xff] }
 0x714   :  { %7732 = vmatprep.subr.bf16.mxu1 %v18859_v41  ;;  %v18874_v41 = vld [vmem:[#allocation692_spill] sm:$0xff] }
 0x716   :  { %7690 = vmatpush1.bf16.msra.mxu0 %v18860_v53  ;;  %v18875_v53 = vld [vmem:[#allocation693_spill] sm:$0xff] }
 0x717   :  { %7733 = vmatpush1.bf16.msra.mxu1 %v18861_v36  ;;  %7691 = vmatprep.subr.bf16.mxu0 %v18862_v7  ;;  %v18876_v36 = vld [vmem:[#allocation694_spill] sm:$0xff]  ;;  %v18877_v7 = vld [vmem:[#allocation695_spill] sm:$0xff] }
 0x718   :  { %7734 = vmatprep.subr.bf16.mxu1 %v18863_v42  ;;  %v18878_v42 = vld [vmem:[#allocation696_spill] sm:$0xff] }
 0x71a   :  { %7692 = vmatpush2.bf16.msra.mxu0 %v18864_v50  ;;  %v18879_v50 = vld [vmem:[#allocation697_spill] sm:$0xff] }
 0x71b   :  { %7735 = vmatpush2.bf16.msra.mxu1 %v18865_v59  ;;  %7693 = vmatprep.subr.bf16.mxu0 %v18866_v18  ;;  %v18880_v59 = vld [vmem:[#allocation698_spill] sm:$0xff]  ;;  %v16367_v18 = vpop.f32.mrf.mxu0 }
 0x71c   :  { %7736 = vmatprep.subr.bf16.mxu1 %v18867_v6  ;;  %v18881_v6 = vld [vmem:[#allocation699_spill] sm:$0xff] }
 0x71e   :  { %7694 = vmatpush2.bf16.msra.mxu0 %v18868_v20  ;;  %v18882_v20 = vld [vmem:[#allocation700_spill] sm:$0xff] }
 0x71f   :  { %7737 = vmatpush2.bf16.msra.mxu1 %v18869_v44  ;;  %7695 = vmatprep.subr.bf16.mxu0 %v18870_v5  ;;  %v16371_v44 = vpop.f32.mrf.mxu1  ;;  %v18883_v5 = vld [vmem:[#allocation701_spill] sm:$0xff] }
 0x720   :  { %7738 = vmatprep.subr.bf16.mxu1 %v18871_v13  ;;  %v18884_v13 = vld [vmem:[#allocation702_spill] sm:$0xff] }
 0x722   :  { %7696 = vmatpush2.bf16.msra.mxu0 %v18872_v31  ;;  %v16375_v31 = vpop.f32.mrf.mxu0 }
 0x723   :  { %7739 = vmatpush2.bf16.msra.mxu1 %v18873_v16  ;;  %7697 = vmatprep.subr.bf16.mxu0 %v18874_v41  ;;  %v18885_v16 = vld [vmem:[#allocation703_spill] sm:$0xff]  ;;  %v18886_v41 = vld [vmem:[#allocation704_spill] sm:$0xff] }
 0x724   :  { %7740 = vmatprep.subr.bf16.mxu1 %v18875_v53  ;;  %v16379_v53 = vpop.f32.mrf.mxu1 }
 0x726   :  { %7698 = vmatpush2.bf16.msra.mxu0 %v18876_v36  ;;  %v18887_v36 = vld [vmem:[#allocation705_spill] sm:$0xff] }
 0x727   :  { %7741 = vmatpush2.bf16.msra.mxu1 %v18877_v7  ;;  %7699 = vmatprep.subr.bf16.mxu0 %v18878_v42  ;;  %v18888_v7 = vld [vmem:[#allocation706_spill] sm:$0xff]  ;;  %v16383_v42 = vpop.f32.mrf.mxu0 }
 0x728   :  { %7742 = vmatprep.subr.bf16.mxu1 %v18879_v50  ;;  %v18889_v50 = vld [vmem:[#allocation707_spill] sm:$0xff] }
 0x72a   :  { %7700 = vmatpush2.bf16.msra.mxu0 %v18880_v59  ;;  %v18890_v59 = vld [vmem:[#allocation708_spill] sm:$0xff] }
 0x72b   :  { %7743 = vmatpush2.bf16.msra.mxu1 %v18881_v6  ;;  %7701 = vmatprep.subr.bf16.mxu0 %v18882_v20  ;;  %v16387_v6 = vpop.f32.mrf.mxu1  ;;  %v18891_v20 = vld [vmem:[#allocation709_spill] sm:$0xff] }
 0x72c   :  { %7744 = vmatprep.subr.bf16.mxu1 %v18883_v5  ;;  %v18892_v5 = vld [vmem:[#allocation710_spill] sm:$0xff] }
 0x72e   :  { %7702 = vmatpush2.bf16.msra.mxu0 %v18884_v13  ;;  %v16391_v13 = vpop.f32.mrf.mxu0 }
 0x72f   :  { %7745 = vmatpush2.bf16.msra.mxu1 %v18885_v16  ;;  %7703 = vmatprep.subr.bf16.mxu0 %v18886_v41  ;;  %v18893_v16 = vld [vmem:[#allocation711_spill] sm:$0xff]  ;;  %v18894_v41 = vld [vmem:[#allocation712_spill] sm:$0xff] }
 0x730   :  { %7746 = vmatprep.subr.bf16.mxu1 %v18887_v36  ;;  %v16395_v36 = vpop.f32.mrf.mxu1 }
 0x731   :  { %18895 = vst [vmem:[#allocation32_spill] sm:$0xff] %v16395_v36  ;;  %v18900_v36 = vld [vmem:[#allocation717_spill] sm:$0xff] }
 0x732   :  { %7704 = vmatpush2.bf16.msra.mxu0 %v18888_v7  ;;  %v18896_v7 = vld [vmem:[#allocation713_spill] sm:$0xff] }
 0x733   :  { %7747 = vmatpush2.bf16.msra.mxu1 %v18889_v50  ;;  %7705 = vmatprep.subr.bf16.mxu0 %v18890_v59 }
 0x734   :  { %7748 = vmatprep.subr.bf16.mxu1 %v18891_v20  ;;  %v18897_v20 = vld [vmem:[#allocation714_spill] sm:$0xff] }
 0x736   :  { %7706 = vmatpush2.bf16.msra.mxu0 %v18892_v5  ;;  %v18898_v5 = vld [vmem:[#allocation715_spill] sm:$0xff] }
 0x737   :  { %7749 = vmatpush2.bf16.msra.mxu1 %v18893_v16  ;;  %7761 = vmatprep.subr.bf16.mxu0 %v18894_v41 }
 0x738   :  { %7804 = vmatprep.subr.bf16.mxu1 %v18896_v7 }
 0x739   :  { %v7451_v1 = vpop.f32.mrf.mxu0  ;;  %11362 = vmatmul.mubr.msk.bf16.vlgmr.msra.gmra.mxu0 %vm1127_vm3, %v16217_v39 }
 0x73a   :  { %v7452_v50 = vadd.f32 %v7451_v1, %v16055_v17  ;;  %v7494_v59 = vpop.f32.mrf.mxu1  ;;  %11364 = vmatmul.mubr.msk.bf16.vlgmr.msra.gmra.mxu1 %vm1127_vm3, %v16223_v33  ;;  %7762 = vmatpush1.bf16.msra.mxu0 %v18897_v20  ;;  %v18899_v17 = vld [vmem:[#allocation716_spill] sm:$0xff] }
 0x73b   :  { %11365 = vmatprep.mubr.msk.bf16.mxu0 %vm1127_vm3, %v16130_v38  ;;  %7805 = vmatpush1.bf16.msra.mxu1 %v18898_v5  ;;  %v7453_v16 = vpop.f32.mrf.mxu0  ;;  %v18901_v5 = vld [vmem:[#allocation718_spill] sm:$0xff] }
 0x73c   :  { %v16407_v41 = vadd.f32 %v7494_v59, %v7452_v50  ;;  %11367 = vmatprep.mubr.msk.bf16.mxu1 %vm1127_vm3, %v16135_v58  ;;  %v7454_v7 = vadd.f32 %v7453_v16, %v16061_v2  ;;  %v7496_v1 = vpop.f32.mrf.mxu1  ;;  %7763 = vmatprep.subr.bf16.mxu0 %v18899_v17  ;;  %v18910_v16 = vld [vmem:[#allocation727_spill] sm:$0xff]  ;;  %v18913_v17 = vld [vmem:[#allocation730_spill] sm:$0xff] }
 0x73d   :  { %v7455_v9 = vpop.f32.mrf.mxu0  ;;  %7806 = vmatprep.subr.bf16.mxu1 %v18900_v36 }
 0x73e   :  { %v16414_v20 = vadd.f32 %v7496_v1, %v7454_v7  ;;  %v7456_v38 = vadd.f32 %v7455_v9, %v16065_v23  ;;  %v7498_v45 = vpop.f32.mrf.mxu1  ;;  %7764 = vmatpush1.bf16.msra.mxu0 %v15307_v25  ;;  %v18902_v9 = vld [vmem:[#allocation719_spill] sm:$0xff]  ;;  %v18903_v23 = vld [vmem:[#allocation720_spill] sm:$0xff]  ;;  %v18904_v25 = vld [vmem:[#allocation721_spill] sm:$0xff] }
 0x73f   :  { %7807 = vmatpush1.bf16.msra.mxu1 %v15311_v22  ;;  %v7457_v50 = vpop.f32.mrf.mxu0  ;;  %7765 = vmatprep.subr.bf16.mxu0 %v15313_v27  ;;  %v18905_v22 = vld [vmem:[#allocation722_spill] sm:$0xff]  ;;  %v18906_v27 = vld [vmem:[#allocation723_spill] sm:$0xff]  ;;  %v18911_v7 = vld [vmem:[#allocation728_spill] sm:$0xff] }
 0x740   :  { %v16420_v58 = vadd.f32 %v7498_v45, %v7456_v38  ;;  %v7458_v2 = vadd.f32 %v7457_v50, %v16070_v52  ;;  %7808 = vmatprep.subr.bf16.mxu1 %v15320_v15  ;;  %v7500_v59 = vpop.f32.mrf.mxu1  ;;  %v18907_v45 = vld [vmem:[#allocation724_spill] sm:$0xff]  ;;  %v18908_v52 = vld [vmem:[#allocation725_spill] sm:$0xff]  ;;  %v18909_v15 = vld [vmem:[#allocation726_spill] sm:$0xff] }
 0x741   :  { %v18912_v1 = vld [vmem:[#allocation729_spill] sm:$0xff]  ;;  %v18914_v38 = vld [vmem:[#allocation731_spill] sm:$0xff]  ;;  %v18915_v50 = vld [vmem:[#allocation732_spill] sm:$0xff] }
 0x742   :  { %v16424_v36 = vadd.f32 %v7500_v59, %v7458_v2  ;;  %7766 = vmatpush1.bf16.msra.mxu0 %v18901_v5  ;;  %v18916_v2 = vld [vmem:[#allocation733_spill] sm:$0xff]  ;;  %v18917_v59 = vld [vmem:[#allocation734_spill] sm:$0xff]  ;;  %v18918_v5 = vld [vmem:[#allocation735_spill] sm:$0xff] }
 0x743   :  { %7809 = vmatpush1.bf16.msra.mxu1 %v18902_v9  ;;  %7767 = vmatprep.subr.bf16.mxu0 %v18903_v23  ;;  %v18919_v9 = vld [vmem:[#allocation736_spill] sm:$0xff]  ;;  %v18920_v23 = vld [vmem:[#allocation737_spill] sm:$0xff] }
 0x744   :  { %7810 = vmatprep.subr.bf16.mxu1 %v18904_v25  ;;  %v18921_v25 = vld [vmem:[#allocation738_spill] sm:$0xff] }
 0x746   :  { %7768 = vmatpush1.bf16.msra.mxu0 %v18905_v22  ;;  %v18922_v22 = vld [vmem:[#allocation739_spill] sm:$0xff] }
 0x747   :  { %7811 = vmatpush1.bf16.msra.mxu1 %v18906_v27  ;;  %7769 = vmatprep.subr.bf16.mxu0 %v18907_v45  ;;  %v18923_v27 = vld [vmem:[#allocation740_spill] sm:$0xff]  ;;  %v18924_v45 = vld [vmem:[#allocation741_spill] sm:$0xff] }
 0x748   :  { %7812 = vmatprep.subr.bf16.mxu1 %v18908_v52  ;;  %v18925_v52 = vld [vmem:[#allocation742_spill] sm:$0xff] }
 0x74a   :  { %7770 = vmatpush1.bf16.msra.mxu0 %v18909_v15  ;;  %v18926_v15 = vld [vmem:[#allocation743_spill] sm:$0xff] }
 0x74b   :  { %7813 = vmatpush1.bf16.msra.mxu1 %v18910_v16  ;;  %7771 = vmatprep.subr.bf16.mxu0 %v18911_v7  ;;  %v18927_v16 = vld [vmem:[#allocation744_spill] sm:$0xff]  ;;  %v18928_v7 = vld [vmem:[#allocation745_spill] sm:$0xff] }
 0x74c   :  { %7814 = vmatprep.subr.bf16.mxu1 %v18912_v1  ;;  %v18929_v1 = vld [vmem:[#allocation746_spill] sm:$0xff] }
 0x74e   :  { %7772 = vmatpush1.bf16.msra.mxu0 %v18913_v17  ;;  %v18930_v17 = vld [vmem:[#allocation747_spill] sm:$0xff] }
 0x74f   :  { %7815 = vmatpush1.bf16.msra.mxu1 %v18914_v38  ;;  %7773 = vmatprep.subr.bf16.mxu0 %v18915_v50  ;;  %v18931_v38 = vld [vmem:[#allocation748_spill] sm:$0xff]  ;;  %v18932_v50 = vld [vmem:[#allocation749_spill] sm:$0xff] }
 0x750   :  { %7816 = vmatprep.subr.bf16.mxu1 %v18916_v2  ;;  %v18933_v2 = vld [vmem:[#allocation750_spill] sm:$0xff] }
 0x752   :  { %7774 = vmatpush1.bf16.msra.mxu0 %v18917_v59  ;;  %v18934_v59 = vld [vmem:[#allocation751_spill] sm:$0xff] }
 0x753   :  { %7817 = vmatpush1.bf16.msra.mxu1 %v18918_v5  ;;  %7775 = vmatprep.subr.bf16.mxu0 %v18919_v9  ;;  %v18935_v5 = vld [vmem:[#allocation752_spill] sm:$0xff]  ;;  %v18936_v9 = vld [vmem:[#allocation753_spill] sm:$0xff] }
 0x754   :  { %7818 = vmatprep.subr.bf16.mxu1 %v18920_v23  ;;  %v18937_v23 = vld [vmem:[#allocation754_spill] sm:$0xff] }
 0x756   :  { %7776 = vmatpush1.bf16.msra.mxu0 %v18921_v25  ;;  %v18938_v25 = vld [vmem:[#allocation755_spill] sm:$0xff] }
 0x757   :  { %7819 = vmatpush1.bf16.msra.mxu1 %v18922_v22  ;;  %7777 = vmatprep.subr.bf16.mxu0 %v18923_v27  ;;  %v18939_v22 = vld [vmem:[#allocation756_spill] sm:$0xff]  ;;  %v18940_v27 = vld [vmem:[#allocation757_spill] sm:$0xff] }
 0x758   :  { %7820 = vmatprep.subr.bf16.mxu1 %v18924_v45  ;;  %v18941_v45 = vld [vmem:[#allocation758_spill] sm:$0xff] }
 0x75a   :  { %7778 = vmatpush2.bf16.msra.mxu0 %v18925_v52  ;;  %v18942_v52 = vld [vmem:[#allocation759_spill] sm:$0xff] }
 0x75b   :  { %7821 = vmatpush2.bf16.msra.mxu1 %v18926_v15  ;;  %7779 = vmatprep.subr.bf16.mxu0 %v18927_v16  ;;  %v18943_v15 = vld [vmem:[#allocation760_spill] sm:$0xff]  ;;  %v18944_v16 = vld [vmem:[#allocation761_spill] sm:$0xff] }
 0x75c   :  { %7822 = vmatprep.subr.bf16.mxu1 %v18928_v7  ;;  %v18945_v7 = vld [vmem:[#allocation762_spill] sm:$0xff] }
 0x75e   :  { %7780 = vmatpush2.bf16.msra.mxu0 %v18929_v1  ;;  %v18946_v1 = vld [vmem:[#allocation763_spill] sm:$0xff] }
 0x75f   :  { %7823 = vmatpush2.bf16.msra.mxu1 %v18930_v17  ;;  %7781 = vmatprep.subr.bf16.mxu0 %v18931_v38  ;;  %v18947_v17 = vld [vmem:[#allocation764_spill] sm:$0xff]  ;;  %v11961_v38 = vld [vmem:[#allocation10 + $0x138] sm:$0xff]  }
 0x760   :  { %7824 = vmatprep.subr.bf16.mxu1 %v18932_v50  ;;  %v18950_v50 = vld [vmem:[#allocation767_spill] sm:$0xff] }
 0x762   :  { %7782 = vmatpush2.bf16.msra.mxu0 %v18933_v2  ;;  %v11962_v2 = vld [vmem:[#allocation10 + $0x170] sm:$0xff]  }
 0x763   :  { %7825 = vmatpush2.bf16.msra.mxu1 %v18934_v59  ;;  %7783 = vmatprep.subr.bf16.mxu0 %v18935_v5  ;;  %v7196_v59 = vadd.f32 %v16197_v32, %v15829_v11 }
 0x764   :  { %7826 = vmatprep.subr.bf16.mxu1 %v18936_v9 }
 0x765   :  { %v7239_v32 = vadd.f32 %v16201_v49, %v7196_v59  ;;  %v11971_v59 = vld [vmem:[#allocation10 + $0x110] sm:$0xff]  }
 0x766   :  { %7784 = vmatpush2.bf16.msra.mxu0 %v18937_v23  ;;  %v11963_v23 = vld [vmem:[#allocation10 + $0x130] sm:$0xff]  }
 0x767   :  { %7827 = vmatpush2.bf16.msra.mxu1 %v18938_v25  ;;  %7785 = vmatprep.subr.bf16.mxu0 %v18939_v22 }
 0x768   :  { %7828 = vmatprep.subr.bf16.mxu1 %v18940_v27  ;;  %v11964_v27 = vld [vmem:[#allocation10 + $0x168] sm:$0xff]  }
 0x76a   :  { %7786 = vmatpush2.bf16.msra.mxu0 %v15453_v8  ;;  %v11960_v8 = vld [vmem:[#allocation10 + $0x178] sm:$0xff]  }
 0x76b   :  { %7829 = vmatpush2.bf16.msra.mxu1 %v15457_v26  ;;  %7787 = vmatprep.subr.bf16.mxu0 %v15459_v10  ;;  %v18948_v26 = vld [vmem:[#allocation765_spill] sm:$0xff]  ;;  %v18949_v10 = vld [vmem:[#allocation766_spill] sm:$0xff] }
 0x76c   :  { %7830 = vmatprep.subr.bf16.mxu1 %v18941_v45 }
 0x76e   :  { %7788 = vmatpush2.bf16.msra.mxu0 %v15465_v14  ;;  %v7194_v14 = vadd.f32 %v16189_v43, %v15823_v56  ;;  %v7198_v56 = vadd.f32 %v16205_v54, %v15833_v51 }
 0x76f   :  { %7831 = vmatpush2.bf16.msra.mxu1 %v18942_v52  ;;  %7789 = vmatprep.subr.bf16.mxu0 %v18943_v15 }
 0x770   :  { %7832 = vmatprep.subr.bf16.mxu1 %v18944_v16  ;;  %v7237_v25 = vadd.f32 %v16193_v55, %v7194_v14  ;;  %v7241_v55 = vadd.f32 %v16209_v62, %v7198_v56  ;;  %v11967_v14 = vld [vmem:[#allocation10 + $0x120] sm:$0xff]   ;;  %v11976_v56 = vld [vmem:[#allocation10 + $0x78] sm:$0xff]  }
 0x772   :  { %7790 = vmatpush2.bf16.msra.mxu0 %v18945_v7 }
 0x773   :  { %7833 = vmatpush2.bf16.msra.mxu1 %v18946_v1  ;;  %7791 = vmatprep.subr.bf16.mxu0 %v18947_v17 }
 0x774   :  { %7834 = vmatprep.subr.bf16.mxu1 %v18948_v26 }
 0x776   :  { %7792 = vmatpush2.bf16.msra.mxu0 %v18949_v10  ;;  %v11965_v10 = vld [vmem:[#allocation10 + $0x128] sm:$0xff]  }
 0x777   :  { %7835 = vmatpush2.bf16.msra.mxu1 %v18950_v50  ;;  %11603 = vmatprep.subr.bf16.mxu0 %v11960_v8  ;;  %v11969_v50 = vld [vmem:[#allocation10 + $0x118] sm:$0xff]  }
 0x779   :  { %v7537_v5 = vpop.f32.mrf.mxu0  ;;  %11366 = vmatmul.mubr.msk.bf16.vlgmr.msra.gmra.mxu0 %vm1127_vm3, %v16217_v39  ;;  %v7200_v39 = vadd.f32 %v16213_v4, %v15838_v34 }
 0x77a   :  { %v7580_v9 = vpop.f32.mrf.mxu1  ;;  %11368 = vmatmul.mubr.msk.bf16.vlgmr.msra.gmra.mxu1 %vm1127_vm3, %v16223_v33  ;;  %11604 = vmatpush3.bf16.msra.mxu0 %v11961_v38  ;;  %v11966_v38 = vld [vmem:[#allocation10 + $0x160] sm:$0xff]  }
 0x77b   :  { %v7581_v43 = vadd.f32 %v7580_v9, %v7537_v5  ;;  %v7539_v22 = vpop.f32.mrf.mxu0  ;;  %11605 = vmatprep.subr.bf16.mxu0 %v11962_v2  ;;  %v7243_v1 = vadd.f32 %v16220_v35, %v7200_v39  ;;  %v11968_v35 = vld [vmem:[#allocation10 + $0x158] sm:$0xff]   ;;  %v11970_v2 = vld [vmem:[#allocation10 + $0x150] sm:$0xff]   ;;  %v11972_v5 = vld [vmem:[#allocation10 + $0x148] sm:$0xff]  }
 0x77c   :  { %v7582_v11 = vpop.f32.mrf.mxu1  ;;  %v11973_v9 = vld [vmem:[#allocation10 + $0x108] sm:$0xff]  }
 0x77d   :  { %v16494_v45 = vadd.f32 %v7581_v43, %v7237_v25  ;;  %v7583_v33 = vadd.f32 %v7582_v11, %v7539_v22  ;;  %v7541_v52 = vpop.f32.mrf.mxu0  ;;  %v11975_v25 = vld [vmem:[#allocation10 + $0x100] sm:$0xff]   ;;  %v11992_v43 = vld [vmem:[#allocation10 + $0x1f8] sm:$0xff]   ;;  %v11998_v11 = vld [vmem:[#allocation10 + $0x1b0] sm:$0xff]  }
 0x77e   :  { %v7584_v15 = vpop.f32.mrf.mxu1  ;;  %11606 = vmatpush3.bf16.msra.mxu0 %v11963_v23  ;;  %v11974_v23 = vld [vmem:[#allocation10 + $0x140] sm:$0xff]   ;;  %11625 = vmatprep.subr.bf16.mxu1 %v11992_v43  ;;  %v11994_v22 = vld [vmem:[#allocation10 + $0x1b8] sm:$0xff]  }
 0x77f   :  { %v7863_v51 = vmax.f32 %v15508_v21, %v16494_v45  ;;  %v16499_v54 = vadd.f32 %v7583_v33, %v7239_v32  ;;  %v7585_v16 = vadd.f32 %v7584_v15, %v7541_v52  ;;  %v7543_v7 = vpop.f32.mrf.mxu0  ;;  %11607 = vmatprep.subr.bf16.mxu0 %v11964_v27  ;;  %v11996_v27 = vld [vmem:[#allocation10 + $0x1f0] sm:$0xff]   ;;  %11626 = vmatpush3.bf16.msra.mxu1 %v11994_v22  ;;  %v12000_v32 = vld [vmem:[#allocation10 + $0x1e8] sm:$0xff]   ;;  %v12010_v43 = vld [vmem:[#allocation10 + $0x198] sm:$0xff]  }
 0x780   :  { %v7586_v49 = vpop.f32.mrf.mxu1  ;;  %11627 = vmatprep.subr.bf16.mxu1 %v11996_v27  ;;  %v12014_v22 = vld [vmem:[#allocation10 + $0x190] sm:$0xff]   ;;  %v12016_v27 = vld [vmem:[#allocation10 + $0x1c8] sm:$0xff]  }
 0x781   :  { %v7864_v34 = vmax.f32 %v15513_v48, %v16499_v54  ;;  %v16504_v4 = vadd.f32 %v7585_v16, %v7241_v55  ;;  %v7587_v17 = vadd.f32 %v7586_v49, %v7543_v7  ;;  %v18958_v45 = vld [vmem:[#allocation25_spill] sm:$0xff] }
 0x782   :  { %11608 = vmatpush3.bf16.msra.mxu0 %v11965_v10 }
 0x783   :  { %v7871_v62 = vmax.f32 %v15519_v40, %v16504_v4  ;;  %v16508_v8 = vadd.f32 %v7587_v17, %v7243_v1  ;;  %11609 = vmatprep.subr.bf16.mxu0 %v11966_v38  ;;  %11628 = vmatpush3.bf16.msra.mxu1 %v11998_v11  ;;  %v12020_v11 = vld [vmem:[#allocation10 + $0x1c0] sm:$0xff]   ;;  %v11977_v4 = vld [vmem:[#allocation10 + $0x38] sm:$0xff]  }
 0x784   :  { %11629 = vmatprep.subr.bf16.mxu1 %v12000_v32  ;;  %v12022_v32 = vld [vmem:[#allocation10 + $0x180] sm:$0xff]  }
 0x785   :  { %v7872_v26 = vmax.f32 %v15523_v3, %v16508_v8  ;;  %v11979_v3 = vld [vmem:[#allocation10 + $0x30] sm:$0xff]   ;;  %v11980_v8 = vld [vmem:[#allocation10 + $0x68] sm:$0xff]  }
 0x786   :  { %11610 = vmatpush3.bf16.msra.mxu0 %v11967_v14 }
 0x787   :  { %11611 = vmatprep.subr.bf16.mxu0 %v11968_v35 }
 0x78a   :  { %11612 = vmatpush3.bf16.msra.mxu0 %v11969_v50 }
 0x78b   :  { %11613 = vmatprep.subr.bf16.mxu0 %v11970_v2 }
 0x78e   :  { %11614 = vmatpush3.bf16.msra.mxu0 %v11971_v59 }
 0x78f   :  { %11615 = vmatprep.subr.bf16.mxu0 %v11972_v5 }
 0x792   :  { %11616 = vmatpush3.bf16.msra.mxu0 %v11973_v9  ;;  %v12002_v9 = vld [vmem:[#allocation10 + $0x1a8] sm:$0xff]  }
 0x793   :  { %11617 = vmatprep.subr.bf16.mxu0 %v11974_v23  ;;  %11630 = vmatpush3.bf16.msra.mxu1 %v12002_v9  ;;  %v12004_v23 = vld [vmem:[#allocation10 + $0x1e0] sm:$0xff]  }
 0x794   :  { %11631 = vmatprep.subr.bf16.mxu1 %v12004_v23 }
 0x796   :  { %11618 = vmatpush3.bf16.msra.mxu0 %v11975_v25  ;;  %v12006_v25 = vld [vmem:[#allocation10 + $0x1a0] sm:$0xff]  }
 0x797   :  { %11647 = vmatprep.subr.bf16.mxu0 %v11976_v56  ;;  %11632 = vmatpush3.bf16.msra.mxu1 %v12006_v25  ;;  %v12008_v56 = vld [vmem:[#allocation10 + $0x1d8] sm:$0xff]  }
 0x798   :  { %11633 = vmatprep.subr.bf16.mxu1 %v12008_v56  ;;  %v18952_v56 = vld [vmem:[#allocation32_spill] sm:$0xff] }
 0x79b   :  { %11634 = vmatpush3.bf16.msra.mxu1 %v12010_v43 }
 0x7b9   :  { %v7623_v39 = vpop.f32.mrf.mxu0 }
 0x7ba   :  { %v7666_v33 = vpop.f32.mrf.mxu1 }
 0x7bb   :  { %v7667_v52 = vadd.f32 %v7666_v33, %v7623_v39  ;;  %v7625_v15 = vpop.f32.mrf.mxu0  ;;  %v12024_v39 = vld [vmem:[#allocation10 + $0xf8] sm:$0xff]   ;;  %v7366_v33 = vadd.f32 %v16367_v18, %v15975_v24 }
 0x7bc   :  { %v7668_v55 = vpop.f32.mrf.mxu1 }
 0x7bd   :  { %v16513_v16 = vadd.f32 %v7667_v52, %v16235_v37  ;;  %v7669_v7 = vadd.f32 %v7668_v55, %v7625_v15  ;;  %v7627_v49 = vpop.f32.mrf.mxu0  ;;  %v7069_v52 = vadd.f32 %v16041_v19, %v16037_v57  ;;  %v7368_v15 = vadd.f32 %v16375_v31, %v15981_v12  ;;  %v16544_v19 = vld [vmem:[#allocation8] sm:$0xf] }
 0x7be   :  { %v7670_v1 = vpop.f32.mrf.mxu1 }
 0x7bf   :  { %v7865_v17 = vmax.f32 %v15588_v63, %v16513_v16  ;;  %v16518_v10 = vadd.f32 %v7669_v7, %v16242_v0  ;;  %v7671_v38 = vadd.f32 %v7670_v1, %v7627_v49  ;;  %v7629_v14 = vpop.f32.mrf.mxu0  ;;  %v7071_v7 = vadd.f32 %v16049_v29, %v16045_v60  ;;  %v18951_v29 = vld [vmem:[#allocation24_spill] sm:$0xff] }
 0x7c0   :  { %v7672_v35 = vpop.f32.mrf.mxu1  ;;  %v7409_v1 = vadd.f32 %v16371_v44, %v7366_v33  ;;  %v7411_v18 = vadd.f32 %v16379_v53, %v7368_v15  ;;  %v18957_v15 = vld [vmem:[#allocation23_spill] sm:$0xff]  ;;  %v12015_v63 = vld [vmem:[#allocation10 + $0x210] sm:$0xff]  }
 0x7c1   :  { %v7866_v50 = vmax.f32 %v15593_v47, %v16518_v10  ;;  %v16523_v2 = vadd.f32 %v7671_v38, %v16248_v28  ;;  %v7673_v37 = vadd.f32 %v7672_v35, %v7629_v14  ;;  %v12012_v28 = vld [vmem:[#allocation10 + $0x1d0] sm:$0xff]   ;;  %v7370_v38 = vadd.f32 %v16383_v42, %v7069_v52  ;;  %v12017_v16 = vld [vmem:[#allocation10 + $0x248] sm:$0xff]  }
 0x7c2   :  { %11635 = vmatprep.subr.bf16.mxu1 %v12012_v28  ;;  %v18953_v28 = vld [vmem:[#allocation93_spill] sm:$0xff] }
 0x7c3   :  { %v7873_v59 = vmax.f32 %v15599_v61, %v16523_v2  ;;  %v16528_v5 = vadd.f32 %v7673_v37, %v16252_v30  ;;  %11636 = vmatpush3.bf16.msra.mxu1 %v12014_v22  ;;  %v12018_v30 = vld [vmem:[#allocation10 + $0x188] sm:$0xff]   ;;  %v7372_v37 = vadd.f32 %v16391_v13, %v7071_v7  ;;  %v7413_v60 = vadd.f32 %v16387_v6, %v7370_v38  ;;  %v12023_v2 = vld [vmem:[#allocation10 + $0x200] sm:$0xff]  }
 0x7c4   :  { %11637 = vmatprep.subr.bf16.mxu1 %v12016_v27  ;;  %v18954_v13 = vsub.s32 0, %v18953_v28  ;;  %v18956_v33 = vsub.s32 1, %v18953_v28 }
 0x7c5   :  { %v7874_v0 = vmax.f32 %v15603_v46, %v16528_v5  ;;  %v7415_v43 = vadd.f32 %v18952_v56, %v7372_v37  ;;  %v11991_v56 = vld [vmem:[#allocation10] sm:$0xff]   ;;  %v12026_v5 = vld [vmem:[#allocation10 + $0xb8] sm:$0xff]  }
 0x7c6   :  { %v7892_v22 = vrot.slane %v16544_v19, %v18954_v13  ;;  %v7896_v52 = vrot.slane %v16544_v19, %v18956_v33  ;;  %v11995_v13 = vld [vmem:[#allocation10 + $0x238] sm:$0xff]  }
 0x7c7   :  { %11638 = vmatpush3.bf16.msra.mxu1 %v12018_v30  ;;  %v18955_v30 = vld [vmem:[#allocation26_spill] sm:$0xff] }
 0x7c8   :  { %11639 = vmatprep.subr.bf16.mxu1 %v12020_v11 }
 0x7cb   :  { %11640 = vmatpush3.bf16.msra.mxu1 %v12022_v32 }
 0x7cc   :  { %11669 = vmatprep.subr.bf16.mxu1 %v12024_v39 }
 0x7f9   :  { %v7709_v55 = vpop.f32.mrf.mxu0 }
 0x7fa   :  { %v7752_v49 = vpop.f32.mrf.mxu1 }
 0x7fb   :  { %v7753_v14 = vadd.f32 %v7752_v49, %v7709_v55  ;;  %v7711_v35 = vpop.f32.mrf.mxu0 }
 0x7fc   :  { %v7754_v24 = vpop.f32.mrf.mxu1 }
 0x7fd   :  { %v7851_v57 = vadd.f32 %v7753_v14, %v7409_v1  ;;  %v7755_v12 = vadd.f32 %v7754_v24, %v7711_v35  ;;  %v7713_v31 = vpop.f32.mrf.mxu0 }
 0x7fe   :  { %v7756_v9 = vpop.f32.mrf.mxu1 }
 0x7ff   :  { %v7867_v23 = vmax.f32 %v18951_v29, %v7851_v57  ;;  %v7852_v44 = vadd.f32 %v7755_v12, %v7411_v18  ;;  %v7757_v25 = vadd.f32 %v7756_v9, %v7713_v31  ;;  %v7715_v42 = vpop.f32.mrf.mxu0  ;;  %v11978_v57 = vld [vmem:[#allocation10 + $0x70] sm:$0xff]   ;;  %v11982_v12 = vld [vmem:[#allocation10 + $0x60] sm:$0xff]   ;;  %v11984_v9 = vld [vmem:[#allocation10 + $0x58] sm:$0xff]  }
 0x800   :  { %v7758_v53 = vpop.f32.mrf.mxu1  ;;  %v11983_v31 = vld [vmem:[#allocation10 + $0x20] sm:$0xff]   ;;  %v11986_v29 = vld [vmem:[#allocation10 + $0x50] sm:$0xff]  }
 0x801   :  { %v7879_v27 = vmax.f32 %v7863_v51, %v7867_v23  ;;  %v7868_v11 = vmax.f32 %v18955_v30, %v7852_v44  ;;  %v7859_v32 = vadd.f32 %v7757_v25, %v7413_v60  ;;  %v7759_v6 = vadd.f32 %v7758_v53, %v7715_v42  ;;  %v11985_v60 = vld [vmem:[#allocation10 + $0x18] sm:$0xff]   ;;  %v11987_v23 = vld [vmem:[#allocation10 + $0x10] sm:$0xff]   ;;  %v11988_v44 = vld [vmem:[#allocation10 + $0x48] sm:$0xff]  }
 0x802   :  { %v11989_v25 = vld [vmem:[#allocation10 + $0x8] sm:$0xff]   ;;  %v11990_v42 = vld [vmem:[#allocation10 + $0x40] sm:$0xff]  }
 0x803   :  { %v7880_v39 = vmax.f32 %v7864_v34, %v7868_v11  ;;  %v7875_v55 = vmax.f32 %v18957_v15, %v7859_v32  ;;  %v7860_v7 = vadd.f32 %v7759_v6, %v7415_v43  ;;  %v7909_v49 = vadd.f32 %v7892_v22, %v7879_v27  ;;  %v11993_v43 = vld [vmem:[#allocation10 + $0x278] sm:$0xff]   ;;  %v11999_v27 = vld [vmem:[#allocation10 + $0x230] sm:$0xff]   ;;  %v12001_v30 = vld [vmem:[#allocation10 + $0x268] sm:$0xff]  }
 0x804   :  { %v12003_v11 = vld [vmem:[#allocation10 + $0x228] sm:$0xff]   ;;  %v12005_v32 = vld [vmem:[#allocation10 + $0x260] sm:$0xff]  }
 0x805   :  { %v7883_v21 = vmax.f32 %v7871_v62, %v7875_v55  ;;  %v7876_v51 = vmax.f32 %v18958_v45, %v7860_v7  ;;  %v7910_v1 = vadd.f32 %v7896_v52, %v7880_v39  ;;  %v7917_v54 = vmax.f32 %v7909_v49, 0.0  ;;  %v12007_v15 = vld [vmem:[#allocation10 + $0x220] sm:$0xff]   ;;  %v12009_v7 = vld [vmem:[#allocation10 + $0x258] sm:$0xff]  }
 0x807   :  { %v7913_v38 = vadd.f32 %v7892_v22, %v7883_v21  ;;  %v7884_v48 = vmax.f32 %v7872_v26, %v7876_v51  ;;  %v7918_v35 = vmax.f32 %v7910_v1, 0.0  ;;  %v11981_v26 = vld [vmem:[#allocation10 + $0x28] sm:$0xff]   ;;  %v11997_v22 = vld [vmem:[#allocation10 + $0x270] sm:$0xff]  }
 0x808   :  { %v18959_v1 = vld [vmem:[#allocation28_spill] sm:$0xff] }
 0x809   :  { %v7921_v34 = vmax.f32 %v7913_v38, 0.0  ;;  %v7914_v14 = vadd.f32 %v7896_v52, %v7884_v48 }
 0x80b   :  { %v16570_v37 = vpack.c.bf16 %v7921_v34, %v7917_v54  ;;  %v7922_v24 = vmax.f32 %v7914_v14, 0.0  ;;  %v12011_v14 = vld [vmem:[#allocation10 + $0x218] sm:$0xff]  }
 0x80d   :  { %v16572_v18 = vpack.c.bf16 %v7922_v24, %v7918_v35  ;;  %v8062_v62 = vrot.slane %v16570_v37, 1  ;;  %v18960_v35 = vsub.s32 2, %v18953_v28 }
 0x80f   :  { %v8063_v40 = vrot.slane %v16572_v18, 1  ;;  %v8680_v53 = vrot.slane %v16572_v18, 2  ;;  %v7900_v24 = vrot.slane %v16544_v19, %v18960_v35  ;;  %v12049_v35 = vld [vmem:[#allocation10 + $0x348] sm:$0xff]  }
 0x811   :  { %8294 = vmatprep.mubr.bf16.mxu0 %v8063_v40 }
 0x812   :  { %8295 = vmatmul.mubr.bf16.vlgmr.msra.gmra.mxu0 %v8062_v62  ;;  %v18961_v62 = vld [vmem:[#allocation30_spill] sm:$0xff] }
 0x813   :  { %11648 = vmatpush3.bf16.msra.mxu0 %v11977_v4  ;;  %8566 = vmatprep.mubr.bf16.mxu0 %v16572_v18  ;;  %v12013_v4 = vld [vmem:[#allocation10 + $0x250] sm:$0xff]  }
 0x814   :  { %11649 = vmatprep.subr.bf16.mxu0 %v11978_v57 }
 0x817   :  { %11650 = vmatpush3.bf16.msra.mxu0 %v11979_v3 }
 0x818   :  { %11651 = vmatprep.subr.bf16.mxu0 %v11980_v8 }
 0x81b   :  { %11652 = vmatpush3.bf16.msra.mxu0 %v11981_v26  ;;  %v18962_v26 = vsub.s32 3, %v18953_v28  ;;  %v12019_v28 = vld [vmem:[#allocation10 + $0x208] sm:$0xff]  }
 0x81c   :  { %11653 = vmatprep.subr.bf16.mxu0 %v11982_v12 }
 0x81d   :  { %v7904_v12 = vrot.slane %v16544_v19, %v18962_v26  ;;  %v9025_v26 = vrot.slane %v16570_v37, 3 }
 0x81f   :  { %11654 = vmatpush3.bf16.msra.mxu0 %v11983_v31  ;;  %v18963_v31 = vld [vmem:[#allocation27_spill] sm:$0xff] }
 0x820   :  { %11655 = vmatprep.subr.bf16.mxu0 %v11984_v9 }
 0x823   :  { %11656 = vmatpush3.bf16.msra.mxu0 %v11985_v60 }
 0x824   :  { %11657 = vmatprep.subr.bf16.mxu0 %v11986_v29  ;;  %v18964_v29 = vld [vmem:[#allocation29_spill] sm:$0xff] }
 0x827   :  { %11658 = vmatpush3.bf16.msra.mxu0 %v11987_v23 }
 0x828   :  { %11659 = vmatprep.subr.bf16.mxu0 %v11988_v44 }
 0x82b   :  { %11660 = vmatpush3.bf16.msra.mxu0 %v11989_v25 }
 0x82c   :  { %11661 = vmatprep.subr.bf16.mxu0 %v11990_v42 }
 0x82f   :  { %11662 = vmatpush3.bf16.msra.mxu0 %v11991_v56 }
 0x830   :  { %11691 = vmatprep.subr.bf16.mxu0 %v11993_v43 }
 0x832   :  { %8567 = vmatmul.mubr.bf16.vlgmr.msra.gmra.mxu0 %v16570_v37 }
 0x833   :  { %11692 = vmatpush3.bf16.msra.mxu0 %v11995_v13  ;;  %8911 = vmatprep.mubr.bf16.mxu0 %v8680_v53  ;;  %v8679_v13 = vrot.slane %v16570_v37, 2  ;;  %v12028_v53 = vld [vmem:[#allocation10 + $0xf0] sm:$0xff]  }
 0x834   :  { %11693 = vmatprep.subr.bf16.mxu0 %v11997_v22 }
 0x837   :  { %11694 = vmatpush3.bf16.msra.mxu0 %v11999_v27  ;;  %v12029_v27 = vld [vmem:[#allocation10 + $0x370] sm:$0xff]  }
 0x838   :  { %11695 = vmatprep.subr.bf16.mxu0 %v12001_v30  ;;  %v9026_v30 = vrot.slane %v16572_v18, 3 }
 0x839   :  { %v7795_v6 = vpop.f32.mrf.mxu0 }
 0x83a   :  { %v7838_v39 = vpop.f32.mrf.mxu1 }
 0x83b   :  { %v7839_v33 = vadd.f32 %v7838_v39, %v7795_v6  ;;  %11696 = vmatpush3.bf16.msra.mxu0 %v12003_v11  ;;  %v7797_v52 = vpop.f32.mrf.mxu0  ;;  %v12030_v11 = vld [vmem:[#allocation10 + $0xb0] sm:$0xff]   ;;  %v12032_v6 = vld [vmem:[#allocation10 + $0xe8] sm:$0xff]  }
 0x83c   :  { %v7840_v55 = vpop.f32.mrf.mxu1  ;;  %11697 = vmatprep.subr.bf16.mxu0 %v12005_v32  ;;  %v12031_v32 = vld [vmem:[#allocation10 + $0x330] sm:$0xff]   ;;  %v12033_v39 = vld [vmem:[#allocation10 + $0x368] sm:$0xff]  }
 0x83d   :  { %v7853_v49 = vadd.f32 %v7839_v33, %v16407_v41  ;;  %v7841_v21 = vadd.f32 %v7840_v55, %v7797_v52  ;;  %v7799_v45 = vpop.f32.mrf.mxu0  ;;  %v12034_v33 = vld [vmem:[#allocation10 + $0xa8] sm:$0xff]   ;;  %v12037_v55 = vld [vmem:[#allocation10 + $0x360] sm:$0xff]  }
 0x83e   :  { %v7842_v51 = vpop.f32.mrf.mxu1  ;;  %v12035_v52 = vld [vmem:[#allocation10 + $0x328] sm:$0xff]  }
 0x83f   :  { %v7869_v38 = vmax.f32 %v18959_v1, %v7853_v49  ;;  %v7854_v48 = vadd.f32 %v7841_v21, %v16414_v20  ;;  %v7843_v54 = vadd.f32 %v7842_v51, %v7799_v45  ;;  %11698 = vmatpush3.bf16.msra.mxu0 %v12007_v15  ;;  %v7801_v34 = vpop.f32.mrf.mxu0  ;;  %v12036_v15 = vld [vmem:[#allocation10 + $0xe0] sm:$0xff]   ;;  %v12040_v21 = vld [vmem:[#allocation10 + $0xd8] sm:$0xff]  }
 0x840   :  { %v7844_v40 = vpop.f32.mrf.mxu1  ;;  %11699 = vmatprep.subr.bf16.mxu0 %v12009_v7  ;;  %v12038_v7 = vld [vmem:[#allocation10 + $0xa0] sm:$0xff]   ;;  %v12041_v45 = vld [vmem:[#allocation10 + $0x358] sm:$0xff]  }
 0x841   :  { %v7881_v41 = vmax.f32 %v7865_v17, %v7869_v38  ;;  %v7870_v57 = vmax.f32 %v18961_v62, %v7854_v48  ;;  %v7861_v3 = vadd.f32 %v7843_v54, %v16420_v58  ;;  %v7845_v20 = vadd.f32 %v7844_v40, %v7801_v34  ;;  %v12039_v49 = vld [vmem:[#allocation10 + $0x320] sm:$0xff]   ;;  %v12042_v51 = vld [vmem:[#allocation10 + $0x98] sm:$0xff]   ;;  %v12044_v38 = vld [vmem:[#allocation10 + $0xd0] sm:$0xff]  }
 0x842   :  { %v12043_v1 = vld [vmem:[#allocation10 + $0x318] sm:$0xff]   ;;  %v12045_v48 = vld [vmem:[#allocation10 + $0x350] sm:$0xff]   ;;  %v12051_v40 = vld [vmem:[#allocation10 + $0x308] sm:$0xff]  }
 0x843   :  { %v7882_v8 = vmax.f32 %v7866_v50, %v7870_v57  ;;  %v7877_v9 = vmax.f32 %v18963_v31, %v7861_v3  ;;  %v7862_v60 = vadd.f32 %v7845_v20, %v16424_v36  ;;  %11700 = vmatpush3.bf16.msra.mxu0 %v12011_v14  ;;  %v7911_v17 = vadd.f32 %v7900_v24, %v7881_v41  ;;  %v12021_v36 = vld [vmem:[#allocation10 + $0x240] sm:$0xff]   ;;  %v12046_v54 = vld [vmem:[#allocation10 + $0x90] sm:$0xff]   ;;  %v12048_v14 = vld [vmem:[#allocation10 + $0xc8] sm:$0xff]  }
 0x844   :  { %11701 = vmatprep.subr.bf16.mxu0 %v12013_v4  ;;  %v12047_v34 = vld [vmem:[#allocation10 + $0x310] sm:$0xff]   ;;  %v12052_v4 = vld [vmem:[#allocation10 + $0xc0] sm:$0xff]   ;;  %v12056_v3 = vld [vmem:[#allocation10 + $0x2f8] sm:$0xff]  }
 0x845   :  { %v7885_v58 = vmax.f32 %v7873_v59, %v7877_v9  ;;  %v7878_v47 = vmax.f32 %v18964_v29, %v7862_v60  ;;  %v7912_v10 = vadd.f32 %v7904_v12, %v7882_v8  ;;  %v7919_v23 = vmax.f32 %v7911_v17, 0.0  ;;  %v12025_v59 = vld [vmem:[#allocation10 + $0x378] sm:$0xff]   ;;  %v12053_v41 = vld [vmem:[#allocation10 + $0x340] sm:$0xff]   ;;  %v12060_v9 = vld [vmem:[#allocation10 + $0x2f0] sm:$0xff]  }
 0x846   :  { %v12054_v62 = vld [vmem:[#allocation10 + $0x80] sm:$0xff]   ;;  %v12057_v20 = vld [vmem:[#allocation10 + $0x478] sm:$0xff]   ;;  %v12061_v60 = vld [vmem:[#allocation10 + $0x470] sm:$0xff]  }
 0x847   :  { %v7915_v50 = vadd.f32 %v7900_v24, %v7885_v58  ;;  %v7886_v19 = vmax.f32 %v7874_v0, %v7878_v47  ;;  %11702 = vmatpush3.bf16.msra.mxu0 %v12015_v63  ;;  %v7920_v42 = vmax.f32 %v7912_v10, 0.0  ;;  %v12027_v0 = vld [vmem:[#allocation10 + $0x338] sm:$0xff]   ;;  %v12050_v24 = vld [vmem:[#allocation10 + $0x88] sm:$0xff]   ;;  %v12055_v57 = vld [vmem:[#allocation10 + $0x300] sm:$0xff]   ;;  %v9372_v63 = vrot.slane %v16572_v18, 4 }
 0x848   :  { %11703 = vmatprep.subr.bf16.mxu0 %v12017_v16  ;;  %v12058_v8 = vld [vmem:[#allocation10 + $0x2b8] sm:$0xff]   ;;  %v12062_v16 = vld [vmem:[#allocation10 + $0x2b0] sm:$0xff]   ;;  %v12064_v58 = vld [vmem:[#allocation10 + $0x2e8] sm:$0xff]  }
 0x849   :  { %v7923_v44 = vmax.f32 %v7915_v50, 0.0  ;;  %v7916_v25 = vadd.f32 %v7904_v12, %v7886_v19  ;;  %v12059_v12 = vld [vmem:[#allocation10 + $0x438] sm:$0xff]   ;;  %v12063_v17 = vld [vmem:[#allocation10 + $0x430] sm:$0xff]   ;;  %v12065_v29 = vld [vmem:[#allocation10 + $0x468] sm:$0xff]  }
 0x84a   :  { %v12066_v47 = vld [vmem:[#allocation10 + $0x2a8] sm:$0xff]   ;;  %v12068_v50 = vld [vmem:[#allocation10 + $0x2e0] sm:$0xff]  }
 0x84b   :  { %v16605_v56 = vpack.c.bf16 %v7923_v44, %v7919_v23  ;;  %v7924_v61 = vmax.f32 %v7916_v25, 0.0  ;;  %11704 = vmatpush3.bf16.msra.mxu0 %v12019_v28  ;;  %v12067_v10 = vld [vmem:[#allocation10 + $0x428] sm:$0xff]   ;;  %v12069_v19 = vld [vmem:[#allocation10 + $0x460] sm:$0xff]   ;;  %v12072_v23 = vld [vmem:[#allocation10 + $0x2d8] sm:$0xff]  }
 0x84c   :  { %11705 = vmatprep.subr.bf16.mxu0 %v12021_v36  ;;  %v12070_v28 = vld [vmem:[#allocation10 + $0x2a0] sm:$0xff]   ;;  %v12073_v44 = vld [vmem:[#allocation10 + $0x458] sm:$0xff]  }
 0x84d   :  { %v16607_v43 = vpack.c.bf16 %v7924_v61, %v7920_v42  ;;  %v8064_v22 = vrot.slane %v16605_v56, 1  ;;  %v12071_v36 = vld [vmem:[#allocation10 + $0x420] sm:$0xff]   ;;  %v12074_v25 = vld [vmem:[#allocation10 + $0x298] sm:$0xff]   ;;  %v12076_v61 = vld [vmem:[#allocation10 + $0x2d0] sm:$0xff]  }
 0x84e   :  { %v12075_v42 = vld [vmem:[#allocation10 + $0x418] sm:$0xff]  }
 0x84f   :  { %11706 = vmatpush3.bf16.msra.mxu0 %v12023_v2  ;;  %v8065_v46 = vrot.slane %v16607_v43, 1  ;;  %v8682_v31 = vrot.slane %v16607_v43, 2  ;;  %v12077_v2 = vld [vmem:[#allocation10 + $0x450] sm:$0xff]  }
 0x850   :  { %11735 = vmatprep.subr.bf16.mxu0 %v12025_v59  ;;  %v12078_v59 = vld [vmem:[#allocation10 + $0x290] sm:$0xff]  }
 0x851   :  { %8334 = vmatprep.mubr.bf16.mxu1 %v8065_v46  ;;  %v12079_v46 = vld [vmem:[#allocation10 + $0x410] sm:$0xff]  }
 0x852   :  { %8912 = vmatmul.mubr.bf16.vlgmr.msra.gmra.mxu0 %v8679_v13  ;;  %8335 = vmatmul.mubr.bf16.vlgmr.msra.gmra.mxu1 %v8064_v22  ;;  %v12082_v13 = vld [vmem:[#allocation10 + $0x288] sm:$0xff]  }
 0x853   :  { %11670 = vmatpush3.bf16.msra.mxu1 %v12026_v5  ;;  %11736 = vmatpush3.bf16.msra.mxu0 %v12027_v0  ;;  %v12080_v5 = vld [vmem:[#allocation10 + $0x2c8] sm:$0xff]  }
 0x854   :  { %9257 = vmatprep.mubr.bf16.mxu0 %v9026_v30  ;;  %8606 = vmatprep.mubr.bf16.mxu1 %v16607_v43  ;;  %v12081_v0 = vld [vmem:[#allocation10 + $0x448] sm:$0xff]   ;;  %v12086_v30 = vld [vmem:[#allocation10 + $0x280] sm:$0xff]  }
 0x855   :  { %11671 = vmatprep.subr.bf16.mxu1 %v12028_v53  ;;  %11737 = vmatprep.subr.bf16.mxu0 %v12029_v27  ;;  %v12083_v22 = vld [vmem:[#allocation10 + $0x408] sm:$0xff]   ;;  %v12084_v53 = vld [vmem:[#allocation10 + $0x2c0] sm:$0xff]  }
 0x856   :  { %v12085_v27 = vld [vmem:[#allocation10 + $0x440] sm:$0xff]  }
 0x857   :  { %11672 = vmatpush3.bf16.msra.mxu1 %v12030_v11  ;;  %11738 = vmatpush3.bf16.msra.mxu0 %v12031_v32  ;;  %v12087_v11 = vld [vmem:[#allocation10 + $0x400] sm:$0xff]   ;;  %v12088_v32 = vld [vmem:[#allocation10 + $0x3f8] sm:$0xff]  }
 0x858   :  { %11673 = vmatprep.subr.bf16.mxu1 %v12032_v6  ;;  %11739 = vmatprep.subr.bf16.mxu0 %v12033_v39  ;;  %v12089_v6 = vld [vmem:[#allocation10 + $0x578] sm:$0xff]  }
 0x859   :  { %v12090_v39 = vld [vmem:[#allocation10 + $0x3b8] sm:$0xff]  }
 0x85b   :  { %11674 = vmatpush3.bf16.msra.mxu1 %v12034_v33  ;;  %11740 = vmatpush3.bf16.msra.mxu0 %v12035_v52  ;;  %v8681_v33 = vrot.slane %v16605_v56, 2  ;;  %v12091_v52 = vld [vmem:[#allocation10 + $0x538] sm:$0xff]  }
 0x85c   :  { %11675 = vmatprep.subr.bf16.mxu1 %v12036_v15  ;;  %11741 = vmatprep.subr.bf16.mxu0 %v12037_v55  ;;  %v9371_v15 = vrot.slane %v16570_v37, 4  ;;  %v12092_v55 = vld [vmem:[#allocation10 + $0x3f0] sm:$0xff]  }
 0x85f   :  { %11676 = vmatpush3.bf16.msra.mxu1 %v12038_v7  ;;  %11742 = vmatpush3.bf16.msra.mxu0 %v12039_v49  ;;  %v9028_v7 = vrot.slane %v16607_v43, 3  ;;  %v12093_v49 = vld [vmem:[#allocation10 + $0x570] sm:$0xff]  }
 0x860   :  { %11677 = vmatprep.subr.bf16.mxu1 %v12040_v21  ;;  %11743 = vmatprep.subr.bf16.mxu0 %v12041_v45  ;;  %v9718_v21 = vrot.slane %v16572_v18, 5  ;;  %v12094_v45 = vld [vmem:[#allocation10 + $0x3b0] sm:$0xff]  }
 0x863   :  { %11678 = vmatpush3.bf16.msra.mxu1 %v12042_v51  ;;  %11744 = vmatpush3.bf16.msra.mxu0 %v12043_v1  ;;  %v12095_v51 = vld [vmem:[#allocation10 + $0x530] sm:$0xff]   ;;  %v12096_v1 = vld [vmem:[#allocation10 + $0x3e8] sm:$0xff]  }
 0x864   :  { %11679 = vmatprep.subr.bf16.mxu1 %v12044_v38  ;;  %11745 = vmatprep.subr.bf16.mxu0 %v12045_v48  ;;  %v12097_v38 = vld [vmem:[#allocation10 + $0x568] sm:$0xff]  }
 0x865   :  { %v12098_v48 = vld [vmem:[#allocation10 + $0x3a8] sm:$0xff]  }
 0x867   :  { %11680 = vmatpush3.bf16.msra.mxu1 %v12046_v54  ;;  %11746 = vmatpush3.bf16.msra.mxu0 %v12047_v34  ;;  %v12099_v54 = vld [vmem:[#allocation10 + $0x528] sm:$0xff]   ;;  %v12100_v34 = vld [vmem:[#allocation10 + $0x3e0] sm:$0xff]  }
 0x868   :  { %11681 = vmatprep.subr.bf16.mxu1 %v12048_v14  ;;  %11747 = vmatprep.subr.bf16.mxu0 %v12049_v35  ;;  %v12101_v14 = vld [vmem:[#allocation10 + $0x560] sm:$0xff]  }
 0x869   :  { %v12102_v35 = vld [vmem:[#allocation10 + $0x3a0] sm:$0xff]  }
 0x86b   :  { %11682 = vmatpush3.bf16.msra.mxu1 %v12050_v24  ;;  %11748 = vmatpush3.bf16.msra.mxu0 %v12051_v40  ;;  %v12103_v24 = vld [vmem:[#allocation10 + $0x520] sm:$0xff]   ;;  %v12104_v40 = vld [vmem:[#allocation10 + $0x3d8] sm:$0xff]  }
 0x86c   :  { %11683 = vmatprep.subr.bf16.mxu1 %v12052_v4  ;;  %11749 = vmatprep.subr.bf16.mxu0 %v12053_v41  ;;  %v12105_v4 = vld [vmem:[#allocation10 + $0x558] sm:$0xff]  }
 0x86d   :  { %v12106_v41 = vld [vmem:[#allocation10 + $0x398] sm:$0xff]  }
 0x86f   :  { %11684 = vmatpush3.bf16.msra.mxu1 %v12054_v62  ;;  %11750 = vmatpush3.bf16.msra.mxu0 %v12055_v57  ;;  %v12107_v62 = vld [vmem:[#allocation10 + $0x518] sm:$0xff]   ;;  %v12108_v57 = vld [vmem:[#allocation10 + $0x3d0] sm:$0xff]  }
 0x870   :  { %11713 = vmatprep.subr.bf16.mxu1 %v12056_v3  ;;  %11779 = vmatprep.subr.bf16.mxu0 %v12057_v20  ;;  %v12109_v3 = vld [vmem:[#allocation10 + $0x550] sm:$0xff]  }
 0x871   :  { %v12110_v20 = vld [vmem:[#allocation10 + $0x390] sm:$0xff]  }
 0x872   :  { %8607 = vmatmul.mubr.bf16.vlgmr.msra.gmra.mxu1 %v16605_v56  ;;  %9258 = vmatmul.mubr.bf16.vlgmr.msra.gmra.mxu0 %v9025_v26  ;;  %v12112_v26 = vld [vmem:[#allocation10 + $0x3c8] sm:$0xff]  }
 0x873   :  { %11714 = vmatpush3.bf16.msra.mxu1 %v12058_v8  ;;  %8951 = vmatprep.mubr.bf16.mxu1 %v8682_v31  ;;  %v12111_v8 = vld [vmem:[#allocation10 + $0x510] sm:$0xff]   ;;  %v12114_v31 = vld [vmem:[#allocation10 + $0x388] sm:$0xff]  }
 0x874   :  { %11780 = vmatpush3.bf16.msra.mxu0 %v12059_v12  ;;  %9603 = vmatprep.mubr.bf16.mxu0 %v9372_v63  ;;  %v12113_v12 = vld [vmem:[#allocation10 + $0x548] sm:$0xff]   ;;  %v12117_v63 = vld [vmem:[#allocation10 + $0x540] sm:$0xff]  }
 0x875   :  { %11715 = vmatprep.subr.bf16.mxu1 %v12060_v9  ;;  %11781 = vmatprep.subr.bf16.mxu0 %v12061_v60  ;;  %v12115_v9 = vld [vmem:[#allocation10 + $0x508] sm:$0xff]   ;;  %v12116_v60 = vld [vmem:[#allocation10 + $0x3c0] sm:$0xff]  }
 0x877   :  { %11716 = vmatpush3.bf16.msra.mxu1 %v12062_v16  ;;  %v12118_v16 = vld [vmem:[#allocation10 + $0x380] sm:$0xff]  }
 0x878   :  { %11782 = vmatpush3.bf16.msra.mxu0 %v12063_v17  ;;  %11717 = vmatprep.subr.bf16.mxu1 %v12064_v58  ;;  %v12119_v17 = vld [vmem:[#allocation10 + $0x500] sm:$0xff]   ;;  %v12120_v58 = vld [vmem:[#allocation10 + $0x4f8] sm:$0xff]  }
 0x879   :  { %11783 = vmatprep.subr.bf16.mxu0 %v12065_v29  ;;  %v12121_v29 = vld [vmem:[#allocation10 + $0x678] sm:$0xff]  }
 0x87b   :  { %11718 = vmatpush3.bf16.msra.mxu1 %v12066_v47  ;;  %v12122_v47 = vld [vmem:[#allocation10 + $0x4b8] sm:$0xff]  }
 0x87c   :  { %11784 = vmatpush3.bf16.msra.mxu0 %v12067_v10  ;;  %11719 = vmatprep.subr.bf16.mxu1 %v12068_v50  ;;  %v9027_v10 = vrot.slane %v16605_v56, 3  ;;  %v12123_v50 = vld [vmem:[#allocation10 + $0x638] sm:$0xff]  }
 0x87d   :  { %11785 = vmatprep.subr.bf16.mxu0 %v12069_v19  ;;  %v9717_v19 = vrot.slane %v16570_v37, 5 }
 0x87f   :  { %11720 = vmatpush3.bf16.msra.mxu1 %v12070_v28  ;;  %v12124_v28 = vld [vmem:[#allocation10 + $0x4f0] sm:$0xff]  }
 0x880   :  { %11786 = vmatpush3.bf16.msra.mxu0 %v12071_v36  ;;  %11721 = vmatprep.subr.bf16.mxu1 %v12072_v23  ;;  %v9374_v36 = vrot.slane %v16607_v43, 4  ;;  %v12125_v23 = vld [vmem:[#allocation10 + $0x670] sm:$0xff]  }
 0x881   :  { %11787 = vmatprep.subr.bf16.mxu0 %v12073_v44  ;;  %v10064_v44 = vrot.slane %v16572_v18, 6  ;;  %v12135_v18 = vld [vmem:[#allocation10 + $0x620] sm:$0xff]  }
 0x883   :  { %11722 = vmatpush3.bf16.msra.mxu1 %v12074_v25  ;;  %v12126_v25 = vld [vmem:[#allocation10 + $0x4b0] sm:$0xff]  }
 0x884   :  { %11788 = vmatpush3.bf16.msra.mxu0 %v12075_v42  ;;  %11723 = vmatprep.subr.bf16.mxu1 %v12076_v61  ;;  %v12127_v42 = vld [vmem:[#allocation10 + $0x630] sm:$0xff]   ;;  %v12128_v61 = vld [vmem:[#allocation10 + $0x4e8] sm:$0xff]  }
 0x885   :  { %11789 = vmatprep.subr.bf16.mxu0 %v12077_v2  ;;  %v12129_v2 = vld [vmem:[#allocation10 + $0x668] sm:$0xff]  }
 0x887   :  { %11724 = vmatpush3.bf16.msra.mxu1 %v12078_v59  ;;  %v12130_v59 = vld [vmem:[#allocation10 + $0x4a8] sm:$0xff]  }
 0x888   :  { %11790 = vmatpush3.bf16.msra.mxu0 %v12079_v46  ;;  %11725 = vmatprep.subr.bf16.mxu1 %v12080_v5  ;;  %v12131_v46 = vld [vmem:[#allocation10 + $0x628] sm:$0xff]   ;;  %v12132_v5 = vld [vmem:[#allocation10 + $0x4e0] sm:$0xff]  }
 0x889   :  { %11791 = vmatprep.subr.bf16.mxu0 %v12081_v0  ;;  %v12133_v0 = vld [vmem:[#allocation10 + $0x660] sm:$0xff]  }
 0x88b   :  { %11726 = vmatpush3.bf16.msra.mxu1 %v12082_v13  ;;  %v12134_v13 = vld [vmem:[#allocation10 + $0x4a0] sm:$0xff]  }
 0x88c   :  { %11792 = vmatpush3.bf16.msra.mxu0 %v12083_v22  ;;  %11727 = vmatprep.subr.bf16.mxu1 %v12084_v53  ;;  %v12136_v22 = vld [vmem:[#allocation10 + $0x4d8] sm:$0xff]  }
 0x88d   :  { %11793 = vmatprep.subr.bf16.mxu0 %v12085_v27  ;;  %v12137_v53 = vld [vmem:[#allocation10 + $0x658] sm:$0xff]  }
 0x88e   :  { %v12138_v27 = vld [vmem:[#allocation10 + $0x498] sm:$0xff]  }
 0x88f   :  { %11728 = vmatpush3.bf16.msra.mxu1 %v12086_v30  ;;  %v12139_v30 = vld [vmem:[#allocation10 + $0x618] sm:$0xff]  }
 0x890   :  { %11794 = vmatpush3.bf16.msra.mxu0 %v12087_v11  ;;  %11757 = vmatprep.subr.bf16.mxu1 %v12088_v32  ;;  %v12140_v11 = vld [vmem:[#allocation10 + $0x4d0] sm:$0xff]  }
 0x891   :  { %11823 = vmatprep.subr.bf16.mxu0 %v12089_v6  ;;  %v12141_v32 = vld [vmem:[#allocation10 + $0x650] sm:$0xff]  }
 0x892   :  { %8952 = vmatmul.mubr.bf16.vlgmr.msra.gmra.mxu1 %v8681_v33  ;;  %v12142_v6 = vld [vmem:[#allocation10 + $0x490] sm:$0xff]   ;;  %v12144_v33 = vld [vmem:[#allocation10 + $0x4c8] sm:$0xff]  }
 0x893   :  { %9604 = vmatmul.mubr.bf16.vlgmr.msra.gmra.mxu0 %v9371_v15  ;;  %11758 = vmatpush3.bf16.msra.mxu1 %v12090_v39  ;;  %v12143_v39 = vld [vmem:[#allocation10 + $0x610] sm:$0xff]   ;;  %v12146_v15 = vld [vmem:[#allocation10 + $0x488] sm:$0xff]  }
 0x894   :  { %9297 = vmatprep.mubr.bf16.mxu1 %v9028_v7  ;;  %11824 = vmatpush3.bf16.msra.mxu0 %v12091_v52  ;;  %v12145_v52 = vld [vmem:[#allocation10 + $0x648] sm:$0xff]   ;;  %v12148_v7 = vld [vmem:[#allocation10 + $0x4c0] sm:$0xff]  }
 0x895   :  { %9949 = vmatprep.mubr.bf16.mxu0 %v9718_v21  ;;  %11759 = vmatprep.subr.bf16.mxu1 %v12092_v55  ;;  %v12147_v55 = vld [vmem:[#allocation10 + $0x608] sm:$0xff]   ;;  %v12150_v21 = vld [vmem:[#allocation10 + $0x480] sm:$0xff]  }
 0x896   :  { %11825 = vmatprep.subr.bf16.mxu0 %v12093_v49  ;;  %v12149_v49 = vld [vmem:[#allocation10 + $0x640] sm:$0xff]  }
 0x897   :  { %11760 = vmatpush3.bf16.msra.mxu1 %v12094_v45  ;;  %v12151_v45 = vld [vmem:[#allocation10 + $0x600] sm:$0xff]  }
 0x898   :  { %11826 = vmatpush3.bf16.msra.mxu0 %v12095_v51  ;;  %11761 = vmatprep.subr.bf16.mxu1 %v12096_v1  ;;  %v12152_v51 = vld [vmem:[#allocation10 + $0x5f8] sm:$0xff]  }
 0x899   :  { %11827 = vmatprep.subr.bf16.mxu0 %v12097_v38  ;;  %v12153_v1 = vld [vmem:[#allocation10 + $0x5b8] sm:$0xff]   ;;  %v9373_v38 = vrot.slane %v16605_v56, 4 }
 0x89b   :  { %11762 = vmatpush3.bf16.msra.mxu1 %v12098_v48  ;;  %v12154_v48 = vld [vmem:[#allocation10 + $0x5f0] sm:$0xff]  }
 0x89c   :  { %11828 = vmatpush3.bf16.msra.mxu0 %v12099_v54  ;;  %11763 = vmatprep.subr.bf16.mxu1 %v12100_v34  ;;  %v10063_v54 = vrot.slane %v16570_v37, 6  ;;  %v12159_v37 = vld [vmem:[#allocation10 + $0x5a0] sm:$0xff]  }
 0x89d   :  { %11829 = vmatprep.subr.bf16.mxu0 %v12101_v14  ;;  %v9720_v14 = vrot.slane %v16607_v43, 5 }
 0x89f   :  { %11764 = vmatpush3.bf16.msra.mxu1 %v12102_v35  ;;  %v12155_v35 = vld [vmem:[#allocation10 + $0x5b0] sm:$0xff]  }
 0x8a0   :  { %11830 = vmatpush3.bf16.msra.mxu0 %v12103_v24  ;;  %11765 = vmatprep.subr.bf16.mxu1 %v12104_v40  ;;  %v12156_v40 = vld [vmem:[#allocation10 + $0x5e8] sm:$0xff]  }
 0x8a1   :  { %11831 = vmatprep.subr.bf16.mxu0 %v12105_v4 }
 0x8a3   :  { %11766 = vmatpush3.bf16.msra.mxu1 %v12106_v41 }
 0x8a4   :  { %11832 = vmatpush3.bf16.msra.mxu0 %v12107_v62  ;;  %11767 = vmatprep.subr.bf16.mxu1 %v12108_v57  ;;  %v12157_v62 = vld [vmem:[#allocation10 + $0x5a8] sm:$0xff]  }
 0x8a5   :  { %11833 = vmatprep.subr.bf16.mxu0 %v12109_v3  ;;  %v12158_v3 = vld [vmem:[#allocation10 + $0x5e0] sm:$0xff]  }
 0x8a7   :  { %11768 = vmatpush3.bf16.msra.mxu1 %v12110_v20  ;;  %v12160_v20 = vld [vmem:[#allocation10 + $0x5d8] sm:$0xff]  }
 0x8a8   :  { %11834 = vmatpush3.bf16.msra.mxu0 %v12111_v8  ;;  %11769 = vmatprep.subr.bf16.mxu1 %v12112_v26  ;;  %v12161_v8 = vld [vmem:[#allocation10 + $0x598] sm:$0xff]   ;;  %v12162_v26 = vld [vmem:[#allocation10 + $0x5d0] sm:$0xff]  }
 0x8a9   :  { %11835 = vmatprep.subr.bf16.mxu0 %v12113_v12  ;;  %v12163_v12 = vld [vmem:[#allocation10 + $0x590] sm:$0xff]  }
 0x8ab   :  { %11770 = vmatpush3.bf16.msra.mxu1 %v12114_v31  ;;  %v12164_v31 = vld [vmem:[#allocation10 + $0x5c8] sm:$0xff]  }
 0x8ac   :  { %11836 = vmatpush3.bf16.msra.mxu0 %v12115_v9  ;;  %11771 = vmatprep.subr.bf16.mxu1 %v12116_v60  ;;  %v12165_v9 = vld [vmem:[#allocation10 + $0x588] sm:$0xff]   ;;  %v12166_v60 = vld [vmem:[#allocation10 + $0x5c0] sm:$0xff]  }
 0x8ad   :  { %11837 = vmatprep.subr.bf16.mxu0 %v12117_v63  ;;  %v12167_v63 = vld [vmem:[#allocation10 + $0x580] sm:$0xff]  }
 0x8af   :  { %11772 = vmatpush3.bf16.msra.mxu1 %v12118_v16  ;;  %v12168_v16 = vld [vmem:[#allocation10 + $0x6f8] sm:$0xff]  }
 0x8b0   :  { %11838 = vmatpush3.bf16.msra.mxu0 %v12119_v17  ;;  %11801 = vmatprep.subr.bf16.mxu1 %v12120_v58  ;;  %v12169_v17 = vld [vmem:[#allocation10 + $0x6b8] sm:$0xff]   ;;  %v9719_v58 = vrot.slane %v16605_v56, 5 }
 0x8b1   :  { %11867 = vmatprep.subr.bf16.mxu0 %v12121_v29  ;;  %v12170_v29 = vld [vmem:[#allocation10 + $0x6f0] sm:$0xff]  }
 0x8b2   :  { %9298 = vmatmul.mubr.bf16.vlgmr.msra.gmra.mxu1 %v9027_v10 }
 0x8b3   :  { %9950 = vmatmul.mubr.bf16.vlgmr.msra.gmra.mxu0 %v9717_v19  ;;  %11802 = vmatpush3.bf16.msra.mxu1 %v12122_v47  ;;  %v10066_v47 = vrot.slane %v16607_v43, 6  ;;  %v12177_v43 = vld [vmem:[#allocation10 + $0x698] sm:$0xff]  }
 0x8b4   :  { %9643 = vmatprep.mubr.bf16.mxu1 %v9374_v36  ;;  %11868 = vmatpush3.bf16.msra.mxu0 %v12123_v50  ;;  %v12171_v50 = vld [vmem:[#allocation10 + $0x6b0] sm:$0xff]  }
 0x8b5   :  { %10295 = vmatprep.mubr.bf16.mxu0 %v10064_v44  ;;  %11803 = vmatprep.subr.bf16.mxu1 %v12124_v28  ;;  %v12172_v28 = vld [vmem:[#allocation10 + $0x6e8] sm:$0xff]  }
 0x8b6   :  { %11869 = vmatprep.subr.bf16.mxu0 %v12125_v23  ;;  %v12173_v44 = vld [vmem:[#allocation10 + $0x6a8] sm:$0xff]  }
 0x8b7   :  { %11804 = vmatpush3.bf16.msra.mxu1 %v12126_v25 }
 0x8b8   :  { %11870 = vmatpush3.bf16.msra.mxu0 %v12127_v42  ;;  %11805 = vmatprep.subr.bf16.mxu1 %v12128_v61  ;;  %v12174_v42 = vld [vmem:[#allocation10 + $0x6e0] sm:$0xff]  }
 0x8b9   :  { %11871 = vmatprep.subr.bf16.mxu0 %v12129_v2  ;;  %v12175_v61 = vld [vmem:[#allocation10 + $0x6a0] sm:$0xff]   ;;  %v12176_v2 = vld [vmem:[#allocation10 + $0x6d8] sm:$0xff]  }
 0x8bb   :  { %11806 = vmatpush3.bf16.msra.mxu1 %v12130_v59  ;;  %v12178_v59 = vld [vmem:[#allocation10 + $0x6d0] sm:$0xff]  }
 0x8bc   :  { %11872 = vmatpush3.bf16.msra.mxu0 %v12131_v46  ;;  %11807 = vmatprep.subr.bf16.mxu1 %v12132_v5  ;;  %v12179_v46 = vld [vmem:[#allocation10 + $0x690] sm:$0xff]   ;;  %v12180_v5 = vld [vmem:[#allocation10 + $0x6c8] sm:$0xff]  }
 0x8bd   :  { %11873 = vmatprep.subr.bf16.mxu0 %v12133_v0  ;;  %v12181_v0 = vld [vmem:[#allocation10 + $0x688] sm:$0xff]  }
 0x8bf   :  { %11808 = vmatpush3.bf16.msra.mxu1 %v12134_v13  ;;  %v12182_v13 = vld [vmem:[#allocation10 + $0x6c0] sm:$0xff]  }
 0x8c0   :  { %11874 = vmatpush3.bf16.msra.mxu0 %v12135_v18  ;;  %11809 = vmatprep.subr.bf16.mxu1 %v12136_v22  ;;  %v12183_v18 = vld [vmem:[#allocation10 + $0x680] sm:$0xff]   ;;  %v10065_v22 = vrot.slane %v16605_v56, 6 }
 0x8c1   :  { %11875 = vmatprep.subr.bf16.mxu0 %v12137_v53 }
 0x8c3   :  { %11810 = vmatpush3.bf16.msra.mxu1 %v12138_v27 }
 0x8c4   :  { %11876 = vmatpush3.bf16.msra.mxu0 %v12139_v30  ;;  %11811 = vmatprep.subr.bf16.mxu1 %v12140_v11 }
 0x8c5   :  { %11877 = vmatprep.subr.bf16.mxu0 %v12141_v32 }
 0x8c7   :  { %11812 = vmatpush3.bf16.msra.mxu1 %v12142_v6 }
 0x8c8   :  { %11878 = vmatpush3.bf16.msra.mxu0 %v12143_v39  ;;  %11813 = vmatprep.subr.bf16.mxu1 %v12144_v33 }
 0x8c9   :  { %11879 = vmatprep.subr.bf16.mxu0 %v12145_v52 }
 0x8cb   :  { %11814 = vmatpush3.bf16.msra.mxu1 %v12146_v15 }
 0x8cc   :  { %11880 = vmatpush3.bf16.msra.mxu0 %v12147_v55  ;;  %11815 = vmatprep.subr.bf16.mxu1 %v12148_v7 }
 0x8cd   :  { %11881 = vmatprep.subr.bf16.mxu0 %v12149_v49 }
 0x8cf   :  { %11816 = vmatpush3.bf16.msra.mxu1 %v12150_v21 }
 0x8d0   :  { %11882 = vmatpush3.bf16.msra.mxu0 %v12151_v45  ;;  %11845 = vmatprep.subr.bf16.mxu1 %v12152_v51 }
 0x8d2   :  { %9644 = vmatmul.mubr.bf16.vlgmr.msra.gmra.mxu1 %v9373_v38  ;;  %v11619_v34 = vpop.f32.mrf.mxu0 }
 0x8d3   :  { %10296 = vmatmul.mubr.bf16.vlgmr.msra.gmra.mxu0 %v10063_v54  ;;  %11846 = vmatpush3.bf16.msra.mxu1 %v12153_v1 }
 0x8d4   :  { %9989 = vmatprep.mubr.bf16.mxu1 %v9720_v14  ;;  %v11620_v24 = vpop.f32.mrf.mxu0  ;;  %11847 = vmatprep.subr.bf16.mxu1 %v12154_v48 }
 0x8d5   :  { %v16629_v4 = vadd.f32 %v11620_v24, %v11619_v34  ;;  %v12397_v24 = vmov 0.0  }
 0x8d6   :  { %v11622_v41 = vpop.f32.mrf.mxu0  ;;  %11920 = vmatprep.subr.bf16.mxu0 %v12397_v24  ;;  %11936 = vmatprep.mubr.msk.bf16.mxu0 %vm12398_vm4, %v12397_v24 }
 0x8d7   :  { %11848 = vmatpush3.bf16.msra.mxu1 %v12155_v35  ;;  %v12184_v35 = vld [vmem:[#allocation13 + $0x38] sm:$0xff]   ;;  %v12187_v41 = vld [vmem:[#allocation13 + $0x20] sm:$0xff]  }
 0x8d8   :  { %v11623_v57 = vpop.f32.mrf.mxu0  ;;  %11849 = vmatprep.subr.bf16.mxu1 %v12156_v40  ;;  %11921 = vmatpush3.bf16.msra.mxu0 %v12184_v35  ;;  %v12185_v40 = vld [vmem:[#allocation13 + $0x30] sm:$0xff]  }
 0x8d9   :  { %11922 = vmatprep.subr.bf16.mxu0 %v12397_v24  ;;  %v12188_v57 = vld [vmem:[#allocation13 + $0x18] sm:$0xff]  }
 0x8db   :  { %11850 = vmatpush3.bf16.msra.mxu1 %v12157_v62 }
 0x8dc   :  { %11851 = vmatprep.subr.bf16.mxu1 %v12158_v3  ;;  %11923 = vmatpush3.bf16.msra.mxu0 %v12185_v40 }
 0x8dd   :  { %11924 = vmatprep.subr.bf16.mxu0 %v12397_v24 }
 0x8df   :  { %11852 = vmatpush3.bf16.msra.mxu1 %v12159_v37 }
 0x8e0   :  { %11853 = vmatprep.subr.bf16.mxu1 %v12160_v20 }
 0x8e3   :  { %11854 = vmatpush3.bf16.msra.mxu1 %v12161_v8 }
 0x8e4   :  { %11855 = vmatprep.subr.bf16.mxu1 %v12162_v26 }
 0x8e7   :  { %11856 = vmatpush3.bf16.msra.mxu1 %v12163_v12 }
 0x8e8   :  { %11857 = vmatprep.subr.bf16.mxu1 %v12164_v31 }
 0x8eb   :  { %11858 = vmatpush3.bf16.msra.mxu1 %v12165_v9 }
 0x8ec   :  { %11859 = vmatprep.subr.bf16.mxu1 %v12166_v60 }
 0x8ef   :  { %11860 = vmatpush3.bf16.msra.mxu1 %v12167_v63 }
 0x8f0   :  { %11889 = vmatprep.subr.bf16.mxu1 %v12168_v16 }
 0x8f2   :  { %v11663_v10 = vpop.f32.mrf.mxu0  ;;  %9990 = vmatmul.mubr.bf16.vlgmr.msra.gmra.mxu1 %v9719_v58  ;;  %v12190_v58 = vld [vmem:[#allocation13 + $0x8] sm:$0xff]  }
 0x8f3   :  { %11890 = vmatpush3.bf16.msra.mxu1 %v12169_v17  ;;  %10335 = vmatprep.mubr.bf16.mxu1 %v10066_v47  ;;  %v12189_v17 = vld [vmem:[#allocation13 + $0x10] sm:$0xff]  }
 0x8f4   :  { %v11664_v19 = vpop.f32.mrf.mxu0  ;;  %11891 = vmatprep.subr.bf16.mxu1 %v12170_v29  ;;  %v12191_v29 = vld [vmem:[#allocation13] sm:$0xff]  }
 0x8f5   :  { %v11665_v36 = vadd.f32 %v11664_v19, %v11663_v10 }
 0x8f6   :  { %v11666_v23 = vpop.f32.mrf.mxu0 }
 0x8f7   :  { %11892 = vmatpush3.bf16.msra.mxu1 %v12171_v50 }
 0x8f8   :  { %v11667_v25 = vpop.f32.mrf.mxu0  ;;  %11893 = vmatprep.subr.bf16.mxu1 %v12172_v28 }
 0x8fb   :  { %11894 = vmatpush3.bf16.msra.mxu1 %v12173_v44 }
 0x8fc   :  { %11895 = vmatprep.subr.bf16.mxu1 %v12174_v42 }
 0x8ff   :  { %11896 = vmatpush3.bf16.msra.mxu1 %v12175_v61 }
 0x900   :  { %11897 = vmatprep.subr.bf16.mxu1 %v12176_v2 }
 0x903   :  { %11898 = vmatpush3.bf16.msra.mxu1 %v12177_v43 }
 0x904   :  { %11899 = vmatprep.subr.bf16.mxu1 %v12178_v59 }
 0x907   :  { %11900 = vmatpush3.bf16.msra.mxu1 %v12179_v46 }
 0x908   :  { %11901 = vmatprep.subr.bf16.mxu1 %v12180_v5 }
 0x90b   :  { %11902 = vmatpush3.bf16.msra.mxu1 %v12181_v0 }
 0x90c   :  { %11903 = vmatprep.subr.bf16.mxu1 %v12182_v13 }
 0x90f   :  { %11904 = vmatpush3.bf16.msra.mxu1 %v12183_v18 }
 0x912   :  { %v11707_v53 = vpop.f32.mrf.mxu0  ;;  %10336 = vmatmul.mubr.bf16.vlgmr.msra.gmra.mxu1 %v10065_v22  ;;  %v11641_v27 = vpop.f32.mrf.mxu1 }
 0x914   :  { %v11708_v30 = vpop.f32.mrf.mxu0  ;;  %v11642_v11 = vpop.f32.mrf.mxu1 }
 0x915   :  { %v11709_v32 = vadd.f32 %v11708_v30, %v11707_v53  ;;  %v11643_v6 = vadd.f32 %v11642_v11, %v11641_v27 }
 0x916   :  { %v11710_v39 = vpop.f32.mrf.mxu0  ;;  %v11644_v33 = vpop.f32.mrf.mxu1 }
 0x917   :  { %v8337_v52 = vadd.f32 %v11643_v6, %v16629_v4  ;;  %v12186_v4 = vld [vmem:[#allocation13 + $0x28] sm:$0xff]  }
 0x918   :  { %v11711_v15 = vpop.f32.mrf.mxu0  ;;  %v11645_v55 = vpop.f32.mrf.mxu1  ;;  %11925 = vmatpush3.bf16.msra.mxu0 %v12186_v4 }
 0x919   :  { %v8569_v7 = vadd.f32 %v11665_v36, %v8337_v52  ;;  %11926 = vmatprep.subr.bf16.mxu0 %v12397_v24 }
 0x91c   :  { %11927 = vmatpush3.bf16.msra.mxu0 %v12187_v41 }
 0x91d   :  { %11928 = vmatprep.subr.bf16.mxu0 %v12397_v24 }
 0x920   :  { %11929 = vmatpush3.bf16.msra.mxu0 %v12188_v57 }
 0x921   :  { %11930 = vmatprep.subr.bf16.mxu0 %v12397_v24 }
 0x924   :  { %11931 = vmatpush3.bf16.msra.mxu0 %v12189_v17 }
 0x925   :  { %11932 = vmatprep.subr.bf16.mxu0 %v12397_v24 }
 0x928   :  { %11933 = vmatpush3.bf16.msra.mxu0 %v12190_v58 }
 0x929   :  { %11934 = vmatprep.subr.bf16.mxu0 %v12397_v24 }
 0x92c   :  { %11935 = vmatpush3.bf16.msra.mxu0 %v12191_v29 }
 0x932   :  { %v11685_v49 = vpop.f32.mrf.mxu1  ;;  %v11751_v21 = vpop.f32.mrf.mxu0 }
 0x934   :  { %v11686_v45 = vpop.f32.mrf.mxu1  ;;  %v11752_v51 = vpop.f32.mrf.mxu0 }
 0x935   :  { %v11687_v1 = vadd.f32 %v11686_v45, %v11685_v49  ;;  %v11753_v56 = vadd.f32 %v11752_v51, %v11751_v21 }
 0x936   :  { %v11688_v38 = vpop.f32.mrf.mxu1  ;;  %v11754_v48 = vpop.f32.mrf.mxu0 }
 0x937   :  { %v8609_v54 = vadd.f32 %v11687_v1, %v8569_v7  ;;  %v11593_v1 = vld [vmem:[#allocation11] ss:$0 sm:$0xff] }
 0x938   :  { %v11689_v34 = vpop.f32.mrf.mxu1  ;;  %v11755_v14 = vpop.f32.mrf.mxu0 }
 0x939   :  { %v11594_v14 = vld [vmem:[#allocation14] ss:$0 sm:$0xff] }
 0x952   :  { %v11729_v62 = vpop.f32.mrf.mxu1 }
 0x953   :  { %v11795_v3 = vpop.f32.mrf.mxu0 }
 0x954   :  { %v11730_v37 = vpop.f32.mrf.mxu1 }
 0x955   :  { %v11731_v20 = vadd.f32 %v11730_v37, %v11729_v62  ;;  %v11796_v8 = vpop.f32.mrf.mxu0 }
 0x956   :  { %v11797_v26 = vadd.f32 %v11796_v8, %v11795_v3  ;;  %v11732_v12 = vpop.f32.mrf.mxu1 }
 0x957   :  { %v8954_v31 = vadd.f32 %v11731_v20, %v11709_v32  ;;  %v11798_v9 = vpop.f32.mrf.mxu0 }
 0x958   :  { %v11733_v60 = vpop.f32.mrf.mxu1 }
 0x959   :  { %v8959_v63 = vadd.f32 %v8954_v31, %v8609_v54  ;;  %v11799_v16 = vpop.f32.mrf.mxu0 }
 0x972   :  { %v11773_v47 = vpop.f32.mrf.mxu1 }
 0x973   :  { %v11839_v10 = vpop.f32.mrf.mxu0 }
 0x974   :  { %v11774_v50 = vpop.f32.mrf.mxu1 }
 0x975   :  { %v11775_v19 = vadd.f32 %v11774_v50, %v11773_v47  ;;  %v11840_v28 = vpop.f32.mrf.mxu0 }
 0x976   :  { %v11841_v36 = vadd.f32 %v11840_v28, %v11839_v10  ;;  %v11776_v23 = vpop.f32.mrf.mxu1 }
 0x977   :  { %v9300_v44 = vadd.f32 %v11775_v19, %v11753_v56  ;;  %v11842_v25 = vpop.f32.mrf.mxu0 }
 0x978   :  { %v11777_v42 = vpop.f32.mrf.mxu1 }
 0x979   :  { %v9305_v61 = vadd.f32 %v9300_v44, %v8959_v63  ;;  %v11843_v2 = vpop.f32.mrf.mxu0 }
 0x992   :  { %v11817_v43 = vpop.f32.mrf.mxu1 }
 0x993   :  { %v11883_v59 = vpop.f32.mrf.mxu0 }
 0x994   :  { %v11818_v46 = vpop.f32.mrf.mxu1 }
 0x995   :  { %v11819_v5 = vadd.f32 %v11818_v46, %v11817_v43  ;;  %v11884_v0 = vpop.f32.mrf.mxu0 }
 0x996   :  { %v11820_v13 = vpop.f32.mrf.mxu1  ;;  %v11885_v49 = vadd.f32 %v11884_v0, %v11883_v59 }
 0x997   :  { %v9646_v18 = vadd.f32 %v11819_v5, %v11797_v26  ;;  %v11886_v22 = vpop.f32.mrf.mxu0 }
 0x998   :  { %v11821_v53 = vpop.f32.mrf.mxu1 }
 0x999   :  { %v9651_v27 = vadd.f32 %v9646_v18, %v9305_v61  ;;  %v11887_v30 = vpop.f32.mrf.mxu0 }
 0x9b2   :  { %v11861_v11 = vpop.f32.mrf.mxu1 }
 0x9b4   :  { %v11862_v32 = vpop.f32.mrf.mxu1 }
 0x9b5   :  { %v11863_v6 = vadd.f32 %v11862_v32, %v11861_v11 }
 0x9b6   :  { %v11864_v39 = vpop.f32.mrf.mxu1 }
 0x9b7   :  { %v9992_v33 = vadd.f32 %v11863_v6, %v11841_v36 }
 0x9b8   :  { %v11865_v52 = vpop.f32.mrf.mxu1 }
 0x9b9   :  { %v9997_v15 = vadd.f32 %v9992_v33, %v9651_v27 }
 0x9d2   :  { %v11905_v55 = vpop.f32.mrf.mxu1 }
 0x9d4   :  { %v11906_v7 = vpop.f32.mrf.mxu1 }
 0x9d5   :  { %v11907_v21 = vadd.f32 %v11906_v7, %v11905_v55 }
 0x9d6   :  { %v11908_v45 = vpop.f32.mrf.mxu1 }
 0x9d7   :  { %v10338_v51 = vadd.f32 %v11907_v21, %v11885_v49 }
 0x9d8   :  { %v11909_v56 = vpop.f32.mrf.mxu1 }
 0x9d9   :  { %v10343_v38 = vadd.f32 %v10338_v51, %v9997_v15 }
 0x9db   :  { %v10351_v48 = vadd.f32 %v11593_v1, %v10343_v38 }
 0x9dd   :  { %v10352_v54 = vmax.f32 %v10351_v48, 0.0 }
 0x9df   :  { %v10353_v34 = vpack.c.bf16 %v10352_v54, %v10352_v54 }
 0x9e1   :  { %11937 = vmatmul.mubr.bf16.vlgmr.msra.gmra.mxu0 %v10353_v34 }
 0xaa1   :  { %v10459_v35 = vpop.f32.mrf.mxu0 }
 0xaa2   :  { %v10460_v24 = vadd.f32 %v11594_v14, %v10459_v35 }
 0xaa3   :  { %v11938_v40 = vpop.f32.mrf.mxu0 }
 0xaa4   :  { %10465 = vst [vmem:[#allocation16] sm:$0x3] %v10460_v24 }
 0xaa5   :  { %v10462_v4 = vpop.f32.mrf.mxu0 }
 0xaa6   :  { %12363 = shalt.err (!%p12360_p2)
}
 0xaa7   :  { %10475 = dma.vmem_to_hbm [thread:$0]  %s10473_s16, 32, %s16648_s10, [#allocation4]   ;;  %v11939_v41 = vpop.f32.mrf.mxu0 }
 0xaa8   :  { %12382 = dma.done.wait [#allocation4], 32  }
 0xaa9   :  { %12383 = vsyncadd [#allocation4], 4294967264 }
 0xaaa   :  { %10479 = vsyncpa [#allocation3], 1 }
 0xaab   :  { %10480 = vsyncpa [#allocation6], 1 }
 0xaac   :  { %10481 = vsyncpa [#allocation9], 1 }
 0xaad   :  { %10482 = vsyncpa [#allocation12], 1 }
 0xaae   :  { %10483 = vsyncpa [#allocation15], 1 }
 0xaaf   :  { %10484 = vsyncpa [#allocation4], 1 }

</bundles_post_ra>
